<compile_context>
chip_gen: v6e
topology: v6e:2x2x1
jax: 0.10.0
libtpu: 0.0.40
codegen_flags: <defaults>
</compile_context>

<pallas_src>
import functools
import math

import jax
import jax.numpy as jnp
from jax import lax
from jax.experimental import pallas as pl
from jax.experimental.pallas import tpu as pltpu


# ---------------------------------------------------------------------------
# In-kernel helpers (operate on values already loaded from VMEM refs)
# ---------------------------------------------------------------------------
def _global_layernorm(z, eps=1e-5):
    """F.layer_norm(z, normalized_shape=z.shape): zero-mean / unit-variance over ALL
    elements (the reference normalizes over the whole (B, S, E) tensor), no affine.
    Two-pass statistics (avoids E[x^2] - mean^2 cancellation)."""
    n = float(z.size)
    mean = jnp.sum(z) / n
    d = z - mean
    var = jnp.sum(d * d) / n
    return d * lax.rsqrt(var + eps)


def _ffn(x2d, w1, b1, w2, b2):
    """Linear(E,4E) -> ReLU -> Linear(4E,E) on flattened (B*S, E); bf16 MXU, f32 acc."""
    h = jnp.dot(x2d.astype(jnp.bfloat16), w1, preferred_element_type=jnp.float32) + b1
    h = jnp.maximum(h, 0.0)
    return jnp.dot(h.astype(jnp.bfloat16), w2, preferred_element_type=jnp.float32) + b2


def _attention_into(attn_ref, q, k, v, masks, lq, lk, num_heads, dk, dv, fill):
    """Scaled dot-product attention for all (batch, head) pairs.

    q: (B*lq, H*dk) bf16 ALREADY scaled by 1/sqrt(dk); k: (B*lk, H*dk) bf16;
    v: (B*lk, H*dv) bf16.  masks[b] is a bool mask broadcastable to (lq, lk)
    (True == masked) or None.  Each head's (lq, dv) result is written straight into the
    VMEM scratch `attn_ref` slice (no lane-concat, no explicit k transpose).
    Matches softmax(masked_fill(QK^T, -1e10) / sqrt(dk)) @ V (scale folded into Q, so the
    fill value is -1e10/sqrt(dk) — mathematically identical).
    """
    batch = len(masks)
    for b in range(batch):
        qb = q[b * lq:(b + 1) * lq]
        kb = k[b * lk:(b + 1) * lk]
        vb = v[b * lk:(b + 1) * lk]
        m = masks[b]
        for h in range(num_heads):
            qh = qb[:, h * dk:(h + 1) * dk]
            kh = kb[:, h * dk:(h + 1) * dk]
            vh = vb[:, h * dv:(h + 1) * dv]
            # contract over dk directly (no kh.T materialization)
            s = lax.dot_general(qh, kh, (((1,), (1,)), ((), ())),
                                preferred_element_type=jnp.float32)          # (lq, lk)
            if m is not None:
                s = jnp.where(m, fill, s)
            s = s - jnp.max(s, axis=-1, keepdims=True)
            p = jnp.exp(s)
            p = p / jnp.sum(p, axis=-1, keepdims=True)        # exact softmax
            attn_ref[b * lq:(b + 1) * lq, h * dv:(h + 1) * dv] = jnp.dot(
                p.astype(jnp.bfloat16), vh, preferred_element_type=jnp.float32)


# ---------------------------------------------------------------------------
# Fused whole-stack kernels (one pallas_call for the encoder, one for the decoder)
# ---------------------------------------------------------------------------
def _encoder_kernel(x_ref, pad_ref,
                    wqkv_ref, bqkv_ref, w1_ref, b1_ref, w2_ref, b2_ref,
                    o_ref, attn_ref, *, num_layers, batch, seq, num_heads, dk, dv):
    emb = num_heads * dk
    scale = 1.0 / math.sqrt(dk)
    fill = jnp.float32(-1e10 * scale)

    # per-batch key-padding masks, hoisted out of the layer loop ((1, S) bool each)
    masks = [pad_ref[b] != 0 for b in range(batch)]

    x = x_ref[...]                                  # (B*S, E) f32, stays in VMEM throughout
    for l in range(num_layers):
        # fused Q|K|V projection: one (B*S,E) x (E,3E) matmul, bias in f32
        qkv = jnp.dot(x.astype(jnp.bfloat16), wqkv_ref[l],
                      preferred_element_type=jnp.float32) + bqkv_ref[l]
        q = (qkv[:, :emb] * scale).astype(jnp.bfloat16)        # cast once, not per head
        k = qkv[:, emb:2 * emb].astype(jnp.bfloat16)
        v = qkv[:, 2 * emb:].astype(jnp.bfloat16)
        _attention_into(attn_ref, q, k, v, masks, seq, seq, num_heads, dk, dv, fill)
        h1 = _global_layernorm(x + attn_ref[...])
        x = _global_layernorm(h1 + _ffn(h1, w1_ref[l], b1_ref[l], w2_ref[l], b2_ref[l]))

    o_ref[...] = x.astype(o_ref.dtype)              # bf16 store: halves inter-kernel HBM hop


def _decoder_kernel(y_ref, enc_ref,
                    swqkv_ref, sbqkv_ref, cwq_ref, cbq_ref, cwkv_ref, cbkv_ref,
                    w1_ref, b1_ref, w2_ref, b2_ref, wout_ref, bout_ref,
                    o_ref, attn_ref, *, num_layers, batch, seq_q, seq_k,
                    num_heads, dk, dv):
    emb = num_heads * dk
    scale = 1.0 / math.sqrt(dk)
    fill = jnp.float32(-1e10 * scale)

    # causal mask generated in-kernel once (no HBM mask), True strictly above the diagonal
    rows = lax.broadcasted_iota(jnp.int32, (seq_q, seq_q), 0)
    cols = lax.broadcasted_iota(jnp.int32, (seq_q, seq_q), 1)
    causal_masks = [cols > rows] * batch
    no_masks = [None] * batch

    y = y_ref[...]                                  # (B*Sy, E) f32
    enc = enc_ref[...]                              # (B*Sx, E) bf16 (encoder output)

    for l in range(num_layers):
        # --- masked self-attention: fused Q|K|V projection ---
        qkv = jnp.dot(y.astype(jnp.bfloat16), swqkv_ref[l],
                      preferred_element_type=jnp.float32) + sbqkv_ref[l]
        q = (qkv[:, :emb] * scale).astype(jnp.bfloat16)
        k = qkv[:, emb:2 * emb].astype(jnp.bfloat16)
        v = qkv[:, 2 * emb:].astype(jnp.bfloat16)
        _attention_into(attn_ref, q, k, v, causal_masks, seq_q, seq_q,
                        num_heads, dk, dv, fill)
        h1 = _global_layernorm(y + attn_ref[...])

        # --- encoder-decoder (cross) attention: fused K|V projection of enc, no mask ---
        qc = ((jnp.dot(h1.astype(jnp.bfloat16), cwq_ref[l],
                       preferred_element_type=jnp.float32) + cbq_ref[l])
              * scale).astype(jnp.bfloat16)
        kvc = jnp.dot(enc, cwkv_ref[l],
                      preferred_element_type=jnp.float32) + cbkv_ref[l]
        kc = kvc[:, :emb].astype(jnp.bfloat16)
        vc = kvc[:, emb:].astype(jnp.bfloat16)
        _attention_into(attn_ref, qc, kc, vc, no_masks, seq_q, seq_k,
                        num_heads, dk, dv, fill)
        h2 = _global_layernorm(h1 + attn_ref[...])

        # --- feed-forward ---
        y = _global_layernorm(h2 + _ffn(h2, w1_ref[l], b1_ref[l], w2_ref[l], b2_ref[l]))

    # --- final vocab projection fused here: padded to 128 lanes -> lane-dense f32 store ---
    o_ref[...] = jnp.dot(y.astype(jnp.bfloat16), wout_ref[...],
                         preferred_element_type=jnp.float32) + bout_ref[...]


# ---------------------------------------------------------------------------
# pallas_call wrappers (grid=(), everything resident in VMEM)
# ---------------------------------------------------------------------------
_VMEM_BUDGET = 32 * 1024 * 1024   # explicit budget (v7x physical VMEM is only 64 MiB)


def encoder_pallas(x2d, pad_mask, ep, *, num_heads, dk, dv):
    num_layers = ep["wqkv"].shape[0]
    batch, _, seq = pad_mask.shape
    emb = num_heads * dk
    kern = functools.partial(_encoder_kernel, num_layers=num_layers, batch=batch,
                             seq=seq, num_heads=num_heads, dk=dk, dv=dv)
    return pl.pallas_call(
        kern,
        out_shape=jax.ShapeDtypeStruct((batch * seq, emb), jnp.bfloat16),
        scratch_shapes=[pltpu.VMEM((batch * seq, num_heads * dv), jnp.float32)],
        compiler_params=pltpu.CompilerParams(vmem_limit_bytes=_VMEM_BUDGET),
    )(x2d, pad_mask, ep["wqkv"], ep["bqkv"], ep["w1"], ep["b1"], ep["w2"], ep["b2"])


def decoder_pallas(y2d, enc2d, dp, fp, *, batch, seq_q, seq_k, num_heads, dk, dv):
    num_layers = dp["swqkv"].shape[0]
    n_out = fp["w"].shape[1]
    kern = functools.partial(_decoder_kernel, num_layers=num_layers, batch=batch,
                             seq_q=seq_q, seq_k=seq_k, num_heads=num_heads, dk=dk, dv=dv)
    return pl.pallas_call(
        kern,
        out_shape=jax.ShapeDtypeStruct((batch * seq_q, n_out), jnp.float32),
        scratch_shapes=[pltpu.VMEM((batch * seq_q, num_heads * dv), jnp.float32)],
        compiler_params=pltpu.CompilerParams(vmem_limit_bytes=_VMEM_BUDGET),
    )(y2d, enc2d,
      dp["swqkv"], dp["sbqkv"], dp["cwq"], dp["cbq"], dp["cwkv"], dp["cbkv"],
      dp["w1"], dp["b1"], dp["w2"], dp["b2"],
      fp["w"], fp["b"])


# ---------------------------------------------------------------------------
# Model glue (plain JAX): embeddings, parameter plumbing
# ---------------------------------------------------------------------------
def embed(tokens, emb):
    # TODO(synk): embedding gather kept in plain JAX (data-dependent gather).
    seq = tokens.shape[1]
    pos = jnp.arange(seq, dtype=jnp.int32)
    return emb["pos"][pos][None, :, :] + emb["tok"][tokens]


def transformer_forward(params, x_tokens, y_tokens, num_heads, padding_idx, vocab_size):
    emb_dim = params["in_emb"]["tok"].shape[1]
    dk = dv = emb_dim // num_heads
    B, Sx = x_tokens.shape
    _, Sy = y_tokens.shape

    # encoder key-padding mask, tiny (B, 1, Sx) int32 (1 == PAD), broadcast in-kernel
    pad_mask = (x_tokens == padding_idx).astype(jnp.int32)[:, None, :]

    # TODO(synk): F.dropout(p=0.1) treated as identity (inference semantics).
    x2d = embed(x_tokens, params["in_emb"]).reshape(B * Sx, emb_dim)
    y2d = embed(y_tokens, params["out_emb"]).reshape(B * Sy, emb_dim)

    enc2d = encoder_pallas(x2d, pad_mask, params["enc"],
                           num_heads=num_heads, dk=dk, dv=dv)
    logits2d = decoder_pallas(y2d, enc2d, params["dec"], params["final"],
                              batch=B, seq_q=Sy, seq_k=Sx,
                              num_heads=num_heads, dk=dk, dv=dv)
    return logits2d[:, :vocab_size].reshape(B, Sy, vocab_size)


# ---------------------------------------------------------------------------
# Deterministic parameter init (xavier-uniform weights, uniform biases), packed & stacked:
#   * Q|K|V of every attention packed column-wise into one (E, 3E) weight (K|V -> (E, 2E)).
#   * Per-layer weights stacked along a leading axis for the fused whole-stack kernels.
#   * Weights stored bf16 (half the weight DMA; f32 accumulation), biases (1, N) f32 rows.
#   * Final projection padded to a 128-lane multiple (lane-dense logits store).
# ---------------------------------------------------------------------------
def _round_up(n, m):
    return ((n + m - 1) // m) * m


def _xavier(key, fin, fout):
    lim = math.sqrt(6.0 / (fin + fout))
    return jax.random.uniform(key, (fin, fout), jnp.float32, -lim, lim)


def _bias(key, fin, fout):
    blim = 1.0 / math.sqrt(fin)
    return jax.random.uniform(key, (fout,), jnp.float32, -blim, blim)


def _linear(key, fin, fout):
    kw, kb = jax.random.split(key)
    return _xavier(kw, fin, fout), _bias(kb, fin, fout)


def _packed_linear(key, fin, fouts):
    """Several independent Linear(fin, fout_i) sharing the same input, packed column-wise."""
    ks = jax.random.split(key, len(fouts))
    pairs = [_linear(k, fin, f) for k, f in zip(ks, fouts)]
    return (jnp.concatenate([w for w, _ in pairs], axis=1),
            jnp.concatenate([b for _, b in pairs], axis=0))


def init_embedding(key, num, dim):
    lim = math.sqrt(6.0 / (num + dim))
    return jax.random.uniform(key, (num, dim), jnp.float32, -lim, lim)


def _stack_w(lst):
    return jnp.stack(lst).astype(jnp.bfloat16)        # (L, fin, fout) bf16


def _stack_b(lst):
    return jnp.stack(lst)[:, None, :]                 # (L, 1, fout) f32


def init_params(key, num_layers, num_in_emb, num_out_emb, emb_dim, max_len, vocab):
    k_ie_tok, k_ie_pos, k_oe_tok, k_oe_pos, k_layers, k_final = jax.random.split(key, 6)

    params = {
        "in_emb": {"tok": init_embedding(k_ie_tok, num_in_emb, emb_dim),
                   "pos": init_embedding(k_ie_pos, max_len, emb_dim)},
        "out_emb": {"tok": init_embedding(k_oe_tok, num_out_emb, emb_dim),
                    "pos": init_embedding(k_oe_pos, max_len, emb_dim)},
    }

    # --- encoder layers ---
    enc_keys = jax.random.split(jax.random.fold_in(k_layers, 0), num_layers)
    wqkv, bqkv, w1, b1, w2, b2 = [], [], [], [], [], []
    for kl in enc_keys:
        k_qkv, k_f1, k_f2 = jax.random.split(kl, 3)
        w, b_ = _packed_linear(k_qkv, emb_dim, [emb_dim] * 3); wqkv.append(w); bqkv.append(b_)
        w, b_ = _linear(k_f1, emb_dim, 4 * emb_dim);           w1.append(w);   b1.append(b_)
        w, b_ = _linear(k_f2, 4 * emb_dim, emb_dim);           w2.append(w);   b2.append(b_)
    params["enc"] = {"wqkv": _stack_w(wqkv), "bqkv": _stack_b(bqkv),
                     "w1": _stack_w(w1), "b1": _stack_b(b1),
                     "w2": _stack_w(w2), "b2": _stack_b(b2)}

    # --- decoder layers ---
    dec_keys = jax.random.split(jax.random.fold_in(k_layers, 1), num_layers)
    swqkv, sbqkv, cwq, cbq, cwkv, cbkv = [], [], [], [], [], []
    w1d, b1d, w2d, b2d = [], [], [], []
    for kl in dec_keys:
        k_sqkv, k_cq, k_ckv, k_f1, k_f2 = jax.random.split(kl, 5)
        w, b_ = _packed_linear(k_sqkv, emb_dim, [emb_dim] * 3); swqkv.append(w); sbqkv.append(b_)
        w, b_ = _linear(k_cq, emb_dim, emb_dim);                cwq.append(w);   cbq.append(b_)
        w, b_ = _packed_linear(k_ckv, emb_dim, [emb_dim] * 2);  cwkv.append(w);  cbkv.append(b_)
        w, b_ = _linear(k_f1, emb_dim, 4 * emb_dim);            w1d.append(w);   b1d.append(b_)
        w, b_ = _linear(k_f2, 4 * emb_dim, emb_dim);            w2d.append(w);   b2d.append(b_)
    params["dec"] = {"swqkv": _stack_w(swqkv), "sbqkv": _stack_b(sbqkv),
                     "cwq": _stack_w(cwq), "cbq": _stack_b(cbq),
                     "cwkv": _stack_w(cwkv), "cbkv": _stack_b(cbkv),
                     "w1": _stack_w(w1d), "b1": _stack_b(b1d),
                     "w2": _stack_w(w2d), "b2": _stack_b(b2d)}

    # --- final vocab projection, padded to a 128-lane multiple ---
    n_pad = _round_up(vocab, 128)
    w, b_ = _linear(k_final, emb_dim, vocab)
    w = jnp.pad(w, ((0, 0), (0, n_pad - vocab)))
    b_ = jnp.pad(b_, (0, n_pad - vocab))
    params["final"] = {"w": w.astype(jnp.bfloat16), "b": b_.reshape(1, -1)}
    return params


# ---------------------------------------------------------------------------
if __name__ == "__main__":
    num_layers = 2
    num_input_embeddings = 50
    num_output_embeddings = 60
    embedding_dim = 32
    padding_idx = 0
    max_token_length = 16
    num_heads = 4
    en_vocab_size = 40

    B, Sx, Sy = 2, 12, 8

    root = jax.random.PRNGKey(0)
    kparams, kdata = jax.random.split(root)
    params = init_params(kparams, num_layers, num_input_embeddings,
                         num_output_embeddings, embedding_dim, max_token_length,
                         en_vocab_size)

    kx, ky = jax.random.split(kdata)
    x_tokens = jax.random.randint(kx, (B, Sx), 0, num_input_embeddings, dtype=jnp.int32)
    y_tokens = jax.random.randint(ky, (B, Sy), 0, num_output_embeddings, dtype=jnp.int32)

    fwd = jax.jit(transformer_forward, static_argnums=(3, 4, 5))
    out = fwd(params, x_tokens, y_tokens, num_heads, padding_idx, en_vocab_size)
    out = jax.block_until_ready(out)

    assert out.shape == (B, Sy, en_vocab_size), out.shape
    assert bool(jnp.all(jnp.isfinite(out)))
    print("KERNEL_OK")
</pallas_src>

<mosaic_0001>
module attributes {stable_mosaic.version = 11 : i64} {
  func.func @_encoder_kernel(%arg0: memref<24x32xf32, #tpu.memory_space<vmem>>, %arg1: memref<2x1x12xi32, #tpu.memory_space<vmem>>, %arg2: memref<2x32x96xbf16, #tpu.memory_space<vmem>>, %arg3: memref<2x1x96xf32, #tpu.memory_space<vmem>>, %arg4: memref<2x32x128xbf16, #tpu.memory_space<vmem>>, %arg5: memref<2x1x128xf32, #tpu.memory_space<vmem>>, %arg6: memref<2x128x32xbf16, #tpu.memory_space<vmem>>, %arg7: memref<2x1x32xf32, #tpu.memory_space<vmem>>, %arg8: memref<24x32xbf16, #tpu.memory_space<vmem>>, %arg9: memref<24x32xf32, #tpu.memory_space<vmem>>) attributes {dimension_semantics = [], scalar_prefetch = 0 : i64, scratch_operands = 1 : i64, tpu.core_type = #tpu.core_type<tc>} {
    %c0 = arith.constant 0 : index
    %c0_0 = arith.constant 0 : index
    %c0_1 = arith.constant 0 : index
    %0 = vector.load %arg1[%c0, %c0_0, %c0_1] : memref<2x1x12xi32, #tpu.memory_space<vmem>>, vector<1x1x12xi32>
    %1 = vector.shape_cast %0 : vector<1x1x12xi32> to vector<1x12xi32>
    %c0_i32 = arith.constant 0 : i32
    %2 = vector.broadcast %c0_i32 : i32 to vector<1x12xi32>
    %3 = arith.cmpi ne, %1, %2 : vector<1x12xi32>
    %c1 = arith.constant 1 : index
    %c0_2 = arith.constant 0 : index
    %c0_3 = arith.constant 0 : index
    %4 = vector.load %arg1[%c1, %c0_2, %c0_3] : memref<2x1x12xi32, #tpu.memory_space<vmem>>, vector<1x1x12xi32>
    %5 = vector.shape_cast %4 : vector<1x1x12xi32> to vector<1x12xi32>
    %c0_i32_4 = arith.constant 0 : i32
    %6 = vector.broadcast %c0_i32_4 : i32 to vector<1x12xi32>
    %7 = arith.cmpi ne, %5, %6 : vector<1x12xi32>
    %c0_5 = arith.constant 0 : index
    %c0_6 = arith.constant 0 : index
    %8 = vector.load %arg0[%c0_5, %c0_6] : memref<24x32xf32, #tpu.memory_space<vmem>>, vector<24x32xf32>
    %9 = arith.truncf %8 : vector<24x32xf32> to vector<24x32xbf16>
    %c0_7 = arith.constant 0 : index
    %c0_8 = arith.constant 0 : index
    %c0_9 = arith.constant 0 : index
    %10 = vector.load %arg2[%c0_7, %c0_8, %c0_9] : memref<2x32x96xbf16, #tpu.memory_space<vmem>>, vector<1x32x96xbf16>
    %11 = vector.shape_cast %10 : vector<1x32x96xbf16> to vector<32x96xbf16>
    %cst = arith.constant dense<0.000000e+00> : vector<24x96xf32>
    %12 = tpu.matmul %9, %11, %cst {dimension_numbers = #tpu.dot_dimension_numbers<[1], [0], [0], [1], [0, 0, 1, 1], [], []>} : vector<24x32xbf16>, vector<32x96xbf16>, vector<24x96xf32> -> vector<24x96xf32>
    %c0_10 = arith.constant 0 : index
    %c0_11 = arith.constant 0 : index
    %c0_12 = arith.constant 0 : index
    %13 = vector.load %arg3[%c0_10, %c0_11, %c0_12] : memref<2x1x96xf32, #tpu.memory_space<vmem>>, vector<1x1x96xf32>
    %14 = vector.shape_cast %13 : vector<1x1x96xf32> to vector<1x96xf32>
    %15 = vector.broadcast %14 : vector<1x96xf32> to vector<24x96xf32>
    %16 = arith.addf %12, %15 : vector<24x96xf32>
    %17 = vector.extract_strided_slice %16 {offsets = [0, 0], sizes = [24, 32], strides = [1, 1]} : vector<24x96xf32> to vector<24x32xf32>
    %cst_13 = arith.constant 0.353553385 : f32
    %18 = vector.broadcast %cst_13 : f32 to vector<24x32xf32>
    %19 = arith.mulf %17, %18 : vector<24x32xf32>
    %20 = arith.truncf %19 : vector<24x32xf32> to vector<24x32xbf16>
    %21 = vector.extract_strided_slice %16 {offsets = [0, 32], sizes = [24, 32], strides = [1, 1]} : vector<24x96xf32> to vector<24x32xf32>
    %22 = arith.truncf %21 : vector<24x32xf32> to vector<24x32xbf16>
    %23 = vector.extract_strided_slice %16 {offsets = [0, 64], sizes = [24, 32], strides = [1, 1]} : vector<24x96xf32> to vector<24x32xf32>
    %24 = arith.truncf %23 : vector<24x32xf32> to vector<24x32xbf16>
    %25 = vector.extract_strided_slice %20 {offsets = [0, 0], sizes = [12, 32], strides = [1, 1]} : vector<24x32xbf16> to vector<12x32xbf16>
    %26 = vector.extract_strided_slice %22 {offsets = [0, 0], sizes = [12, 32], strides = [1, 1]} : vector<24x32xbf16> to vector<12x32xbf16>
    %27 = vector.extract_strided_slice %24 {offsets = [0, 0], sizes = [12, 32], strides = [1, 1]} : vector<24x32xbf16> to vector<12x32xbf16>
    %28 = vector.extract_strided_slice %25 {offsets = [0, 0], sizes = [12, 8], strides = [1, 1]} : vector<12x32xbf16> to vector<12x8xbf16>
    %29 = vector.extract_strided_slice %26 {offsets = [0, 0], sizes = [12, 8], strides = [1, 1]} : vector<12x32xbf16> to vector<12x8xbf16>
    %30 = vector.extract_strided_slice %27 {offsets = [0, 0], sizes = [12, 8], strides = [1, 1]} : vector<12x32xbf16> to vector<12x8xbf16>
    %cst_14 = arith.constant dense<0.000000e+00> : vector<12x12xf32>
    %31 = tpu.matmul %28, %29, %cst_14 {dimension_numbers = #tpu.dot_dimension_numbers<[1], [1], [0], [0], [0, 0, 1, 0], [], []>} : vector<12x8xbf16>, vector<12x8xbf16>, vector<12x12xf32> -> vector<12x12xf32>
    %cst_15 = arith.constant -3.53553382E+9 : f32
    %32 = vector.shape_cast %3 : vector<1x12xi1> to vector<1x12xi1>
    %33 = vector.broadcast %32 : vector<1x12xi1> to vector<12x12xi1>
    %34 = vector.broadcast %cst_15 : f32 to vector<12x12xf32>
    %35 = arith.select %33, %34, %31 : vector<12x12xi1>, vector<12x12xf32>
    %cst_16 = arith.constant dense<0xFF800000> : vector<12xf32>
    %36 = vector.multi_reduction <maximumf>, %35, %cst_16 [1] : vector<12x12xf32> to vector<12xf32>
    %37 = vector.shape_cast %36 : vector<12xf32> to vector<12x1xf32>
    %38 = vector.broadcast %37 : vector<12x1xf32> to vector<12x12xf32>
    %39 = arith.subf %35, %38 : vector<12x12xf32>
    %40 = math.exp %39 : vector<12x12xf32>
    %cst_17 = arith.constant dense<0.000000e+00> : vector<12xf32>
    %41 = vector.multi_reduction <add>, %40, %cst_17 [1] : vector<12x12xf32> to vector<12xf32>
    %42 = vector.shape_cast %41 : vector<12xf32> to vector<12x1xf32>
    %43 = vector.broadcast %42 : vector<12x1xf32> to vector<12x12xf32>
    %44 = arith.divf %40, %43 : vector<12x12xf32>
    %45 = arith.truncf %44 : vector<12x12xf32> to vector<12x12xbf16>
    %cst_18 = arith.constant dense<0.000000e+00> : vector<12x8xf32>
    %46 = tpu.matmul %45, %30, %cst_18 {dimension_numbers = #tpu.dot_dimension_numbers<[1], [0], [0], [1], [0, 0, 1, 1], [], []>} : vector<12x12xbf16>, vector<12x8xbf16>, vector<12x8xf32> -> vector<12x8xf32>
    %c0_19 = arith.constant 0 : index
    %c0_20 = arith.constant 0 : index
    %47 = vector.load %arg9[%c0_19, %c0_20] : memref<24x32xf32, #tpu.memory_space<vmem>>, vector<12x8xf32>
    tpu.vector_store %arg9[%c0_19, %c0_20], %46 {strides = array<i32>} : memref<24x32xf32, #tpu.memory_space<vmem>>, vector<12x8xf32>,
    %48 = vector.extract_strided_slice %25 {offsets = [0, 8], sizes = [12, 8], strides = [1, 1]} : vector<12x32xbf16> to vector<12x8xbf16>
    %49 = vector.extract_strided_slice %26 {offsets = [0, 8], sizes = [12, 8], strides = [1, 1]} : vector<12x32xbf16> to vector<12x8xbf16>
    %50 = vector.extract_strided_slice %27 {offsets = [0, 8], sizes = [12, 8], strides = [1, 1]} : vector<12x32xbf16> to vector<12x8xbf16>
    %cst_21 = arith.constant dense<0.000000e+00> : vector<12x12xf32>
    %51 = tpu.matmul %48, %49, %cst_21 {dimension_numbers = #tpu.dot_dimension_numbers<[1], [1], [0], [0], [0, 0, 1, 0], [], []>} : vector<12x8xbf16>, vector<12x8xbf16>, vector<12x12xf32> -> vector<12x12xf32>
    %cst_22 = arith.constant -3.53553382E+9 : f32
    %52 = vector.shape_cast %3 : vector<1x12xi1> to vector<1x12xi1>
    %53 = vector.broadcast %52 : vector<1x12xi1> to vector<12x12xi1>
    %54 = vector.broadcast %cst_22 : f32 to vector<12x12xf32>
    %55 = arith.select %53, %54, %51 : vector<12x12xi1>, vector<12x12xf32>
    %cst_23 = arith.constant dense<0xFF800000> : vector<12xf32>
    %56 = vector.multi_reduction <maximumf>, %55, %cst_23 [1] : vector<12x12xf32> to vector<12xf32>
    %57 = vector.shape_cast %56 : vector<12xf32> to vector<12x1xf32>
    %58 = vector.broadcast %57 : vector<12x1xf32> to vector<12x12xf32>
    %59 = arith.subf %55, %58 : vector<12x12xf32>
    %60 = math.exp %59 : vector<12x12xf32>
    %cst_24 = arith.constant dense<0.000000e+00> : vector<12xf32>
    %61 = vector.multi_reduction <add>, %60, %cst_24 [1] : vector<12x12xf32> to vector<12xf32>
    %62 = vector.shape_cast %61 : vector<12xf32> to vector<12x1xf32>
    %63 = vector.broadcast %62 : vector<12x1xf32> to vector<12x12xf32>
    %64 = arith.divf %60, %63 : vector<12x12xf32>
    %65 = arith.truncf %64 : vector<12x12xf32> to vector<12x12xbf16>
    %cst_25 = arith.constant dense<0.000000e+00> : vector<12x8xf32>
    %66 = tpu.matmul %65, %50, %cst_25 {dimension_numbers = #tpu.dot_dimension_numbers<[1], [0], [0], [1], [0, 0, 1, 1], [], []>} : vector<12x12xbf16>, vector<12x8xbf16>, vector<12x8xf32> -> vector<12x8xf32>
    %c0_26 = arith.constant 0 : index
    %c8 = arith.constant 8 : index
    %67 = vector.load %arg9[%c0_26, %c8] : memref<24x32xf32, #tpu.memory_space<vmem>>, vector<12x8xf32>
    tpu.vector_store %arg9[%c0_26, %c8], %66 {strides = array<i32>} : memref<24x32xf32, #tpu.memory_space<vmem>>, vector<12x8xf32>,
    %68 = vector.extract_strided_slice %25 {offsets = [0, 16], sizes = [12, 8], strides = [1, 1]} : vector<12x32xbf16> to vector<12x8xbf16>
    %69 = vector.extract_strided_slice %26 {offsets = [0, 16], sizes = [12, 8], strides = [1, 1]} : vector<12x32xbf16> to vector<12x8xbf16>
    %70 = vector.extract_strided_slice %27 {offsets = [0, 16], sizes = [12, 8], strides = [1, 1]} : vector<12x32xbf16> to vector<12x8xbf16>
    %cst_27 = arith.constant dense<0.000000e+00> : vector<12x12xf32>
    %71 = tpu.matmul %68, %69, %cst_27 {dimension_numbers = #tpu.dot_dimension_numbers<[1], [1], [0], [0], [0, 0, 1, 0], [], []>} : vector<12x8xbf16>, vector<12x8xbf16>, vector<12x12xf32> -> vector<12x12xf32>
    %cst_28 = arith.constant -3.53553382E+9 : f32
    %72 = vector.shape_cast %3 : vector<1x12xi1> to vector<1x12xi1>
    %73 = vector.broadcast %72 : vector<1x12xi1> to vector<12x12xi1>
    %74 = vector.broadcast %cst_28 : f32 to vector<12x12xf32>
    %75 = arith.select %73, %74, %71 : vector<12x12xi1>, vector<12x12xf32>
    %cst_29 = arith.constant dense<0xFF800000> : vector<12xf32>
    %76 = vector.multi_reduction <maximumf>, %75, %cst_29 [1] : vector<12x12xf32> to vector<12xf32>
    %77 = vector.shape_cast %76 : vector<12xf32> to vector<12x1xf32>
    %78 = vector.broadcast %77 : vector<12x1xf32> to vector<12x12xf32>
    %79 = arith.subf %75, %78 : vector<12x12xf32>
    %80 = math.exp %79 : vector<12x12xf32>
    %cst_30 = arith.constant dense<0.000000e+00> : vector<12xf32>
    %81 = vector.multi_reduction <add>, %80, %cst_30 [1] : vector<12x12xf32> to vector<12xf32>
    %82 = vector.shape_cast %81 : vector<12xf32> to vector<12x1xf32>
    %83 = vector.broadcast %82 : vector<12x1xf32> to vector<12x12xf32>
    %84 = arith.divf %80, %83 : vector<12x12xf32>
    %85 = arith.truncf %84 : vector<12x12xf32> to vector<12x12xbf16>
    %cst_31 = arith.constant dense<0.000000e+00> : vector<12x8xf32>
    %86 = tpu.matmul %85, %70, %cst_31 {dimension_numbers = #tpu.dot_dimension_numbers<[1], [0], [0], [1], [0, 0, 1, 1], [], []>} : vector<12x12xbf16>, vector<12x8xbf16>, vector<12x8xf32> -> vector<12x8xf32>
    %c0_32 = arith.constant 0 : index
    %c16 = arith.constant 16 : index
    %87 = vector.load %arg9[%c0_32, %c16] : memref<24x32xf32, #tpu.memory_space<vmem>>, vector<12x8xf32>
    tpu.vector_store %arg9[%c0_32, %c16], %86 {strides = array<i32>} : memref<24x32xf32, #tpu.memory_space<vmem>>, vector<12x8xf32>,
    %88 = vector.extract_strided_slice %25 {offsets = [0, 24], sizes = [12, 8], strides = [1, 1]} : vector<12x32xbf16> to vector<12x8xbf16>
    %89 = vector.extract_strided_slice %26 {offsets = [0, 24], sizes = [12, 8], strides = [1, 1]} : vector<12x32xbf16> to vector<12x8xbf16>
    %90 = vector.extract_strided_slice %27 {offsets = [0, 24], sizes = [12, 8], strides = [1, 1]} : vector<12x32xbf16> to vector<12x8xbf16>
    %cst_33 = arith.constant dense<0.000000e+00> : vector<12x12xf32>
    %91 = tpu.matmul %88, %89, %cst_33 {dimension_numbers = #tpu.dot_dimension_numbers<[1], [1], [0], [0], [0, 0, 1, 0], [], []>} : vector<12x8xbf16>, vector<12x8xbf16>, vector<12x12xf32> -> vector<12x12xf32>
    %cst_34 = arith.constant -3.53553382E+9 : f32
    %92 = vector.shape_cast %3 : vector<1x12xi1> to vector<1x12xi1>
    %93 = vector.broadcast %92 : vector<1x12xi1> to vector<12x12xi1>
    %94 = vector.broadcast %cst_34 : f32 to vector<12x12xf32>
    %95 = arith.select %93, %94, %91 : vector<12x12xi1>, vector<12x12xf32>
    %cst_35 = arith.constant dense<0xFF800000> : vector<12xf32>
    %96 = vector.multi_reduction <maximumf>, %95, %cst_35 [1] : vector<12x12xf32> to vector<12xf32>
    %97 = vector.shape_cast %96 : vector<12xf32> to vector<12x1xf32>
    %98 = vector.broadcast %97 : vector<12x1xf32> to vector<12x12xf32>
    %99 = arith.subf %95, %98 : vector<12x12xf32>
    %100 = math.exp %99 : vector<12x12xf32>
    %cst_36 = arith.constant dense<0.000000e+00> : vector<12xf32>
    %101 = vector.multi_reduction <add>, %100, %cst_36 [1] : vector<12x12xf32> to vector<12xf32>
    %102 = vector.shape_cast %101 : vector<12xf32> to vector<12x1xf32>
    %103 = vector.broadcast %102 : vector<12x1xf32> to vector<12x12xf32>
    %104 = arith.divf %100, %103 : vector<12x12xf32>
    %105 = arith.truncf %104 : vector<12x12xf32> to vector<12x12xbf16>
    %cst_37 = arith.constant dense<0.000000e+00> : vector<12x8xf32>
    %106 = tpu.matmul %105, %90, %cst_37 {dimension_numbers = #tpu.dot_dimension_numbers<[1], [0], [0], [1], [0, 0, 1, 1], [], []>} : vector<12x12xbf16>, vector<12x8xbf16>, vector<12x8xf32> -> vector<12x8xf32>
    %c0_38 = arith.constant 0 : index
    %c24 = arith.constant 24 : index
    %107 = vector.load %arg9[%c0_38, %c24] : memref<24x32xf32, #tpu.memory_space<vmem>>, vector<12x8xf32>
    tpu.vector_store %arg9[%c0_38, %c24], %106 {strides = array<i32>} : memref<24x32xf32, #tpu.memory_space<vmem>>, vector<12x8xf32>,
    %108 = vector.extract_strided_slice %20 {offsets = [12, 0], sizes = [12, 32], strides = [1, 1]} : vector<24x32xbf16> to vector<12x32xbf16>
    %109 = vector.extract_strided_slice %22 {offsets = [12, 0], sizes = [12, 32], strides = [1, 1]} : vector<24x32xbf16> to vector<12x32xbf16>
    %110 = vector.extract_strided_slice %24 {offsets = [12, 0], sizes = [12, 32], strides = [1, 1]} : vector<24x32xbf16> to vector<12x32xbf16>
    %111 = vector.extract_strided_slice %108 {offsets = [0, 0], sizes = [12, 8], strides = [1, 1]} : vector<12x32xbf16> to vector<12x8xbf16>
    %112 = vector.extract_strided_slice %109 {offsets = [0, 0], sizes = [12, 8], strides = [1, 1]} : vector<12x32xbf16> to vector<12x8xbf16>
    %113 = vector.extract_strided_slice %110 {offsets = [0, 0], sizes = [12, 8], strides = [1, 1]} : vector<12x32xbf16> to vector<12x8xbf16>
    %cst_39 = arith.constant dense<0.000000e+00> : vector<12x12xf32>
    %114 = tpu.matmul %111, %112, %cst_39 {dimension_numbers = #tpu.dot_dimension_numbers<[1], [1], [0], [0], [0, 0, 1, 0], [], []>} : vector<12x8xbf16>, vector<12x8xbf16>, vector<12x12xf32> -> vector<12x12xf32>
    %cst_40 = arith.constant -3.53553382E+9 : f32
    %115 = vector.shape_cast %7 : vector<1x12xi1> to vector<1x12xi1>
    %116 = vector.broadcast %115 : vector<1x12xi1> to vector<12x12xi1>
    %117 = vector.broadcast %cst_40 : f32 to vector<12x12xf32>
    %118 = arith.select %116, %117, %114 : vector<12x12xi1>, vector<12x12xf32>
    %cst_41 = arith.constant dense<0xFF800000> : vector<12xf32>
    %119 = vector.multi_reduction <maximumf>, %118, %cst_41 [1] : vector<12x12xf32> to vector<12xf32>
    %120 = vector.shape_cast %119 : vector<12xf32> to vector<12x1xf32>
    %121 = vector.broadcast %120 : vector<12x1xf32> to vector<12x12xf32>
    %122 = arith.subf %118, %121 : vector<12x12xf32>
    %123 = math.exp %122 : vector<12x12xf32>
    %cst_42 = arith.constant dense<0.000000e+00> : vector<12xf32>
    %124 = vector.multi_reduction <add>, %123, %cst_42 [1] : vector<12x12xf32> to vector<12xf32>
    %125 = vector.shape_cast %124 : vector<12xf32> to vector<12x1xf32>
    %126 = vector.broadcast %125 : vector<12x1xf32> to vector<12x12xf32>
    %127 = arith.divf %123, %126 : vector<12x12xf32>
    %128 = arith.truncf %127 : vector<12x12xf32> to vector<12x12xbf16>
    %cst_43 = arith.constant dense<0.000000e+00> : vector<12x8xf32>
    %129 = tpu.matmul %128, %113, %cst_43 {dimension_numbers = #tpu.dot_dimension_numbers<[1], [0], [0], [1], [0, 0, 1, 1], [], []>} : vector<12x12xbf16>, vector<12x8xbf16>, vector<12x8xf32> -> vector<12x8xf32>
    %c12 = arith.constant 12 : index
    %c0_44 = arith.constant 0 : index
    %130 = vector.load %arg9[%c12, %c0_44] : memref<24x32xf32, #tpu.memory_space<vmem>>, vector<12x8xf32>
    tpu.vector_store %arg9[%c12, %c0_44], %129 {strides = array<i32>} : memref<24x32xf32, #tpu.memory_space<vmem>>, vector<12x8xf32>,
    %131 = vector.extract_strided_slice %108 {offsets = [0, 8], sizes = [12, 8], strides = [1, 1]} : vector<12x32xbf16> to vector<12x8xbf16>
    %132 = vector.extract_strided_slice %109 {offsets = [0, 8], sizes = [12, 8], strides = [1, 1]} : vector<12x32xbf16> to vector<12x8xbf16>
    %133 = vector.extract_strided_slice %110 {offsets = [0, 8], sizes = [12, 8], strides = [1, 1]} : vector<12x32xbf16> to vector<12x8xbf16>
    %cst_45 = arith.constant dense<0.000000e+00> : vector<12x12xf32>
    %134 = tpu.matmul %131, %132, %cst_45 {dimension_numbers = #tpu.dot_dimension_numbers<[1], [1], [0], [0], [0, 0, 1, 0], [], []>} : vector<12x8xbf16>, vector<12x8xbf16>, vector<12x12xf32> -> vector<12x12xf32>
    %cst_46 = arith.constant -3.53553382E+9 : f32
    %135 = vector.shape_cast %7 : vector<1x12xi1> to vector<1x12xi1>
    %136 = vector.broadcast %135 : vector<1x12xi1> to vector<12x12xi1>
    %137 = vector.broadcast %cst_46 : f32 to vector<12x12xf32>
    %138 = arith.select %136, %137, %134 : vector<12x12xi1>, vector<12x12xf32>
    %cst_47 = arith.constant dense<0xFF800000> : vector<12xf32>
    %139 = vector.multi_reduction <maximumf>, %138, %cst_47 [1] : vector<12x12xf32> to vector<12xf32>
    %140 = vector.shape_cast %139 : vector<12xf32> to vector<12x1xf32>
    %141 = vector.broadcast %140 : vector<12x1xf32> to vector<12x12xf32>
    %142 = arith.subf %138, %141 : vector<12x12xf32>
    %143 = math.exp %142 : vector<12x12xf32>
    %cst_48 = arith.constant dense<0.000000e+00> : vector<12xf32>
    %144 = vector.multi_reduction <add>, %143, %cst_48 [1] : vector<12x12xf32> to vector<12xf32>
    %145 = vector.shape_cast %144 : vector<12xf32> to vector<12x1xf32>
    %146 = vector.broadcast %145 : vector<12x1xf32> to vector<12x12xf32>
    %147 = arith.divf %143, %146 : vector<12x12xf32>
    %148 = arith.truncf %147 : vector<12x12xf32> to vector<12x12xbf16>
    %cst_49 = arith.constant dense<0.000000e+00> : vector<12x8xf32>
    %149 = tpu.matmul %148, %133, %cst_49 {dimension_numbers = #tpu.dot_dimension_numbers<[1], [0], [0], [1], [0, 0, 1, 1], [], []>} : vector<12x12xbf16>, vector<12x8xbf16>, vector<12x8xf32> -> vector<12x8xf32>
    %c12_50 = arith.constant 12 : index
    %c8_51 = arith.constant 8 : index
    %150 = vector.load %arg9[%c12_50, %c8_51] : memref<24x32xf32, #tpu.memory_space<vmem>>, vector<12x8xf32>
    tpu.vector_store %arg9[%c12_50, %c8_51], %149 {strides = array<i32>} : memref<24x32xf32, #tpu.memory_space<vmem>>, vector<12x8xf32>,
    %151 = vector.extract_strided_slice %108 {offsets = [0, 16], sizes = [12, 8], strides = [1, 1]} : vector<12x32xbf16> to vector<12x8xbf16>
    %152 = vector.extract_strided_slice %109 {offsets = [0, 16], sizes = [12, 8], strides = [1, 1]} : vector<12x32xbf16> to vector<12x8xbf16>
    %153 = vector.extract_strided_slice %110 {offsets = [0, 16], sizes = [12, 8], strides = [1, 1]} : vector<12x32xbf16> to vector<12x8xbf16>
    %cst_52 = arith.constant dense<0.000000e+00> : vector<12x12xf32>
    %154 = tpu.matmul %151, %152, %cst_52 {dimension_numbers = #tpu.dot_dimension_numbers<[1], [1], [0], [0], [0, 0, 1, 0], [], []>} : vector<12x8xbf16>, vector<12x8xbf16>, vector<12x12xf32> -> vector<12x12xf32>
    %cst_53 = arith.constant -3.53553382E+9 : f32
    %155 = vector.shape_cast %7 : vector<1x12xi1> to vector<1x12xi1>
    %156 = vector.broadcast %155 : vector<1x12xi1> to vector<12x12xi1>
    %157 = vector.broadcast %cst_53 : f32 to vector<12x12xf32>
    %158 = arith.select %156, %157, %154 : vector<12x12xi1>, vector<12x12xf32>
    %cst_54 = arith.constant dense<0xFF800000> : vector<12xf32>
    %159 = vector.multi_reduction <maximumf>, %158, %cst_54 [1] : vector<12x12xf32> to vector<12xf32>
    %160 = vector.shape_cast %159 : vector<12xf32> to vector<12x1xf32>
    %161 = vector.broadcast %160 : vector<12x1xf32> to vector<12x12xf32>
    %162 = arith.subf %158, %161 : vector<12x12xf32>
    %163 = math.exp %162 : vector<12x12xf32>
    %cst_55 = arith.constant dense<0.000000e+00> : vector<12xf32>
    %164 = vector.multi_reduction <add>, %163, %cst_55 [1] : vector<12x12xf32> to vector<12xf32>
    %165 = vector.shape_cast %164 : vector<12xf32> to vector<12x1xf32>
    %166 = vector.broadcast %165 : vector<12x1xf32> to vector<12x12xf32>
    %167 = arith.divf %163, %166 : vector<12x12xf32>
    %168 = arith.truncf %167 : vector<12x12xf32> to vector<12x12xbf16>
    %cst_56 = arith.constant dense<0.000000e+00> : vector<12x8xf32>
    %169 = tpu.matmul %168, %153, %cst_56 {dimension_numbers = #tpu.dot_dimension_numbers<[1], [0], [0], [1], [0, 0, 1, 1], [], []>} : vector<12x12xbf16>, vector<12x8xbf16>, vector<12x8xf32> -> vector<12x8xf32>
    %c12_57 = arith.constant 12 : index
    %c16_58 = arith.constant 16 : index
    %170 = vector.load %arg9[%c12_57, %c16_58] : memref<24x32xf32, #tpu.memory_space<vmem>>, vector<12x8xf32>
    tpu.vector_store %arg9[%c12_57, %c16_58], %169 {strides = array<i32>} : memref<24x32xf32, #tpu.memory_space<vmem>>, vector<12x8xf32>,
    %171 = vector.extract_strided_slice %108 {offsets = [0, 24], sizes = [12, 8], strides = [1, 1]} : vector<12x32xbf16> to vector<12x8xbf16>
    %172 = vector.extract_strided_slice %109 {offsets = [0, 24], sizes = [12, 8], strides = [1, 1]} : vector<12x32xbf16> to vector<12x8xbf16>
    %173 = vector.extract_strided_slice %110 {offsets = [0, 24], sizes = [12, 8], strides = [1, 1]} : vector<12x32xbf16> to vector<12x8xbf16>
    %cst_59 = arith.constant dense<0.000000e+00> : vector<12x12xf32>
    %174 = tpu.matmul %171, %172, %cst_59 {dimension_numbers = #tpu.dot_dimension_numbers<[1], [1], [0], [0], [0, 0, 1, 0], [], []>} : vector<12x8xbf16>, vector<12x8xbf16>, vector<12x12xf32> -> vector<12x12xf32>
    %cst_60 = arith.constant -3.53553382E+9 : f32
    %175 = vector.shape_cast %7 : vector<1x12xi1> to vector<1x12xi1>
    %176 = vector.broadcast %175 : vector<1x12xi1> to vector<12x12xi1>
    %177 = vector.broadcast %cst_60 : f32 to vector<12x12xf32>
    %178 = arith.select %176, %177, %174 : vector<12x12xi1>, vector<12x12xf32>
    %cst_61 = arith.constant dense<0xFF800000> : vector<12xf32>
    %179 = vector.multi_reduction <maximumf>, %178, %cst_61 [1] : vector<12x12xf32> to vector<12xf32>
    %180 = vector.shape_cast %179 : vector<12xf32> to vector<12x1xf32>
    %181 = vector.broadcast %180 : vector<12x1xf32> to vector<12x12xf32>
    %182 = arith.subf %178, %181 : vector<12x12xf32>
    %183 = math.exp %182 : vector<12x12xf32>
    %cst_62 = arith.constant dense<0.000000e+00> : vector<12xf32>
    %184 = vector.multi_reduction <add>, %183, %cst_62 [1] : vector<12x12xf32> to vector<12xf32>
    %185 = vector.shape_cast %184 : vector<12xf32> to vector<12x1xf32>
    %186 = vector.broadcast %185 : vector<12x1xf32> to vector<12x12xf32>
    %187 = arith.divf %183, %186 : vector<12x12xf32>
    %188 = arith.truncf %187 : vector<12x12xf32> to vector<12x12xbf16>
    %cst_63 = arith.constant dense<0.000000e+00> : vector<12x8xf32>
    %189 = tpu.matmul %188, %173, %cst_63 {dimension_numbers = #tpu.dot_dimension_numbers<[1], [0], [0], [1], [0, 0, 1, 1], [], []>} : vector<12x12xbf16>, vector<12x8xbf16>, vector<12x8xf32> -> vector<12x8xf32>
    %c12_64 = arith.constant 12 : index
    %c24_65 = arith.constant 24 : index
    %190 = vector.load %arg9[%c12_64, %c24_65] : memref<24x32xf32, #tpu.memory_space<vmem>>, vector<12x8xf32>
    tpu.vector_store %arg9[%c12_64, %c24_65], %189 {strides = array<i32>} : memref<24x32xf32, #tpu.memory_space<vmem>>, vector<12x8xf32>,
    %c0_66 = arith.constant 0 : index
    %c0_67 = arith.constant 0 : index
    %191 = vector.load %arg9[%c0_66, %c0_67] : memref<24x32xf32, #tpu.memory_space<vmem>>, vector<24x32xf32>
    %192 = arith.addf %8, %191 : vector<24x32xf32>
    %193 = vector.shape_cast %192 : vector<24x32xf32> to vector<1x24x32xf32>
    %cst_68 = arith.constant dense<0.000000e+00> : vector<1xf32>
    %194 = vector.multi_reduction <add>, %193, %cst_68 [1, 2] : vector<1x24x32xf32> to vector<1xf32>
    %195 = vector.shape_cast %194 : vector<1xf32> to vector<1x1x1xf32>
    %196 = vector.extract %195[0, 0, 0] : f32 from vector<1x1x1xf32>
    %cst_69 = arith.constant 7.680000e+02 : f32
    %197 = arith.divf %196, %cst_69 : f32
    %198 = vector.broadcast %197 : f32 to vector<24x32xf32>
    %199 = arith.subf %192, %198 : vector<24x32xf32>
    %200 = arith.mulf %199, %199 : vector<24x32xf32>
    %201 = vector.shape_cast %200 : vector<24x32xf32> to vector<1x24x32xf32>
    %cst_70 = arith.constant dense<0.000000e+00> : vector<1xf32>
    %202 = vector.multi_reduction <add>, %201, %cst_70 [1, 2] : vector<1x24x32xf32> to vector<1xf32>
    %203 = vector.shape_cast %202 : vector<1xf32> to vector<1x1x1xf32>
    %204 = vector.extract %203[0, 0, 0] : f32 from vector<1x1x1xf32>
    %cst_71 = arith.constant 7.680000e+02 : f32
    %205 = arith.divf %204, %cst_71 : f32
    %cst_72 = arith.constant 9.99999974E-6 : f32
    %206 = arith.addf %205, %cst_72 : f32
    %207 = math.rsqrt %206 : f32
    %208 = vector.broadcast %207 : f32 to vector<24x32xf32>
    %209 = arith.mulf %199, %208 : vector<24x32xf32>
    %c0_73 = arith.constant 0 : index
    %c0_74 = arith.constant 0 : index
    %c0_75 = arith.constant 0 : index
    %210 = vector.load %arg4[%c0_73, %c0_74, %c0_75] : memref<2x32x128xbf16, #tpu.memory_space<vmem>>, vector<1x32x128xbf16>
    %211 = vector.shape_cast %210 : vector<1x32x128xbf16> to vector<32x128xbf16>
    %c0_76 = arith.constant 0 : index
    %c0_77 = arith.constant 0 : index
    %c0_78 = arith.constant 0 : index
    %212 = vector.load %arg5[%c0_76, %c0_77, %c0_78] : memref<2x1x128xf32, #tpu.memory_space<vmem>>, vector<1x1x128xf32>
    %213 = vector.shape_cast %212 : vector<1x1x128xf32> to vector<1x128xf32>
    %c0_79 = arith.constant 0 : index
    %c0_80 = arith.constant 0 : index
    %c0_81 = arith.constant 0 : index
    %214 = vector.load %arg6[%c0_79, %c0_80, %c0_81] : memref<2x128x32xbf16, #tpu.memory_space<vmem>>, vector<1x128x32xbf16>
    %215 = vector.shape_cast %214 : vector<1x128x32xbf16> to vector<128x32xbf16>
    %c0_82 = arith.constant 0 : index
    %c0_83 = arith.constant 0 : index
    %c0_84 = arith.constant 0 : index
    %216 = vector.load %arg7[%c0_82, %c0_83, %c0_84] : memref<2x1x32xf32, #tpu.memory_space<vmem>>, vector<1x1x32xf32>
    %217 = vector.shape_cast %216 : vector<1x1x32xf32> to vector<1x32xf32>
    %218 = arith.truncf %209 : vector<24x32xf32> to vector<24x32xbf16>
    %cst_85 = arith.constant dense<0.000000e+00> : vector<24x128xf32>
    %219 = tpu.matmul %218, %211, %cst_85 {dimension_numbers = #tpu.dot_dimension_numbers<[1], [0], [0], [1], [0, 0, 1, 1], [], []>} : vector<24x32xbf16>, vector<32x128xbf16>, vector<24x128xf32> -> vector<24x128xf32>
    %220 = vector.broadcast %213 : vector<1x128xf32> to vector<24x128xf32>
    %221 = arith.addf %219, %220 : vector<24x128xf32>
    %cst_86 = arith.constant 0.000000e+00 : f32
    %222 = vector.broadcast %cst_86 : f32 to vector<24x128xf32>
    %223 = arith.maximumf %221, %222 : vector<24x128xf32>
    %224 = arith.truncf %223 : vector<24x128xf32> to vector<24x128xbf16>
    %cst_87 = arith.constant dense<0.000000e+00> : vector<24x32xf32>
    %225 = tpu.matmul %224, %215, %cst_87 {dimension_numbers = #tpu.dot_dimension_numbers<[1], [0], [0], [1], [0, 0, 1, 1], [], []>} : vector<24x128xbf16>, vector<128x32xbf16>, vector<24x32xf32> -> vector<24x32xf32>
    %226 = vector.broadcast %217 : vector<1x32xf32> to vector<24x32xf32>
    %227 = arith.addf %225, %226 : vector<24x32xf32>
    %228 = arith.addf %209, %227 : vector<24x32xf32>
    %229 = vector.shape_cast %228 : vector<24x32xf32> to vector<1x24x32xf32>
    %cst_88 = arith.constant dense<0.000000e+00> : vector<1xf32>
    %230 = vector.multi_reduction <add>, %229, %cst_88 [1, 2] : vector<1x24x32xf32> to vector<1xf32>
    %231 = vector.shape_cast %230 : vector<1xf32> to vector<1x1x1xf32>
    %232 = vector.extract %231[0, 0, 0] : f32 from vector<1x1x1xf32>
    %cst_89 = arith.constant 7.680000e+02 : f32
    %233 = arith.divf %232, %cst_89 : f32
    %234 = vector.broadcast %233 : f32 to vector<24x32xf32>
    %235 = arith.subf %228, %234 : vector<24x32xf32>
    %236 = arith.mulf %235, %235 : vector<24x32xf32>
    %237 = vector.shape_cast %236 : vector<24x32xf32> to vector<1x24x32xf32>
    %cst_90 = arith.constant dense<0.000000e+00> : vector<1xf32>
    %238 = vector.multi_reduction <add>, %237, %cst_90 [1, 2] : vector<1x24x32xf32> to vector<1xf32>
    %239 = vector.shape_cast %238 : vector<1xf32> to vector<1x1x1xf32>
    %240 = vector.extract %239[0, 0, 0] : f32 from vector<1x1x1xf32>
    %cst_91 = arith.constant 7.680000e+02 : f32
    %241 = arith.divf %240, %cst_91 : f32
    %cst_92 = arith.constant 9.99999974E-6 : f32
    %242 = arith.addf %241, %cst_92 : f32
    %243 = math.rsqrt %242 : f32
    %244 = vector.broadcast %243 : f32 to vector<24x32xf32>
    %245 = arith.mulf %235, %244 : vector<24x32xf32>
    %246 = arith.truncf %245 : vector<24x32xf32> to vector<24x32xbf16>
    %c1_93 = arith.constant 1 : index
    %c0_94 = arith.constant 0 : index
    %c0_95 = arith.constant 0 : index
    %247 = vector.load %arg2[%c1_93, %c0_94, %c0_95] : memref<2x32x96xbf16, #tpu.memory_space<vmem>>, vector<1x32x96xbf16>
    %248 = vector.shape_cast %247 : vector<1x32x96xbf16> to vector<32x96xbf16>
    %cst_96 = arith.constant dense<0.000000e+00> : vector<24x96xf32>
    %249 = tpu.matmul %246, %248, %cst_96 {dimension_numbers = #tpu.dot_dimension_numbers<[1], [0], [0], [1], [0, 0, 1, 1], [], []>} : vector<24x32xbf16>, vector<32x96xbf16>, vector<24x96xf32> -> vector<24x96xf32>
    %c1_97 = arith.constant 1 : index
    %c0_98 = arith.constant 0 : index
    %c0_99 = arith.constant 0 : index
    %250 = vector.load %arg3[%c1_97, %c0_98, %c0_99] : memref<2x1x96xf32, #tpu.memory_space<vmem>>, vector<1x1x96xf32>
    %251 = vector.shape_cast %250 : vector<1x1x96xf32> to vector<1x96xf32>
    %252 = vector.broadcast %251 : vector<1x96xf32> to vector<24x96xf32>
    %253 = arith.addf %249, %252 : vector<24x96xf32>
    %254 = vector.extract_strided_slice %253 {offsets = [0, 0], sizes = [24, 32], strides = [1, 1]} : vector<24x96xf32> to vector<24x32xf32>
    %cst_100 = arith.constant 0.353553385 : f32
    %255 = vector.broadcast %cst_100 : f32 to vector<24x32xf32>
    %256 = arith.mulf %254, %255 : vector<24x32xf32>
    %257 = arith.truncf %256 : vector<24x32xf32> to vector<24x32xbf16>
    %258 = vector.extract_strided_slice %253 {offsets = [0, 32], sizes = [24, 32], strides = [1, 1]} : vector<24x96xf32> to vector<24x32xf32>
    %259 = arith.truncf %258 : vector<24x32xf32> to vector<24x32xbf16>
    %260 = vector.extract_strided_slice %253 {offsets = [0, 64], sizes = [24, 32], strides = [1, 1]} : vector<24x96xf32> to vector<24x32xf32>
    %261 = arith.truncf %260 : vector<24x32xf32> to vector<24x32xbf16>
    %262 = vector.extract_strided_slice %257 {offsets = [0, 0], sizes = [12, 32], strides = [1, 1]} : vector<24x32xbf16> to vector<12x32xbf16>
    %263 = vector.extract_strided_slice %259 {offsets = [0, 0], sizes = [12, 32], strides = [1, 1]} : vector<24x32xbf16> to vector<12x32xbf16>
    %264 = vector.extract_strided_slice %261 {offsets = [0, 0], sizes = [12, 32], strides = [1, 1]} : vector<24x32xbf16> to vector<12x32xbf16>
    %265 = vector.extract_strided_slice %262 {offsets = [0, 0], sizes = [12, 8], strides = [1, 1]} : vector<12x32xbf16> to vector<12x8xbf16>
    %266 = vector.extract_strided_slice %263 {offsets = [0, 0], sizes = [12, 8], strides = [1, 1]} : vector<12x32xbf16> to vector<12x8xbf16>
    %267 = vector.extract_strided_slice %264 {offsets = [0, 0], sizes = [12, 8], strides = [1, 1]} : vector<12x32xbf16> to vector<12x8xbf16>
    %cst_101 = arith.constant dense<0.000000e+00> : vector<12x12xf32>
    %268 = tpu.matmul %265, %266, %cst_101 {dimension_numbers = #tpu.dot_dimension_numbers<[1], [1], [0], [0], [0, 0, 1, 0], [], []>} : vector<12x8xbf16>, vector<12x8xbf16>, vector<12x12xf32> -> vector<12x12xf32>
    %cst_102 = arith.constant -3.53553382E+9 : f32
    %269 = vector.shape_cast %3 : vector<1x12xi1> to vector<1x12xi1>
    %270 = vector.broadcast %269 : vector<1x12xi1> to vector<12x12xi1>
    %271 = vector.broadcast %cst_102 : f32 to vector<12x12xf32>
    %272 = arith.select %270, %271, %268 : vector<12x12xi1>, vector<12x12xf32>
    %cst_103 = arith.constant dense<0xFF800000> : vector<12xf32>
    %273 = vector.multi_reduction <maximumf>, %272, %cst_103 [1] : vector<12x12xf32> to vector<12xf32>
    %274 = vector.shape_cast %273 : vector<12xf32> to vector<12x1xf32>
    %275 = vector.broadcast %274 : vector<12x1xf32> to vector<12x12xf32>
    %276 = arith.subf %272, %275 : vector<12x12xf32>
    %277 = math.exp %276 : vector<12x12xf32>
    %cst_104 = arith.constant dense<0.000000e+00> : vector<12xf32>
    %278 = vector.multi_reduction <add>, %277, %cst_104 [1] : vector<12x12xf32> to vector<12xf32>
    %279 = vector.shape_cast %278 : vector<12xf32> to vector<12x1xf32>
    %280 = vector.broadcast %279 : vector<12x1xf32> to vector<12x12xf32>
    %281 = arith.divf %277, %280 : vector<12x12xf32>
    %282 = arith.truncf %281 : vector<12x12xf32> to vector<12x12xbf16>
    %cst_105 = arith.constant dense<0.000000e+00> : vector<12x8xf32>
    %283 = tpu.matmul %282, %267, %cst_105 {dimension_numbers = #tpu.dot_dimension_numbers<[1], [0], [0], [1], [0, 0, 1, 1], [], []>} : vector<12x12xbf16>, vector<12x8xbf16>, vector<12x8xf32> -> vector<12x8xf32>
    %c0_106 = arith.constant 0 : index
    %c0_107 = arith.constant 0 : index
    %284 = vector.load %arg9[%c0_106, %c0_107] : memref<24x32xf32, #tpu.memory_space<vmem>>, vector<12x8xf32>
    tpu.vector_store %arg9[%c0_106, %c0_107], %283 {strides = array<i32>} : memref<24x32xf32, #tpu.memory_space<vmem>>, vector<12x8xf32>,
    %285 = vector.extract_strided_slice %262 {offsets = [0, 8], sizes = [12, 8], strides = [1, 1]} : vector<12x32xbf16> to vector<12x8xbf16>
    %286 = vector.extract_strided_slice %263 {offsets = [0, 8], sizes = [12, 8], strides = [1, 1]} : vector<12x32xbf16> to vector<12x8xbf16>
    %287 = vector.extract_strided_slice %264 {offsets = [0, 8], sizes = [12, 8], strides = [1, 1]} : vector<12x32xbf16> to vector<12x8xbf16>
    %cst_108 = arith.constant dense<0.000000e+00> : vector<12x12xf32>
    %288 = tpu.matmul %285, %286, %cst_108 {dimension_numbers = #tpu.dot_dimension_numbers<[1], [1], [0], [0], [0, 0, 1, 0], [], []>} : vector<12x8xbf16>, vector<12x8xbf16>, vector<12x12xf32> -> vector<12x12xf32>
    %cst_109 = arith.constant -3.53553382E+9 : f32
    %289 = vector.shape_cast %3 : vector<1x12xi1> to vector<1x12xi1>
    %290 = vector.broadcast %289 : vector<1x12xi1> to vector<12x12xi1>
    %291 = vector.broadcast %cst_109 : f32 to vector<12x12xf32>
    %292 = arith.select %290, %291, %288 : vector<12x12xi1>, vector<12x12xf32>
    %cst_110 = arith.constant dense<0xFF800000> : vector<12xf32>
    %293 = vector.multi_reduction <maximumf>, %292, %cst_110 [1] : vector<12x12xf32> to vector<12xf32>
    %294 = vector.shape_cast %293 : vector<12xf32> to vector<12x1xf32>
    %295 = vector.broadcast %294 : vector<12x1xf32> to vector<12x12xf32>
    %296 = arith.subf %292, %295 : vector<12x12xf32>
    %297 = math.exp %296 : vector<12x12xf32>
    %cst_111 = arith.constant dense<0.000000e+00> : vector<12xf32>
    %298 = vector.multi_reduction <add>, %297, %cst_111 [1] : vector<12x12xf32> to vector<12xf32>
    %299 = vector.shape_cast %298 : vector<12xf32> to vector<12x1xf32>
    %300 = vector.broadcast %299 : vector<12x1xf32> to vector<12x12xf32>
    %301 = arith.divf %297, %300 : vector<12x12xf32>
    %302 = arith.truncf %301 : vector<12x12xf32> to vector<12x12xbf16>
    %cst_112 = arith.constant dense<0.000000e+00> : vector<12x8xf32>
    %303 = tpu.matmul %302, %287, %cst_112 {dimension_numbers = #tpu.dot_dimension_numbers<[1], [0], [0], [1], [0, 0, 1, 1], [], []>} : vector<12x12xbf16>, vector<12x8xbf16>, vector<12x8xf32> -> vector<12x8xf32>
    %c0_113 = arith.constant 0 : index
    %c8_114 = arith.constant 8 : index
    %304 = vector.load %arg9[%c0_113, %c8_114] : memref<24x32xf32, #tpu.memory_space<vmem>>, vector<12x8xf32>
    tpu.vector_store %arg9[%c0_113, %c8_114], %303 {strides = array<i32>} : memref<24x32xf32, #tpu.memory_space<vmem>>, vector<12x8xf32>,
    %305 = vector.extract_strided_slice %262 {offsets = [0, 16], sizes = [12, 8], strides = [1, 1]} : vector<12x32xbf16> to vector<12x8xbf16>
    %306 = vector.extract_strided_slice %263 {offsets = [0, 16], sizes = [12, 8], strides = [1, 1]} : vector<12x32xbf16> to vector<12x8xbf16>
    %307 = vector.extract_strided_slice %264 {offsets = [0, 16], sizes = [12, 8], strides = [1, 1]} : vector<12x32xbf16> to vector<12x8xbf16>
    %cst_115 = arith.constant dense<0.000000e+00> : vector<12x12xf32>
    %308 = tpu.matmul %305, %306, %cst_115 {dimension_numbers = #tpu.dot_dimension_numbers<[1], [1], [0], [0], [0, 0, 1, 0], [], []>} : vector<12x8xbf16>, vector<12x8xbf16>, vector<12x12xf32> -> vector<12x12xf32>
    %cst_116 = arith.constant -3.53553382E+9 : f32
    %309 = vector.shape_cast %3 : vector<1x12xi1> to vector<1x12xi1>
    %310 = vector.broadcast %309 : vector<1x12xi1> to vector<12x12xi1>
    %311 = vector.broadcast %cst_116 : f32 to vector<12x12xf32>
    %312 = arith.select %310, %311, %308 : vector<12x12xi1>, vector<12x12xf32>
    %cst_117 = arith.constant dense<0xFF800000> : vector<12xf32>
    %313 = vector.multi_reduction <maximumf>, %312, %cst_117 [1] : vector<12x12xf32> to vector<12xf32>
    %314 = vector.shape_cast %313 : vector<12xf32> to vector<12x1xf32>
    %315 = vector.broadcast %314 : vector<12x1xf32> to vector<12x12xf32>
    %316 = arith.subf %312, %315 : vector<12x12xf32>
    %317 = math.exp %316 : vector<12x12xf32>
    %cst_118 = arith.constant dense<0.000000e+00> : vector<12xf32>
    %318 = vector.multi_reduction <add>, %317, %cst_118 [1] : vector<12x12xf32> to vector<12xf32>
    %319 = vector.shape_cast %318 : vector<12xf32> to vector<12x1xf32>
    %320 = vector.broadcast %319 : vector<12x1xf32> to vector<12x12xf32>
    %321 = arith.divf %317, %320 : vector<12x12xf32>
    %322 = arith.truncf %321 : vector<12x12xf32> to vector<12x12xbf16>
    %cst_119 = arith.constant dense<0.000000e+00> : vector<12x8xf32>
    %323 = tpu.matmul %322, %307, %cst_119 {dimension_numbers = #tpu.dot_dimension_numbers<[1], [0], [0], [1], [0, 0, 1, 1], [], []>} : vector<12x12xbf16>, vector<12x8xbf16>, vector<12x8xf32> -> vector<12x8xf32>
    %c0_120 = arith.constant 0 : index
    %c16_121 = arith.constant 16 : index
    %324 = vector.load %arg9[%c0_120, %c16_121] : memref<24x32xf32, #tpu.memory_space<vmem>>, vector<12x8xf32>
    tpu.vector_store %arg9[%c0_120, %c16_121], %323 {strides = array<i32>} : memref<24x32xf32, #tpu.memory_space<vmem>>, vector<12x8xf32>,
    %325 = vector.extract_strided_slice %262 {offsets = [0, 24], sizes = [12, 8], strides = [1, 1]} : vector<12x32xbf16> to vector<12x8xbf16>
    %326 = vector.extract_strided_slice %263 {offsets = [0, 24], sizes = [12, 8], strides = [1, 1]} : vector<12x32xbf16> to vector<12x8xbf16>
    %327 = vector.extract_strided_slice %264 {offsets = [0, 24], sizes = [12, 8], strides = [1, 1]} : vector<12x32xbf16> to vector<12x8xbf16>
    %cst_122 = arith.constant dense<0.000000e+00> : vector<12x12xf32>
    %328 = tpu.matmul %325, %326, %cst_122 {dimension_numbers = #tpu.dot_dimension_numbers<[1], [1], [0], [0], [0, 0, 1, 0], [], []>} : vector<12x8xbf16>, vector<12x8xbf16>, vector<12x12xf32> -> vector<12x12xf32>
    %cst_123 = arith.constant -3.53553382E+9 : f32
    %329 = vector.shape_cast %3 : vector<1x12xi1> to vector<1x12xi1>
    %330 = vector.broadcast %329 : vector<1x12xi1> to vector<12x12xi1>
    %331 = vector.broadcast %cst_123 : f32 to vector<12x12xf32>
    %332 = arith.select %330, %331, %328 : vector<12x12xi1>, vector<12x12xf32>
    %cst_124 = arith.constant dense<0xFF800000> : vector<12xf32>
    %333 = vector.multi_reduction <maximumf>, %332, %cst_124 [1] : vector<12x12xf32> to vector<12xf32>
    %334 = vector.shape_cast %333 : vector<12xf32> to vector<12x1xf32>
    %335 = vector.broadcast %334 : vector<12x1xf32> to vector<12x12xf32>
    %336 = arith.subf %332, %335 : vector<12x12xf32>
    %337 = math.exp %336 : vector<12x12xf32>
    %cst_125 = arith.constant dense<0.000000e+00> : vector<12xf32>
    %338 = vector.multi_reduction <add>, %337, %cst_125 [1] : vector<12x12xf32> to vector<12xf32>
    %339 = vector.shape_cast %338 : vector<12xf32> to vector<12x1xf32>
    %340 = vector.broadcast %339 : vector<12x1xf32> to vector<12x12xf32>
    %341 = arith.divf %337, %340 : vector<12x12xf32>
    %342 = arith.truncf %341 : vector<12x12xf32> to vector<12x12xbf16>
    %cst_126 = arith.constant dense<0.000000e+00> : vector<12x8xf32>
    %343 = tpu.matmul %342, %327, %cst_126 {dimension_numbers = #tpu.dot_dimension_numbers<[1], [0], [0], [1], [0, 0, 1, 1], [], []>} : vector<12x12xbf16>, vector<12x8xbf16>, vector<12x8xf32> -> vector<12x8xf32>
    %c0_127 = arith.constant 0 : index
    %c24_128 = arith.constant 24 : index
    %344 = vector.load %arg9[%c0_127, %c24_128] : memref<24x32xf32, #tpu.memory_space<vmem>>, vector<12x8xf32>
    tpu.vector_store %arg9[%c0_127, %c24_128], %343 {strides = array<i32>} : memref<24x32xf32, #tpu.memory_space<vmem>>, vector<12x8xf32>,
    %345 = vector.extract_strided_slice %257 {offsets = [12, 0], sizes = [12, 32], strides = [1, 1]} : vector<24x32xbf16> to vector<12x32xbf16>
    %346 = vector.extract_strided_slice %259 {offsets = [12, 0], sizes = [12, 32], strides = [1, 1]} : vector<24x32xbf16> to vector<12x32xbf16>
    %347 = vector.extract_strided_slice %261 {offsets = [12, 0], sizes = [12, 32], strides = [1, 1]} : vector<24x32xbf16> to vector<12x32xbf16>
    %348 = vector.extract_strided_slice %345 {offsets = [0, 0], sizes = [12, 8], strides = [1, 1]} : vector<12x32xbf16> to vector<12x8xbf16>
    %349 = vector.extract_strided_slice %346 {offsets = [0, 0], sizes = [12, 8], strides = [1, 1]} : vector<12x32xbf16> to vector<12x8xbf16>
    %350 = vector.extract_strided_slice %347 {offsets = [0, 0], sizes = [12, 8], strides = [1, 1]} : vector<12x32xbf16> to vector<12x8xbf16>
    %cst_129 = arith.constant dense<0.000000e+00> : vector<12x12xf32>
    %351 = tpu.matmul %348, %349, %cst_129 {dimension_numbers = #tpu.dot_dimension_numbers<[1], [1], [0], [0], [0, 0, 1, 0], [], []>} : vector<12x8xbf16>, vector<12x8xbf16>, vector<12x12xf32> -> vector<12x12xf32>
    %cst_130 = arith.constant -3.53553382E+9 : f32
    %352 = vector.shape_cast %7 : vector<1x12xi1> to vector<1x12xi1>
    %353 = vector.broadcast %352 : vector<1x12xi1> to vector<12x12xi1>
    %354 = vector.broadcast %cst_130 : f32 to vector<12x12xf32>
    %355 = arith.select %353, %354, %351 : vector<12x12xi1>, vector<12x12xf32>
    %cst_131 = arith.constant dense<0xFF800000> : vector<12xf32>
    %356 = vector.multi_reduction <maximumf>, %355, %cst_131 [1] : vector<12x12xf32> to vector<12xf32>
    %357 = vector.shape_cast %356 : vector<12xf32> to vector<12x1xf32>
    %358 = vector.broadcast %357 : vector<12x1xf32> to vector<12x12xf32>
    %359 = arith.subf %355, %358 : vector<12x12xf32>
    %360 = math.exp %359 : vector<12x12xf32>
    %cst_132 = arith.constant dense<0.000000e+00> : vector<12xf32>
    %361 = vector.multi_reduction <add>, %360, %cst_132 [1] : vector<12x12xf32> to vector<12xf32>
    %362 = vector.shape_cast %361 : vector<12xf32> to vector<12x1xf32>
    %363 = vector.broadcast %362 : vector<12x1xf32> to vector<12x12xf32>
    %364 = arith.divf %360, %363 : vector<12x12xf32>
    %365 = arith.truncf %364 : vector<12x12xf32> to vector<12x12xbf16>
    %cst_133 = arith.constant dense<0.000000e+00> : vector<12x8xf32>
    %366 = tpu.matmul %365, %350, %cst_133 {dimension_numbers = #tpu.dot_dimension_numbers<[1], [0], [0], [1], [0, 0, 1, 1], [], []>} : vector<12x12xbf16>, vector<12x8xbf16>, vector<12x8xf32> -> vector<12x8xf32>
    %c12_134 = arith.constant 12 : index
    %c0_135 = arith.constant 0 : index
    %367 = vector.load %arg9[%c12_134, %c0_135] : memref<24x32xf32, #tpu.memory_space<vmem>>, vector<12x8xf32>
    tpu.vector_store %arg9[%c12_134, %c0_135], %366 {strides = array<i32>} : memref<24x32xf32, #tpu.memory_space<vmem>>, vector<12x8xf32>,
    %368 = vector.extract_strided_slice %345 {offsets = [0, 8], sizes = [12, 8], strides = [1, 1]} : vector<12x32xbf16> to vector<12x8xbf16>
    %369 = vector.extract_strided_slice %346 {offsets = [0, 8], sizes = [12, 8], strides = [1, 1]} : vector<12x32xbf16> to vector<12x8xbf16>
    %370 = vector.extract_strided_slice %347 {offsets = [0, 8], sizes = [12, 8], strides = [1, 1]} : vector<12x32xbf16> to vector<12x8xbf16>
    %cst_136 = arith.constant dense<0.000000e+00> : vector<12x12xf32>
    %371 = tpu.matmul %368, %369, %cst_136 {dimension_numbers = #tpu.dot_dimension_numbers<[1], [1], [0], [0], [0, 0, 1, 0], [], []>} : vector<12x8xbf16>, vector<12x8xbf16>, vector<12x12xf32> -> vector<12x12xf32>
    %cst_137 = arith.constant -3.53553382E+9 : f32
    %372 = vector.shape_cast %7 : vector<1x12xi1> to vector<1x12xi1>
    %373 = vector.broadcast %372 : vector<1x12xi1> to vector<12x12xi1>
    %374 = vector.broadcast %cst_137 : f32 to vector<12x12xf32>
    %375 = arith.select %373, %374, %371 : vector<12x12xi1>, vector<12x12xf32>
    %cst_138 = arith.constant dense<0xFF800000> : vector<12xf32>
    %376 = vector.multi_reduction <maximumf>, %375, %cst_138 [1] : vector<12x12xf32> to vector<12xf32>
    %377 = vector.shape_cast %376 : vector<12xf32> to vector<12x1xf32>
    %378 = vector.broadcast %377 : vector<12x1xf32> to vector<12x12xf32>
    %379 = arith.subf %375, %378 : vector<12x12xf32>
    %380 = math.exp %379 : vector<12x12xf32>
    %cst_139 = arith.constant dense<0.000000e+00> : vector<12xf32>
    %381 = vector.multi_reduction <add>, %380, %cst_139 [1] : vector<12x12xf32> to vector<12xf32>
    %382 = vector.shape_cast %381 : vector<12xf32> to vector<12x1xf32>
    %383 = vector.broadcast %382 : vector<12x1xf32> to vector<12x12xf32>
    %384 = arith.divf %380, %383 : vector<12x12xf32>
    %385 = arith.truncf %384 : vector<12x12xf32> to vector<12x12xbf16>
    %cst_140 = arith.constant dense<0.000000e+00> : vector<12x8xf32>
    %386 = tpu.matmul %385, %370, %cst_140 {dimension_numbers = #tpu.dot_dimension_numbers<[1], [0], [0], [1], [0, 0, 1, 1], [], []>} : vector<12x12xbf16>, vector<12x8xbf16>, vector<12x8xf32> -> vector<12x8xf32>
    %c12_141 = arith.constant 12 : index
    %c8_142 = arith.constant 8 : index
    %387 = vector.load %arg9[%c12_141, %c8_142] : memref<24x32xf32, #tpu.memory_space<vmem>>, vector<12x8xf32>
    tpu.vector_store %arg9[%c12_141, %c8_142], %386 {strides = array<i32>} : memref<24x32xf32, #tpu.memory_space<vmem>>, vector<12x8xf32>,
    %388 = vector.extract_strided_slice %345 {offsets = [0, 16], sizes = [12, 8], strides = [1, 1]} : vector<12x32xbf16> to vector<12x8xbf16>
    %389 = vector.extract_strided_slice %346 {offsets = [0, 16], sizes = [12, 8], strides = [1, 1]} : vector<12x32xbf16> to vector<12x8xbf16>
    %390 = vector.extract_strided_slice %347 {offsets = [0, 16], sizes = [12, 8], strides = [1, 1]} : vector<12x32xbf16> to vector<12x8xbf16>
    %cst_143 = arith.constant dense<0.000000e+00> : vector<12x12xf32>
    %391 = tpu.matmul %388, %389, %cst_143 {dimension_numbers = #tpu.dot_dimension_numbers<[1], [1], [0], [0], [0, 0, 1, 0], [], []>} : vector<12x8xbf16>, vector<12x8xbf16>, vector<12x12xf32> -> vector<12x12xf32>
    %cst_144 = arith.constant -3.53553382E+9 : f32
    %392 = vector.shape_cast %7 : vector<1x12xi1> to vector<1x12xi1>
    %393 = vector.broadcast %392 : vector<1x12xi1> to vector<12x12xi1>
    %394 = vector.broadcast %cst_144 : f32 to vector<12x12xf32>
    %395 = arith.select %393, %394, %391 : vector<12x12xi1>, vector<12x12xf32>
    %cst_145 = arith.constant dense<0xFF800000> : vector<12xf32>
    %396 = vector.multi_reduction <maximumf>, %395, %cst_145 [1] : vector<12x12xf32> to vector<12xf32>
    %397 = vector.shape_cast %396 : vector<12xf32> to vector<12x1xf32>
    %398 = vector.broadcast %397 : vector<12x1xf32> to vector<12x12xf32>
    %399 = arith.subf %395, %398 : vector<12x12xf32>
    %400 = math.exp %399 : vector<12x12xf32>
    %cst_146 = arith.constant dense<0.000000e+00> : vector<12xf32>
    %401 = vector.multi_reduction <add>, %400, %cst_146 [1] : vector<12x12xf32> to vector<12xf32>
    %402 = vector.shape_cast %401 : vector<12xf32> to vector<12x1xf32>
    %403 = vector.broadcast %402 : vector<12x1xf32> to vector<12x12xf32>
    %404 = arith.divf %400, %403 : vector<12x12xf32>
    %405 = arith.truncf %404 : vector<12x12xf32> to vector<12x12xbf16>
    %cst_147 = arith.constant dense<0.000000e+00> : vector<12x8xf32>
    %406 = tpu.matmul %405, %390, %cst_147 {dimension_numbers = #tpu.dot_dimension_numbers<[1], [0], [0], [1], [0, 0, 1, 1], [], []>} : vector<12x12xbf16>, vector<12x8xbf16>, vector<12x8xf32> -> vector<12x8xf32>
    %c12_148 = arith.constant 12 : index
    %c16_149 = arith.constant 16 : index
    %407 = vector.load %arg9[%c12_148, %c16_149] : memref<24x32xf32, #tpu.memory_space<vmem>>, vector<12x8xf32>
    tpu.vector_store %arg9[%c12_148, %c16_149], %406 {strides = array<i32>} : memref<24x32xf32, #tpu.memory_space<vmem>>, vector<12x8xf32>,
    %408 = vector.extract_strided_slice %345 {offsets = [0, 24], sizes = [12, 8], strides = [1, 1]} : vector<12x32xbf16> to vector<12x8xbf16>
    %409 = vector.extract_strided_slice %346 {offsets = [0, 24], sizes = [12, 8], strides = [1, 1]} : vector<12x32xbf16> to vector<12x8xbf16>
    %410 = vector.extract_strided_slice %347 {offsets = [0, 24], sizes = [12, 8], strides = [1, 1]} : vector<12x32xbf16> to vector<12x8xbf16>
    %cst_150 = arith.constant dense<0.000000e+00> : vector<12x12xf32>
    %411 = tpu.matmul %408, %409, %cst_150 {dimension_numbers = #tpu.dot_dimension_numbers<[1], [1], [0], [0], [0, 0, 1, 0], [], []>} : vector<12x8xbf16>, vector<12x8xbf16>, vector<12x12xf32> -> vector<12x12xf32>
    %cst_151 = arith.constant -3.53553382E+9 : f32
    %412 = vector.shape_cast %7 : vector<1x12xi1> to vector<1x12xi1>
    %413 = vector.broadcast %412 : vector<1x12xi1> to vector<12x12xi1>
    %414 = vector.broadcast %cst_151 : f32 to vector<12x12xf32>
    %415 = arith.select %413, %414, %411 : vector<12x12xi1>, vector<12x12xf32>
    %cst_152 = arith.constant dense<0xFF800000> : vector<12xf32>
    %416 = vector.multi_reduction <maximumf>, %415, %cst_152 [1] : vector<12x12xf32> to vector<12xf32>
    %417 = vector.shape_cast %416 : vector<12xf32> to vector<12x1xf32>
    %418 = vector.broadcast %417 : vector<12x1xf32> to vector<12x12xf32>
    %419 = arith.subf %415, %418 : vector<12x12xf32>
    %420 = math.exp %419 : vector<12x12xf32>
    %cst_153 = arith.constant dense<0.000000e+00> : vector<12xf32>
    %421 = vector.multi_reduction <add>, %420, %cst_153 [1] : vector<12x12xf32> to vector<12xf32>
    %422 = vector.shape_cast %421 : vector<12xf32> to vector<12x1xf32>
    %423 = vector.broadcast %422 : vector<12x1xf32> to vector<12x12xf32>
    %424 = arith.divf %420, %423 : vector<12x12xf32>
    %425 = arith.truncf %424 : vector<12x12xf32> to vector<12x12xbf16>
    %cst_154 = arith.constant dense<0.000000e+00> : vector<12x8xf32>
    %426 = tpu.matmul %425, %410, %cst_154 {dimension_numbers = #tpu.dot_dimension_numbers<[1], [0], [0], [1], [0, 0, 1, 1], [], []>} : vector<12x12xbf16>, vector<12x8xbf16>, vector<12x8xf32> -> vector<12x8xf32>
    %c12_155 = arith.constant 12 : index
    %c24_156 = arith.constant 24 : index
    %427 = vector.load %arg9[%c12_155, %c24_156] : memref<24x32xf32, #tpu.memory_space<vmem>>, vector<12x8xf32>
    tpu.vector_store %arg9[%c12_155, %c24_156], %426 {strides = array<i32>} : memref<24x32xf32, #tpu.memory_space<vmem>>, vector<12x8xf32>,
    %c0_157 = arith.constant 0 : index
    %c0_158 = arith.constant 0 : index
    %428 = vector.load %arg9[%c0_157, %c0_158] : memref<24x32xf32, #tpu.memory_space<vmem>>, vector<24x32xf32>
    %429 = arith.addf %245, %428 : vector<24x32xf32>
    %430 = vector.shape_cast %429 : vector<24x32xf32> to vector<1x24x32xf32>
    %cst_159 = arith.constant dense<0.000000e+00> : vector<1xf32>
    %431 = vector.multi_reduction <add>, %430, %cst_159 [1, 2] : vector<1x24x32xf32> to vector<1xf32>
    %432 = vector.shape_cast %431 : vector<1xf32> to vector<1x1x1xf32>
    %433 = vector.extract %432[0, 0, 0] : f32 from vector<1x1x1xf32>
    %cst_160 = arith.constant 7.680000e+02 : f32
    %434 = arith.divf %433, %cst_160 : f32
    %435 = vector.broadcast %434 : f32 to vector<24x32xf32>
    %436 = arith.subf %429, %435 : vector<24x32xf32>
    %437 = arith.mulf %436, %436 : vector<24x32xf32>
    %438 = vector.shape_cast %437 : vector<24x32xf32> to vector<1x24x32xf32>
    %cst_161 = arith.constant dense<0.000000e+00> : vector<1xf32>
    %439 = vector.multi_reduction <add>, %438, %cst_161 [1, 2] : vector<1x24x32xf32> to vector<1xf32>
    %440 = vector.shape_cast %439 : vector<1xf32> to vector<1x1x1xf32>
    %441 = vector.extract %440[0, 0, 0] : f32 from vector<1x1x1xf32>
    %cst_162 = arith.constant 7.680000e+02 : f32
    %442 = arith.divf %441, %cst_162 : f32
    %cst_163 = arith.constant 9.99999974E-6 : f32
    %443 = arith.addf %442, %cst_163 : f32
    %444 = math.rsqrt %443 : f32
    %445 = vector.broadcast %444 : f32 to vector<24x32xf32>
    %446 = arith.mulf %436, %445 : vector<24x32xf32>
    %c1_164 = arith.constant 1 : index
    %c0_165 = arith.constant 0 : index
    %c0_166 = arith.constant 0 : index
    %447 = vector.load %arg4[%c1_164, %c0_165, %c0_166] : memref<2x32x128xbf16, #tpu.memory_space<vmem>>, vector<1x32x128xbf16>
    %448 = vector.shape_cast %447 : vector<1x32x128xbf16> to vector<32x128xbf16>
    %c1_167 = arith.constant 1 : index
    %c0_168 = arith.constant 0 : index
    %c0_169 = arith.constant 0 : index
    %449 = vector.load %arg5[%c1_167, %c0_168, %c0_169] : memref<2x1x128xf32, #tpu.memory_space<vmem>>, vector<1x1x128xf32>
    %450 = vector.shape_cast %449 : vector<1x1x128xf32> to vector<1x128xf32>
    %c1_170 = arith.constant 1 : index
    %c0_171 = arith.constant 0 : index
    %c0_172 = arith.constant 0 : index
    %451 = vector.load %arg6[%c1_170, %c0_171, %c0_172] : memref<2x128x32xbf16, #tpu.memory_space<vmem>>, vector<1x128x32xbf16>
    %452 = vector.shape_cast %451 : vector<1x128x32xbf16> to vector<128x32xbf16>
    %c1_173 = arith.constant 1 : index
    %c0_174 = arith.constant 0 : index
    %c0_175 = arith.constant 0 : index
    %453 = vector.load %arg7[%c1_173, %c0_174, %c0_175] : memref<2x1x32xf32, #tpu.memory_space<vmem>>, vector<1x1x32xf32>
    %454 = vector.shape_cast %453 : vector<1x1x32xf32> to vector<1x32xf32>
    %455 = arith.truncf %446 : vector<24x32xf32> to vector<24x32xbf16>
    %cst_176 = arith.constant dense<0.000000e+00> : vector<24x128xf32>
    %456 = tpu.matmul %455, %448, %cst_176 {dimension_numbers = #tpu.dot_dimension_numbers<[1], [0], [0], [1], [0, 0, 1, 1], [], []>} : vector<24x32xbf16>, vector<32x128xbf16>, vector<24x128xf32> -> vector<24x128xf32>
    %457 = vector.broadcast %450 : vector<1x128xf32> to vector<24x128xf32>
    %458 = arith.addf %456, %457 : vector<24x128xf32>
    %cst_177 = arith.constant 0.000000e+00 : f32
    %459 = vector.broadcast %cst_177 : f32 to vector<24x128xf32>
    %460 = arith.maximumf %458, %459 : vector<24x128xf32>
    %461 = arith.truncf %460 : vector<24x128xf32> to vector<24x128xbf16>
    %cst_178 = arith.constant dense<0.000000e+00> : vector<24x32xf32>
    %462 = tpu.matmul %461, %452, %cst_178 {dimension_numbers = #tpu.dot_dimension_numbers<[1], [0], [0], [1], [0, 0, 1, 1], [], []>} : vector<24x128xbf16>, vector<128x32xbf16>, vector<24x32xf32> -> vector<24x32xf32>
    %463 = vector.broadcast %454 : vector<1x32xf32> to vector<24x32xf32>
    %464 = arith.addf %462, %463 : vector<24x32xf32>
    %465 = arith.addf %446, %464 : vector<24x32xf32>
    %466 = vector.shape_cast %465 : vector<24x32xf32> to vector<1x24x32xf32>
    %cst_179 = arith.constant dense<0.000000e+00> : vector<1xf32>
    %467 = vector.multi_reduction <add>, %466, %cst_179 [1, 2] : vector<1x24x32xf32> to vector<1xf32>
    %468 = vector.shape_cast %467 : vector<1xf32> to vector<1x1x1xf32>
    %469 = vector.extract %468[0, 0, 0] : f32 from vector<1x1x1xf32>
    %cst_180 = arith.constant 7.680000e+02 : f32
    %470 = arith.divf %469, %cst_180 : f32
    %471 = vector.broadcast %470 : f32 to vector<24x32xf32>
    %472 = arith.subf %465, %471 : vector<24x32xf32>
    %473 = arith.mulf %472, %472 : vector<24x32xf32>
    %474 = vector.shape_cast %473 : vector<24x32xf32> to vector<1x24x32xf32>
    %cst_181 = arith.constant dense<0.000000e+00> : vector<1xf32>
    %475 = vector.multi_reduction <add>, %474, %cst_181 [1, 2] : vector<1x24x32xf32> to vector<1xf32>
    %476 = vector.shape_cast %475 : vector<1xf32> to vector<1x1x1xf32>
    %477 = vector.extract %476[0, 0, 0] : f32 from vector<1x1x1xf32>
    %cst_182 = arith.constant 7.680000e+02 : f32
    %478 = arith.divf %477, %cst_182 : f32
    %cst_183 = arith.constant 9.99999974E-6 : f32
    %479 = arith.addf %478, %cst_183 : f32
    %480 = math.rsqrt %479 : f32
    %481 = vector.broadcast %480 : f32 to vector<24x32xf32>
    %482 = arith.mulf %472, %481 : vector<24x32xf32>
    %483 = arith.truncf %482 : vector<24x32xf32> to vector<24x32xbf16>
    %c0_184 = arith.constant 0 : index
    %c0_185 = arith.constant 0 : index
    %484 = vector.load %arg8[%c0_184, %c0_185] : memref<24x32xbf16, #tpu.memory_space<vmem>>, vector<24x32xbf16>
    tpu.vector_store %arg8[%c0_184, %c0_185], %483 {strides = array<i32>} : memref<24x32xbf16, #tpu.memory_space<vmem>>, vector<24x32xbf16>,
    return
  }
}

module attributes {stable_mosaic.version = 11 : i64} {
  func.func @_decoder_kernel(%arg0: memref<16x32xf32, #tpu.memory_space<vmem>>, %arg1: memref<24x32xbf16, #tpu.memory_space<vmem>>, %arg2: memref<2x32x96xbf16, #tpu.memory_space<vmem>>, %arg3: memref<2x1x96xf32, #tpu.memory_space<vmem>>, %arg4: memref<2x32x32xbf16, #tpu.memory_space<vmem>>, %arg5: memref<2x1x32xf32, #tpu.memory_space<vmem>>, %arg6: memref<2x32x64xbf16, #tpu.memory_space<vmem>>, %arg7: memref<2x1x64xf32, #tpu.memory_space<vmem>>, %arg8: memref<2x32x128xbf16, #tpu.memory_space<vmem>>, %arg9: memref<2x1x128xf32, #tpu.memory_space<vmem>>, %arg10: memref<2x128x32xbf16, #tpu.memory_space<vmem>>, %arg11: memref<2x1x32xf32, #tpu.memory_space<vmem>>, %arg12: memref<32x128xbf16, #tpu.memory_space<vmem>>, %arg13: memref<1x128xf32, #tpu.memory_space<vmem>>, %arg14: memref<16x128xf32, #tpu.memory_space<vmem>>, %arg15: memref<16x32xf32, #tpu.memory_space<vmem>>) attributes {dimension_semantics = [], scalar_prefetch = 0 : i64, scratch_operands = 1 : i64, tpu.core_type = #tpu.core_type<tc>} {
    %0 = tpu.iota {dimensions = array<i32: 0>} : vector<8x8xi32>
    %1 = tpu.iota {dimensions = array<i32: 1>} : vector<8x8xi32>
    %2 = arith.cmpi sgt, %1, %0 : vector<8x8xi32>
    %c0 = arith.constant 0 : index
    %c0_0 = arith.constant 0 : index
    %3 = vector.load %arg0[%c0, %c0_0] : memref<16x32xf32, #tpu.memory_space<vmem>>, vector<16x32xf32>
    %c0_1 = arith.constant 0 : index
    %c0_2 = arith.constant 0 : index
    %4 = vector.load %arg1[%c0_1, %c0_2] : memref<24x32xbf16, #tpu.memory_space<vmem>>, vector<24x32xbf16>
    %5 = arith.truncf %3 : vector<16x32xf32> to vector<16x32xbf16>
    %c0_3 = arith.constant 0 : index
    %c0_4 = arith.constant 0 : index
    %c0_5 = arith.constant 0 : index
    %6 = vector.load %arg2[%c0_3, %c0_4, %c0_5] : memref<2x32x96xbf16, #tpu.memory_space<vmem>>, vector<1x32x96xbf16>
    %7 = vector.shape_cast %6 : vector<1x32x96xbf16> to vector<32x96xbf16>
    %cst = arith.constant dense<0.000000e+00> : vector<16x96xf32>
    %8 = tpu.matmul %5, %7, %cst {dimension_numbers = #tpu.dot_dimension_numbers<[1], [0], [0], [1], [0, 0, 1, 1], [], []>} : vector<16x32xbf16>, vector<32x96xbf16>, vector<16x96xf32> -> vector<16x96xf32>
    %c0_6 = arith.constant 0 : index
    %c0_7 = arith.constant 0 : index
    %c0_8 = arith.constant 0 : index
    %9 = vector.load %arg3[%c0_6, %c0_7, %c0_8] : memref<2x1x96xf32, #tpu.memory_space<vmem>>, vector<1x1x96xf32>
    %10 = vector.shape_cast %9 : vector<1x1x96xf32> to vector<1x96xf32>
    %11 = vector.broadcast %10 : vector<1x96xf32> to vector<16x96xf32>
    %12 = arith.addf %8, %11 : vector<16x96xf32>
    %13 = vector.extract_strided_slice %12 {offsets = [0, 0], sizes = [16, 32], strides = [1, 1]} : vector<16x96xf32> to vector<16x32xf32>
    %cst_9 = arith.constant 0.353553385 : f32
    %14 = vector.broadcast %cst_9 : f32 to vector<16x32xf32>
    %15 = arith.mulf %13, %14 : vector<16x32xf32>
    %16 = arith.truncf %15 : vector<16x32xf32> to vector<16x32xbf16>
    %17 = vector.extract_strided_slice %12 {offsets = [0, 32], sizes = [16, 32], strides = [1, 1]} : vector<16x96xf32> to vector<16x32xf32>
    %18 = arith.truncf %17 : vector<16x32xf32> to vector<16x32xbf16>
    %19 = vector.extract_strided_slice %12 {offsets = [0, 64], sizes = [16, 32], strides = [1, 1]} : vector<16x96xf32> to vector<16x32xf32>
    %20 = arith.truncf %19 : vector<16x32xf32> to vector<16x32xbf16>
    %21 = vector.extract_strided_slice %16 {offsets = [0, 0], sizes = [8, 32], strides = [1, 1]} : vector<16x32xbf16> to vector<8x32xbf16>
    %22 = vector.extract_strided_slice %18 {offsets = [0, 0], sizes = [8, 32], strides = [1, 1]} : vector<16x32xbf16> to vector<8x32xbf16>
    %23 = vector.extract_strided_slice %20 {offsets = [0, 0], sizes = [8, 32], strides = [1, 1]} : vector<16x32xbf16> to vector<8x32xbf16>
    %24 = vector.extract_strided_slice %21 {offsets = [0, 0], sizes = [8, 8], strides = [1, 1]} : vector<8x32xbf16> to vector<8x8xbf16>
    %25 = vector.extract_strided_slice %22 {offsets = [0, 0], sizes = [8, 8], strides = [1, 1]} : vector<8x32xbf16> to vector<8x8xbf16>
    %26 = vector.extract_strided_slice %23 {offsets = [0, 0], sizes = [8, 8], strides = [1, 1]} : vector<8x32xbf16> to vector<8x8xbf16>
    %cst_10 = arith.constant dense<0.000000e+00> : vector<8x8xf32>
    %27 = tpu.matmul %24, %25, %cst_10 {dimension_numbers = #tpu.dot_dimension_numbers<[1], [1], [0], [0], [0, 0, 1, 0], [], []>} : vector<8x8xbf16>, vector<8x8xbf16>, vector<8x8xf32> -> vector<8x8xf32>
    %cst_11 = arith.constant -3.53553382E+9 : f32
    %28 = vector.broadcast %cst_11 : f32 to vector<8x8xf32>
    %29 = arith.select %2, %28, %27 : vector<8x8xi1>, vector<8x8xf32>
    %cst_12 = arith.constant dense<0xFF800000> : vector<8xf32>
    %30 = vector.multi_reduction <maximumf>, %29, %cst_12 [1] : vector<8x8xf32> to vector<8xf32>
    %31 = vector.shape_cast %30 : vector<8xf32> to vector<8x1xf32>
    %32 = vector.broadcast %31 : vector<8x1xf32> to vector<8x8xf32>
    %33 = arith.subf %29, %32 : vector<8x8xf32>
    %34 = math.exp %33 : vector<8x8xf32>
    %cst_13 = arith.constant dense<0.000000e+00> : vector<8xf32>
    %35 = vector.multi_reduction <add>, %34, %cst_13 [1] : vector<8x8xf32> to vector<8xf32>
    %36 = vector.shape_cast %35 : vector<8xf32> to vector<8x1xf32>
    %37 = vector.broadcast %36 : vector<8x1xf32> to vector<8x8xf32>
    %38 = arith.divf %34, %37 : vector<8x8xf32>
    %39 = arith.truncf %38 : vector<8x8xf32> to vector<8x8xbf16>
    %cst_14 = arith.constant dense<0.000000e+00> : vector<8x8xf32>
    %40 = tpu.matmul %39, %26, %cst_14 {dimension_numbers = #tpu.dot_dimension_numbers<[1], [0], [0], [1], [0, 0, 1, 1], [], []>} : vector<8x8xbf16>, vector<8x8xbf16>, vector<8x8xf32> -> vector<8x8xf32>
    %c0_15 = arith.constant 0 : index
    %c0_16 = arith.constant 0 : index
    %41 = vector.load %arg15[%c0_15, %c0_16] : memref<16x32xf32, #tpu.memory_space<vmem>>, vector<8x8xf32>
    tpu.vector_store %arg15[%c0_15, %c0_16], %40 {strides = array<i32>} : memref<16x32xf32, #tpu.memory_space<vmem>>, vector<8x8xf32>,
    %42 = vector.extract_strided_slice %21 {offsets = [0, 8], sizes = [8, 8], strides = [1, 1]} : vector<8x32xbf16> to vector<8x8xbf16>
    %43 = vector.extract_strided_slice %22 {offsets = [0, 8], sizes = [8, 8], strides = [1, 1]} : vector<8x32xbf16> to vector<8x8xbf16>
    %44 = vector.extract_strided_slice %23 {offsets = [0, 8], sizes = [8, 8], strides = [1, 1]} : vector<8x32xbf16> to vector<8x8xbf16>
    %cst_17 = arith.constant dense<0.000000e+00> : vector<8x8xf32>
    %45 = tpu.matmul %42, %43, %cst_17 {dimension_numbers = #tpu.dot_dimension_numbers<[1], [1], [0], [0], [0, 0, 1, 0], [], []>} : vector<8x8xbf16>, vector<8x8xbf16>, vector<8x8xf32> -> vector<8x8xf32>
    %cst_18 = arith.constant -3.53553382E+9 : f32
    %46 = vector.broadcast %cst_18 : f32 to vector<8x8xf32>
    %47 = arith.select %2, %46, %45 : vector<8x8xi1>, vector<8x8xf32>
    %cst_19 = arith.constant dense<0xFF800000> : vector<8xf32>
    %48 = vector.multi_reduction <maximumf>, %47, %cst_19 [1] : vector<8x8xf32> to vector<8xf32>
    %49 = vector.shape_cast %48 : vector<8xf32> to vector<8x1xf32>
    %50 = vector.broadcast %49 : vector<8x1xf32> to vector<8x8xf32>
    %51 = arith.subf %47, %50 : vector<8x8xf32>
    %52 = math.exp %51 : vector<8x8xf32>
    %cst_20 = arith.constant dense<0.000000e+00> : vector<8xf32>
    %53 = vector.multi_reduction <add>, %52, %cst_20 [1] : vector<8x8xf32> to vector<8xf32>
    %54 = vector.shape_cast %53 : vector<8xf32> to vector<8x1xf32>
    %55 = vector.broadcast %54 : vector<8x1xf32> to vector<8x8xf32>
    %56 = arith.divf %52, %55 : vector<8x8xf32>
    %57 = arith.truncf %56 : vector<8x8xf32> to vector<8x8xbf16>
    %cst_21 = arith.constant dense<0.000000e+00> : vector<8x8xf32>
    %58 = tpu.matmul %57, %44, %cst_21 {dimension_numbers = #tpu.dot_dimension_numbers<[1], [0], [0], [1], [0, 0, 1, 1], [], []>} : vector<8x8xbf16>, vector<8x8xbf16>, vector<8x8xf32> -> vector<8x8xf32>
    %c0_22 = arith.constant 0 : index
    %c8 = arith.constant 8 : index
    %59 = vector.load %arg15[%c0_22, %c8] : memref<16x32xf32, #tpu.memory_space<vmem>>, vector<8x8xf32>
    tpu.vector_store %arg15[%c0_22, %c8], %58 {strides = array<i32>} : memref<16x32xf32, #tpu.memory_space<vmem>>, vector<8x8xf32>,
    %60 = vector.extract_strided_slice %21 {offsets = [0, 16], sizes = [8, 8], strides = [1, 1]} : vector<8x32xbf16> to vector<8x8xbf16>
    %61 = vector.extract_strided_slice %22 {offsets = [0, 16], sizes = [8, 8], strides = [1, 1]} : vector<8x32xbf16> to vector<8x8xbf16>
    %62 = vector.extract_strided_slice %23 {offsets = [0, 16], sizes = [8, 8], strides = [1, 1]} : vector<8x32xbf16> to vector<8x8xbf16>
    %cst_23 = arith.constant dense<0.000000e+00> : vector<8x8xf32>
    %63 = tpu.matmul %60, %61, %cst_23 {dimension_numbers = #tpu.dot_dimension_numbers<[1], [1], [0], [0], [0, 0, 1, 0], [], []>} : vector<8x8xbf16>, vector<8x8xbf16>, vector<8x8xf32> -> vector<8x8xf32>
    %cst_24 = arith.constant -3.53553382E+9 : f32
    %64 = vector.broadcast %cst_24 : f32 to vector<8x8xf32>
    %65 = arith.select %2, %64, %63 : vector<8x8xi1>, vector<8x8xf32>
    %cst_25 = arith.constant dense<0xFF800000> : vector<8xf32>
    %66 = vector.multi_reduction <maximumf>, %65, %cst_25 [1] : vector<8x8xf32> to vector<8xf32>
    %67 = vector.shape_cast %66 : vector<8xf32> to vector<8x1xf32>
    %68 = vector.broadcast %67 : vector<8x1xf32> to vector<8x8xf32>
    %69 = arith.subf %65, %68 : vector<8x8xf32>
    %70 = math.exp %69 : vector<8x8xf32>
    %cst_26 = arith.constant dense<0.000000e+00> : vector<8xf32>
    %71 = vector.multi_reduction <add>, %70, %cst_26 [1] : vector<8x8xf32> to vector<8xf32>
    %72 = vector.shape_cast %71 : vector<8xf32> to vector<8x1xf32>
    %73 = vector.broadcast %72 : vector<8x1xf32> to vector<8x8xf32>
    %74 = arith.divf %70, %73 : vector<8x8xf32>
    %75 = arith.truncf %74 : vector<8x8xf32> to vector<8x8xbf16>
    %cst_27 = arith.constant dense<0.000000e+00> : vector<8x8xf32>
    %76 = tpu.matmul %75, %62, %cst_27 {dimension_numbers = #tpu.dot_dimension_numbers<[1], [0], [0], [1], [0, 0, 1, 1], [], []>} : vector<8x8xbf16>, vector<8x8xbf16>, vector<8x8xf32> -> vector<8x8xf32>
    %c0_28 = arith.constant 0 : index
    %c16 = arith.constant 16 : index
    %77 = vector.load %arg15[%c0_28, %c16] : memref<16x32xf32, #tpu.memory_space<vmem>>, vector<8x8xf32>
    tpu.vector_store %arg15[%c0_28, %c16], %76 {strides = array<i32>} : memref<16x32xf32, #tpu.memory_space<vmem>>, vector<8x8xf32>,
    %78 = vector.extract_strided_slice %21 {offsets = [0, 24], sizes = [8, 8], strides = [1, 1]} : vector<8x32xbf16> to vector<8x8xbf16>
    %79 = vector.extract_strided_slice %22 {offsets = [0, 24], sizes = [8, 8], strides = [1, 1]} : vector<8x32xbf16> to vector<8x8xbf16>
    %80 = vector.extract_strided_slice %23 {offsets = [0, 24], sizes = [8, 8], strides = [1, 1]} : vector<8x32xbf16> to vector<8x8xbf16>
    %cst_29 = arith.constant dense<0.000000e+00> : vector<8x8xf32>
    %81 = tpu.matmul %78, %79, %cst_29 {dimension_numbers = #tpu.dot_dimension_numbers<[1], [1], [0], [0], [0, 0, 1, 0], [], []>} : vector<8x8xbf16>, vector<8x8xbf16>, vector<8x8xf32> -> vector<8x8xf32>
    %cst_30 = arith.constant -3.53553382E+9 : f32
    %82 = vector.broadcast %cst_30 : f32 to vector<8x8xf32>
    %83 = arith.select %2, %82, %81 : vector<8x8xi1>, vector<8x8xf32>
    %cst_31 = arith.constant dense<0xFF800000> : vector<8xf32>
    %84 = vector.multi_reduction <maximumf>, %83, %cst_31 [1] : vector<8x8xf32> to vector<8xf32>
    %85 = vector.shape_cast %84 : vector<8xf32> to vector<8x1xf32>
    %86 = vector.broadcast %85 : vector<8x1xf32> to vector<8x8xf32>
    %87 = arith.subf %83, %86 : vector<8x8xf32>
    %88 = math.exp %87 : vector<8x8xf32>
    %cst_32 = arith.constant dense<0.000000e+00> : vector<8xf32>
    %89 = vector.multi_reduction <add>, %88, %cst_32 [1] : vector<8x8xf32> to vector<8xf32>
    %90 = vector.shape_cast %89 : vector<8xf32> to vector<8x1xf32>
    %91 = vector.broadcast %90 : vector<8x1xf32> to vector<8x8xf32>
    %92 = arith.divf %88, %91 : vector<8x8xf32>
    %93 = arith.truncf %92 : vector<8x8xf32> to vector<8x8xbf16>
    %cst_33 = arith.constant dense<0.000000e+00> : vector<8x8xf32>
    %94 = tpu.matmul %93, %80, %cst_33 {dimension_numbers = #tpu.dot_dimension_numbers<[1], [0], [0], [1], [0, 0, 1, 1], [], []>} : vector<8x8xbf16>, vector<8x8xbf16>, vector<8x8xf32> -> vector<8x8xf32>
    %c0_34 = arith.constant 0 : index
    %c24 = arith.constant 24 : index
    %95 = vector.load %arg15[%c0_34, %c24] : memref<16x32xf32, #tpu.memory_space<vmem>>, vector<8x8xf32>
    tpu.vector_store %arg15[%c0_34, %c24], %94 {strides = array<i32>} : memref<16x32xf32, #tpu.memory_space<vmem>>, vector<8x8xf32>,
    %96 = vector.extract_strided_slice %16 {offsets = [8, 0], sizes = [8, 32], strides = [1, 1]} : vector<16x32xbf16> to vector<8x32xbf16>
    %97 = vector.extract_strided_slice %18 {offsets = [8, 0], sizes = [8, 32], strides = [1, 1]} : vector<16x32xbf16> to vector<8x32xbf16>
    %98 = vector.extract_strided_slice %20 {offsets = [8, 0], sizes = [8, 32], strides = [1, 1]} : vector<16x32xbf16> to vector<8x32xbf16>
    %99 = vector.extract_strided_slice %96 {offsets = [0, 0], sizes = [8, 8], strides = [1, 1]} : vector<8x32xbf16> to vector<8x8xbf16>
    %100 = vector.extract_strided_slice %97 {offsets = [0, 0], sizes = [8, 8], strides = [1, 1]} : vector<8x32xbf16> to vector<8x8xbf16>
    %101 = vector.extract_strided_slice %98 {offsets = [0, 0], sizes = [8, 8], strides = [1, 1]} : vector<8x32xbf16> to vector<8x8xbf16>
    %cst_35 = arith.constant dense<0.000000e+00> : vector<8x8xf32>
    %102 = tpu.matmul %99, %100, %cst_35 {dimension_numbers = #tpu.dot_dimension_numbers<[1], [1], [0], [0], [0, 0, 1, 0], [], []>} : vector<8x8xbf16>, vector<8x8xbf16>, vector<8x8xf32> -> vector<8x8xf32>
    %cst_36 = arith.constant -3.53553382E+9 : f32
    %103 = vector.broadcast %cst_36 : f32 to vector<8x8xf32>
    %104 = arith.select %2, %103, %102 : vector<8x8xi1>, vector<8x8xf32>
    %cst_37 = arith.constant dense<0xFF800000> : vector<8xf32>
    %105 = vector.multi_reduction <maximumf>, %104, %cst_37 [1] : vector<8x8xf32> to vector<8xf32>
    %106 = vector.shape_cast %105 : vector<8xf32> to vector<8x1xf32>
    %107 = vector.broadcast %106 : vector<8x1xf32> to vector<8x8xf32>
    %108 = arith.subf %104, %107 : vector<8x8xf32>
    %109 = math.exp %108 : vector<8x8xf32>
    %cst_38 = arith.constant dense<0.000000e+00> : vector<8xf32>
    %110 = vector.multi_reduction <add>, %109, %cst_38 [1] : vector<8x8xf32> to vector<8xf32>
    %111 = vector.shape_cast %110 : vector<8xf32> to vector<8x1xf32>
    %112 = vector.broadcast %111 : vector<8x1xf32> to vector<8x8xf32>
    %113 = arith.divf %109, %112 : vector<8x8xf32>
    %114 = arith.truncf %113 : vector<8x8xf32> to vector<8x8xbf16>
    %cst_39 = arith.constant dense<0.000000e+00> : vector<8x8xf32>
    %115 = tpu.matmul %114, %101, %cst_39 {dimension_numbers = #tpu.dot_dimension_numbers<[1], [0], [0], [1], [0, 0, 1, 1], [], []>} : vector<8x8xbf16>, vector<8x8xbf16>, vector<8x8xf32> -> vector<8x8xf32>
    %c8_40 = arith.constant 8 : index
    %c0_41 = arith.constant 0 : index
    %116 = vector.load %arg15[%c8_40, %c0_41] : memref<16x32xf32, #tpu.memory_space<vmem>>, vector<8x8xf32>
    tpu.vector_store %arg15[%c8_40, %c0_41], %115 {strides = array<i32>} : memref<16x32xf32, #tpu.memory_space<vmem>>, vector<8x8xf32>,
    %117 = vector.extract_strided_slice %96 {offsets = [0, 8], sizes = [8, 8], strides = [1, 1]} : vector<8x32xbf16> to vector<8x8xbf16>
    %118 = vector.extract_strided_slice %97 {offsets = [0, 8], sizes = [8, 8], strides = [1, 1]} : vector<8x32xbf16> to vector<8x8xbf16>
    %119 = vector.extract_strided_slice %98 {offsets = [0, 8], sizes = [8, 8], strides = [1, 1]} : vector<8x32xbf16> to vector<8x8xbf16>
    %cst_42 = arith.constant dense<0.000000e+00> : vector<8x8xf32>
    %120 = tpu.matmul %117, %118, %cst_42 {dimension_numbers = #tpu.dot_dimension_numbers<[1], [1], [0], [0], [0, 0, 1, 0], [], []>} : vector<8x8xbf16>, vector<8x8xbf16>, vector<8x8xf32> -> vector<8x8xf32>
    %cst_43 = arith.constant -3.53553382E+9 : f32
    %121 = vector.broadcast %cst_43 : f32 to vector<8x8xf32>
    %122 = arith.select %2, %121, %120 : vector<8x8xi1>, vector<8x8xf32>
    %cst_44 = arith.constant dense<0xFF800000> : vector<8xf32>
    %123 = vector.multi_reduction <maximumf>, %122, %cst_44 [1] : vector<8x8xf32> to vector<8xf32>
    %124 = vector.shape_cast %123 : vector<8xf32> to vector<8x1xf32>
    %125 = vector.broadcast %124 : vector<8x1xf32> to vector<8x8xf32>
    %126 = arith.subf %122, %125 : vector<8x8xf32>
    %127 = math.exp %126 : vector<8x8xf32>
    %cst_45 = arith.constant dense<0.000000e+00> : vector<8xf32>
    %128 = vector.multi_reduction <add>, %127, %cst_45 [1] : vector<8x8xf32> to vector<8xf32>
    %129 = vector.shape_cast %128 : vector<8xf32> to vector<8x1xf32>
    %130 = vector.broadcast %129 : vector<8x1xf32> to vector<8x8xf32>
    %131 = arith.divf %127, %130 : vector<8x8xf32>
    %132 = arith.truncf %131 : vector<8x8xf32> to vector<8x8xbf16>
    %cst_46 = arith.constant dense<0.000000e+00> : vector<8x8xf32>
    %133 = tpu.matmul %132, %119, %cst_46 {dimension_numbers = #tpu.dot_dimension_numbers<[1], [0], [0], [1], [0, 0, 1, 1], [], []>} : vector<8x8xbf16>, vector<8x8xbf16>, vector<8x8xf32> -> vector<8x8xf32>
    %c8_47 = arith.constant 8 : index
    %c8_48 = arith.constant 8 : index
    %134 = vector.load %arg15[%c8_47, %c8_48] : memref<16x32xf32, #tpu.memory_space<vmem>>, vector<8x8xf32>
    tpu.vector_store %arg15[%c8_47, %c8_48], %133 {strides = array<i32>} : memref<16x32xf32, #tpu.memory_space<vmem>>, vector<8x8xf32>,
    %135 = vector.extract_strided_slice %96 {offsets = [0, 16], sizes = [8, 8], strides = [1, 1]} : vector<8x32xbf16> to vector<8x8xbf16>
    %136 = vector.extract_strided_slice %97 {offsets = [0, 16], sizes = [8, 8], strides = [1, 1]} : vector<8x32xbf16> to vector<8x8xbf16>
    %137 = vector.extract_strided_slice %98 {offsets = [0, 16], sizes = [8, 8], strides = [1, 1]} : vector<8x32xbf16> to vector<8x8xbf16>
    %cst_49 = arith.constant dense<0.000000e+00> : vector<8x8xf32>
    %138 = tpu.matmul %135, %136, %cst_49 {dimension_numbers = #tpu.dot_dimension_numbers<[1], [1], [0], [0], [0, 0, 1, 0], [], []>} : vector<8x8xbf16>, vector<8x8xbf16>, vector<8x8xf32> -> vector<8x8xf32>
    %cst_50 = arith.constant -3.53553382E+9 : f32
    %139 = vector.broadcast %cst_50 : f32 to vector<8x8xf32>
    %140 = arith.select %2, %139, %138 : vector<8x8xi1>, vector<8x8xf32>
    %cst_51 = arith.constant dense<0xFF800000> : vector<8xf32>
    %141 = vector.multi_reduction <maximumf>, %140, %cst_51 [1] : vector<8x8xf32> to vector<8xf32>
    %142 = vector.shape_cast %141 : vector<8xf32> to vector<8x1xf32>
    %143 = vector.broadcast %142 : vector<8x1xf32> to vector<8x8xf32>
    %144 = arith.subf %140, %143 : vector<8x8xf32>
    %145 = math.exp %144 : vector<8x8xf32>
    %cst_52 = arith.constant dense<0.000000e+00> : vector<8xf32>
    %146 = vector.multi_reduction <add>, %145, %cst_52 [1] : vector<8x8xf32> to vector<8xf32>
    %147 = vector.shape_cast %146 : vector<8xf32> to vector<8x1xf32>
    %148 = vector.broadcast %147 : vector<8x1xf32> to vector<8x8xf32>
    %149 = arith.divf %145, %148 : vector<8x8xf32>
    %150 = arith.truncf %149 : vector<8x8xf32> to vector<8x8xbf16>
    %cst_53 = arith.constant dense<0.000000e+00> : vector<8x8xf32>
    %151 = tpu.matmul %150, %137, %cst_53 {dimension_numbers = #tpu.dot_dimension_numbers<[1], [0], [0], [1], [0, 0, 1, 1], [], []>} : vector<8x8xbf16>, vector<8x8xbf16>, vector<8x8xf32> -> vector<8x8xf32>
    %c8_54 = arith.constant 8 : index
    %c16_55 = arith.constant 16 : index
    %152 = vector.load %arg15[%c8_54, %c16_55] : memref<16x32xf32, #tpu.memory_space<vmem>>, vector<8x8xf32>
    tpu.vector_store %arg15[%c8_54, %c16_55], %151 {strides = array<i32>} : memref<16x32xf32, #tpu.memory_space<vmem>>, vector<8x8xf32>,
    %153 = vector.extract_strided_slice %96 {offsets = [0, 24], sizes = [8, 8], strides = [1, 1]} : vector<8x32xbf16> to vector<8x8xbf16>
    %154 = vector.extract_strided_slice %97 {offsets = [0, 24], sizes = [8, 8], strides = [1, 1]} : vector<8x32xbf16> to vector<8x8xbf16>
    %155 = vector.extract_strided_slice %98 {offsets = [0, 24], sizes = [8, 8], strides = [1, 1]} : vector<8x32xbf16> to vector<8x8xbf16>
    %cst_56 = arith.constant dense<0.000000e+00> : vector<8x8xf32>
    %156 = tpu.matmul %153, %154, %cst_56 {dimension_numbers = #tpu.dot_dimension_numbers<[1], [1], [0], [0], [0, 0, 1, 0], [], []>} : vector<8x8xbf16>, vector<8x8xbf16>, vector<8x8xf32> -> vector<8x8xf32>
    %cst_57 = arith.constant -3.53553382E+9 : f32
    %157 = vector.broadcast %cst_57 : f32 to vector<8x8xf32>
    %158 = arith.select %2, %157, %156 : vector<8x8xi1>, vector<8x8xf32>
    %cst_58 = arith.constant dense<0xFF800000> : vector<8xf32>
    %159 = vector.multi_reduction <maximumf>, %158, %cst_58 [1] : vector<8x8xf32> to vector<8xf32>
    %160 = vector.shape_cast %159 : vector<8xf32> to vector<8x1xf32>
    %161 = vector.broadcast %160 : vector<8x1xf32> to vector<8x8xf32>
    %162 = arith.subf %158, %161 : vector<8x8xf32>
    %163 = math.exp %162 : vector<8x8xf32>
    %cst_59 = arith.constant dense<0.000000e+00> : vector<8xf32>
    %164 = vector.multi_reduction <add>, %163, %cst_59 [1] : vector<8x8xf32> to vector<8xf32>
    %165 = vector.shape_cast %164 : vector<8xf32> to vector<8x1xf32>
    %166 = vector.broadcast %165 : vector<8x1xf32> to vector<8x8xf32>
    %167 = arith.divf %163, %166 : vector<8x8xf32>
    %168 = arith.truncf %167 : vector<8x8xf32> to vector<8x8xbf16>
    %cst_60 = arith.constant dense<0.000000e+00> : vector<8x8xf32>
    %169 = tpu.matmul %168, %155, %cst_60 {dimension_numbers = #tpu.dot_dimension_numbers<[1], [0], [0], [1], [0, 0, 1, 1], [], []>} : vector<8x8xbf16>, vector<8x8xbf16>, vector<8x8xf32> -> vector<8x8xf32>
    %c8_61 = arith.constant 8 : index
    %c24_62 = arith.constant 24 : index
    %170 = vector.load %arg15[%c8_61, %c24_62] : memref<16x32xf32, #tpu.memory_space<vmem>>, vector<8x8xf32>
    tpu.vector_store %arg15[%c8_61, %c24_62], %169 {strides = array<i32>} : memref<16x32xf32, #tpu.memory_space<vmem>>, vector<8x8xf32>,
    %c0_63 = arith.constant 0 : index
    %c0_64 = arith.constant 0 : index
    %171 = vector.load %arg15[%c0_63, %c0_64] : memref<16x32xf32, #tpu.memory_space<vmem>>, vector<16x32xf32>
    %172 = arith.addf %3, %171 : vector<16x32xf32>
    %173 = vector.shape_cast %172 : vector<16x32xf32> to vector<1x16x32xf32>
    %cst_65 = arith.constant dense<0.000000e+00> : vector<1xf32>
    %174 = vector.multi_reduction <add>, %173, %cst_65 [1, 2] : vector<1x16x32xf32> to vector<1xf32>
    %175 = vector.shape_cast %174 : vector<1xf32> to vector<1x1x1xf32>
    %176 = vector.extract %175[0, 0, 0] : f32 from vector<1x1x1xf32>
    %cst_66 = arith.constant 5.120000e+02 : f32
    %177 = arith.divf %176, %cst_66 : f32
    %178 = vector.broadcast %177 : f32 to vector<16x32xf32>
    %179 = arith.subf %172, %178 : vector<16x32xf32>
    %180 = arith.mulf %179, %179 : vector<16x32xf32>
    %181 = vector.shape_cast %180 : vector<16x32xf32> to vector<1x16x32xf32>
    %cst_67 = arith.constant dense<0.000000e+00> : vector<1xf32>
    %182 = vector.multi_reduction <add>, %181, %cst_67 [1, 2] : vector<1x16x32xf32> to vector<1xf32>
    %183 = vector.shape_cast %182 : vector<1xf32> to vector<1x1x1xf32>
    %184 = vector.extract %183[0, 0, 0] : f32 from vector<1x1x1xf32>
    %cst_68 = arith.constant 5.120000e+02 : f32
    %185 = arith.divf %184, %cst_68 : f32
    %cst_69 = arith.constant 9.99999974E-6 : f32
    %186 = arith.addf %185, %cst_69 : f32
    %187 = math.rsqrt %186 : f32
    %188 = vector.broadcast %187 : f32 to vector<16x32xf32>
    %189 = arith.mulf %179, %188 : vector<16x32xf32>
    %190 = arith.truncf %189 : vector<16x32xf32> to vector<16x32xbf16>
    %c0_70 = arith.constant 0 : index
    %c0_71 = arith.constant 0 : index
    %c0_72 = arith.constant 0 : index
    %191 = vector.load %arg4[%c0_70, %c0_71, %c0_72] : memref<2x32x32xbf16, #tpu.memory_space<vmem>>, vector<1x32x32xbf16>
    %192 = vector.shape_cast %191 : vector<1x32x32xbf16> to vector<32x32xbf16>
    %cst_73 = arith.constant dense<0.000000e+00> : vector<16x32xf32>
    %193 = tpu.matmul %190, %192, %cst_73 {dimension_numbers = #tpu.dot_dimension_numbers<[1], [0], [0], [1], [0, 0, 1, 1], [], []>} : vector<16x32xbf16>, vector<32x32xbf16>, vector<16x32xf32> -> vector<16x32xf32>
    %c0_74 = arith.constant 0 : index
    %c0_75 = arith.constant 0 : index
    %c0_76 = arith.constant 0 : index
    %194 = vector.load %arg5[%c0_74, %c0_75, %c0_76] : memref<2x1x32xf32, #tpu.memory_space<vmem>>, vector<1x1x32xf32>
    %195 = vector.shape_cast %194 : vector<1x1x32xf32> to vector<1x32xf32>
    %196 = vector.broadcast %195 : vector<1x32xf32> to vector<16x32xf32>
    %197 = arith.addf %193, %196 : vector<16x32xf32>
    %cst_77 = arith.constant 0.353553385 : f32
    %198 = vector.broadcast %cst_77 : f32 to vector<16x32xf32>
    %199 = arith.mulf %197, %198 : vector<16x32xf32>
    %200 = arith.truncf %199 : vector<16x32xf32> to vector<16x32xbf16>
    %c0_78 = arith.constant 0 : index
    %c0_79 = arith.constant 0 : index
    %c0_80 = arith.constant 0 : index
    %201 = vector.load %arg6[%c0_78, %c0_79, %c0_80] : memref<2x32x64xbf16, #tpu.memory_space<vmem>>, vector<1x32x64xbf16>
    %202 = vector.shape_cast %201 : vector<1x32x64xbf16> to vector<32x64xbf16>
    %cst_81 = arith.constant dense<0.000000e+00> : vector<24x64xf32>
    %203 = tpu.matmul %4, %202, %cst_81 {dimension_numbers = #tpu.dot_dimension_numbers<[1], [0], [0], [1], [0, 0, 1, 1], [], []>} : vector<24x32xbf16>, vector<32x64xbf16>, vector<24x64xf32> -> vector<24x64xf32>
    %c0_82 = arith.constant 0 : index
    %c0_83 = arith.constant 0 : index
    %c0_84 = arith.constant 0 : index
    %204 = vector.load %arg7[%c0_82, %c0_83, %c0_84] : memref<2x1x64xf32, #tpu.memory_space<vmem>>, vector<1x1x64xf32>
    %205 = vector.shape_cast %204 : vector<1x1x64xf32> to vector<1x64xf32>
    %206 = vector.broadcast %205 : vector<1x64xf32> to vector<24x64xf32>
    %207 = arith.addf %203, %206 : vector<24x64xf32>
    %208 = vector.extract_strided_slice %207 {offsets = [0, 0], sizes = [24, 32], strides = [1, 1]} : vector<24x64xf32> to vector<24x32xf32>
    %209 = arith.truncf %208 : vector<24x32xf32> to vector<24x32xbf16>
    %210 = vector.extract_strided_slice %207 {offsets = [0, 32], sizes = [24, 32], strides = [1, 1]} : vector<24x64xf32> to vector<24x32xf32>
    %211 = arith.truncf %210 : vector<24x32xf32> to vector<24x32xbf16>
    %212 = vector.extract_strided_slice %200 {offsets = [0, 0], sizes = [8, 32], strides = [1, 1]} : vector<16x32xbf16> to vector<8x32xbf16>
    %213 = vector.extract_strided_slice %209 {offsets = [0, 0], sizes = [12, 32], strides = [1, 1]} : vector<24x32xbf16> to vector<12x32xbf16>
    %214 = vector.extract_strided_slice %211 {offsets = [0, 0], sizes = [12, 32], strides = [1, 1]} : vector<24x32xbf16> to vector<12x32xbf16>
    %215 = vector.extract_strided_slice %212 {offsets = [0, 0], sizes = [8, 8], strides = [1, 1]} : vector<8x32xbf16> to vector<8x8xbf16>
    %216 = vector.extract_strided_slice %213 {offsets = [0, 0], sizes = [12, 8], strides = [1, 1]} : vector<12x32xbf16> to vector<12x8xbf16>
    %217 = vector.extract_strided_slice %214 {offsets = [0, 0], sizes = [12, 8], strides = [1, 1]} : vector<12x32xbf16> to vector<12x8xbf16>
    %cst_85 = arith.constant dense<0.000000e+00> : vector<8x12xf32>
    %218 = tpu.matmul %215, %216, %cst_85 {dimension_numbers = #tpu.dot_dimension_numbers<[1], [1], [0], [0], [0, 0, 1, 0], [], []>} : vector<8x8xbf16>, vector<12x8xbf16>, vector<8x12xf32> -> vector<8x12xf32>
    %cst_86 = arith.constant dense<0xFF800000> : vector<8xf32>
    %219 = vector.multi_reduction <maximumf>, %218, %cst_86 [1] : vector<8x12xf32> to vector<8xf32>
    %220 = vector.shape_cast %219 : vector<8xf32> to vector<8x1xf32>
    %221 = vector.broadcast %220 : vector<8x1xf32> to vector<8x12xf32>
    %222 = arith.subf %218, %221 : vector<8x12xf32>
    %223 = math.exp %222 : vector<8x12xf32>
    %cst_87 = arith.constant dense<0.000000e+00> : vector<8xf32>
    %224 = vector.multi_reduction <add>, %223, %cst_87 [1] : vector<8x12xf32> to vector<8xf32>
    %225 = vector.shape_cast %224 : vector<8xf32> to vector<8x1xf32>
    %226 = vector.broadcast %225 : vector<8x1xf32> to vector<8x12xf32>
    %227 = arith.divf %223, %226 : vector<8x12xf32>
    %228 = arith.truncf %227 : vector<8x12xf32> to vector<8x12xbf16>
    %cst_88 = arith.constant dense<0.000000e+00> : vector<8x8xf32>
    %229 = tpu.matmul %228, %217, %cst_88 {dimension_numbers = #tpu.dot_dimension_numbers<[1], [0], [0], [1], [0, 0, 1, 1], [], []>} : vector<8x12xbf16>, vector<12x8xbf16>, vector<8x8xf32> -> vector<8x8xf32>
    %c0_89 = arith.constant 0 : index
    %c0_90 = arith.constant 0 : index
    %230 = vector.load %arg15[%c0_89, %c0_90] : memref<16x32xf32, #tpu.memory_space<vmem>>, vector<8x8xf32>
    tpu.vector_store %arg15[%c0_89, %c0_90], %229 {strides = array<i32>} : memref<16x32xf32, #tpu.memory_space<vmem>>, vector<8x8xf32>,
    %231 = vector.extract_strided_slice %212 {offsets = [0, 8], sizes = [8, 8], strides = [1, 1]} : vector<8x32xbf16> to vector<8x8xbf16>
    %232 = vector.extract_strided_slice %213 {offsets = [0, 8], sizes = [12, 8], strides = [1, 1]} : vector<12x32xbf16> to vector<12x8xbf16>
    %233 = vector.extract_strided_slice %214 {offsets = [0, 8], sizes = [12, 8], strides = [1, 1]} : vector<12x32xbf16> to vector<12x8xbf16>
    %cst_91 = arith.constant dense<0.000000e+00> : vector<8x12xf32>
    %234 = tpu.matmul %231, %232, %cst_91 {dimension_numbers = #tpu.dot_dimension_numbers<[1], [1], [0], [0], [0, 0, 1, 0], [], []>} : vector<8x8xbf16>, vector<12x8xbf16>, vector<8x12xf32> -> vector<8x12xf32>
    %cst_92 = arith.constant dense<0xFF800000> : vector<8xf32>
    %235 = vector.multi_reduction <maximumf>, %234, %cst_92 [1] : vector<8x12xf32> to vector<8xf32>
    %236 = vector.shape_cast %235 : vector<8xf32> to vector<8x1xf32>
    %237 = vector.broadcast %236 : vector<8x1xf32> to vector<8x12xf32>
    %238 = arith.subf %234, %237 : vector<8x12xf32>
    %239 = math.exp %238 : vector<8x12xf32>
    %cst_93 = arith.constant dense<0.000000e+00> : vector<8xf32>
    %240 = vector.multi_reduction <add>, %239, %cst_93 [1] : vector<8x12xf32> to vector<8xf32>
    %241 = vector.shape_cast %240 : vector<8xf32> to vector<8x1xf32>
    %242 = vector.broadcast %241 : vector<8x1xf32> to vector<8x12xf32>
    %243 = arith.divf %239, %242 : vector<8x12xf32>
    %244 = arith.truncf %243 : vector<8x12xf32> to vector<8x12xbf16>
    %cst_94 = arith.constant dense<0.000000e+00> : vector<8x8xf32>
    %245 = tpu.matmul %244, %233, %cst_94 {dimension_numbers = #tpu.dot_dimension_numbers<[1], [0], [0], [1], [0, 0, 1, 1], [], []>} : vector<8x12xbf16>, vector<12x8xbf16>, vector<8x8xf32> -> vector<8x8xf32>
    %c0_95 = arith.constant 0 : index
    %c8_96 = arith.constant 8 : index
    %246 = vector.load %arg15[%c0_95, %c8_96] : memref<16x32xf32, #tpu.memory_space<vmem>>, vector<8x8xf32>
    tpu.vector_store %arg15[%c0_95, %c8_96], %245 {strides = array<i32>} : memref<16x32xf32, #tpu.memory_space<vmem>>, vector<8x8xf32>,
    %247 = vector.extract_strided_slice %212 {offsets = [0, 16], sizes = [8, 8], strides = [1, 1]} : vector<8x32xbf16> to vector<8x8xbf16>
    %248 = vector.extract_strided_slice %213 {offsets = [0, 16], sizes = [12, 8], strides = [1, 1]} : vector<12x32xbf16> to vector<12x8xbf16>
    %249 = vector.extract_strided_slice %214 {offsets = [0, 16], sizes = [12, 8], strides = [1, 1]} : vector<12x32xbf16> to vector<12x8xbf16>
    %cst_97 = arith.constant dense<0.000000e+00> : vector<8x12xf32>
    %250 = tpu.matmul %247, %248, %cst_97 {dimension_numbers = #tpu.dot_dimension_numbers<[1], [1], [0], [0], [0, 0, 1, 0], [], []>} : vector<8x8xbf16>, vector<12x8xbf16>, vector<8x12xf32> -> vector<8x12xf32>
    %cst_98 = arith.constant dense<0xFF800000> : vector<8xf32>
    %251 = vector.multi_reduction <maximumf>, %250, %cst_98 [1] : vector<8x12xf32> to vector<8xf32>
    %252 = vector.shape_cast %251 : vector<8xf32> to vector<8x1xf32>
    %253 = vector.broadcast %252 : vector<8x1xf32> to vector<8x12xf32>
    %254 = arith.subf %250, %253 : vector<8x12xf32>
    %255 = math.exp %254 : vector<8x12xf32>
    %cst_99 = arith.constant dense<0.000000e+00> : vector<8xf32>
    %256 = vector.multi_reduction <add>, %255, %cst_99 [1] : vector<8x12xf32> to vector<8xf32>
    %257 = vector.shape_cast %256 : vector<8xf32> to vector<8x1xf32>
    %258 = vector.broadcast %257 : vector<8x1xf32> to vector<8x12xf32>
    %259 = arith.divf %255, %258 : vector<8x12xf32>
    %260 = arith.truncf %259 : vector<8x12xf32> to vector<8x12xbf16>
    %cst_100 = arith.constant dense<0.000000e+00> : vector<8x8xf32>
    %261 = tpu.matmul %260, %249, %cst_100 {dimension_numbers = #tpu.dot_dimension_numbers<[1], [0], [0], [1], [0, 0, 1, 1], [], []>} : vector<8x12xbf16>, vector<12x8xbf16>, vector<8x8xf32> -> vector<8x8xf32>
    %c0_101 = arith.constant 0 : index
    %c16_102 = arith.constant 16 : index
    %262 = vector.load %arg15[%c0_101, %c16_102] : memref<16x32xf32, #tpu.memory_space<vmem>>, vector<8x8xf32>
    tpu.vector_store %arg15[%c0_101, %c16_102], %261 {strides = array<i32>} : memref<16x32xf32, #tpu.memory_space<vmem>>, vector<8x8xf32>,
    %263 = vector.extract_strided_slice %212 {offsets = [0, 24], sizes = [8, 8], strides = [1, 1]} : vector<8x32xbf16> to vector<8x8xbf16>
    %264 = vector.extract_strided_slice %213 {offsets = [0, 24], sizes = [12, 8], strides = [1, 1]} : vector<12x32xbf16> to vector<12x8xbf16>
    %265 = vector.extract_strided_slice %214 {offsets = [0, 24], sizes = [12, 8], strides = [1, 1]} : vector<12x32xbf16> to vector<12x8xbf16>
    %cst_103 = arith.constant dense<0.000000e+00> : vector<8x12xf32>
    %266 = tpu.matmul %263, %264, %cst_103 {dimension_numbers = #tpu.dot_dimension_numbers<[1], [1], [0], [0], [0, 0, 1, 0], [], []>} : vector<8x8xbf16>, vector<12x8xbf16>, vector<8x12xf32> -> vector<8x12xf32>
    %cst_104 = arith.constant dense<0xFF800000> : vector<8xf32>
    %267 = vector.multi_reduction <maximumf>, %266, %cst_104 [1] : vector<8x12xf32> to vector<8xf32>
    %268 = vector.shape_cast %267 : vector<8xf32> to vector<8x1xf32>
    %269 = vector.broadcast %268 : vector<8x1xf32> to vector<8x12xf32>
    %270 = arith.subf %266, %269 : vector<8x12xf32>
    %271 = math.exp %270 : vector<8x12xf32>
    %cst_105 = arith.constant dense<0.000000e+00> : vector<8xf32>
    %272 = vector.multi_reduction <add>, %271, %cst_105 [1] : vector<8x12xf32> to vector<8xf32>
    %273 = vector.shape_cast %272 : vector<8xf32> to vector<8x1xf32>
    %274 = vector.broadcast %273 : vector<8x1xf32> to vector<8x12xf32>
    %275 = arith.divf %271, %274 : vector<8x12xf32>
    %276 = arith.truncf %275 : vector<8x12xf32> to vector<8x12xbf16>
    %cst_106 = arith.constant dense<0.000000e+00> : vector<8x8xf32>
    %277 = tpu.matmul %276, %265, %cst_106 {dimension_numbers = #tpu.dot_dimension_numbers<[1], [0], [0], [1], [0, 0, 1, 1], [], []>} : vector<8x12xbf16>, vector<12x8xbf16>, vector<8x8xf32> -> vector<8x8xf32>
    %c0_107 = arith.constant 0 : index
    %c24_108 = arith.constant 24 : index
    %278 = vector.load %arg15[%c0_107, %c24_108] : memref<16x32xf32, #tpu.memory_space<vmem>>, vector<8x8xf32>
    tpu.vector_store %arg15[%c0_107, %c24_108], %277 {strides = array<i32>} : memref<16x32xf32, #tpu.memory_space<vmem>>, vector<8x8xf32>,
    %279 = vector.extract_strided_slice %200 {offsets = [8, 0], sizes = [8, 32], strides = [1, 1]} : vector<16x32xbf16> to vector<8x32xbf16>
    %280 = vector.extract_strided_slice %209 {offsets = [12, 0], sizes = [12, 32], strides = [1, 1]} : vector<24x32xbf16> to vector<12x32xbf16>
    %281 = vector.extract_strided_slice %211 {offsets = [12, 0], sizes = [12, 32], strides = [1, 1]} : vector<24x32xbf16> to vector<12x32xbf16>
    %282 = vector.extract_strided_slice %279 {offsets = [0, 0], sizes = [8, 8], strides = [1, 1]} : vector<8x32xbf16> to vector<8x8xbf16>
    %283 = vector.extract_strided_slice %280 {offsets = [0, 0], sizes = [12, 8], strides = [1, 1]} : vector<12x32xbf16> to vector<12x8xbf16>
    %284 = vector.extract_strided_slice %281 {offsets = [0, 0], sizes = [12, 8], strides = [1, 1]} : vector<12x32xbf16> to vector<12x8xbf16>
    %cst_109 = arith.constant dense<0.000000e+00> : vector<8x12xf32>
    %285 = tpu.matmul %282, %283, %cst_109 {dimension_numbers = #tpu.dot_dimension_numbers<[1], [1], [0], [0], [0, 0, 1, 0], [], []>} : vector<8x8xbf16>, vector<12x8xbf16>, vector<8x12xf32> -> vector<8x12xf32>
    %cst_110 = arith.constant dense<0xFF800000> : vector<8xf32>
    %286 = vector.multi_reduction <maximumf>, %285, %cst_110 [1] : vector<8x12xf32> to vector<8xf32>
    %287 = vector.shape_cast %286 : vector<8xf32> to vector<8x1xf32>
    %288 = vector.broadcast %287 : vector<8x1xf32> to vector<8x12xf32>
    %289 = arith.subf %285, %288 : vector<8x12xf32>
    %290 = math.exp %289 : vector<8x12xf32>
    %cst_111 = arith.constant dense<0.000000e+00> : vector<8xf32>
    %291 = vector.multi_reduction <add>, %290, %cst_111 [1] : vector<8x12xf32> to vector<8xf32>
    %292 = vector.shape_cast %291 : vector<8xf32> to vector<8x1xf32>
    %293 = vector.broadcast %292 : vector<8x1xf32> to vector<8x12xf32>
    %294 = arith.divf %290, %293 : vector<8x12xf32>
    %295 = arith.truncf %294 : vector<8x12xf32> to vector<8x12xbf16>
    %cst_112 = arith.constant dense<0.000000e+00> : vector<8x8xf32>
    %296 = tpu.matmul %295, %284, %cst_112 {dimension_numbers = #tpu.dot_dimension_numbers<[1], [0], [0], [1], [0, 0, 1, 1], [], []>} : vector<8x12xbf16>, vector<12x8xbf16>, vector<8x8xf32> -> vector<8x8xf32>
    %c8_113 = arith.constant 8 : index
    %c0_114 = arith.constant 0 : index
    %297 = vector.load %arg15[%c8_113, %c0_114] : memref<16x32xf32, #tpu.memory_space<vmem>>, vector<8x8xf32>
    tpu.vector_store %arg15[%c8_113, %c0_114], %296 {strides = array<i32>} : memref<16x32xf32, #tpu.memory_space<vmem>>, vector<8x8xf32>,
    %298 = vector.extract_strided_slice %279 {offsets = [0, 8], sizes = [8, 8], strides = [1, 1]} : vector<8x32xbf16> to vector<8x8xbf16>
    %299 = vector.extract_strided_slice %280 {offsets = [0, 8], sizes = [12, 8], strides = [1, 1]} : vector<12x32xbf16> to vector<12x8xbf16>
    %300 = vector.extract_strided_slice %281 {offsets = [0, 8], sizes = [12, 8], strides = [1, 1]} : vector<12x32xbf16> to vector<12x8xbf16>
    %cst_115 = arith.constant dense<0.000000e+00> : vector<8x12xf32>
    %301 = tpu.matmul %298, %299, %cst_115 {dimension_numbers = #tpu.dot_dimension_numbers<[1], [1], [0], [0], [0, 0, 1, 0], [], []>} : vector<8x8xbf16>, vector<12x8xbf16>, vector<8x12xf32> -> vector<8x12xf32>
    %cst_116 = arith.constant dense<0xFF800000> : vector<8xf32>
    %302 = vector.multi_reduction <maximumf>, %301, %cst_116 [1] : vector<8x12xf32> to vector<8xf32>
    %303 = vector.shape_cast %302 : vector<8xf32> to vector<8x1xf32>
    %304 = vector.broadcast %303 : vector<8x1xf32> to vector<8x12xf32>
    %305 = arith.subf %301, %304 : vector<8x12xf32>
    %306 = math.exp %305 : vector<8x12xf32>
    %cst_117 = arith.constant dense<0.000000e+00> : vector<8xf32>
    %307 = vector.multi_reduction <add>, %306, %cst_117 [1] : vector<8x12xf32> to vector<8xf32>
    %308 = vector.shape_cast %307 : vector<8xf32> to vector<8x1xf32>
    %309 = vector.broadcast %308 : vector<8x1xf32> to vector<8x12xf32>
    %310 = arith.divf %306, %309 : vector<8x12xf32>
    %311 = arith.truncf %310 : vector<8x12xf32> to vector<8x12xbf16>
    %cst_118 = arith.constant dense<0.000000e+00> : vector<8x8xf32>
    %312 = tpu.matmul %311, %300, %cst_118 {dimension_numbers = #tpu.dot_dimension_numbers<[1], [0], [0], [1], [0, 0, 1, 1], [], []>} : vector<8x12xbf16>, vector<12x8xbf16>, vector<8x8xf32> -> vector<8x8xf32>
    %c8_119 = arith.constant 8 : index
    %c8_120 = arith.constant 8 : index
    %313 = vector.load %arg15[%c8_119, %c8_120] : memref<16x32xf32, #tpu.memory_space<vmem>>, vector<8x8xf32>
    tpu.vector_store %arg15[%c8_119, %c8_120], %312 {strides = array<i32>} : memref<16x32xf32, #tpu.memory_space<vmem>>, vector<8x8xf32>,
    %314 = vector.extract_strided_slice %279 {offsets = [0, 16], sizes = [8, 8], strides = [1, 1]} : vector<8x32xbf16> to vector<8x8xbf16>
    %315 = vector.extract_strided_slice %280 {offsets = [0, 16], sizes = [12, 8], strides = [1, 1]} : vector<12x32xbf16> to vector<12x8xbf16>
    %316 = vector.extract_strided_slice %281 {offsets = [0, 16], sizes = [12, 8], strides = [1, 1]} : vector<12x32xbf16> to vector<12x8xbf16>
    %cst_121 = arith.constant dense<0.000000e+00> : vector<8x12xf32>
    %317 = tpu.matmul %314, %315, %cst_121 {dimension_numbers = #tpu.dot_dimension_numbers<[1], [1], [0], [0], [0, 0, 1, 0], [], []>} : vector<8x8xbf16>, vector<12x8xbf16>, vector<8x12xf32> -> vector<8x12xf32>
    %cst_122 = arith.constant dense<0xFF800000> : vector<8xf32>
    %318 = vector.multi_reduction <maximumf>, %317, %cst_122 [1] : vector<8x12xf32> to vector<8xf32>
    %319 = vector.shape_cast %318 : vector<8xf32> to vector<8x1xf32>
    %320 = vector.broadcast %319 : vector<8x1xf32> to vector<8x12xf32>
    %321 = arith.subf %317, %320 : vector<8x12xf32>
    %322 = math.exp %321 : vector<8x12xf32>
    %cst_123 = arith.constant dense<0.000000e+00> : vector<8xf32>
    %323 = vector.multi_reduction <add>, %322, %cst_123 [1] : vector<8x12xf32> to vector<8xf32>
    %324 = vector.shape_cast %323 : vector<8xf32> to vector<8x1xf32>
    %325 = vector.broadcast %324 : vector<8x1xf32> to vector<8x12xf32>
    %326 = arith.divf %322, %325 : vector<8x12xf32>
    %327 = arith.truncf %326 : vector<8x12xf32> to vector<8x12xbf16>
    %cst_124 = arith.constant dense<0.000000e+00> : vector<8x8xf32>
    %328 = tpu.matmul %327, %316, %cst_124 {dimension_numbers = #tpu.dot_dimension_numbers<[1], [0], [0], [1], [0, 0, 1, 1], [], []>} : vector<8x12xbf16>, vector<12x8xbf16>, vector<8x8xf32> -> vector<8x8xf32>
    %c8_125 = arith.constant 8 : index
    %c16_126 = arith.constant 16 : index
    %329 = vector.load %arg15[%c8_125, %c16_126] : memref<16x32xf32, #tpu.memory_space<vmem>>, vector<8x8xf32>
    tpu.vector_store %arg15[%c8_125, %c16_126], %328 {strides = array<i32>} : memref<16x32xf32, #tpu.memory_space<vmem>>, vector<8x8xf32>,
    %330 = vector.extract_strided_slice %279 {offsets = [0, 24], sizes = [8, 8], strides = [1, 1]} : vector<8x32xbf16> to vector<8x8xbf16>
    %331 = vector.extract_strided_slice %280 {offsets = [0, 24], sizes = [12, 8], strides = [1, 1]} : vector<12x32xbf16> to vector<12x8xbf16>
    %332 = vector.extract_strided_slice %281 {offsets = [0, 24], sizes = [12, 8], strides = [1, 1]} : vector<12x32xbf16> to vector<12x8xbf16>
    %cst_127 = arith.constant dense<0.000000e+00> : vector<8x12xf32>
    %333 = tpu.matmul %330, %331, %cst_127 {dimension_numbers = #tpu.dot_dimension_numbers<[1], [1], [0], [0], [0, 0, 1, 0], [], []>} : vector<8x8xbf16>, vector<12x8xbf16>, vector<8x12xf32> -> vector<8x12xf32>
    %cst_128 = arith.constant dense<0xFF800000> : vector<8xf32>
    %334 = vector.multi_reduction <maximumf>, %333, %cst_128 [1] : vector<8x12xf32> to vector<8xf32>
    %335 = vector.shape_cast %334 : vector<8xf32> to vector<8x1xf32>
    %336 = vector.broadcast %335 : vector<8x1xf32> to vector<8x12xf32>
    %337 = arith.subf %333, %336 : vector<8x12xf32>
    %338 = math.exp %337 : vector<8x12xf32>
    %cst_129 = arith.constant dense<0.000000e+00> : vector<8xf32>
    %339 = vector.multi_reduction <add>, %338, %cst_129 [1] : vector<8x12xf32> to vector<8xf32>
    %340 = vector.shape_cast %339 : vector<8xf32> to vector<8x1xf32>
    %341 = vector.broadcast %340 : vector<8x1xf32> to vector<8x12xf32>
    %342 = arith.divf %338, %341 : vector<8x12xf32>
    %343 = arith.truncf %342 : vector<8x12xf32> to vector<8x12xbf16>
    %cst_130 = arith.constant dense<0.000000e+00> : vector<8x8xf32>
    %344 = tpu.matmul %343, %332, %cst_130 {dimension_numbers = #tpu.dot_dimension_numbers<[1], [0], [0], [1], [0, 0, 1, 1], [], []>} : vector<8x12xbf16>, vector<12x8xbf16>, vector<8x8xf32> -> vector<8x8xf32>
    %c8_131 = arith.constant 8 : index
    %c24_132 = arith.constant 24 : index
    %345 = vector.load %arg15[%c8_131, %c24_132] : memref<16x32xf32, #tpu.memory_space<vmem>>, vector<8x8xf32>
    tpu.vector_store %arg15[%c8_131, %c24_132], %344 {strides = array<i32>} : memref<16x32xf32, #tpu.memory_space<vmem>>, vector<8x8xf32>,
    %c0_133 = arith.constant 0 : index
    %c0_134 = arith.constant 0 : index
    %346 = vector.load %arg15[%c0_133, %c0_134] : memref<16x32xf32, #tpu.memory_space<vmem>>, vector<16x32xf32>
    %347 = arith.addf %189, %346 : vector<16x32xf32>
    %348 = vector.shape_cast %347 : vector<16x32xf32> to vector<1x16x32xf32>
    %cst_135 = arith.constant dense<0.000000e+00> : vector<1xf32>
    %349 = vector.multi_reduction <add>, %348, %cst_135 [1, 2] : vector<1x16x32xf32> to vector<1xf32>
    %350 = vector.shape_cast %349 : vector<1xf32> to vector<1x1x1xf32>
    %351 = vector.extract %350[0, 0, 0] : f32 from vector<1x1x1xf32>
    %cst_136 = arith.constant 5.120000e+02 : f32
    %352 = arith.divf %351, %cst_136 : f32
    %353 = vector.broadcast %352 : f32 to vector<16x32xf32>
    %354 = arith.subf %347, %353 : vector<16x32xf32>
    %355 = arith.mulf %354, %354 : vector<16x32xf32>
    %356 = vector.shape_cast %355 : vector<16x32xf32> to vector<1x16x32xf32>
    %cst_137 = arith.constant dense<0.000000e+00> : vector<1xf32>
    %357 = vector.multi_reduction <add>, %356, %cst_137 [1, 2] : vector<1x16x32xf32> to vector<1xf32>
    %358 = vector.shape_cast %357 : vector<1xf32> to vector<1x1x1xf32>
    %359 = vector.extract %358[0, 0, 0] : f32 from vector<1x1x1xf32>
    %cst_138 = arith.constant 5.120000e+02 : f32
    %360 = arith.divf %359, %cst_138 : f32
    %cst_139 = arith.constant 9.99999974E-6 : f32
    %361 = arith.addf %360, %cst_139 : f32
    %362 = math.rsqrt %361 : f32
    %363 = vector.broadcast %362 : f32 to vector<16x32xf32>
    %364 = arith.mulf %354, %363 : vector<16x32xf32>
    %c0_140 = arith.constant 0 : index
    %c0_141 = arith.constant 0 : index
    %c0_142 = arith.constant 0 : index
    %365 = vector.load %arg8[%c0_140, %c0_141, %c0_142] : memref<2x32x128xbf16, #tpu.memory_space<vmem>>, vector<1x32x128xbf16>
    %366 = vector.shape_cast %365 : vector<1x32x128xbf16> to vector<32x128xbf16>
    %c0_143 = arith.constant 0 : index
    %c0_144 = arith.constant 0 : index
    %c0_145 = arith.constant 0 : index
    %367 = vector.load %arg9[%c0_143, %c0_144, %c0_145] : memref<2x1x128xf32, #tpu.memory_space<vmem>>, vector<1x1x128xf32>
    %368 = vector.shape_cast %367 : vector<1x1x128xf32> to vector<1x128xf32>
    %c0_146 = arith.constant 0 : index
    %c0_147 = arith.constant 0 : index
    %c0_148 = arith.constant 0 : index
    %369 = vector.load %arg10[%c0_146, %c0_147, %c0_148] : memref<2x128x32xbf16, #tpu.memory_space<vmem>>, vector<1x128x32xbf16>
    %370 = vector.shape_cast %369 : vector<1x128x32xbf16> to vector<128x32xbf16>
    %c0_149 = arith.constant 0 : index
    %c0_150 = arith.constant 0 : index
    %c0_151 = arith.constant 0 : index
    %371 = vector.load %arg11[%c0_149, %c0_150, %c0_151] : memref<2x1x32xf32, #tpu.memory_space<vmem>>, vector<1x1x32xf32>
    %372 = vector.shape_cast %371 : vector<1x1x32xf32> to vector<1x32xf32>
    %373 = arith.truncf %364 : vector<16x32xf32> to vector<16x32xbf16>
    %cst_152 = arith.constant dense<0.000000e+00> : vector<16x128xf32>
    %374 = tpu.matmul %373, %366, %cst_152 {dimension_numbers = #tpu.dot_dimension_numbers<[1], [0], [0], [1], [0, 0, 1, 1], [], []>} : vector<16x32xbf16>, vector<32x128xbf16>, vector<16x128xf32> -> vector<16x128xf32>
    %375 = vector.broadcast %368 : vector<1x128xf32> to vector<16x128xf32>
    %376 = arith.addf %374, %375 : vector<16x128xf32>
    %cst_153 = arith.constant 0.000000e+00 : f32
    %377 = vector.broadcast %cst_153 : f32 to vector<16x128xf32>
    %378 = arith.maximumf %376, %377 : vector<16x128xf32>
    %379 = arith.truncf %378 : vector<16x128xf32> to vector<16x128xbf16>
    %cst_154 = arith.constant dense<0.000000e+00> : vector<16x32xf32>
    %380 = tpu.matmul %379, %370, %cst_154 {dimension_numbers = #tpu.dot_dimension_numbers<[1], [0], [0], [1], [0, 0, 1, 1], [], []>} : vector<16x128xbf16>, vector<128x32xbf16>, vector<16x32xf32> -> vector<16x32xf32>
    %381 = vector.broadcast %372 : vector<1x32xf32> to vector<16x32xf32>
    %382 = arith.addf %380, %381 : vector<16x32xf32>
    %383 = arith.addf %364, %382 : vector<16x32xf32>
    %384 = vector.shape_cast %383 : vector<16x32xf32> to vector<1x16x32xf32>
    %cst_155 = arith.constant dense<0.000000e+00> : vector<1xf32>
    %385 = vector.multi_reduction <add>, %384, %cst_155 [1, 2] : vector<1x16x32xf32> to vector<1xf32>
    %386 = vector.shape_cast %385 : vector<1xf32> to vector<1x1x1xf32>
    %387 = vector.extract %386[0, 0, 0] : f32 from vector<1x1x1xf32>
    %cst_156 = arith.constant 5.120000e+02 : f32
    %388 = arith.divf %387, %cst_156 : f32
    %389 = vector.broadcast %388 : f32 to vector<16x32xf32>
    %390 = arith.subf %383, %389 : vector<16x32xf32>
    %391 = arith.mulf %390, %390 : vector<16x32xf32>
    %392 = vector.shape_cast %391 : vector<16x32xf32> to vector<1x16x32xf32>
    %cst_157 = arith.constant dense<0.000000e+00> : vector<1xf32>
    %393 = vector.multi_reduction <add>, %392, %cst_157 [1, 2] : vector<1x16x32xf32> to vector<1xf32>
    %394 = vector.shape_cast %393 : vector<1xf32> to vector<1x1x1xf32>
    %395 = vector.extract %394[0, 0, 0] : f32 from vector<1x1x1xf32>
    %cst_158 = arith.constant 5.120000e+02 : f32
    %396 = arith.divf %395, %cst_158 : f32
    %cst_159 = arith.constant 9.99999974E-6 : f32
    %397 = arith.addf %396, %cst_159 : f32
    %398 = math.rsqrt %397 : f32
    %399 = vector.broadcast %398 : f32 to vector<16x32xf32>
    %400 = arith.mulf %390, %399 : vector<16x32xf32>
    %401 = arith.truncf %400 : vector<16x32xf32> to vector<16x32xbf16>
    %c1 = arith.constant 1 : index
    %c0_160 = arith.constant 0 : index
    %c0_161 = arith.constant 0 : index
    %402 = vector.load %arg2[%c1, %c0_160, %c0_161] : memref<2x32x96xbf16, #tpu.memory_space<vmem>>, vector<1x32x96xbf16>
    %403 = vector.shape_cast %402 : vector<1x32x96xbf16> to vector<32x96xbf16>
    %cst_162 = arith.constant dense<0.000000e+00> : vector<16x96xf32>
    %404 = tpu.matmul %401, %403, %cst_162 {dimension_numbers = #tpu.dot_dimension_numbers<[1], [0], [0], [1], [0, 0, 1, 1], [], []>} : vector<16x32xbf16>, vector<32x96xbf16>, vector<16x96xf32> -> vector<16x96xf32>
    %c1_163 = arith.constant 1 : index
    %c0_164 = arith.constant 0 : index
    %c0_165 = arith.constant 0 : index
    %405 = vector.load %arg3[%c1_163, %c0_164, %c0_165] : memref<2x1x96xf32, #tpu.memory_space<vmem>>, vector<1x1x96xf32>
    %406 = vector.shape_cast %405 : vector<1x1x96xf32> to vector<1x96xf32>
    %407 = vector.broadcast %406 : vector<1x96xf32> to vector<16x96xf32>
    %408 = arith.addf %404, %407 : vector<16x96xf32>
    %409 = vector.extract_strided_slice %408 {offsets = [0, 0], sizes = [16, 32], strides = [1, 1]} : vector<16x96xf32> to vector<16x32xf32>
    %cst_166 = arith.constant 0.353553385 : f32
    %410 = vector.broadcast %cst_166 : f32 to vector<16x32xf32>
    %411 = arith.mulf %409, %410 : vector<16x32xf32>
    %412 = arith.truncf %411 : vector<16x32xf32> to vector<16x32xbf16>
    %413 = vector.extract_strided_slice %408 {offsets = [0, 32], sizes = [16, 32], strides = [1, 1]} : vector<16x96xf32> to vector<16x32xf32>
    %414 = arith.truncf %413 : vector<16x32xf32> to vector<16x32xbf16>
    %415 = vector.extract_strided_slice %408 {offsets = [0, 64], sizes = [16, 32], strides = [1, 1]} : vector<16x96xf32> to vector<16x32xf32>
    %416 = arith.truncf %415 : vector<16x32xf32> to vector<16x32xbf16>
    %417 = vector.extract_strided_slice %412 {offsets = [0, 0], sizes = [8, 32], strides = [1, 1]} : vector<16x32xbf16> to vector<8x32xbf16>
    %418 = vector.extract_strided_slice %414 {offsets = [0, 0], sizes = [8, 32], strides = [1, 1]} : vector<16x32xbf16> to vector<8x32xbf16>
    %419 = vector.extract_strided_slice %416 {offsets = [0, 0], sizes = [8, 32], strides = [1, 1]} : vector<16x32xbf16> to vector<8x32xbf16>
    %420 = vector.extract_strided_slice %417 {offsets = [0, 0], sizes = [8, 8], strides = [1, 1]} : vector<8x32xbf16> to vector<8x8xbf16>
    %421 = vector.extract_strided_slice %418 {offsets = [0, 0], sizes = [8, 8], strides = [1, 1]} : vector<8x32xbf16> to vector<8x8xbf16>
    %422 = vector.extract_strided_slice %419 {offsets = [0, 0], sizes = [8, 8], strides = [1, 1]} : vector<8x32xbf16> to vector<8x8xbf16>
    %cst_167 = arith.constant dense<0.000000e+00> : vector<8x8xf32>
    %423 = tpu.matmul %420, %421, %cst_167 {dimension_numbers = #tpu.dot_dimension_numbers<[1], [1], [0], [0], [0, 0, 1, 0], [], []>} : vector<8x8xbf16>, vector<8x8xbf16>, vector<8x8xf32> -> vector<8x8xf32>
    %cst_168 = arith.constant -3.53553382E+9 : f32
    %424 = vector.broadcast %cst_168 : f32 to vector<8x8xf32>
    %425 = arith.select %2, %424, %423 : vector<8x8xi1>, vector<8x8xf32>
    %cst_169 = arith.constant dense<0xFF800000> : vector<8xf32>
    %426 = vector.multi_reduction <maximumf>, %425, %cst_169 [1] : vector<8x8xf32> to vector<8xf32>
    %427 = vector.shape_cast %426 : vector<8xf32> to vector<8x1xf32>
    %428 = vector.broadcast %427 : vector<8x1xf32> to vector<8x8xf32>
    %429 = arith.subf %425, %428 : vector<8x8xf32>
    %430 = math.exp %429 : vector<8x8xf32>
    %cst_170 = arith.constant dense<0.000000e+00> : vector<8xf32>
    %431 = vector.multi_reduction <add>, %430, %cst_170 [1] : vector<8x8xf32> to vector<8xf32>
    %432 = vector.shape_cast %431 : vector<8xf32> to vector<8x1xf32>
    %433 = vector.broadcast %432 : vector<8x1xf32> to vector<8x8xf32>
    %434 = arith.divf %430, %433 : vector<8x8xf32>
    %435 = arith.truncf %434 : vector<8x8xf32> to vector<8x8xbf16>
    %cst_171 = arith.constant dense<0.000000e+00> : vector<8x8xf32>
    %436 = tpu.matmul %435, %422, %cst_171 {dimension_numbers = #tpu.dot_dimension_numbers<[1], [0], [0], [1], [0, 0, 1, 1], [], []>} : vector<8x8xbf16>, vector<8x8xbf16>, vector<8x8xf32> -> vector<8x8xf32>
    %c0_172 = arith.constant 0 : index
    %c0_173 = arith.constant 0 : index
    %437 = vector.load %arg15[%c0_172, %c0_173] : memref<16x32xf32, #tpu.memory_space<vmem>>, vector<8x8xf32>
    tpu.vector_store %arg15[%c0_172, %c0_173], %436 {strides = array<i32>} : memref<16x32xf32, #tpu.memory_space<vmem>>, vector<8x8xf32>,
    %438 = vector.extract_strided_slice %417 {offsets = [0, 8], sizes = [8, 8], strides = [1, 1]} : vector<8x32xbf16> to vector<8x8xbf16>
    %439 = vector.extract_strided_slice %418 {offsets = [0, 8], sizes = [8, 8], strides = [1, 1]} : vector<8x32xbf16> to vector<8x8xbf16>
    %440 = vector.extract_strided_slice %419 {offsets = [0, 8], sizes = [8, 8], strides = [1, 1]} : vector<8x32xbf16> to vector<8x8xbf16>
    %cst_174 = arith.constant dense<0.000000e+00> : vector<8x8xf32>
    %441 = tpu.matmul %438, %439, %cst_174 {dimension_numbers = #tpu.dot_dimension_numbers<[1], [1], [0], [0], [0, 0, 1, 0], [], []>} : vector<8x8xbf16>, vector<8x8xbf16>, vector<8x8xf32> -> vector<8x8xf32>
    %cst_175 = arith.constant -3.53553382E+9 : f32
    %442 = vector.broadcast %cst_175 : f32 to vector<8x8xf32>
    %443 = arith.select %2, %442, %441 : vector<8x8xi1>, vector<8x8xf32>
    %cst_176 = arith.constant dense<0xFF800000> : vector<8xf32>
    %444 = vector.multi_reduction <maximumf>, %443, %cst_176 [1] : vector<8x8xf32> to vector<8xf32>
    %445 = vector.shape_cast %444 : vector<8xf32> to vector<8x1xf32>
    %446 = vector.broadcast %445 : vector<8x1xf32> to vector<8x8xf32>
    %447 = arith.subf %443, %446 : vector<8x8xf32>
    %448 = math.exp %447 : vector<8x8xf32>
    %cst_177 = arith.constant dense<0.000000e+00> : vector<8xf32>
    %449 = vector.multi_reduction <add>, %448, %cst_177 [1] : vector<8x8xf32> to vector<8xf32>
    %450 = vector.shape_cast %449 : vector<8xf32> to vector<8x1xf32>
    %451 = vector.broadcast %450 : vector<8x1xf32> to vector<8x8xf32>
    %452 = arith.divf %448, %451 : vector<8x8xf32>
    %453 = arith.truncf %452 : vector<8x8xf32> to vector<8x8xbf16>
    %cst_178 = arith.constant dense<0.000000e+00> : vector<8x8xf32>
    %454 = tpu.matmul %453, %440, %cst_178 {dimension_numbers = #tpu.dot_dimension_numbers<[1], [0], [0], [1], [0, 0, 1, 1], [], []>} : vector<8x8xbf16>, vector<8x8xbf16>, vector<8x8xf32> -> vector<8x8xf32>
    %c0_179 = arith.constant 0 : index
    %c8_180 = arith.constant 8 : index
    %455 = vector.load %arg15[%c0_179, %c8_180] : memref<16x32xf32, #tpu.memory_space<vmem>>, vector<8x8xf32>
    tpu.vector_store %arg15[%c0_179, %c8_180], %454 {strides = array<i32>} : memref<16x32xf32, #tpu.memory_space<vmem>>, vector<8x8xf32>,
    %456 = vector.extract_strided_slice %417 {offsets = [0, 16], sizes = [8, 8], strides = [1, 1]} : vector<8x32xbf16> to vector<8x8xbf16>
    %457 = vector.extract_strided_slice %418 {offsets = [0, 16], sizes = [8, 8], strides = [1, 1]} : vector<8x32xbf16> to vector<8x8xbf16>
    %458 = vector.extract_strided_slice %419 {offsets = [0, 16], sizes = [8, 8], strides = [1, 1]} : vector<8x32xbf16> to vector<8x8xbf16>
    %cst_181 = arith.constant dense<0.000000e+00> : vector<8x8xf32>
    %459 = tpu.matmul %456, %457, %cst_181 {dimension_numbers = #tpu.dot_dimension_numbers<[1], [1], [0], [0], [0, 0, 1, 0], [], []>} : vector<8x8xbf16>, vector<8x8xbf16>, vector<8x8xf32> -> vector<8x8xf32>
    %cst_182 = arith.constant -3.53553382E+9 : f32
    %460 = vector.broadcast %cst_182 : f32 to vector<8x8xf32>
    %461 = arith.select %2, %460, %459 : vector<8x8xi1>, vector<8x8xf32>
    %cst_183 = arith.constant dense<0xFF800000> : vector<8xf32>
    %462 = vector.multi_reduction <maximumf>, %461, %cst_183 [1] : vector<8x8xf32> to vector<8xf32>
    %463 = vector.shape_cast %462 : vector<8xf32> to vector<8x1xf32>
    %464 = vector.broadcast %463 : vector<8x1xf32> to vector<8x8xf32>
    %465 = arith.subf %461, %464 : vector<8x8xf32>
    %466 = math.exp %465 : vector<8x8xf32>
    %cst_184 = arith.constant dense<0.000000e+00> : vector<8xf32>
    %467 = vector.multi_reduction <add>, %466, %cst_184 [1] : vector<8x8xf32> to vector<8xf32>
    %468 = vector.shape_cast %467 : vector<8xf32> to vector<8x1xf32>
    %469 = vector.broadcast %468 : vector<8x1xf32> to vector<8x8xf32>
    %470 = arith.divf %466, %469 : vector<8x8xf32>
    %471 = arith.truncf %470 : vector<8x8xf32> to vector<8x8xbf16>
    %cst_185 = arith.constant dense<0.000000e+00> : vector<8x8xf32>
    %472 = tpu.matmul %471, %458, %cst_185 {dimension_numbers = #tpu.dot_dimension_numbers<[1], [0], [0], [1], [0, 0, 1, 1], [], []>} : vector<8x8xbf16>, vector<8x8xbf16>, vector<8x8xf32> -> vector<8x8xf32>
    %c0_186 = arith.constant 0 : index
    %c16_187 = arith.constant 16 : index
    %473 = vector.load %arg15[%c0_186, %c16_187] : memref<16x32xf32, #tpu.memory_space<vmem>>, vector<8x8xf32>
    tpu.vector_store %arg15[%c0_186, %c16_187], %472 {strides = array<i32>} : memref<16x32xf32, #tpu.memory_space<vmem>>, vector<8x8xf32>,
    %474 = vector.extract_strided_slice %417 {offsets = [0, 24], sizes = [8, 8], strides = [1, 1]} : vector<8x32xbf16> to vector<8x8xbf16>
    %475 = vector.extract_strided_slice %418 {offsets = [0, 24], sizes = [8, 8], strides = [1, 1]} : vector<8x32xbf16> to vector<8x8xbf16>
    %476 = vector.extract_strided_slice %419 {offsets = [0, 24], sizes = [8, 8], strides = [1, 1]} : vector<8x32xbf16> to vector<8x8xbf16>
    %cst_188 = arith.constant dense<0.000000e+00> : vector<8x8xf32>
    %477 = tpu.matmul %474, %475, %cst_188 {dimension_numbers = #tpu.dot_dimension_numbers<[1], [1], [0], [0], [0, 0, 1, 0], [], []>} : vector<8x8xbf16>, vector<8x8xbf16>, vector<8x8xf32> -> vector<8x8xf32>
    %cst_189 = arith.constant -3.53553382E+9 : f32
    %478 = vector.broadcast %cst_189 : f32 to vector<8x8xf32>
    %479 = arith.select %2, %478, %477 : vector<8x8xi1>, vector<8x8xf32>
    %cst_190 = arith.constant dense<0xFF800000> : vector<8xf32>
    %480 = vector.multi_reduction <maximumf>, %479, %cst_190 [1] : vector<8x8xf32> to vector<8xf32>
    %481 = vector.shape_cast %480 : vector<8xf32> to vector<8x1xf32>
    %482 = vector.broadcast %481 : vector<8x1xf32> to vector<8x8xf32>
    %483 = arith.subf %479, %482 : vector<8x8xf32>
    %484 = math.exp %483 : vector<8x8xf32>
    %cst_191 = arith.constant dense<0.000000e+00> : vector<8xf32>
    %485 = vector.multi_reduction <add>, %484, %cst_191 [1] : vector<8x8xf32> to vector<8xf32>
    %486 = vector.shape_cast %485 : vector<8xf32> to vector<8x1xf32>
    %487 = vector.broadcast %486 : vector<8x1xf32> to vector<8x8xf32>
    %488 = arith.divf %484, %487 : vector<8x8xf32>
    %489 = arith.truncf %488 : vector<8x8xf32> to vector<8x8xbf16>
    %cst_192 = arith.constant dense<0.000000e+00> : vector<8x8xf32>
    %490 = tpu.matmul %489, %476, %cst_192 {dimension_numbers = #tpu.dot_dimension_numbers<[1], [0], [0], [1], [0, 0, 1, 1], [], []>} : vector<8x8xbf16>, vector<8x8xbf16>, vector<8x8xf32> -> vector<8x8xf32>
    %c0_193 = arith.constant 0 : index
    %c24_194 = arith.constant 24 : index
    %491 = vector.load %arg15[%c0_193, %c24_194] : memref<16x32xf32, #tpu.memory_space<vmem>>, vector<8x8xf32>
    tpu.vector_store %arg15[%c0_193, %c24_194], %490 {strides = array<i32>} : memref<16x32xf32, #tpu.memory_space<vmem>>, vector<8x8xf32>,
    %492 = vector.extract_strided_slice %412 {offsets = [8, 0], sizes = [8, 32], strides = [1, 1]} : vector<16x32xbf16> to vector<8x32xbf16>
    %493 = vector.extract_strided_slice %414 {offsets = [8, 0], sizes = [8, 32], strides = [1, 1]} : vector<16x32xbf16> to vector<8x32xbf16>
    %494 = vector.extract_strided_slice %416 {offsets = [8, 0], sizes = [8, 32], strides = [1, 1]} : vector<16x32xbf16> to vector<8x32xbf16>
    %495 = vector.extract_strided_slice %492 {offsets = [0, 0], sizes = [8, 8], strides = [1, 1]} : vector<8x32xbf16> to vector<8x8xbf16>
    %496 = vector.extract_strided_slice %493 {offsets = [0, 0], sizes = [8, 8], strides = [1, 1]} : vector<8x32xbf16> to vector<8x8xbf16>
    %497 = vector.extract_strided_slice %494 {offsets = [0, 0], sizes = [8, 8], strides = [1, 1]} : vector<8x32xbf16> to vector<8x8xbf16>
    %cst_195 = arith.constant dense<0.000000e+00> : vector<8x8xf32>
    %498 = tpu.matmul %495, %496, %cst_195 {dimension_numbers = #tpu.dot_dimension_numbers<[1], [1], [0], [0], [0, 0, 1, 0], [], []>} : vector<8x8xbf16>, vector<8x8xbf16>, vector<8x8xf32> -> vector<8x8xf32>
    %cst_196 = arith.constant -3.53553382E+9 : f32
    %499 = vector.broadcast %cst_196 : f32 to vector<8x8xf32>
    %500 = arith.select %2, %499, %498 : vector<8x8xi1>, vector<8x8xf32>
    %cst_197 = arith.constant dense<0xFF800000> : vector<8xf32>
    %501 = vector.multi_reduction <maximumf>, %500, %cst_197 [1] : vector<8x8xf32> to vector<8xf32>
    %502 = vector.shape_cast %501 : vector<8xf32> to vector<8x1xf32>
    %503 = vector.broadcast %502 : vector<8x1xf32> to vector<8x8xf32>
    %504 = arith.subf %500, %503 : vector<8x8xf32>
    %505 = math.exp %504 : vector<8x8xf32>
    %cst_198 = arith.constant dense<0.000000e+00> : vector<8xf32>
    %506 = vector.multi_reduction <add>, %505, %cst_198 [1] : vector<8x8xf32> to vector<8xf32>
    %507 = vector.shape_cast %506 : vector<8xf32> to vector<8x1xf32>
    %508 = vector.broadcast %507 : vector<8x1xf32> to vector<8x8xf32>
    %509 = arith.divf %505, %508 : vector<8x8xf32>
    %510 = arith.truncf %509 : vector<8x8xf32> to vector<8x8xbf16>
    %cst_199 = arith.constant dense<0.000000e+00> : vector<8x8xf32>
    %511 = tpu.matmul %510, %497, %cst_199 {dimension_numbers = #tpu.dot_dimension_numbers<[1], [0], [0], [1], [0, 0, 1, 1], [], []>} : vector<8x8xbf16>, vector<8x8xbf16>, vector<8x8xf32> -> vector<8x8xf32>
    %c8_200 = arith.constant 8 : index
    %c0_201 = arith.constant 0 : index
    %512 = vector.load %arg15[%c8_200, %c0_201] : memref<16x32xf32, #tpu.memory_space<vmem>>, vector<8x8xf32>
    tpu.vector_store %arg15[%c8_200, %c0_201], %511 {strides = array<i32>} : memref<16x32xf32, #tpu.memory_space<vmem>>, vector<8x8xf32>,
    %513 = vector.extract_strided_slice %492 {offsets = [0, 8], sizes = [8, 8], strides = [1, 1]} : vector<8x32xbf16> to vector<8x8xbf16>
    %514 = vector.extract_strided_slice %493 {offsets = [0, 8], sizes = [8, 8], strides = [1, 1]} : vector<8x32xbf16> to vector<8x8xbf16>
    %515 = vector.extract_strided_slice %494 {offsets = [0, 8], sizes = [8, 8], strides = [1, 1]} : vector<8x32xbf16> to vector<8x8xbf16>
    %cst_202 = arith.constant dense<0.000000e+00> : vector<8x8xf32>
    %516 = tpu.matmul %513, %514, %cst_202 {dimension_numbers = #tpu.dot_dimension_numbers<[1], [1], [0], [0], [0, 0, 1, 0], [], []>} : vector<8x8xbf16>, vector<8x8xbf16>, vector<8x8xf32> -> vector<8x8xf32>
    %cst_203 = arith.constant -3.53553382E+9 : f32
    %517 = vector.broadcast %cst_203 : f32 to vector<8x8xf32>
    %518 = arith.select %2, %517, %516 : vector<8x8xi1>, vector<8x8xf32>
    %cst_204 = arith.constant dense<0xFF800000> : vector<8xf32>
    %519 = vector.multi_reduction <maximumf>, %518, %cst_204 [1] : vector<8x8xf32> to vector<8xf32>
    %520 = vector.shape_cast %519 : vector<8xf32> to vector<8x1xf32>
    %521 = vector.broadcast %520 : vector<8x1xf32> to vector<8x8xf32>
    %522 = arith.subf %518, %521 : vector<8x8xf32>
    %523 = math.exp %522 : vector<8x8xf32>
    %cst_205 = arith.constant dense<0.000000e+00> : vector<8xf32>
    %524 = vector.multi_reduction <add>, %523, %cst_205 [1] : vector<8x8xf32> to vector<8xf32>
    %525 = vector.shape_cast %524 : vector<8xf32> to vector<8x1xf32>
    %526 = vector.broadcast %525 : vector<8x1xf32> to vector<8x8xf32>
    %527 = arith.divf %523, %526 : vector<8x8xf32>
    %528 = arith.truncf %527 : vector<8x8xf32> to vector<8x8xbf16>
    %cst_206 = arith.constant dense<0.000000e+00> : vector<8x8xf32>
    %529 = tpu.matmul %528, %515, %cst_206 {dimension_numbers = #tpu.dot_dimension_numbers<[1], [0], [0], [1], [0, 0, 1, 1], [], []>} : vector<8x8xbf16>, vector<8x8xbf16>, vector<8x8xf32> -> vector<8x8xf32>
    %c8_207 = arith.constant 8 : index
    %c8_208 = arith.constant 8 : index
    %530 = vector.load %arg15[%c8_207, %c8_208] : memref<16x32xf32, #tpu.memory_space<vmem>>, vector<8x8xf32>
    tpu.vector_store %arg15[%c8_207, %c8_208], %529 {strides = array<i32>} : memref<16x32xf32, #tpu.memory_space<vmem>>, vector<8x8xf32>,
    %531 = vector.extract_strided_slice %492 {offsets = [0, 16], sizes = [8, 8], strides = [1, 1]} : vector<8x32xbf16> to vector<8x8xbf16>
    %532 = vector.extract_strided_slice %493 {offsets = [0, 16], sizes = [8, 8], strides = [1, 1]} : vector<8x32xbf16> to vector<8x8xbf16>
    %533 = vector.extract_strided_slice %494 {offsets = [0, 16], sizes = [8, 8], strides = [1, 1]} : vector<8x32xbf16> to vector<8x8xbf16>
    %cst_209 = arith.constant dense<0.000000e+00> : vector<8x8xf32>
    %534 = tpu.matmul %531, %532, %cst_209 {dimension_numbers = #tpu.dot_dimension_numbers<[1], [1], [0], [0], [0, 0, 1, 0], [], []>} : vector<8x8xbf16>, vector<8x8xbf16>, vector<8x8xf32> -> vector<8x8xf32>
    %cst_210 = arith.constant -3.53553382E+9 : f32
    %535 = vector.broadcast %cst_210 : f32 to vector<8x8xf32>
    %536 = arith.select %2, %535, %534 : vector<8x8xi1>, vector<8x8xf32>
    %cst_211 = arith.constant dense<0xFF800000> : vector<8xf32>
    %537 = vector.multi_reduction <maximumf>, %536, %cst_211 [1] : vector<8x8xf32> to vector<8xf32>
    %538 = vector.shape_cast %537 : vector<8xf32> to vector<8x1xf32>
    %539 = vector.broadcast %538 : vector<8x1xf32> to vector<8x8xf32>
    %540 = arith.subf %536, %539 : vector<8x8xf32>
    %541 = math.exp %540 : vector<8x8xf32>
    %cst_212 = arith.constant dense<0.000000e+00> : vector<8xf32>
    %542 = vector.multi_reduction <add>, %541, %cst_212 [1] : vector<8x8xf32> to vector<8xf32>
    %543 = vector.shape_cast %542 : vector<8xf32> to vector<8x1xf32>
    %544 = vector.broadcast %543 : vector<8x1xf32> to vector<8x8xf32>
    %545 = arith.divf %541, %544 : vector<8x8xf32>
    %546 = arith.truncf %545 : vector<8x8xf32> to vector<8x8xbf16>
    %cst_213 = arith.constant dense<0.000000e+00> : vector<8x8xf32>
    %547 = tpu.matmul %546, %533, %cst_213 {dimension_numbers = #tpu.dot_dimension_numbers<[1], [0], [0], [1], [0, 0, 1, 1], [], []>} : vector<8x8xbf16>, vector<8x8xbf16>, vector<8x8xf32> -> vector<8x8xf32>
    %c8_214 = arith.constant 8 : index
    %c16_215 = arith.constant 16 : index
    %548 = vector.load %arg15[%c8_214, %c16_215] : memref<16x32xf32, #tpu.memory_space<vmem>>, vector<8x8xf32>
    tpu.vector_store %arg15[%c8_214, %c16_215], %547 {strides = array<i32>} : memref<16x32xf32, #tpu.memory_space<vmem>>, vector<8x8xf32>,
    %549 = vector.extract_strided_slice %492 {offsets = [0, 24], sizes = [8, 8], strides = [1, 1]} : vector<8x32xbf16> to vector<8x8xbf16>
    %550 = vector.extract_strided_slice %493 {offsets = [0, 24], sizes = [8, 8], strides = [1, 1]} : vector<8x32xbf16> to vector<8x8xbf16>
    %551 = vector.extract_strided_slice %494 {offsets = [0, 24], sizes = [8, 8], strides = [1, 1]} : vector<8x32xbf16> to vector<8x8xbf16>
    %cst_216 = arith.constant dense<0.000000e+00> : vector<8x8xf32>
    %552 = tpu.matmul %549, %550, %cst_216 {dimension_numbers = #tpu.dot_dimension_numbers<[1], [1], [0], [0], [0, 0, 1, 0], [], []>} : vector<8x8xbf16>, vector<8x8xbf16>, vector<8x8xf32> -> vector<8x8xf32>
    %cst_217 = arith.constant -3.53553382E+9 : f32
    %553 = vector.broadcast %cst_217 : f32 to vector<8x8xf32>
    %554 = arith.select %2, %553, %552 : vector<8x8xi1>, vector<8x8xf32>
    %cst_218 = arith.constant dense<0xFF800000> : vector<8xf32>
    %555 = vector.multi_reduction <maximumf>, %554, %cst_218 [1] : vector<8x8xf32> to vector<8xf32>
    %556 = vector.shape_cast %555 : vector<8xf32> to vector<8x1xf32>
    %557 = vector.broadcast %556 : vector<8x1xf32> to vector<8x8xf32>
    %558 = arith.subf %554, %557 : vector<8x8xf32>
    %559 = math.exp %558 : vector<8x8xf32>
    %cst_219 = arith.constant dense<0.000000e+00> : vector<8xf32>
    %560 = vector.multi_reduction <add>, %559, %cst_219 [1] : vector<8x8xf32> to vector<8xf32>
    %561 = vector.shape_cast %560 : vector<8xf32> to vector<8x1xf32>
    %562 = vector.broadcast %561 : vector<8x1xf32> to vector<8x8xf32>
    %563 = arith.divf %559, %562 : vector<8x8xf32>
    %564 = arith.truncf %563 : vector<8x8xf32> to vector<8x8xbf16>
    %cst_220 = arith.constant dense<0.000000e+00> : vector<8x8xf32>
    %565 = tpu.matmul %564, %551, %cst_220 {dimension_numbers = #tpu.dot_dimension_numbers<[1], [0], [0], [1], [0, 0, 1, 1], [], []>} : vector<8x8xbf16>, vector<8x8xbf16>, vector<8x8xf32> -> vector<8x8xf32>
    %c8_221 = arith.constant 8 : index
    %c24_222 = arith.constant 24 : index
    %566 = vector.load %arg15[%c8_221, %c24_222] : memref<16x32xf32, #tpu.memory_space<vmem>>, vector<8x8xf32>
    tpu.vector_store %arg15[%c8_221, %c24_222], %565 {strides = array<i32>} : memref<16x32xf32, #tpu.memory_space<vmem>>, vector<8x8xf32>,
    %c0_223 = arith.constant 0 : index
    %c0_224 = arith.constant 0 : index
    %567 = vector.load %arg15[%c0_223, %c0_224] : memref<16x32xf32, #tpu.memory_space<vmem>>, vector<16x32xf32>
    %568 = arith.addf %400, %567 : vector<16x32xf32>
    %569 = vector.shape_cast %568 : vector<16x32xf32> to vector<1x16x32xf32>
    %cst_225 = arith.constant dense<0.000000e+00> : vector<1xf32>
    %570 = vector.multi_reduction <add>, %569, %cst_225 [1, 2] : vector<1x16x32xf32> to vector<1xf32>
    %571 = vector.shape_cast %570 : vector<1xf32> to vector<1x1x1xf32>
    %572 = vector.extract %571[0, 0, 0] : f32 from vector<1x1x1xf32>
    %cst_226 = arith.constant 5.120000e+02 : f32
    %573 = arith.divf %572, %cst_226 : f32
    %574 = vector.broadcast %573 : f32 to vector<16x32xf32>
    %575 = arith.subf %568, %574 : vector<16x32xf32>
    %576 = arith.mulf %575, %575 : vector<16x32xf32>
    %577 = vector.shape_cast %576 : vector<16x32xf32> to vector<1x16x32xf32>
    %cst_227 = arith.constant dense<0.000000e+00> : vector<1xf32>
    %578 = vector.multi_reduction <add>, %577, %cst_227 [1, 2] : vector<1x16x32xf32> to vector<1xf32>
    %579 = vector.shape_cast %578 : vector<1xf32> to vector<1x1x1xf32>
    %580 = vector.extract %579[0, 0, 0] : f32 from vector<1x1x1xf32>
    %cst_228 = arith.constant 5.120000e+02 : f32
    %581 = arith.divf %580, %cst_228 : f32
    %cst_229 = arith.constant 9.99999974E-6 : f32
    %582 = arith.addf %581, %cst_229 : f32
    %583 = math.rsqrt %582 : f32
    %584 = vector.broadcast %583 : f32 to vector<16x32xf32>
    %585 = arith.mulf %575, %584 : vector<16x32xf32>
    %586 = arith.truncf %585 : vector<16x32xf32> to vector<16x32xbf16>
    %c1_230 = arith.constant 1 : index
    %c0_231 = arith.constant 0 : index
    %c0_232 = arith.constant 0 : index
    %587 = vector.load %arg4[%c1_230, %c0_231, %c0_232] : memref<2x32x32xbf16, #tpu.memory_space<vmem>>, vector<1x32x32xbf16>
    %588 = vector.shape_cast %587 : vector<1x32x32xbf16> to vector<32x32xbf16>
    %cst_233 = arith.constant dense<0.000000e+00> : vector<16x32xf32>
    %589 = tpu.matmul %586, %588, %cst_233 {dimension_numbers = #tpu.dot_dimension_numbers<[1], [0], [0], [1], [0, 0, 1, 1], [], []>} : vector<16x32xbf16>, vector<32x32xbf16>, vector<16x32xf32> -> vector<16x32xf32>
    %c1_234 = arith.constant 1 : index
    %c0_235 = arith.constant 0 : index
    %c0_236 = arith.constant 0 : index
    %590 = vector.load %arg5[%c1_234, %c0_235, %c0_236] : memref<2x1x32xf32, #tpu.memory_space<vmem>>, vector<1x1x32xf32>
    %591 = vector.shape_cast %590 : vector<1x1x32xf32> to vector<1x32xf32>
    %592 = vector.broadcast %591 : vector<1x32xf32> to vector<16x32xf32>
    %593 = arith.addf %589, %592 : vector<16x32xf32>
    %cst_237 = arith.constant 0.353553385 : f32
    %594 = vector.broadcast %cst_237 : f32 to vector<16x32xf32>
    %595 = arith.mulf %593, %594 : vector<16x32xf32>
    %596 = arith.truncf %595 : vector<16x32xf32> to vector<16x32xbf16>
    %c1_238 = arith.constant 1 : index
    %c0_239 = arith.constant 0 : index
    %c0_240 = arith.constant 0 : index
    %597 = vector.load %arg6[%c1_238, %c0_239, %c0_240] : memref<2x32x64xbf16, #tpu.memory_space<vmem>>, vector<1x32x64xbf16>
    %598 = vector.shape_cast %597 : vector<1x32x64xbf16> to vector<32x64xbf16>
    %cst_241 = arith.constant dense<0.000000e+00> : vector<24x64xf32>
    %599 = tpu.matmul %4, %598, %cst_241 {dimension_numbers = #tpu.dot_dimension_numbers<[1], [0], [0], [1], [0, 0, 1, 1], [], []>} : vector<24x32xbf16>, vector<32x64xbf16>, vector<24x64xf32> -> vector<24x64xf32>
    %c1_242 = arith.constant 1 : index
    %c0_243 = arith.constant 0 : index
    %c0_244 = arith.constant 0 : index
    %600 = vector.load %arg7[%c1_242, %c0_243, %c0_244] : memref<2x1x64xf32, #tpu.memory_space<vmem>>, vector<1x1x64xf32>
    %601 = vector.shape_cast %600 : vector<1x1x64xf32> to vector<1x64xf32>
    %602 = vector.broadcast %601 : vector<1x64xf32> to vector<24x64xf32>
    %603 = arith.addf %599, %602 : vector<24x64xf32>
    %604 = vector.extract_strided_slice %603 {offsets = [0, 0], sizes = [24, 32], strides = [1, 1]} : vector<24x64xf32> to vector<24x32xf32>
    %605 = arith.truncf %604 : vector<24x32xf32> to vector<24x32xbf16>
    %606 = vector.extract_strided_slice %603 {offsets = [0, 32], sizes = [24, 32], strides = [1, 1]} : vector<24x64xf32> to vector<24x32xf32>
    %607 = arith.truncf %606 : vector<24x32xf32> to vector<24x32xbf16>
    %608 = vector.extract_strided_slice %596 {offsets = [0, 0], sizes = [8, 32], strides = [1, 1]} : vector<16x32xbf16> to vector<8x32xbf16>
    %609 = vector.extract_strided_slice %605 {offsets = [0, 0], sizes = [12, 32], strides = [1, 1]} : vector<24x32xbf16> to vector<12x32xbf16>
    %610 = vector.extract_strided_slice %607 {offsets = [0, 0], sizes = [12, 32], strides = [1, 1]} : vector<24x32xbf16> to vector<12x32xbf16>
    %611 = vector.extract_strided_slice %608 {offsets = [0, 0], sizes = [8, 8], strides = [1, 1]} : vector<8x32xbf16> to vector<8x8xbf16>
    %612 = vector.extract_strided_slice %609 {offsets = [0, 0], sizes = [12, 8], strides = [1, 1]} : vector<12x32xbf16> to vector<12x8xbf16>
    %613 = vector.extract_strided_slice %610 {offsets = [0, 0], sizes = [12, 8], strides = [1, 1]} : vector<12x32xbf16> to vector<12x8xbf16>
    %cst_245 = arith.constant dense<0.000000e+00> : vector<8x12xf32>
    %614 = tpu.matmul %611, %612, %cst_245 {dimension_numbers = #tpu.dot_dimension_numbers<[1], [1], [0], [0], [0, 0, 1, 0], [], []>} : vector<8x8xbf16>, vector<12x8xbf16>, vector<8x12xf32> -> vector<8x12xf32>
    %cst_246 = arith.constant dense<0xFF800000> : vector<8xf32>
    %615 = vector.multi_reduction <maximumf>, %614, %cst_246 [1] : vector<8x12xf32> to vector<8xf32>
    %616 = vector.shape_cast %615 : vector<8xf32> to vector<8x1xf32>
    %617 = vector.broadcast %616 : vector<8x1xf32> to vector<8x12xf32>
    %618 = arith.subf %614, %617 : vector<8x12xf32>
    %619 = math.exp %618 : vector<8x12xf32>
    %cst_247 = arith.constant dense<0.000000e+00> : vector<8xf32>
    %620 = vector.multi_reduction <add>, %619, %cst_247 [1] : vector<8x12xf32> to vector<8xf32>
    %621 = vector.shape_cast %620 : vector<8xf32> to vector<8x1xf32>
    %622 = vector.broadcast %621 : vector<8x1xf32> to vector<8x12xf32>
    %623 = arith.divf %619, %622 : vector<8x12xf32>
    %624 = arith.truncf %623 : vector<8x12xf32> to vector<8x12xbf16>
    %cst_248 = arith.constant dense<0.000000e+00> : vector<8x8xf32>
    %625 = tpu.matmul %624, %613, %cst_248 {dimension_numbers = #tpu.dot_dimension_numbers<[1], [0], [0], [1], [0, 0, 1, 1], [], []>} : vector<8x12xbf16>, vector<12x8xbf16>, vector<8x8xf32> -> vector<8x8xf32>
    %c0_249 = arith.constant 0 : index
    %c0_250 = arith.constant 0 : index
    %626 = vector.load %arg15[%c0_249, %c0_250] : memref<16x32xf32, #tpu.memory_space<vmem>>, vector<8x8xf32>
    tpu.vector_store %arg15[%c0_249, %c0_250], %625 {strides = array<i32>} : memref<16x32xf32, #tpu.memory_space<vmem>>, vector<8x8xf32>,
    %627 = vector.extract_strided_slice %608 {offsets = [0, 8], sizes = [8, 8], strides = [1, 1]} : vector<8x32xbf16> to vector<8x8xbf16>
    %628 = vector.extract_strided_slice %609 {offsets = [0, 8], sizes = [12, 8], strides = [1, 1]} : vector<12x32xbf16> to vector<12x8xbf16>
    %629 = vector.extract_strided_slice %610 {offsets = [0, 8], sizes = [12, 8], strides = [1, 1]} : vector<12x32xbf16> to vector<12x8xbf16>
    %cst_251 = arith.constant dense<0.000000e+00> : vector<8x12xf32>
    %630 = tpu.matmul %627, %628, %cst_251 {dimension_numbers = #tpu.dot_dimension_numbers<[1], [1], [0], [0], [0, 0, 1, 0], [], []>} : vector<8x8xbf16>, vector<12x8xbf16>, vector<8x12xf32> -> vector<8x12xf32>
    %cst_252 = arith.constant dense<0xFF800000> : vector<8xf32>
    %631 = vector.multi_reduction <maximumf>, %630, %cst_252 [1] : vector<8x12xf32> to vector<8xf32>
    %632 = vector.shape_cast %631 : vector<8xf32> to vector<8x1xf32>
    %633 = vector.broadcast %632 : vector<8x1xf32> to vector<8x12xf32>
    %634 = arith.subf %630, %633 : vector<8x12xf32>
    %635 = math.exp %634 : vector<8x12xf32>
    %cst_253 = arith.constant dense<0.000000e+00> : vector<8xf32>
    %636 = vector.multi_reduction <add>, %635, %cst_253 [1] : vector<8x12xf32> to vector<8xf32>
    %637 = vector.shape_cast %636 : vector<8xf32> to vector<8x1xf32>
    %638 = vector.broadcast %637 : vector<8x1xf32> to vector<8x12xf32>
    %639 = arith.divf %635, %638 : vector<8x12xf32>
    %640 = arith.truncf %639 : vector<8x12xf32> to vector<8x12xbf16>
    %cst_254 = arith.constant dense<0.000000e+00> : vector<8x8xf32>
    %641 = tpu.matmul %640, %629, %cst_254 {dimension_numbers = #tpu.dot_dimension_numbers<[1], [0], [0], [1], [0, 0, 1, 1], [], []>} : vector<8x12xbf16>, vector<12x8xbf16>, vector<8x8xf32> -> vector<8x8xf32>
    %c0_255 = arith.constant 0 : index
    %c8_256 = arith.constant 8 : index
    %642 = vector.load %arg15[%c0_255, %c8_256] : memref<16x32xf32, #tpu.memory_space<vmem>>, vector<8x8xf32>
    tpu.vector_store %arg15[%c0_255, %c8_256], %641 {strides = array<i32>} : memref<16x32xf32, #tpu.memory_space<vmem>>, vector<8x8xf32>,
    %643 = vector.extract_strided_slice %608 {offsets = [0, 16], sizes = [8, 8], strides = [1, 1]} : vector<8x32xbf16> to vector<8x8xbf16>
    %644 = vector.extract_strided_slice %609 {offsets = [0, 16], sizes = [12, 8], strides = [1, 1]} : vector<12x32xbf16> to vector<12x8xbf16>
    %645 = vector.extract_strided_slice %610 {offsets = [0, 16], sizes = [12, 8], strides = [1, 1]} : vector<12x32xbf16> to vector<12x8xbf16>
    %cst_257 = arith.constant dense<0.000000e+00> : vector<8x12xf32>
    %646 = tpu.matmul %643, %644, %cst_257 {dimension_numbers = #tpu.dot_dimension_numbers<[1], [1], [0], [0], [0, 0, 1, 0], [], []>} : vector<8x8xbf16>, vector<12x8xbf16>, vector<8x12xf32> -> vector<8x12xf32>
    %cst_258 = arith.constant dense<0xFF800000> : vector<8xf32>
    %647 = vector.multi_reduction <maximumf>, %646, %cst_258 [1] : vector<8x12xf32> to vector<8xf32>
    %648 = vector.shape_cast %647 : vector<8xf32> to vector<8x1xf32>
    %649 = vector.broadcast %648 : vector<8x1xf32> to vector<8x12xf32>
    %650 = arith.subf %646, %649 : vector<8x12xf32>
    %651 = math.exp %650 : vector<8x12xf32>
    %cst_259 = arith.constant dense<0.000000e+00> : vector<8xf32>
    %652 = vector.multi_reduction <add>, %651, %cst_259 [1] : vector<8x12xf32> to vector<8xf32>
    %653 = vector.shape_cast %652 : vector<8xf32> to vector<8x1xf32>
    %654 = vector.broadcast %653 : vector<8x1xf32> to vector<8x12xf32>
    %655 = arith.divf %651, %654 : vector<8x12xf32>
    %656 = arith.truncf %655 : vector<8x12xf32> to vector<8x12xbf16>
    %cst_260 = arith.constant dense<0.000000e+00> : vector<8x8xf32>
    %657 = tpu.matmul %656, %645, %cst_260 {dimension_numbers = #tpu.dot_dimension_numbers<[1], [0], [0], [1], [0, 0, 1, 1], [], []>} : vector<8x12xbf16>, vector<12x8xbf16>, vector<8x8xf32> -> vector<8x8xf32>
    %c0_261 = arith.constant 0 : index
    %c16_262 = arith.constant 16 : index
    %658 = vector.load %arg15[%c0_261, %c16_262] : memref<16x32xf32, #tpu.memory_space<vmem>>, vector<8x8xf32>
    tpu.vector_store %arg15[%c0_261, %c16_262], %657 {strides = array<i32>} : memref<16x32xf32, #tpu.memory_space<vmem>>, vector<8x8xf32>,
    %659 = vector.extract_strided_slice %608 {offsets = [0, 24], sizes = [8, 8], strides = [1, 1]} : vector<8x32xbf16> to vector<8x8xbf16>
    %660 = vector.extract_strided_slice %609 {offsets = [0, 24], sizes = [12, 8], strides = [1, 1]} : vector<12x32xbf16> to vector<12x8xbf16>
    %661 = vector.extract_strided_slice %610 {offsets = [0, 24], sizes = [12, 8], strides = [1, 1]} : vector<12x32xbf16> to vector<12x8xbf16>
    %cst_263 = arith.constant dense<0.000000e+00> : vector<8x12xf32>
    %662 = tpu.matmul %659, %660, %cst_263 {dimension_numbers = #tpu.dot_dimension_numbers<[1], [1], [0], [0], [0, 0, 1, 0], [], []>} : vector<8x8xbf16>, vector<12x8xbf16>, vector<8x12xf32> -> vector<8x12xf32>
    %cst_264 = arith.constant dense<0xFF800000> : vector<8xf32>
    %663 = vector.multi_reduction <maximumf>, %662, %cst_264 [1] : vector<8x12xf32> to vector<8xf32>
    %664 = vector.shape_cast %663 : vector<8xf32> to vector<8x1xf32>
    %665 = vector.broadcast %664 : vector<8x1xf32> to vector<8x12xf32>
    %666 = arith.subf %662, %665 : vector<8x12xf32>
    %667 = math.exp %666 : vector<8x12xf32>
    %cst_265 = arith.constant dense<0.000000e+00> : vector<8xf32>
    %668 = vector.multi_reduction <add>, %667, %cst_265 [1] : vector<8x12xf32> to vector<8xf32>
    %669 = vector.shape_cast %668 : vector<8xf32> to vector<8x1xf32>
    %670 = vector.broadcast %669 : vector<8x1xf32> to vector<8x12xf32>
    %671 = arith.divf %667, %670 : vector<8x12xf32>
    %672 = arith.truncf %671 : vector<8x12xf32> to vector<8x12xbf16>
    %cst_266 = arith.constant dense<0.000000e+00> : vector<8x8xf32>
    %673 = tpu.matmul %672, %661, %cst_266 {dimension_numbers = #tpu.dot_dimension_numbers<[1], [0], [0], [1], [0, 0, 1, 1], [], []>} : vector<8x12xbf16>, vector<12x8xbf16>, vector<8x8xf32> -> vector<8x8xf32>
    %c0_267 = arith.constant 0 : index
    %c24_268 = arith.constant 24 : index
    %674 = vector.load %arg15[%c0_267, %c24_268] : memref<16x32xf32, #tpu.memory_space<vmem>>, vector<8x8xf32>
    tpu.vector_store %arg15[%c0_267, %c24_268], %673 {strides = array<i32>} : memref<16x32xf32, #tpu.memory_space<vmem>>, vector<8x8xf32>,
    %675 = vector.extract_strided_slice %596 {offsets = [8, 0], sizes = [8, 32], strides = [1, 1]} : vector<16x32xbf16> to vector<8x32xbf16>
    %676 = vector.extract_strided_slice %605 {offsets = [12, 0], sizes = [12, 32], strides = [1, 1]} : vector<24x32xbf16> to vector<12x32xbf16>
    %677 = vector.extract_strided_slice %607 {offsets = [12, 0], sizes = [12, 32], strides = [1, 1]} : vector<24x32xbf16> to vector<12x32xbf16>
    %678 = vector.extract_strided_slice %675 {offsets = [0, 0], sizes = [8, 8], strides = [1, 1]} : vector<8x32xbf16> to vector<8x8xbf16>
    %679 = vector.extract_strided_slice %676 {offsets = [0, 0], sizes = [12, 8], strides = [1, 1]} : vector<12x32xbf16> to vector<12x8xbf16>
    %680 = vector.extract_strided_slice %677 {offsets = [0, 0], sizes = [12, 8], strides = [1, 1]} : vector<12x32xbf16> to vector<12x8xbf16>
    %cst_269 = arith.constant dense<0.000000e+00> : vector<8x12xf32>
    %681 = tpu.matmul %678, %679, %cst_269 {dimension_numbers = #tpu.dot_dimension_numbers<[1], [1], [0], [0], [0, 0, 1, 0], [], []>} : vector<8x8xbf16>, vector<12x8xbf16>, vector<8x12xf32> -> vector<8x12xf32>
    %cst_270 = arith.constant dense<0xFF800000> : vector<8xf32>
    %682 = vector.multi_reduction <maximumf>, %681, %cst_270 [1] : vector<8x12xf32> to vector<8xf32>
    %683 = vector.shape_cast %682 : vector<8xf32> to vector<8x1xf32>
    %684 = vector.broadcast %683 : vector<8x1xf32> to vector<8x12xf32>
    %685 = arith.subf %681, %684 : vector<8x12xf32>
    %686 = math.exp %685 : vector<8x12xf32>
    %cst_271 = arith.constant dense<0.000000e+00> : vector<8xf32>
    %687 = vector.multi_reduction <add>, %686, %cst_271 [1] : vector<8x12xf32> to vector<8xf32>
    %688 = vector.shape_cast %687 : vector<8xf32> to vector<8x1xf32>
    %689 = vector.broadcast %688 : vector<8x1xf32> to vector<8x12xf32>
    %690 = arith.divf %686, %689 : vector<8x12xf32>
    %691 = arith.truncf %690 : vector<8x12xf32> to vector<8x12xbf16>
    %cst_272 = arith.constant dense<0.000000e+00> : vector<8x8xf32>
    %692 = tpu.matmul %691, %680, %cst_272 {dimension_numbers = #tpu.dot_dimension_numbers<[1], [0], [0], [1], [0, 0, 1, 1], [], []>} : vector<8x12xbf16>, vector<12x8xbf16>, vector<8x8xf32> -> vector<8x8xf32>
    %c8_273 = arith.constant 8 : index
    %c0_274 = arith.constant 0 : index
    %693 = vector.load %arg15[%c8_273, %c0_274] : memref<16x32xf32, #tpu.memory_space<vmem>>, vector<8x8xf32>
    tpu.vector_store %arg15[%c8_273, %c0_274], %692 {strides = array<i32>} : memref<16x32xf32, #tpu.memory_space<vmem>>, vector<8x8xf32>,
    %694 = vector.extract_strided_slice %675 {offsets = [0, 8], sizes = [8, 8], strides = [1, 1]} : vector<8x32xbf16> to vector<8x8xbf16>
    %695 = vector.extract_strided_slice %676 {offsets = [0, 8], sizes = [12, 8], strides = [1, 1]} : vector<12x32xbf16> to vector<12x8xbf16>
    %696 = vector.extract_strided_slice %677 {offsets = [0, 8], sizes = [12, 8], strides = [1, 1]} : vector<12x32xbf16> to vector<12x8xbf16>
    %cst_275 = arith.constant dense<0.000000e+00> : vector<8x12xf32>
    %697 = tpu.matmul %694, %695, %cst_275 {dimension_numbers = #tpu.dot_dimension_numbers<[1], [1], [0], [0], [0, 0, 1, 0], [], []>} : vector<8x8xbf16>, vector<12x8xbf16>, vector<8x12xf32> -> vector<8x12xf32>
    %cst_276 = arith.constant dense<0xFF800000> : vector<8xf32>
    %698 = vector.multi_reduction <maximumf>, %697, %cst_276 [1] : vector<8x12xf32> to vector<8xf32>
    %699 = vector.shape_cast %698 : vector<8xf32> to vector<8x1xf32>
    %700 = vector.broadcast %699 : vector<8x1xf32> to vector<8x12xf32>
    %701 = arith.subf %697, %700 : vector<8x12xf32>
    %702 = math.exp %701 : vector<8x12xf32>
    %cst_277 = arith.constant dense<0.000000e+00> : vector<8xf32>
    %703 = vector.multi_reduction <add>, %702, %cst_277 [1] : vector<8x12xf32> to vector<8xf32>
    %704 = vector.shape_cast %703 : vector<8xf32> to vector<8x1xf32>
    %705 = vector.broadcast %704 : vector<8x1xf32> to vector<8x12xf32>
    %706 = arith.divf %702, %705 : vector<8x12xf32>
    %707 = arith.truncf %706 : vector<8x12xf32> to vector<8x12xbf16>
    %cst_278 = arith.constant dense<0.000000e+00> : vector<8x8xf32>
    %708 = tpu.matmul %707, %696, %cst_278 {dimension_numbers = #tpu.dot_dimension_numbers<[1], [0], [0], [1], [0, 0, 1, 1], [], []>} : vector<8x12xbf16>, vector<12x8xbf16>, vector<8x8xf32> -> vector<8x8xf32>
    %c8_279 = arith.constant 8 : index
    %c8_280 = arith.constant 8 : index
    %709 = vector.load %arg15[%c8_279, %c8_280] : memref<16x32xf32, #tpu.memory_space<vmem>>, vector<8x8xf32>
    tpu.vector_store %arg15[%c8_279, %c8_280], %708 {strides = array<i32>} : memref<16x32xf32, #tpu.memory_space<vmem>>, vector<8x8xf32>,
    %710 = vector.extract_strided_slice %675 {offsets = [0, 16], sizes = [8, 8], strides = [1, 1]} : vector<8x32xbf16> to vector<8x8xbf16>
    %711 = vector.extract_strided_slice %676 {offsets = [0, 16], sizes = [12, 8], strides = [1, 1]} : vector<12x32xbf16> to vector<12x8xbf16>
    %712 = vector.extract_strided_slice %677 {offsets = [0, 16], sizes = [12, 8], strides = [1, 1]} : vector<12x32xbf16> to vector<12x8xbf16>
    %cst_281 = arith.constant dense<0.000000e+00> : vector<8x12xf32>
    %713 = tpu.matmul %710, %711, %cst_281 {dimension_numbers = #tpu.dot_dimension_numbers<[1], [1], [0], [0], [0, 0, 1, 0], [], []>} : vector<8x8xbf16>, vector<12x8xbf16>, vector<8x12xf32> -> vector<8x12xf32>
    %cst_282 = arith.constant dense<0xFF800000> : vector<8xf32>
    %714 = vector.multi_reduction <maximumf>, %713, %cst_282 [1] : vector<8x12xf32> to vector<8xf32>
    %715 = vector.shape_cast %714 : vector<8xf32> to vector<8x1xf32>
    %716 = vector.broadcast %715 : vector<8x1xf32> to vector<8x12xf32>
    %717 = arith.subf %713, %716 : vector<8x12xf32>
    %718 = math.exp %717 : vector<8x12xf32>
    %cst_283 = arith.constant dense<0.000000e+00> : vector<8xf32>
    %719 = vector.multi_reduction <add>, %718, %cst_283 [1] : vector<8x12xf32> to vector<8xf32>
    %720 = vector.shape_cast %719 : vector<8xf32> to vector<8x1xf32>
    %721 = vector.broadcast %720 : vector<8x1xf32> to vector<8x12xf32>
    %722 = arith.divf %718, %721 : vector<8x12xf32>
    %723 = arith.truncf %722 : vector<8x12xf32> to vector<8x12xbf16>
    %cst_284 = arith.constant dense<0.000000e+00> : vector<8x8xf32>
    %724 = tpu.matmul %723, %712, %cst_284 {dimension_numbers = #tpu.dot_dimension_numbers<[1], [0], [0], [1], [0, 0, 1, 1], [], []>} : vector<8x12xbf16>, vector<12x8xbf16>, vector<8x8xf32> -> vector<8x8xf32>
    %c8_285 = arith.constant 8 : index
    %c16_286 = arith.constant 16 : index
    %725 = vector.load %arg15[%c8_285, %c16_286] : memref<16x32xf32, #tpu.memory_space<vmem>>, vector<8x8xf32>
    tpu.vector_store %arg15[%c8_285, %c16_286], %724 {strides = array<i32>} : memref<16x32xf32, #tpu.memory_space<vmem>>, vector<8x8xf32>,
    %726 = vector.extract_strided_slice %675 {offsets = [0, 24], sizes = [8, 8], strides = [1, 1]} : vector<8x32xbf16> to vector<8x8xbf16>
    %727 = vector.extract_strided_slice %676 {offsets = [0, 24], sizes = [12, 8], strides = [1, 1]} : vector<12x32xbf16> to vector<12x8xbf16>
    %728 = vector.extract_strided_slice %677 {offsets = [0, 24], sizes = [12, 8], strides = [1, 1]} : vector<12x32xbf16> to vector<12x8xbf16>
    %cst_287 = arith.constant dense<0.000000e+00> : vector<8x12xf32>
    %729 = tpu.matmul %726, %727, %cst_287 {dimension_numbers = #tpu.dot_dimension_numbers<[1], [1], [0], [0], [0, 0, 1, 0], [], []>} : vector<8x8xbf16>, vector<12x8xbf16>, vector<8x12xf32> -> vector<8x12xf32>
    %cst_288 = arith.constant dense<0xFF800000> : vector<8xf32>
    %730 = vector.multi_reduction <maximumf>, %729, %cst_288 [1] : vector<8x12xf32> to vector<8xf32>
    %731 = vector.shape_cast %730 : vector<8xf32> to vector<8x1xf32>
    %732 = vector.broadcast %731 : vector<8x1xf32> to vector<8x12xf32>
    %733 = arith.subf %729, %732 : vector<8x12xf32>
    %734 = math.exp %733 : vector<8x12xf32>
    %cst_289 = arith.constant dense<0.000000e+00> : vector<8xf32>
    %735 = vector.multi_reduction <add>, %734, %cst_289 [1] : vector<8x12xf32> to vector<8xf32>
    %736 = vector.shape_cast %735 : vector<8xf32> to vector<8x1xf32>
    %737 = vector.broadcast %736 : vector<8x1xf32> to vector<8x12xf32>
    %738 = arith.divf %734, %737 : vector<8x12xf32>
    %739 = arith.truncf %738 : vector<8x12xf32> to vector<8x12xbf16>
    %cst_290 = arith.constant dense<0.000000e+00> : vector<8x8xf32>
    %740 = tpu.matmul %739, %728, %cst_290 {dimension_numbers = #tpu.dot_dimension_numbers<[1], [0], [0], [1], [0, 0, 1, 1], [], []>} : vector<8x12xbf16>, vector<12x8xbf16>, vector<8x8xf32> -> vector<8x8xf32>
    %c8_291 = arith.constant 8 : index
    %c24_292 = arith.constant 24 : index
    %741 = vector.load %arg15[%c8_291, %c24_292] : memref<16x32xf32, #tpu.memory_space<vmem>>, vector<8x8xf32>
    tpu.vector_store %arg15[%c8_291, %c24_292], %740 {strides = array<i32>} : memref<16x32xf32, #tpu.memory_space<vmem>>, vector<8x8xf32>,
    %c0_293 = arith.constant 0 : index
    %c0_294 = arith.constant 0 : index
    %742 = vector.load %arg15[%c0_293, %c0_294] : memref<16x32xf32, #tpu.memory_space<vmem>>, vector<16x32xf32>
    %743 = arith.addf %585, %742 : vector<16x32xf32>
    %744 = vector.shape_cast %743 : vector<16x32xf32> to vector<1x16x32xf32>
    %cst_295 = arith.constant dense<0.000000e+00> : vector<1xf32>
    %745 = vector.multi_reduction <add>, %744, %cst_295 [1, 2] : vector<1x16x32xf32> to vector<1xf32>
    %746 = vector.shape_cast %745 : vector<1xf32> to vector<1x1x1xf32>
    %747 = vector.extract %746[0, 0, 0] : f32 from vector<1x1x1xf32>
    %cst_296 = arith.constant 5.120000e+02 : f32
    %748 = arith.divf %747, %cst_296 : f32
    %749 = vector.broadcast %748 : f32 to vector<16x32xf32>
    %750 = arith.subf %743, %749 : vector<16x32xf32>
    %751 = arith.mulf %750, %750 : vector<16x32xf32>
    %752 = vector.shape_cast %751 : vector<16x32xf32> to vector<1x16x32xf32>
    %cst_297 = arith.constant dense<0.000000e+00> : vector<1xf32>
    %753 = vector.multi_reduction <add>, %752, %cst_297 [1, 2] : vector<1x16x32xf32> to vector<1xf32>
    %754 = vector.shape_cast %753 : vector<1xf32> to vector<1x1x1xf32>
    %755 = vector.extract %754[0, 0, 0] : f32 from vector<1x1x1xf32>
    %cst_298 = arith.constant 5.120000e+02 : f32
    %756 = arith.divf %755, %cst_298 : f32
    %cst_299 = arith.constant 9.99999974E-6 : f32
    %757 = arith.addf %756, %cst_299 : f32
    %758 = math.rsqrt %757 : f32
    %759 = vector.broadcast %758 : f32 to vector<16x32xf32>
    %760 = arith.mulf %750, %759 : vector<16x32xf32>
    %c1_300 = arith.constant 1 : index
    %c0_301 = arith.constant 0 : index
    %c0_302 = arith.constant 0 : index
    %761 = vector.load %arg8[%c1_300, %c0_301, %c0_302] : memref<2x32x128xbf16, #tpu.memory_space<vmem>>, vector<1x32x128xbf16>
    %762 = vector.shape_cast %761 : vector<1x32x128xbf16> to vector<32x128xbf16>
    %c1_303 = arith.constant 1 : index
    %c0_304 = arith.constant 0 : index
    %c0_305 = arith.constant 0 : index
    %763 = vector.load %arg9[%c1_303, %c0_304, %c0_305] : memref<2x1x128xf32, #tpu.memory_space<vmem>>, vector<1x1x128xf32>
    %764 = vector.shape_cast %763 : vector<1x1x128xf32> to vector<1x128xf32>
    %c1_306 = arith.constant 1 : index
    %c0_307 = arith.constant 0 : index
    %c0_308 = arith.constant 0 : index
    %765 = vector.load %arg10[%c1_306, %c0_307, %c0_308] : memref<2x128x32xbf16, #tpu.memory_space<vmem>>, vector<1x128x32xbf16>
    %766 = vector.shape_cast %765 : vector<1x128x32xbf16> to vector<128x32xbf16>
    %c1_309 = arith.constant 1 : index
    %c0_310 = arith.constant 0 : index
    %c0_311 = arith.constant 0 : index
    %767 = vector.load %arg11[%c1_309, %c0_310, %c0_311] : memref<2x1x32xf32, #tpu.memory_space<vmem>>, vector<1x1x32xf32>
    %768 = vector.shape_cast %767 : vector<1x1x32xf32> to vector<1x32xf32>
    %769 = arith.truncf %760 : vector<16x32xf32> to vector<16x32xbf16>
    %cst_312 = arith.constant dense<0.000000e+00> : vector<16x128xf32>
    %770 = tpu.matmul %769, %762, %cst_312 {dimension_numbers = #tpu.dot_dimension_numbers<[1], [0], [0], [1], [0, 0, 1, 1], [], []>} : vector<16x32xbf16>, vector<32x128xbf16>, vector<16x128xf32> -> vector<16x128xf32>
    %771 = vector.broadcast %764 : vector<1x128xf32> to vector<16x128xf32>
    %772 = arith.addf %770, %771 : vector<16x128xf32>
    %cst_313 = arith.constant 0.000000e+00 : f32
    %773 = vector.broadcast %cst_313 : f32 to vector<16x128xf32>
    %774 = arith.maximumf %772, %773 : vector<16x128xf32>
    %775 = arith.truncf %774 : vector<16x128xf32> to vector<16x128xbf16>
    %cst_314 = arith.constant dense<0.000000e+00> : vector<16x32xf32>
    %776 = tpu.matmul %775, %766, %cst_314 {dimension_numbers = #tpu.dot_dimension_numbers<[1], [0], [0], [1], [0, 0, 1, 1], [], []>} : vector<16x128xbf16>, vector<128x32xbf16>, vector<16x32xf32> -> vector<16x32xf32>
    %777 = vector.broadcast %768 : vector<1x32xf32> to vector<16x32xf32>
    %778 = arith.addf %776, %777 : vector<16x32xf32>
    %779 = arith.addf %760, %778 : vector<16x32xf32>
    %780 = vector.shape_cast %779 : vector<16x32xf32> to vector<1x16x32xf32>
    %cst_315 = arith.constant dense<0.000000e+00> : vector<1xf32>
    %781 = vector.multi_reduction <add>, %780, %cst_315 [1, 2] : vector<1x16x32xf32> to vector<1xf32>
    %782 = vector.shape_cast %781 : vector<1xf32> to vector<1x1x1xf32>
    %783 = vector.extract %782[0, 0, 0] : f32 from vector<1x1x1xf32>
    %cst_316 = arith.constant 5.120000e+02 : f32
    %784 = arith.divf %783, %cst_316 : f32
    %785 = vector.broadcast %784 : f32 to vector<16x32xf32>
    %786 = arith.subf %779, %785 : vector<16x32xf32>
    %787 = arith.mulf %786, %786 : vector<16x32xf32>
    %788 = vector.shape_cast %787 : vector<16x32xf32> to vector<1x16x32xf32>
    %cst_317 = arith.constant dense<0.000000e+00> : vector<1xf32>
    %789 = vector.multi_reduction <add>, %788, %cst_317 [1, 2] : vector<1x16x32xf32> to vector<1xf32>
    %790 = vector.shape_cast %789 : vector<1xf32> to vector<1x1x1xf32>
    %791 = vector.extract %790[0, 0, 0] : f32 from vector<1x1x1xf32>
    %cst_318 = arith.constant 5.120000e+02 : f32
    %792 = arith.divf %791, %cst_318 : f32
    %cst_319 = arith.constant 9.99999974E-6 : f32
    %793 = arith.addf %792, %cst_319 : f32
    %794 = math.rsqrt %793 : f32
    %795 = vector.broadcast %794 : f32 to vector<16x32xf32>
    %796 = arith.mulf %786, %795 : vector<16x32xf32>
    %797 = arith.truncf %796 : vector<16x32xf32> to vector<16x32xbf16>
    %c0_320 = arith.constant 0 : index
    %c0_321 = arith.constant 0 : index
    %798 = vector.load %arg12[%c0_320, %c0_321] : memref<32x128xbf16, #tpu.memory_space<vmem>>, vector<32x128xbf16>
    %cst_322 = arith.constant dense<0.000000e+00> : vector<16x128xf32>
    %799 = tpu.matmul %797, %798, %cst_322 {dimension_numbers = #tpu.dot_dimension_numbers<[1], [0], [0], [1], [0, 0, 1, 1], [], []>} : vector<16x32xbf16>, vector<32x128xbf16>, vector<16x128xf32> -> vector<16x128xf32>
    %c0_323 = arith.constant 0 : index
    %c0_324 = arith.constant 0 : index
    %800 = vector.load %arg13[%c0_323, %c0_324] : memref<1x128xf32, #tpu.memory_space<vmem>>, vector<1x128xf32>
    %801 = vector.broadcast %800 : vector<1x128xf32> to vector<16x128xf32>
    %802 = arith.addf %799, %801 : vector<16x128xf32>
    %c0_325 = arith.constant 0 : index
    %c0_326 = arith.constant 0 : index
    %803 = vector.load %arg14[%c0_325, %c0_326] : memref<16x128xf32, #tpu.memory_space<vmem>>, vector<16x128xf32>
    tpu.vector_store %arg14[%c0_325, %c0_326], %802 {strides = array<i32>} : memref<16x128xf32, #tpu.memory_space<vmem>>, vector<16x128xf32>,
    return
  }
}

</mosaic_0001>

<bundles_post_ra>
// kernel: transformer_forward.2
= control target key start
LH: loop header
LB: loop body
LE: loop exit
PB: predicated region body
PF: predicated region fallthrough
CT: control target
= control target key end

     0   :  { %vm63_vm0 = vcmask 261120   ;;  %v3694_v8 = vmov 0.0   ;;  %vm3695_vm1 = vmmov 0   ;;  %s3696_s17 = smov 96   ;;  %vm128_vm2 = vcmask 64512   ;;  %s3698_s20 = smov 64   ;;  %s4615_s2 = inlined_call_operand.vmem [shape: bf16[2,32,96], index: 2, kind: input, shape index: {}]   ;;  %s4616_s0 = inlined_call_operand.vmem [shape: f32[24,32], index: 0, kind: input, shape index: {}]   ;;  %s4617_s3 = inlined_call_operand.vmem [shape: f32[2,1,96], index: 3, kind: input, shape index: {}]   ;;  %s4618_s1 = inlined_call_operand.vmem [shape: s32[2,1,12], index: 1, kind: input, shape index: {}]   ;;  %s4619_s4 = inlined_call_operand.vmem [shape: bf16[2,32,128], index: 4, kind: input, shape index: {}]   ;;  %s4620_s6 = inlined_call_operand.vmem [shape: bf16[2,128,32], index: 6, kind: input, shape index: {}]   ;;  %s4621_s5 = inlined_call_operand.vmem [shape: f32[2,1,128], index: 5, kind: input, shape index: {}]   ;;  %s4622_s7 = inlined_call_operand.vmem [shape: f32[2,1,32], index: 7, kind: input, shape index: {}]   ;;  %s4623_s8 = inlined_call_operand.vmem [shape: bf16[24,32], index: 8, kind: output, shape index: {}]  }
   0x1   :  { %v3531_v0 = vld [vmem:[%s4615_s2 + $0x8] sm:$0xff]   ;;  %v3532_v1 = vld [vmem:[%s4615_s2] sm:$0xff]   ;;  %v37_v4 = vld [vmem:[%s4616_s0 + $0x10] sm:$0xff]  ;;  %3252 = vmatprep.subr.bf16.mxu0 %v3694_v8  ;;  %3254 = vmatprep.mubr.msk.bf16.mxu0 %vm3695_vm1, %v3694_v8  ;;  %v177_v22 = vlaneseq  ;;  %v3697_v26 = vmov 0   ;;  %vm184_vm5 = vcmask 97280   ;;  %vm188_vm6 = vcmask 93184  }
   0x2   :  { %3226 = vmatprep.subr.bf16.mxu1 %v3531_v0  ;;  %v35_v2 = vld [vmem:[%s4616_s0] sm:$0xff]  ;;  %v36_v3 = vld [vmem:[%s4616_s0 + $0x8] sm:$0xff]  ;;  %v39_v6 = vpack.c.bf16 %v37_v4, %v37_v4  ;;  %s3699_s21 = smov 80   ;;  %vm675_vm7 = vcmask 1041408   ;;  %s3700_s22 = smov 120   ;;  %vm214_vm8 = vcmask 1045504  }
   0x3   :  { %3227 = vmatpush3.bf16.msra.mxu1 %v3531_v0  ;;  %v38_v5 = vpack.c.bf16 %v36_v3, %v35_v2  ;;  %v3023_v7 = vld [vmem:[%s4617_s3] ss:$0 sm:$0xff]  ;;  %v3799_v24 = vshrl.u32 %v177_v22, 7  ;;  %s3701_s23 = smov 112   ;;  %s3702_s24 = smov 104   ;;  %vm260_vm9 = vcmask 60416  }
   0x4   :  { %3228 = vmatprep.subr.bf16.mxu1 %v3532_v1  ;;  %v30_v23 = vld [vmem:[%s4618_s1] sm:$0x1]  ;;  %s3703_s25 = smov 88   ;;  %s3704_s26 = smov 72   ;;  %vm396_vm12 = vcmask 130112   ;;  %vm398_vm13 = vcmask 126016  }
   0x5   :  { %3230 = vmatprep.mubr.msk.bf16.mxu1 %vm63_vm0, %v38_v5  ;;  %vm31_vm3 = vcmp.ne.s32.totalorder %v30_v23, 0  ;;  %v179_v25 = vsub.s32 0, %v3799_v24  ;;  %s3706_s29 = smov 48   ;;  %s3707_s30 = smov 40   ;;  %vm533_vm14 = vcmask 195712   ;;  %vm535_vm15 = vcmask 191616  }
   0x6   :  { %v176_v27 = vsel %vm31_vm3, 1, %v3697_v26  ;;  %s3708_s9 = smov 8   ;;  %s3709_s10 = smov 16   ;;  %vm670_vm3 = vcmask 261312  }
   0x7   :  { %3229 = vmatpush3.bf16.msra.mxu1 %v3532_v1  ;;  %v3805_v28 = vrot.slane %v176_v27, %v179_v25  ;;  %s3710_s11 = smov 24  }
   0x8   :  { %3234 = vmatprep.subr.bf16.mxu1 %v3694_v8 }
   0x9   :  { %vm181_vm4 = vcmp.eq.s32.totalorder %v3805_v28, 1 }
   0xa   :  { %3231 = vmatmul.mubr.msk.bf16.vlgmr.msra.gmra.mxu1 %vm63_vm0, %v39_v6 }
   0xb   :  { %3236 = vmatprep.mubr.msk.bf16.mxu1 %vm3695_vm1, %v3694_v8 }
  0xca   :  { %v3232_v9 = vpop.f32.mrf.mxu1 }
  0xcb   :  { %v3782_v10 = vadd.f32 %v3232_v9, %v3023_v7 }
  0xcc   :  { %v104_v11 = vpop.f32.mrf.mxu1 }
  0xcd   :  { %v105_v13 = vadd.f32 %v3023_v7, %v104_v11  ;;  %v120_v37 = vmul.f32 0.35355338, %v3782_v10  ;;  %v124_v54 = vpack.c.bf16 %v3782_v10, %v3782_v10 }
  0xce   :  { %v3233_v12 = vpop.f32.mrf.mxu1 }
  0xcf   :  { %v118_v16 = vmul.f32 0.35355338, %v105_v13  ;;  %v122_v38 = vpack.c.bf16 %v120_v37, %v120_v37  ;;  %v681_v56 = vrot.slane %v124_v54, 6 }
  0xd0   :  { %v107_v14 = vpop.f32.mrf.mxu1 }
  0xd1   :  { %v108_v15 = vadd.f32 %v3023_v7, %v107_v14  ;;  %v677_v40 = vrot.slane %v122_v38, 6 }
  0xd3   :  { %v119_v17 = vmul.f32 0.35355338, %v108_v15  ;;  %v3784_v18 = vpack.c.bf16 %v108_v15, %v105_v13 }
  0xd5   :  { %v3786_v19 = vpack.c.bf16 %v119_v17, %v118_v16  ;;  %126 = vrot.lane.b32.xlu0 %v3784_v18, %s3696_s17  ;;  %v680_v55 = vrot.slane %v3784_v18, 6 }
  0xd7   :  { %v676_v39 = vrot.slane %v3786_v19, 6  ;;  %v3847_v57 = vsel %vm675_vm7, %v680_v55, %v681_v56 }
  0xd9   :  { %v3821_v41 = vsel %vm675_vm7, %v676_v39, %v677_v40 }
 0x147   :  { %v127_v20 = vpop.permute.xlu0 %126 }
 0x148   :  { %v133_v21 = vsel %vm128_vm2, %v127_v20, 0 }
 0x149   :  { %3235 = vmatpush3.bf16.xpose.msra.mxu1 %v133_v21 }
 0x14a   :  { %3240 = vmatprep.subr.bf16.mxu1 %v3694_v8 }
 0x150   :  { %3237 = vmatmul.mubr.msk.bf16.vlgmr.msra.gmra.mxu1 %vm128_vm2, %v3786_v19 }
 0x151   :  { %3242 = vmatprep.mubr.msk.bf16.mxu1 %vm3695_vm1, %v3694_v8 }
 0x210   :  { %v169_v29 = vpop.f32.mrf.mxu1 }
 0x211   :  { %v182_v30 = vsel %vm181_vm4, -3.5355338e+09, %v169_v29 }
 0x212   :  { %v3238_v31 = vpop.f32.mrf.mxu1  ;;  %v185_v32 = vsel %vm184_vm5, %v182_v30, -inf }
 0x213   :  { %186 = vmax.xlane.f32.xlu0 %v185_v32 }
 0x214   :  { %v172_v33 = vpop.f32.mrf.mxu1 }
 0x215   :  { %v183_v34 = vsel %vm181_vm4, -3.5355338e+09, %v172_v33 }
 0x216   :  { %v3239_v35 = vpop.f32.mrf.mxu1  ;;  %v189_v36 = vsel %vm188_vm6, %v183_v34, -inf }
 0x217   :  { %190 = vmax.xlane.f32.xlu1 %v189_v36 }
 0x228   :  { %209 = vrot.lane.b32.xlu1 %v3784_v18, %s3698_s20 }
 0x229   :  { %402 = vrot.lane.b32.xlu0 %v3784_v18, %s3699_s21 }
 0x22d   :  { %814 = vrot.lane.b32.xlu0 %v3821_v41, %s3700_s22 }
 0x231   :  { %949 = vrot.lane.b32.xlu0 %v3821_v41, %s3701_s23 }
 0x235   :  { %1084 = vrot.lane.b32.xlu0 %v3821_v41, %s3702_s24 }
 0x29c   :  { %v187_v42 = vpop.xlane.xlu0 %186 }
 0x29d   :  { %v192_v43 = vsub.f32 %v182_v30, %v187_v42 }
 0x29f   :  { %v194_v44 = vmul.f32 1.442695, %v192_v43 }
 0x2a0   :  { %v191_v45 = vpop.xlane.xlu1 %190  ;;  %v403_v5 = vpop.permute.xlu0 %402 }
 0x2a1   :  { %3555 = vpow2.f32 %v194_v44  ;;  %v193_v46 = vsub.f32 %v183_v34, %v191_v45  ;;  %v408_v6 = vsel %vm128_vm2, %v403_v5, 0 }
 0x2a3   :  { %v196_v47 = vmul.f32 1.442695, %v193_v46 }
 0x2a4   :  { %v210_v48 = vpop.permute.xlu1 %209  ;;  %v815_v16 = vpop.permute.xlu0 %814 }
 0x2a5   :  { %3557 = vpow2.f32 %v196_v47  ;;  %v216_v49 = vsel %vm214_vm8, %v210_v48, 0 }
 0x2a6   :  { %3241 = vmatpush3.bf16.msra.mxu1 %v216_v49 }
 0x2a7   :  { %3246 = vmatprep.subr.bf16.mxu1 %v3694_v8 }
 0x2a8   :  { %v950_v20 = vpop.permute.xlu0 %949 }
 0x2ac   :  { %v1085_v22 = vpop.permute.xlu0 %1084 }
 0x2ae   :  { %v3556_v50 = vpop.eup %3555 }
 0x2af   :  { %v198_v51 = vsel %vm184_vm5, %v3556_v50, 0.0 }
 0x2b0   :  { %199 = vadd.xlane.f32.xlu1 %v198_v51 }
 0x2b2   :  { %v3558_v52 = vpop.eup %3557 }
 0x2b3   :  { %v201_v53 = vsel %vm188_vm6, %v3558_v52, 0.0 }
 0x2b4   :  { %202 = vadd.xlane.f32.xlu1 %v201_v53 }
 0x2c5   :  { %265 = vrot.lane.b32.xlu1 %v3784_v18, %s3703_s25 }
 0x2c9   :  { %263 = vrot.lane.b32.xlu1 %v3786_v19, %s3700_s22 }
 0x2cd   :  { %400 = vrot.lane.b32.xlu1 %v3786_v19, %s3701_s23 }
 0x2d1   :  { %539 = vrot.lane.b32.xlu1 %v3784_v18, %s3704_s26 }
 0x2d5   :  { %537 = vrot.lane.b32.xlu1 %v3786_v19, %s3702_s24 }
 0x2d9   :  { %683 = vrot.lane.b32.xlu1 %v3847_v57, %s3696_s17 }
 0x2dd   :  { %816 = vrot.lane.b32.xlu1 %v3847_v57, %s3703_s25 }
 0x2e1   :  { %951 = vrot.lane.b32.xlu1 %v3847_v57, %s3699_s21 }
 0x2e5   :  { %1086 = vrot.lane.b32.xlu1 %v3847_v57, %s3704_s26 }
 0x339   :  { %v200_v58 = vpop.xlane.xlu1 %199 }
 0x33a   :  { %3559 = vrcp.f32 %v200_v58 }
 0x33d   :  { %v203_v59 = vpop.xlane.xlu1 %202 }
 0x33e   :  { %3561 = vrcp.f32 %v203_v59 }
 0x341   :  { %v266_v60 = vpop.permute.xlu1 %265 }
 0x342   :  { %v271_v3 = vsel %vm128_vm2, %v266_v60, 0 }
 0x345   :  { %v264_v1 = vpop.permute.xlu1 %263 }
 0x347   :  { %v3560_v61 = vpop.eup %3559 }
 0x348   :  { %v205_v63 = vmul.f32 %v3560_v61, %v3556_v50 }
 0x349   :  { %v401_v4 = vpop.permute.xlu1 %400 }
 0x34b   :  { %v3562_v62 = vpop.eup %3561 }
 0x34c   :  { %v207_v0 = vmul.f32 %v3562_v62, %v3558_v52 }
 0x34d   :  { %v540_v7 = vpop.permute.xlu1 %539 }
 0x34e   :  { %v208_v2 = vpack.c.bf16 %v207_v0, %v205_v63  ;;  %v545_v10 = vsel %vm128_vm2, %v540_v7, 0 }
 0x350   :  { %3243 = vmatmul.mubr.msk.bf16.vlgmr.msra.gmra.mxu1 %vm184_vm5, %v208_v2 }
 0x351   :  { %3247 = vmatpush3.bf16.xpose.msra.mxu1 %v271_v3  ;;  %3248 = vmatprep.mubr.msk.bf16.mxu1 %vm3695_vm1, %v3694_v8  ;;  %v538_v9 = vpop.permute.xlu1 %537 }
 0x352   :  { %3258 = vmatprep.subr.bf16.mxu1 %v3694_v8 }
 0x355   :  { %v684_v11 = vpop.permute.xlu1 %683 }
 0x356   :  { %v689_v12 = vsel %vm128_vm2, %v684_v11, 0 }
 0x358   :  { %3249 = vmatmul.mubr.msk.bf16.vlgmr.msra.gmra.mxu1 %vm128_vm2, %v264_v1 }
 0x359   :  { %3259 = vmatpush3.bf16.xpose.msra.mxu1 %v408_v6  ;;  %3260 = vmatprep.mubr.msk.bf16.mxu1 %vm3695_vm1, %v3694_v8  ;;  %v817_v13 = vpop.permute.xlu1 %816 }
 0x35a   :  { %3270 = vmatprep.subr.bf16.mxu1 %v3694_v8  ;;  %v822_v14 = vsel %vm128_vm2, %v817_v13, 0 }
 0x35d   :  { %v952_v15 = vpop.permute.xlu1 %951 }
 0x35e   :  { %v957_v17 = vsel %vm128_vm2, %v952_v15, 0 }
 0x360   :  { %3261 = vmatmul.mubr.msk.bf16.vlgmr.msra.gmra.mxu1 %vm128_vm2, %v401_v4 }
 0x361   :  { %3271 = vmatpush3.bf16.xpose.msra.mxu1 %v545_v10  ;;  %3272 = vmatprep.mubr.msk.bf16.mxu1 %vm3695_vm1, %v3694_v8  ;;  %v1087_v19 = vpop.permute.xlu1 %1086 }
 0x362   :  { %3282 = vmatprep.subr.bf16.mxu1 %v3694_v8  ;;  %v1092_v21 = vsel %vm128_vm2, %v1087_v19, 0 }
 0x368   :  { %3273 = vmatmul.mubr.msk.bf16.vlgmr.msra.gmra.mxu1 %vm128_vm2, %v538_v9 }
 0x369   :  { %3283 = vmatpush3.bf16.xpose.msra.mxu1 %v689_v12  ;;  %3284 = vmatprep.mubr.msk.bf16.mxu1 %vm3695_vm1, %v3694_v8 }
 0x36a   :  { %3294 = vmatprep.subr.bf16.mxu1 %v3694_v8 }
 0x370   :  { %3285 = vmatmul.mubr.msk.bf16.vlgmr.msra.gmra.mxu1 %vm128_vm2, %v3821_v41  ;;  %v3022_v41 = vld [vmem:[%s4618_s1 + $0x1] sm:$0x1]  ;;  %s3705_s1 = smov 56  }
 0x371   :  { %3295 = vmatpush3.bf16.xpose.msra.mxu1 %v822_v14  ;;  %3296 = vmatprep.mubr.msk.bf16.mxu1 %vm3695_vm1, %v3694_v8  ;;  %vm34_vm10 = vcmp.ne.s32.totalorder %v3022_v41, 0 }
 0x372   :  { %3306 = vmatprep.subr.bf16.mxu1 %v3694_v8  ;;  %v732_v48 = vsel %vm34_vm10, 1, %v3697_v26  ;;  %vm672_vm10 = vcmask 257216  }
 0x373   :  { %v3931_v53 = vrot.slane %v732_v48, %v179_v25 }
 0x375   :  { %vm737_vm11 = vcmp.eq.s32.totalorder %v3931_v53, 1 }
 0x378   :  { %3297 = vmatmul.mubr.msk.bf16.vlgmr.msra.gmra.mxu1 %vm128_vm2, %v815_v16 }
 0x379   :  { %3307 = vmatpush3.bf16.xpose.msra.mxu1 %v957_v17  ;;  %3308 = vmatprep.mubr.msk.bf16.mxu1 %vm3695_vm1, %v3694_v8 }
 0x37a   :  { %3318 = vmatprep.subr.bf16.mxu1 %v3694_v8 }
 0x380   :  { %3309 = vmatmul.mubr.msk.bf16.vlgmr.msra.gmra.mxu1 %vm128_vm2, %v950_v20 }
 0x381   :  { %3319 = vmatpush3.bf16.xpose.msra.mxu1 %v1092_v21  ;;  %3320 = vmatprep.mubr.msk.bf16.mxu1 %vm3695_vm1, %v3694_v8 }
 0x388   :  { %3321 = vmatmul.mubr.msk.bf16.vlgmr.msra.gmra.mxu1 %vm128_vm2, %v1085_v22 }
 0x410   :  { %v252_v23 = vpop.f32.mrf.mxu1 }
 0x411   :  { %259 = vst.msk [vmem:[#allocation2] sm:$0xff] %vm128_vm2, %v252_v23 }
 0x412   :  { %v3244_v27 = vpop.f32.mrf.mxu1 }
 0x414   :  { %v255_v29 = vpop.f32.mrf.mxu1 }
 0x415   :  { %261 = vst.msk [vmem:[#allocation2 + $0x8] sm:$0xf] %vm260_vm9, %v255_v29 }
 0x416   :  { %v3245_v30 = vpop.f32.mrf.mxu1 }
 0x418   :  { %v307_v31 = vpop.f32.mrf.mxu1 }
 0x419   :  { %v3897_v32 = vsel %vm181_vm4, -3.5355338e+09, %v307_v31 }
 0x41a   :  { %v3250_v33 = vpop.f32.mrf.mxu1  ;;  %v316_v34 = vsel %vm184_vm5, %v3897_v32, -inf }
 0x41b   :  { %317 = vmax.xlane.f32.xlu1 %v316_v34 }
 0x41c   :  { %v310_v35 = vpop.f32.mrf.mxu1 }
 0x41d   :  { %v3903_v36 = vsel %vm181_vm4, -3.5355338e+09, %v310_v35 }
 0x41e   :  { %v3251_v37 = vpop.f32.mrf.mxu1  ;;  %v319_v38 = vsel %vm188_vm6, %v3903_v36, -inf }
 0x41f   :  { %320 = vmax.xlane.f32.xlu0 %v319_v38 }
 0x420   :  { %v444_v39 = vpop.f32.mrf.mxu1 }
 0x421   :  { %v3909_v40 = vsel %vm181_vm4, -3.5355338e+09, %v444_v39 }
 0x422   :  { %v3262_v42 = vpop.f32.mrf.mxu1  ;;  %v453_v43 = vsel %vm184_vm5, %v3909_v40, -inf }
 0x423   :  { %454 = vmax.xlane.f32.xlu0 %v453_v43 }
 0x424   :  { %v447_v44 = vpop.f32.mrf.mxu1 }
 0x425   :  { %v3918_v45 = vsel %vm181_vm4, -3.5355338e+09, %v447_v44 }
 0x426   :  { %v3263_v46 = vpop.f32.mrf.mxu1  ;;  %v456_v47 = vsel %vm188_vm6, %v3918_v45, -inf }
 0x427   :  { %457 = vmax.xlane.f32.xlu1 %v456_v47 }
 0x428   :  { %v581_v49 = vpop.f32.mrf.mxu1 }
 0x429   :  { %v3925_v50 = vsel %vm181_vm4, -3.5355338e+09, %v581_v49 }
 0x42a   :  { %v3274_v51 = vpop.f32.mrf.mxu1  ;;  %v590_v52 = vsel %vm184_vm5, %v3925_v50, -inf }
 0x42b   :  { %591 = vmax.xlane.f32.xlu0 %v590_v52 }
 0x42c   :  { %v584_v54 = vpop.f32.mrf.mxu1 }
 0x42d   :  { %v3935_v55 = vsel %vm181_vm4, -3.5355338e+09, %v584_v54 }
 0x42e   :  { %v3275_v26 = vpop.f32.mrf.mxu1  ;;  %v593_v56 = vsel %vm188_vm6, %v3935_v55, -inf }
 0x42f   :  { %594 = vmax.xlane.f32.xlu1 %v593_v56 }
 0x430   :  { %v725_v58 = vpop.f32.mrf.mxu1 }
 0x431   :  { %v3942_v59 = vsel %vm737_vm11, -3.5355338e+09, %v725_v58 }
 0x432   :  { %v3286_v24 = vpop.f32.mrf.mxu1  ;;  %v740_v25 = vsel %vm184_vm5, %v3942_v59, -inf }
 0x433   :  { %741 = vmax.xlane.f32.xlu0 %v740_v25 }
 0x434   :  { %v728_v60 = vpop.f32.mrf.mxu1 }
 0x435   :  { %v3948_v61 = vsel %vm737_vm11, -3.5355338e+09, %v728_v60 }
 0x436   :  { %v3287_v62 = vpop.f32.mrf.mxu1  ;;  %v743_v63 = vsel %vm188_vm6, %v3948_v61, -inf }
 0x437   :  { %744 = vmax.xlane.f32.xlu1 %v743_v63 }
 0x438   :  { %v858_v0 = vpop.f32.mrf.mxu1 }
 0x439   :  { %v3954_v1 = vsel %vm737_vm11, -3.5355338e+09, %v858_v0 }
 0x43a   :  { %v3298_v2 = vpop.f32.mrf.mxu1  ;;  %v867_v3 = vsel %vm184_vm5, %v3954_v1, -inf }
 0x43b   :  { %868 = vmax.xlane.f32.xlu0 %v867_v3 }
 0x43c   :  { %v861_v4 = vpop.f32.mrf.mxu1 }
 0x43d   :  { %v3960_v5 = vsel %vm737_vm11, -3.5355338e+09, %v861_v4 }
 0x43e   :  { %v3299_v6 = vpop.f32.mrf.mxu1  ;;  %v870_v7 = vsel %vm188_vm6, %v3960_v5, -inf }
 0x43f   :  { %871 = vmax.xlane.f32.xlu1 %v870_v7 }
 0x440   :  { %v993_v9 = vpop.f32.mrf.mxu1 }
 0x441   :  { %v3966_v10 = vsel %vm737_vm11, -3.5355338e+09, %v993_v9 }
 0x442   :  { %v3310_v11 = vpop.f32.mrf.mxu1  ;;  %v1002_v12 = vsel %vm184_vm5, %v3966_v10, -inf }
 0x443   :  { %1003 = vmax.xlane.f32.xlu0 %v1002_v12 }
 0x444   :  { %v996_v13 = vpop.f32.mrf.mxu1 }
 0x445   :  { %v3972_v14 = vsel %vm737_vm11, -3.5355338e+09, %v996_v13 }
 0x446   :  { %v3311_v15 = vpop.f32.mrf.mxu1  ;;  %v1005_v16 = vsel %vm188_vm6, %v3972_v14, -inf }
 0x447   :  { %1006 = vmax.xlane.f32.xlu1 %v1005_v16 }
 0x448   :  { %v1128_v17 = vpop.f32.mrf.mxu1 }
 0x449   :  { %v3988_v27 = vsel %vm737_vm11, -3.5355338e+09, %v1128_v17 }
 0x44a   :  { %v3322_v19 = vpop.f32.mrf.mxu1  ;;  %v1137_v29 = vsel %vm184_vm5, %v3988_v27, -inf }
 0x44c   :  { %v1131_v20 = vpop.f32.mrf.mxu1 }
 0x44d   :  { %v3978_v21 = vsel %vm737_vm11, -3.5355338e+09, %v1131_v20 }
 0x44e   :  { %v3323_v22 = vpop.f32.mrf.mxu1  ;;  %v1140_v23 = vsel %vm188_vm6, %v3978_v21, -inf }
 0x44f   :  { %1141 = vmax.xlane.f32.xlu1 %v1140_v23 }
 0x459   :  { %339 = vrot.lane.b32.xlu0 %v3784_v18, %s3705_s1 }
 0x460   :  { %476 = vrot.lane.b32.xlu1 %v3784_v18, %s3706_s29 }
 0x478   :  { %1138 = vmax.xlane.f32.xlu0 %v1137_v29 }
 0x4a4   :  { %v318_v30 = vpop.xlane.xlu1 %317 }
 0x4a5   :  { %v322_v31 = vsub.f32 %v3897_v32, %v318_v30 }
 0x4a7   :  { %v324_v33 = vmul.f32 1.442695, %v322_v31 }
 0x4a8   :  { %v321_v34 = vpop.xlane.xlu0 %320 }
 0x4a9   :  { %3563 = vpow2.f32 %v324_v33  ;;  %v323_v35 = vsub.f32 %v3903_v36, %v321_v34 }
 0x4ab   :  { %v326_v37 = vmul.f32 1.442695, %v323_v35 }
 0x4ac   :  { %v455_v38 = vpop.xlane.xlu0 %454 }
 0x4ad   :  { %3565 = vpow2.f32 %v326_v37  ;;  %v459_v39 = vsub.f32 %v3909_v40, %v455_v38 }
 0x4af   :  { %v461_v41 = vmul.f32 1.442695, %v459_v39 }
 0x4b0   :  { %v458_v42 = vpop.xlane.xlu1 %457 }
 0x4b1   :  { %3567 = vpow2.f32 %v461_v41  ;;  %v460_v43 = vsub.f32 %v3918_v45, %v458_v42 }
 0x4b3   :  { %v463_v44 = vmul.f32 1.442695, %v460_v43 }
 0x4b4   :  { %v592_v46 = vpop.xlane.xlu0 %591 }
 0x4b5   :  { %3569 = vpow2.f32 %v463_v44  ;;  %v596_v32 = vsub.f32 %v3925_v50, %v592_v46 }
 0x4b6   :  { %v3997_v47 = vpop.eup %3563 }
 0x4b7   :  { %v598_v48 = vmul.f32 1.442695, %v596_v32  ;;  %v328_v36 = vsel %vm184_vm5, %v3997_v47, 0.0 }
 0x4b8   :  { %v595_v49 = vpop.xlane.xlu1 %594  ;;  %329 = vadd.xlane.f32.xlu0 %v328_v36 }
 0x4b9   :  { %3571 = vpow2.f32 %v598_v48  ;;  %v597_v40 = vsub.f32 %v3935_v55, %v595_v49 }
 0x4ba   :  { %v4002_v51 = vpop.eup %3565 }
 0x4bb   :  { %v600_v52 = vmul.f32 1.442695, %v597_v40  ;;  %v331_v45 = vsel %vm188_vm6, %v4002_v51, 0.0 }
 0x4bc   :  { %332 = vadd.xlane.f32.xlu1 %v331_v45  ;;  %v742_v26 = vpop.xlane.xlu0 %741 }
 0x4bd   :  { %3573 = vpow2.f32 %v600_v52  ;;  %v746_v29 = vsub.f32 %v3942_v59, %v742_v26 }
 0x4be   :  { %v4006_v50 = vpop.eup %3567 }
 0x4bf   :  { %v465_v54 = vsel %vm184_vm5, %v4006_v50, 0.0  ;;  %v748_v30 = vmul.f32 1.442695, %v746_v29 }
 0x4c0   :  { %v745_v56 = vpop.xlane.xlu1 %744  ;;  %466 = vadd.xlane.f32.xlu0 %v465_v54 }
 0x4c1   :  { %v747_v58 = vsub.f32 %v3948_v61, %v745_v56 }
 0x4c2   :  { %v4011_v24 = vpop.eup %3569 }
 0x4c3   :  { %v750_v55 = vmul.f32 1.442695, %v747_v58  ;;  %v468_v25 = vsel %vm188_vm6, %v4011_v24, 0.0 }
 0x4c4   :  { %v869_v60 = vpop.xlane.xlu0 %868  ;;  %469 = vadd.xlane.f32.xlu1 %v468_v25 }
 0x4c5   :  { %3575 = vpow2.f32 %v750_v55  ;;  %v873_v62 = vsub.f32 %v3954_v1, %v869_v60 }
 0x4c6   :  { %v4016_v63 = vpop.eup %3571 }
 0x4c7   :  { %v875_v0 = vmul.f32 1.442695, %v873_v62  ;;  %v602_v2 = vsel %vm184_vm5, %v4016_v63, 0.0 }
 0x4c8   :  { %v872_v3 = vpop.xlane.xlu1 %871  ;;  %603 = vadd.xlane.f32.xlu0 %v602_v2 }
 0x4c9   :  { %3577 = vpow2.f32 %v875_v0  ;;  %v874_v61 = vsub.f32 %v3960_v5, %v872_v3 }
 0x4ca   :  { %v4021_v4 = vpop.eup %3573 }
 0x4cb   :  { %v877_v6 = vmul.f32 1.442695, %v874_v61  ;;  %v605_v7 = vsel %vm188_vm6, %v4021_v4, 0.0 }
 0x4cc   :  { %v1004_v9 = vpop.xlane.xlu0 %1003  ;;  %606 = vadd.xlane.f32.xlu1 %v605_v7 }
 0x4cd   :  { %3579 = vpow2.f32 %v877_v6  ;;  %v1008_v31 = vsub.f32 %v3966_v10, %v1004_v9 }
 0x4cf   :  { %v1010_v33 = vmul.f32 1.442695, %v1008_v31 }
 0x4d0   :  { %v340_v1 = vpop.permute.xlu0 %339  ;;  %v1007_v11 = vpop.xlane.xlu1 %1006 }
 0x4d1   :  { %v1009_v12 = vsub.f32 %v3972_v14, %v1007_v11  ;;  %v345_v13 = vsel %vm214_vm8, %v340_v1, 0 }
 0x4d2   :  { %v4027_v15 = vpop.eup %3575  ;;  %3253 = vmatpush3.bf16.msra.mxu0 %v345_v13 }
 0x4d3   :  { %v1012_v16 = vmul.f32 1.442695, %v1009_v12  ;;  %v755_v5 = vsel %vm188_vm6, %v4027_v15, 0.0  ;;  %3264 = vmatprep.subr.bf16.mxu0 %v3694_v8 }
 0x4d4   :  { %756 = vadd.xlane.f32.xlu1 %v755_v5 }
 0x4d5   :  { %3581 = vpow2.f32 %v1012_v16 }
 0x4d6   :  { %v4032_v17 = vpop.eup %3577  ;;  %3583 = vpow2.f32 %v748_v30 }
 0x4d7   :  { %v879_v19 = vsel %vm184_vm5, %v4032_v17, 0.0  ;;  %3585 = vpow2.f32 %v1010_v33 }
 0x4d8   :  { %880 = vadd.xlane.f32.xlu1 %v879_v19  ;;  %v1142_v37 = vpop.xlane.xlu1 %1141 }
 0x4d9   :  { %v1144_v38 = vsub.f32 %v3978_v21, %v1142_v37 }
 0x4da   :  { %v4036_v14 = vpop.eup %3579 }
 0x4db   :  { %v882_v20 = vsel %vm188_vm6, %v4036_v14, 0.0  ;;  %v1147_v41 = vmul.f32 1.442695, %v1144_v38 }
 0x4dc   :  { %883 = vadd.xlane.f32.xlu1 %v882_v20 }
 0x4de   :  { %613 = vrot.lane.b32.xlu0 %v3784_v18, %s3707_s30 }
 0x4e2   :  { %v4042_v22 = vpop.eup %3581 }
 0x4e3   :  { %v1017_v23 = vsel %vm188_vm6, %v4042_v22, 0.0  ;;  %v4048_v34 = vpop.eup %3583 }
 0x4e4   :  { %1018 = vadd.xlane.f32.xlu1 %v1017_v23  ;;  %v752_v35 = vsel %vm184_vm5, %v4048_v34, 0.0  ;;  %v4052_v18 = vpop.eup %3585 }
 0x4e5   :  { %v1014_v59 = vsel %vm184_vm5, %v4052_v18, 0.0 }
 0x4fd   :  { %753 = vadd.xlane.f32.xlu0 %v752_v35 }
 0x501   :  { %1015 = vadd.xlane.f32.xlu0 %v1014_v59  ;;  %v1139_v39 = vpop.xlane.xlu0 %1138 }
 0x502   :  { %v1143_v10 = vsub.f32 %v3988_v27, %v1139_v39  ;;  %v477_v27 = vpop.permute.xlu1 %476 }
 0x503   :  { %v482_v58 = vsel %vm214_vm8, %v477_v27, 0 }
 0x504   :  { %v1145_v42 = vmul.f32 1.442695, %v1143_v10 }
 0x506   :  { %3587 = vpow2.f32 %v1145_v42 }
 0x507   :  { %3589 = vpow2.f32 %v1147_v41 }
 0x513   :  { %v4058_v43 = vpop.eup %3587 }
 0x514   :  { %v1149_v44 = vsel %vm184_vm5, %v4058_v43, 0.0  ;;  %v4062_v46 = vpop.eup %3589 }
 0x515   :  { %1150 = vadd.xlane.f32.xlu1 %v1149_v44  ;;  %v1152_v21 = vsel %vm188_vm6, %v4062_v46, 0.0 }
 0x517   :  { %890 = vrot.lane.b32.xlu0 %v3847_v57, %s3705_s1 }
 0x519   :  { %1153 = vadd.xlane.f32.xlu1 %v1152_v21 }
 0x51b   :  { %1025 = vrot.lane.b32.xlu0 %v3847_v57, %s3706_s29 }
 0x51f   :  { %1160 = vrot.lane.b32.xlu0 %v3847_v57, %s3707_s30 }
 0x52a   :  { %763 = vrot.lane.b32.xlu1 %v3847_v57, %s3698_s20 }
 0x541   :  { %v330_v32 = vpop.xlane.xlu0 %329 }
 0x542   :  { %3591 = vrcp.f32 %v330_v32 }
 0x545   :  { %v333_v48 = vpop.xlane.xlu1 %332 }
 0x546   :  { %3593 = vrcp.f32 %v333_v48 }
 0x549   :  { %v467_v36 = vpop.xlane.xlu0 %466 }
 0x54a   :  { %3595 = vrcp.f32 %v467_v36 }
 0x54d   :  { %v470_v49 = vpop.xlane.xlu1 %469 }
 0x54e   :  { %3597 = vrcp.f32 %v470_v49 }
 0x54f   :  { %v3592_v40 = vpop.eup %3591 }
 0x550   :  { %v335_v54 = vmul.f32 %v3592_v40, %v3997_v47 }
 0x551   :  { %v604_v52 = vpop.xlane.xlu0 %603 }
 0x552   :  { %3599 = vrcp.f32 %v604_v52 }
 0x553   :  { %v3594_v45 = vpop.eup %3593 }
 0x554   :  { %v337_v26 = vmul.f32 %v3594_v45, %v4002_v51 }
 0x555   :  { %v607_v56 = vpop.xlane.xlu1 %606  ;;  %v614_v51 = vpop.permute.xlu0 %613 }
 0x556   :  { %3601 = vrcp.f32 %v607_v56  ;;  %v338_v57 = vpack.c.bf16 %v337_v26, %v335_v54  ;;  %v619_v0 = vsel %vm214_vm8, %v614_v51, 0 }
 0x557   :  { %v3596_v55 = vpop.eup %3595 }
 0x558   :  { %3255 = vmatmul.mubr.msk.bf16.vlgmr.msra.gmra.mxu0 %vm184_vm5, %v338_v57  ;;  %v472_v60 = vmul.f32 %v3596_v55, %v4006_v50 }
 0x559   :  { %3265 = vmatpush3.bf16.msra.mxu0 %v482_v58  ;;  %3266 = vmatprep.mubr.msk.bf16.mxu0 %vm3695_vm1, %v3694_v8 }
 0x55a   :  { %3276 = vmatprep.subr.bf16.mxu0 %v3694_v8 }
 0x55b   :  { %v3598_v25 = vpop.eup %3597 }
 0x55c   :  { %v474_v47 = vmul.f32 %v3598_v25, %v4011_v24 }
 0x55d   :  { %v757_v24 = vpop.xlane.xlu1 %756 }
 0x55e   :  { %v475_v62 = vpack.c.bf16 %v474_v47, %v472_v60 }
 0x55f   :  { %v3600_v2 = vpop.eup %3599 }
 0x560   :  { %3267 = vmatmul.mubr.msk.bf16.vlgmr.msra.gmra.mxu0 %vm184_vm5, %v475_v62  ;;  %v609_v61 = vmul.f32 %v3600_v2, %v4016_v63 }
 0x561   :  { %3277 = vmatpush3.bf16.msra.mxu0 %v619_v0  ;;  %3278 = vmatprep.mubr.msk.bf16.mxu0 %vm3695_vm1, %v3694_v8  ;;  %v881_v7 = vpop.xlane.xlu1 %880 }
 0x562   :  { %3288 = vmatprep.subr.bf16.mxu0 %v3694_v8 }
 0x563   :  { %v3602_v3 = vpop.eup %3601 }
 0x564   :  { %v611_v50 = vmul.f32 %v3602_v3, %v4021_v4 }
 0x565   :  { %v884_v1 = vpop.xlane.xlu1 %883 }
 0x566   :  { %v612_v6 = vpack.c.bf16 %v611_v50, %v609_v61 }
 0x568   :  { %3279 = vmatmul.mubr.msk.bf16.vlgmr.msra.gmra.mxu0 %vm184_vm5, %v612_v6 }
 0x569   :  { %3290 = vmatprep.mubr.msk.bf16.mxu0 %vm3695_vm1, %v3694_v8 }
 0x56d   :  { %v1019_v11 = vpop.xlane.xlu1 %1018 }
 0x586   :  { %v754_v9 = vpop.xlane.xlu0 %753 }
 0x587   :  { %3603 = vrcp.f32 %v754_v9 }
 0x588   :  { %3605 = vrcp.f32 %v757_v24 }
 0x589   :  { %3607 = vrcp.f32 %v884_v1 }
 0x58a   :  { %3609 = vrcp.f32 %v881_v7  ;;  %v1016_v63 = vpop.xlane.xlu0 %1015 }
 0x58b   :  { %3611 = vrcp.f32 %v1016_v63 }
 0x58c   :  { %3613 = vrcp.f32 %v1019_v11 }
 0x58e   :  { %v891_v29 = vpop.permute.xlu0 %890 }
 0x58f   :  { %v896_v33 = vsel %vm214_vm8, %v891_v29, 0 }
 0x592   :  { %v1026_v37 = vpop.permute.xlu0 %1025 }
 0x593   :  { %v1031_v39 = vsel %vm214_vm8, %v1026_v37, 0 }
 0x594   :  { %v3604_v13 = vpop.eup %3603 }
 0x595   :  { %v3606_v4 = vpop.eup %3605  ;;  %v759_v5 = vmul.f32 %v3604_v13, %v4048_v34 }
 0x596   :  { %v761_v23 = vmul.f32 %v3606_v4, %v4027_v15  ;;  %v3608_v31 = vpop.eup %3607  ;;  %v1161_v42 = vpop.permute.xlu0 %1160 }
 0x597   :  { %v3610_v35 = vpop.eup %3609  ;;  %v888_v15 = vmul.f32 %v3608_v31, %v4036_v14  ;;  %v1166_v21 = vsel %vm214_vm8, %v1161_v42, 0 }
 0x598   :  { %v762_v30 = vpack.c.bf16 %v761_v23, %v759_v5  ;;  %v886_v34 = vmul.f32 %v3610_v35, %v4032_v17  ;;  %v3612_v59 = vpop.eup %3611 }
 0x599   :  { %v3614_v10 = vpop.eup %3613  ;;  %v1021_v41 = vmul.f32 %v3612_v59, %v4052_v18  ;;  %v3693_v59 = vld [vmem:[%s4616_s0 + $0x10] sm:$0xff] }
 0x59a   :  { %v889_v38 = vpack.c.bf16 %v888_v15, %v886_v34  ;;  %v1023_v14 = vmul.f32 %v3614_v10, %v4042_v22  ;;  %v3692_v15 = vld [vmem:[%s4616_s0 + $0x8] sm:$0xff] }
 0x59c   :  { %v1024_v17 = vpack.c.bf16 %v1023_v14, %v1021_v41 }
 0x59e   :  { %v1151_v12 = vpop.xlane.xlu1 %1150 }
 0x5a2   :  { %v1154_v16 = vpop.xlane.xlu1 %1153 }
 0x5a3   :  { %3615 = vrcp.f32 %v1154_v16 }
 0x5a4   :  { %3617 = vrcp.f32 %v1151_v12 }
 0x5a6   :  { %v764_v19 = vpop.permute.xlu1 %763 }
 0x5a7   :  { %v769_v20 = vsel %vm214_vm8, %v764_v19, 0 }
 0x5a8   :  { %3289 = vmatpush3.bf16.msra.mxu0 %v769_v20 }
 0x5a9   :  { %3300 = vmatprep.subr.bf16.mxu0 %v3694_v8 }
 0x5ab   :  { %3291 = vmatmul.mubr.msk.bf16.vlgmr.msra.gmra.mxu0 %vm184_vm5, %v762_v30 }
 0x5ac   :  { %3301 = vmatpush3.bf16.msra.mxu0 %v896_v33  ;;  %3302 = vmatprep.mubr.msk.bf16.mxu0 %vm3695_vm1, %v3694_v8  ;;  %v3691_v33 = vld [vmem:[%s4616_s0] sm:$0xff] }
 0x5ad   :  { %3312 = vmatprep.subr.bf16.mxu0 %v3694_v8 }
 0x5b0   :  { %v3616_v44 = vpop.eup %3615 }
 0x5b1   :  { %v3618_v27 = vpop.eup %3617  ;;  %v1158_v32 = vmul.f32 %v3616_v44, %v4062_v46 }
 0x5b2   :  { %v1156_v48 = vmul.f32 %v3618_v27, %v4058_v43 }
 0x5b3   :  { %3303 = vmatmul.mubr.msk.bf16.vlgmr.msra.gmra.mxu0 %vm184_vm5, %v889_v38 }
 0x5b4   :  { %3313 = vmatpush3.bf16.msra.mxu0 %v1031_v39  ;;  %3314 = vmatprep.mubr.msk.bf16.mxu0 %vm3695_vm1, %v3694_v8  ;;  %v1159_v36 = vpack.c.bf16 %v1158_v32, %v1156_v48 }
 0x5b5   :  { %3324 = vmatprep.subr.bf16.mxu0 %v3694_v8 }
 0x5bb   :  { %3315 = vmatmul.mubr.msk.bf16.vlgmr.msra.gmra.mxu0 %vm184_vm5, %v1024_v17 }
 0x5bc   :  { %3325 = vmatpush3.bf16.msra.mxu0 %v1166_v21  ;;  %3326 = vmatprep.mubr.msk.bf16.mxu0 %vm3695_vm1, %v3694_v8 }
 0x5c3   :  { %3327 = vmatmul.mubr.msk.bf16.vlgmr.msra.gmra.mxu0 %vm184_vm5, %v1159_v36 }
 0x618   :  { %v381_v22 = vpop.f32.mrf.mxu0 }
 0x619   :  { %390 = vrot.lane.b32.xlu0 %v381_v22, %s3708_s9 }
 0x61a   :  { %v3256_v18 = vpop.f32.mrf.mxu0 }
 0x61c   :  { %v384_v49 = vpop.f32.mrf.mxu0 }
 0x61d   :  { %392 = vrot.lane.b32.xlu1 %v384_v49, %s3708_s9 }
 0x61e   :  { %v3257_v40 = vpop.f32.mrf.mxu0 }
 0x620   :  { %v518_v52 = vpop.f32.mrf.mxu0 }
 0x621   :  { %527 = vrot.lane.b32.xlu1 %v518_v52, %s3709_s10 }
 0x622   :  { %v3268_v45 = vpop.f32.mrf.mxu0 }
 0x624   :  { %v521_v46 = vpop.f32.mrf.mxu0 }
 0x625   :  { %529 = vrot.lane.b32.xlu0 %v521_v46, %s3709_s10 }
 0x626   :  { %v3269_v43 = vpop.f32.mrf.mxu0 }
 0x628   :  { %v655_v54 = vpop.f32.mrf.mxu0 }
 0x629   :  { %664 = vrot.lane.b32.xlu0 %v655_v54, %s3710_s11 }
 0x62a   :  { %v3280_v26 = vpop.f32.mrf.mxu0 }
 0x62c   :  { %v658_v56 = vpop.f32.mrf.mxu0 }
 0x62d   :  { %666 = vrot.lane.b32.xlu1 %v658_v56, %s3710_s11 }
 0x62e   :  { %v3281_v57 = vpop.f32.mrf.mxu0 }
 0x66b   :  { %v805_v58 = vpop.f32.mrf.mxu0 }
 0x66c   :  { %812 = vst.msk [vmem:[#allocation2 + $0xc] sm:$0xff] %vm128_vm2, %v805_v58  ;;  %v3533_v58 = vld [vmem:[%s4619_s4 + $0x8] sm:$0xff]  }
 0x66d   :  { %v3292_v55 = vpop.f32.mrf.mxu0  ;;  %3330 = vmatprep.subr.bf16.mxu1 %v3533_v58 }
 0x66e   :  { %3331 = vmatpush3.bf16.msra.mxu1 %v3533_v58 }
 0x66f   :  { %v808_v25 = vpop.f32.mrf.mxu0 }
 0x670   :  { %813 = vst.msk [vmem:[#allocation2 + $0x14] sm:$0xf] %vm260_vm9, %v808_v25 }
 0x671   :  { %v3293_v60 = vpop.f32.mrf.mxu0 }
 0x673   :  { %v932_v47 = vpop.f32.mrf.mxu0 }
 0x674   :  { %941 = vrot.lane.b32.xlu0 %v932_v47, %s3708_s9 }
 0x675   :  { %v3304_v51 = vpop.f32.mrf.mxu0 }
 0x676   :  { %v3534_v51 = vld [vmem:[%s4619_s4] sm:$0xff]  }
 0x677   :  { %v935_v62 = vpop.f32.mrf.mxu0  ;;  %3332 = vmatprep.subr.bf16.mxu1 %v3534_v51 }
 0x678   :  { %943 = vrot.lane.b32.xlu0 %v935_v62, %s3708_s9  ;;  %3333 = vmatpush3.bf16.msra.mxu1 %v3534_v51 }
 0x679   :  { %v3305_v0 = vpop.f32.mrf.mxu0 }
 0x67b   :  { %v1067_v2 = vpop.f32.mrf.mxu0 }
 0x67c   :  { %1076 = vrot.lane.b32.xlu1 %v1067_v2, %s3709_s10 }
 0x67d   :  { %v3316_v3 = vpop.f32.mrf.mxu0 }
 0x67e   :  { %v3535_v3 = vld [vmem:[%s4620_s6 + $0x38] sm:$0xff]  }
 0x67f   :  { %v1070_v61 = vpop.f32.mrf.mxu0  ;;  %3338 = vmatprep.subr.bf16.mxu0 %v3535_v3 }
 0x680   :  { %1078 = vrot.lane.b32.xlu0 %v1070_v61, %s3709_s10  ;;  %v3536_v61 = vld [vmem:[%s4620_s6 + $0x30] sm:$0xff]   ;;  %3339 = vmatpush3.bf16.msra.mxu0 %v3535_v3 }
 0x681   :  { %v3317_v50 = vpop.f32.mrf.mxu0  ;;  %3340 = vmatprep.subr.bf16.mxu0 %v3536_v61 }
 0x682   :  { %v3537_v50 = vld [vmem:[%s4620_s6 + $0x28] sm:$0xff]  }
 0x683   :  { %v1202_v6 = vpop.f32.mrf.mxu0 }
 0x684   :  { %1211 = vrot.lane.b32.xlu1 %v1202_v6, %s3710_s11  ;;  %v3538_v6 = vld [vmem:[%s4620_s6 + $0x20] sm:$0xff]   ;;  %3341 = vmatpush3.bf16.msra.mxu0 %v3536_v61 }
 0x685   :  { %v3328_v24 = vpop.f32.mrf.mxu0  ;;  %3342 = vmatprep.subr.bf16.mxu0 %v3537_v50 }
 0x686   :  { %v3539_v24 = vld [vmem:[%s4620_s6 + $0x18] sm:$0xff]  }
 0x687   :  { %v1205_v7 = vpop.f32.mrf.mxu0 }
 0x688   :  { %1213 = vrot.lane.b32.xlu1 %v1205_v7, %s3710_s11  ;;  %3343 = vmatpush3.bf16.msra.mxu0 %v3537_v50 }
 0x689   :  { %v3329_v9 = vpop.f32.mrf.mxu0  ;;  %3344 = vmatprep.subr.bf16.mxu0 %v3538_v6 }
 0x68b   :  { %v391_v1 = vpop.permute.xlu0 %390 }
 0x68c   :  { %397 = vst.msk [vmem:[#allocation2] sm:$0xff] %vm396_vm12, %v391_v1  ;;  %3345 = vmatpush3.bf16.msra.mxu0 %v3538_v6  ;;  %v3543_v6 = vld [vmem:[%s4615_s2 + $0x18] sm:$0xff]  }
 0x68d   :  { %3346 = vmatprep.subr.bf16.mxu0 %v3539_v24  ;;  %3358 = vmatprep.subr.bf16.mxu1 %v3543_v6 }
 0x68f   :  { %v393_v11 = vpop.permute.xlu1 %392 }
 0x690   :  { %399 = vst.msk [vmem:[#allocation2 + $0x8] sm:$0xf] %vm398_vm13, %v393_v11  ;;  %3347 = vmatpush3.bf16.msra.mxu0 %v3539_v24 }
 0x693   :  { %v528_v12 = vpop.permute.xlu1 %527 }
 0x694   :  { %534 = vst.msk [vmem:[#allocation2] sm:$0xff] %vm533_vm14, %v528_v12 }
 0x697   :  { %v530_v13 = vpop.permute.xlu0 %529 }
 0x698   :  { %536 = vst.msk [vmem:[#allocation2 + $0x8] sm:$0xf] %vm535_vm15, %v530_v13 }
 0x69b   :  { %v665_v63 = vpop.permute.xlu0 %664 }
 0x69c   :  { %671 = vst.msk [vmem:[#allocation2] sm:$0xff] %vm670_vm3, %v665_v63 }
 0x69f   :  { %v667_v16 = vpop.permute.xlu1 %666 }
 0x6a0   :  { %673 = vst.msk [vmem:[#allocation2 + $0x8] sm:$0xf] %vm672_vm10, %v667_v16 }
 0x6a3   :  { %v1219_v30 = vld [vmem:[#allocation2] sm:$0xff] }
 0x6a4   :  { %v1222_v35 = vadd.f32 %v3691_v33, %v1219_v30 }
 0x6a6   :  { %v1225_v10 = vsel %vm63_vm0, %v1222_v35, 0.0 }
 0x6e6   :  { %v942_v4 = vpop.permute.xlu0 %941 }
 0x6e7   :  { %947 = vst.msk [vmem:[#allocation2 + $0xc] sm:$0xff] %vm396_vm12, %v942_v4  ;;  %v3540_v4 = vld [vmem:[%s4620_s6 + $0x10] sm:$0xff]  }
 0x6e8   :  { %3348 = vmatprep.subr.bf16.mxu0 %v3540_v4 }
 0x6e9   :  { %3349 = vmatpush3.bf16.msra.mxu0 %v3540_v4 }
 0x6ea   :  { %v944_v5 = vpop.permute.xlu0 %943 }
 0x6eb   :  { %948 = vst.msk [vmem:[#allocation2 + $0x14] sm:$0xf] %vm398_vm13, %v944_v5  ;;  %v3541_v5 = vld [vmem:[%s4620_s6 + $0x8] sm:$0xff]  }
 0x6ec   :  { %3350 = vmatprep.subr.bf16.mxu0 %v3541_v5 }
 0x6ed   :  { %3351 = vmatpush3.bf16.msra.mxu0 %v3541_v5 }
 0x6ee   :  { %v1077_v19 = vpop.permute.xlu1 %1076 }
 0x6ef   :  { %1082 = vst.msk [vmem:[#allocation2 + $0xc] sm:$0xff] %vm533_vm14, %v1077_v19  ;;  %v3542_v19 = vld [vmem:[%s4620_s6] sm:$0xff]  }
 0x6f0   :  { %3352 = vmatprep.subr.bf16.mxu0 %v3542_v19 }
 0x6f1   :  { %3353 = vmatpush3.bf16.msra.mxu0 %v3542_v19 }
 0x6f2   :  { %v1079_v20 = vpop.permute.xlu0 %1078  ;;  %3384 = vmatprep.subr.bf16.mxu0 %v3694_v8 }
 0x6f3   :  { %1083 = vst.msk [vmem:[#allocation2 + $0x14] sm:$0xf] %vm535_vm15, %v1079_v20 }
 0x6f6   :  { %v1212_v23 = vpop.permute.xlu1 %1211 }
 0x6f7   :  { %1217 = vst.msk [vmem:[#allocation2 + $0xc] sm:$0xff] %vm670_vm3, %v1212_v23  ;;  %v3044_v23 = vld [vmem:[%s4621_s5] ss:$0 sm:$0xff] }
 0x6fa   :  { %v1214_v29 = vpop.permute.xlu1 %1213 }
 0x6fb   :  { %1218 = vst.msk [vmem:[#allocation2 + $0x14] sm:$0xf] %vm672_vm10, %v1214_v29 }
 0x6fe   :  { %v1220_v31 = vld [vmem:[#allocation2 + $0x8] sm:$0xff] }
 0x6ff   :  { %v1223_v34 = vadd.f32 %v3692_v15, %v1220_v31 }
 0x701   :  { %v1226_v37 = vsel %vm63_vm0, %v1223_v34, 0.0 }
 0x702   :  { %v1221_v38 = vld [vmem:[#allocation2 + $0x10] sm:$0xff]  ;;  %v1227_v41 = vadd.f32 %v1226_v37, %v1225_v10 }
 0x703   :  { %v1224_v39 = vadd.f32 %v3693_v59, %v1221_v38 }
 0x705   :  { %v1228_v14 = vsel %vm63_vm0, %v1224_v39, 0.0 }
 0x706   :  { %v1229_v42 = vadd.f32 %v1228_v14, %v1227_v41  ;;  %v3049_v41 = vld [vmem:[%s4622_s7] ss:$0 sm:$0xff] }
 0x708   :  { %1230 = vadd.xlane.f32.xlu0 %v1229_v42 }
 0x791   :  { %v1231_v17 = vpop.xlane.xlu0 %1230 }
 0x792   :  { %v1232_v44 = vrot.slane %v1231_v17, 4 }
 0x794   :  { %v1233_v21 = vadd.f32 %v1232_v44, %v1231_v17 }
 0x796   :  { %v1234_v27 = vrot.slane %v1233_v21, 2 }
 0x798   :  { %v1235_v32 = vadd.f32 %v1234_v27, %v1233_v21 }
 0x79a   :  { %v1236_v48 = vrot.slane %v1235_v32, 1 }
 0x79c   :  { %v1237_v36 = vadd.f32 %v1236_v48, %v1235_v32 }
 0x79e   :  { %3490 = vpush %v1237_v36 }
 0x7cf   :  { %s3491_s19 = spop %3490 }
 0x7d0   :  { %s1241_s27 = smul.f32 0.0013020834, %s3491_s19 }
 0x7d2   :  { %v1242_v22 = vstv %s1241_s27 }
 0x7d3   :  { %v1243_v18 = vsub.f32 %v1222_v35, %v1242_v22  ;;  %v1244_v49 = vsub.f32 %v1223_v34, %v1242_v22  ;;  %v1245_v40 = vsub.f32 %v1224_v39, %v1242_v22 }
 0x7d5   :  { %v1246_v52 = vmul.f32 %v1243_v18, %v1243_v18  ;;  %v1247_v45 = vmul.f32 %v1244_v49, %v1244_v49  ;;  %v1248_v46 = vmul.f32 %v1245_v40, %v1245_v40 }
 0x7d7   :  { %v1249_v43 = vsel %vm63_vm0, %v1246_v52, 0.0  ;;  %v1250_v54 = vsel %vm63_vm0, %v1247_v45, 0.0  ;;  %v1252_v56 = vsel %vm63_vm0, %v1248_v46, 0.0 }
 0x7d8   :  { %v1251_v26 = vadd.f32 %v1250_v54, %v1249_v43 }
 0x7da   :  { %v1253_v57 = vadd.f32 %v1252_v56, %v1251_v26 }
 0x7dc   :  { %1254 = vadd.xlane.f32.xlu1 %v1253_v57 }
 0x865   :  { %v1255_v55 = vpop.xlane.xlu1 %1254 }
 0x866   :  { %v1256_v25 = vrot.slane %v1255_v55, 4 }
 0x868   :  { %v1257_v60 = vadd.f32 %v1256_v25, %v1255_v55 }
 0x86a   :  { %v1258_v47 = vrot.slane %v1257_v60, 2 }
 0x86c   :  { %v1259_v62 = vadd.f32 %v1258_v47, %v1257_v60 }
 0x86e   :  { %v1260_v0 = vrot.slane %v1259_v62, 1 }
 0x870   :  { %v1261_v2 = vadd.f32 %v1260_v0, %v1259_v62 }
 0x872   :  { %3492 = vpush %v1261_v2 }
 0x8a3   :  { %s3493_s14 = spop %3492 }
 0x8a4   :  { %s1265_s15 = smul.f32 0.0013020834, %s3493_s14 }
 0x8a6   :  { %s1266_s16 = sadd.f32 1e-05, %s1265_s15 }
 0x8a8   :  { %v1267_v7 = vstv %s1266_s16 }
 0x8a9   :  { %3619 = vrsqrt.f32 %v1267_v7 }
 0x8b6   :  { %v3620_v9 = vpop.eup %3619 }
 0x8b7   :  { %3494 = vpush %v3620_v9 }
 0x8e8   :  { %s3495_s18 = spop %3494 }
 0x8e9   :  { %v1270_v1 = vstv %s3495_s18 }
 0x8ea   :  { %v1271_v11 = vmul.f32 %v1270_v1, %v1243_v18  ;;  %v1272_v12 = vmul.f32 %v1270_v1, %v1244_v49  ;;  %v1273_v13 = vmul.f32 %v1270_v1, %v1245_v40 }
 0x8ec   :  { %v1296_v63 = vpack.c.bf16 %v1272_v12, %v1271_v11  ;;  %v1297_v16 = vpack.c.bf16 %v1273_v13, %v1273_v13 }
 0x8ee   :  { %3334 = vmatprep.mubr.msk.bf16.mxu1 %vm63_vm0, %v1296_v63 }
 0x8ef   :  { %3335 = vmatmul.mubr.msk.bf16.vlgmr.msra.gmra.mxu1 %vm63_vm0, %v1297_v16 }
 0x8f0   :  { %3359 = vmatpush3.bf16.msra.mxu1 %v3543_v6 }
 0x9af   :  { %v3336_v20 = vpop.f32.mrf.mxu1 }
 0x9b0   :  { %v1365_v30 = vadd.f32 %v3336_v20, %v3044_v23 }
 0x9b1   :  { %v1356_v29 = vpop.f32.mrf.mxu1 }
 0x9b2   :  { %v1357_v33 = vadd.f32 %v3044_v23, %v1356_v29  ;;  %v1372_v34 = vmax.f32 %v1365_v30, 0.0 }
 0x9b3   :  { %v3337_v31 = vpop.f32.mrf.mxu1 }
 0x9b4   :  { %v1370_v37 = vmax.f32 %v1357_v33, 0.0  ;;  %v1374_v39 = vpack.c.bf16 %v1372_v34, %v1372_v34 }
 0x9b5   :  { %v1359_v35 = vpop.f32.mrf.mxu1 }
 0x9b6   :  { %v1360_v15 = vadd.f32 %v3044_v23, %v1359_v35 }
 0x9b8   :  { %v1371_v38 = vmax.f32 %v1360_v15, 0.0  ;;  %v3063_v15 = vld [vmem:[%s4617_s3 + $0x1] ss:$0 sm:$0xff] }
 0x9ba   :  { %v1373_v59 = vpack.c.bf16 %v1371_v38, %v1370_v37 }
 0x9bc   :  { %3354 = vmatprep.mubr.bf16.mxu0 %v1373_v59 }
 0x9bd   :  { %3355 = vmatmul.mubr.bf16.vlgmr.msra.gmra.mxu0 %v1374_v39 }
 0x9be   :  { %3386 = vmatprep.mubr.msk.bf16.mxu0 %vm3695_vm1, %v3694_v8 }
 0xa7d   :  { %v3356_v10 = vpop.f32.mrf.mxu0 }
 0xa7e   :  { %v1472_v44 = vadd.f32 %v3356_v10, %v3049_v41 }
 0xa7f   :  { %v1463_v14 = vpop.f32.mrf.mxu0 }
 0xa80   :  { %v1464_v42 = vadd.f32 %v3049_v41, %v1463_v14  ;;  %v1479_v48 = vadd.f32 %v1472_v44, %v1273_v13 }
 0xa81   :  { %v3357_v17 = vpop.f32.mrf.mxu0 }
 0xa82   :  { %v1477_v27 = vadd.f32 %v1464_v42, %v1271_v11  ;;  %v1483_v40 = vsel %vm63_vm0, %v1479_v48, 0.0  ;;  %v3544_v11 = vld [vmem:[%s4615_s2 + $0x10] sm:$0xff]  }
 0xa83   :  { %v1466_v21 = vpop.f32.mrf.mxu0  ;;  %3360 = vmatprep.subr.bf16.mxu1 %v3544_v11 }
 0xa84   :  { %v1467_v32 = vadd.f32 %v3049_v41, %v1466_v21  ;;  %v1480_v22 = vsel %vm63_vm0, %v1477_v27, 0.0  ;;  %3361 = vmatpush3.bf16.msra.mxu1 %v3544_v11 }
 0xa85   :  { %3366 = vmatprep.subr.bf16.mxu1 %v3694_v8 }
 0xa86   :  { %v1478_v36 = vadd.f32 %v1467_v32, %v1272_v12 }
 0xa88   :  { %v1481_v18 = vsel %vm63_vm0, %v1478_v36, 0.0 }
 0xa89   :  { %v1482_v49 = vadd.f32 %v1481_v18, %v1480_v22 }
 0xa8b   :  { %v1484_v52 = vadd.f32 %v1483_v40, %v1482_v49 }
 0xa8d   :  { %1485 = vadd.xlane.f32.xlu0 %v1484_v52 }
 0xb16   :  { %v1486_v45 = vpop.xlane.xlu0 %1485 }
 0xb17   :  { %v1487_v46 = vrot.slane %v1486_v45, 4 }
 0xb19   :  { %v1488_v43 = vadd.f32 %v1487_v46, %v1486_v45 }
 0xb1b   :  { %v1489_v54 = vrot.slane %v1488_v43, 2 }
 0xb1d   :  { %v1490_v26 = vadd.f32 %v1489_v54, %v1488_v43 }
 0xb1f   :  { %v1491_v56 = vrot.slane %v1490_v26, 1 }
 0xb21   :  { %v1492_v57 = vadd.f32 %v1491_v56, %v1490_v26 }
 0xb23   :  { %3496 = vpush %v1492_v57 }
 0xb54   :  { %s3497_s19 = spop %3496 }
 0xb55   :  { %s1496_s27 = smul.f32 0.0013020834, %s3497_s19 }
 0xb57   :  { %v1497_v58 = vstv %s1496_s27 }
 0xb58   :  { %v1498_v55 = vsub.f32 %v1477_v27, %v1497_v58  ;;  %v1499_v25 = vsub.f32 %v1478_v36, %v1497_v58  ;;  %v1500_v60 = vsub.f32 %v1479_v48, %v1497_v58 }
 0xb5a   :  { %v1501_v47 = vmul.f32 %v1498_v55, %v1498_v55  ;;  %v1502_v51 = vmul.f32 %v1499_v25, %v1499_v25  ;;  %v1503_v62 = vmul.f32 %v1500_v60, %v1500_v60 }
 0xb5c   :  { %v1504_v0 = vsel %vm63_vm0, %v1501_v47, 0.0  ;;  %v1505_v2 = vsel %vm63_vm0, %v1502_v51, 0.0  ;;  %v1507_v61 = vsel %vm63_vm0, %v1503_v62, 0.0 }
 0xb5d   :  { %v1506_v3 = vadd.f32 %v1505_v2, %v1504_v0 }
 0xb5f   :  { %v1508_v50 = vadd.f32 %v1507_v61, %v1506_v3 }
 0xb61   :  { %1509 = vadd.xlane.f32.xlu0 %v1508_v50 }
 0xbea   :  { %v1510_v24 = vpop.xlane.xlu0 %1509 }
 0xbeb   :  { %v1511_v7 = vrot.slane %v1510_v24, 4 }
 0xbed   :  { %v1512_v9 = vadd.f32 %v1511_v7, %v1510_v24 }
 0xbef   :  { %v1513_v1 = vrot.slane %v1512_v9, 2 }
 0xbf1   :  { %v1514_v12 = vadd.f32 %v1513_v1, %v1512_v9 }
 0xbf3   :  { %v1515_v13 = vrot.slane %v1514_v12, 1 }
 0xbf5   :  { %v1516_v63 = vadd.f32 %v1515_v13, %v1514_v12 }
 0xbf7   :  { %3498 = vpush %v1516_v63 }
 0xc28   :  { %s3499_s14 = spop %3498 }
 0xc29   :  { %s1520_s15 = smul.f32 0.0013020834, %s3499_s14 }
 0xc2b   :  { %s1521_s16 = sadd.f32 1e-05, %s1520_s15 }
 0xc2d   :  { %v1522_v16 = vstv %s1521_s16 }
 0xc2e   :  { %3621 = vrsqrt.f32 %v1522_v16 }
 0xc3b   :  { %v3622_v4 = vpop.eup %3621 }
 0xc3c   :  { %3500 = vpush %v3622_v4 }
 0xc6d   :  { %s3501_s18 = spop %3500 }
 0xc6e   :  { %v1525_v5 = vstv %s3501_s18 }
 0xc6f   :  { %v4213_v19 = vmul.f32 %v1525_v5, %v1498_v55  ;;  %v4215_v20 = vmul.f32 %v1525_v5, %v1499_v25  ;;  %v4217_v23 = vmul.f32 %v1525_v5, %v1500_v60 }
 0xc71   :  { %v1529_v29 = vpack.c.bf16 %v4215_v20, %v4213_v19  ;;  %v1530_v30 = vpack.c.bf16 %v4217_v23, %v4217_v23 }
 0xc73   :  { %3362 = vmatprep.mubr.msk.bf16.mxu1 %vm63_vm0, %v1529_v29 }
 0xc74   :  { %3363 = vmatmul.mubr.msk.bf16.vlgmr.msra.gmra.mxu1 %vm63_vm0, %v1530_v30 }
 0xc75   :  { %3368 = vmatprep.mubr.msk.bf16.mxu1 %vm3695_vm1, %v3694_v8 }
 0xd34   :  { %v3364_v31 = vpop.f32.mrf.mxu1 }
 0xd35   :  { %v1605_v14 = vadd.f32 %v3364_v31, %v3063_v15 }
 0xd36   :  { %v1596_v33 = vpop.f32.mrf.mxu1 }
 0xd37   :  { %v1597_v37 = vadd.f32 %v3063_v15, %v1596_v33  ;;  %v1616_v42 = vpack.c.bf16 %v1605_v14, %v1605_v14  ;;  %v1612_v62 = vmul.f32 0.35355338, %v1605_v14 }
 0xd38   :  { %v3365_v35 = vpop.f32.mrf.mxu1 }
 0xd39   :  { %v1610_v10 = vmul.f32 0.35355338, %v1597_v37  ;;  %v2155_v44 = vrot.slane %v1616_v42, 6  ;;  %v1614_v0 = vpack.c.bf16 %v1612_v62, %v1612_v62 }
 0xd3a   :  { %v1599_v34 = vpop.f32.mrf.mxu1 }
 0xd3b   :  { %v1600_v38 = vadd.f32 %v3063_v15, %v1599_v34  ;;  %v2151_v3 = vrot.slane %v1614_v0, 6 }
 0xd3d   :  { %v4230_v59 = vpack.c.bf16 %v1600_v38, %v1597_v37  ;;  %v1611_v39 = vmul.f32 0.35355338, %v1600_v38 }
 0xd3f   :  { %1618 = vrot.lane.b32.xlu1 %v4230_v59, %s3696_s17  ;;  %v1613_v41 = vpack.c.bf16 %v1611_v39, %v1610_v10  ;;  %v2154_v17 = vrot.slane %v4230_v59, 6 }
 0xd41   :  { %v4245_v21 = vsel %vm675_vm7, %v2154_v17, %v2155_v44  ;;  %v2150_v2 = vrot.slane %v1613_v41, 6 }
 0xd43   :  { %1692 = vrot.lane.b32.xlu1 %v4230_v59, %s3698_s20  ;;  %v2152_v61 = vsel %vm675_vm7, %v2150_v2, %v2151_v3 }
 0xd47   :  { %1744 = vrot.lane.b32.xlu1 %v1613_v41, %s3700_s22 }
 0xd4b   :  { %1881 = vrot.lane.b32.xlu1 %v4230_v59, %s3699_s21 }
 0xd4f   :  { %1879 = vrot.lane.b32.xlu1 %v1613_v41, %s3701_s23 }
 0xd53   :  { %2016 = vrot.lane.b32.xlu1 %v4230_v59, %s3704_s26 }
 0xd57   :  { %2014 = vrot.lane.b32.xlu1 %v1613_v41, %s3702_s24 }
 0xd5b   :  { %2284 = vrot.lane.b32.xlu1 %v4245_v21, %s3703_s25 }
 0xd5f   :  { %2419 = vrot.lane.b32.xlu1 %v4245_v21, %s3699_s21 }
 0xd63   :  { %2554 = vrot.lane.b32.xlu1 %v4245_v21, %s3704_s26 }
 0xdb1   :  { %v1619_v27 = vpop.permute.xlu1 %1618 }
 0xdb2   :  { %v1624_v32 = vsel %vm128_vm2, %v1619_v27, 0 }
 0xdb3   :  { %3367 = vmatpush3.bf16.xpose.msra.mxu1 %v1624_v32 }
 0xdb4   :  { %3372 = vmatprep.subr.bf16.mxu1 %v3694_v8 }
 0xdb5   :  { %v1693_v48 = vpop.permute.xlu1 %1692 }
 0xdb6   :  { %v1698_v36 = vsel %vm214_vm8, %v1693_v48, 0 }
 0xdb9   :  { %v1745_v9 = vpop.permute.xlu1 %1744 }
 0xdba   :  { %3369 = vmatmul.mubr.msk.bf16.vlgmr.msra.gmra.mxu1 %vm128_vm2, %v1613_v41 }
 0xdbb   :  { %3373 = vmatpush3.bf16.msra.mxu1 %v1698_v36  ;;  %3374 = vmatprep.mubr.msk.bf16.mxu1 %vm3695_vm1, %v3694_v8 }
 0xdbc   :  { %3378 = vmatprep.subr.bf16.mxu1 %v3694_v8 }
 0xdbd   :  { %v1882_v16 = vpop.permute.xlu1 %1881 }
 0xdbe   :  { %v1887_v5 = vsel %vm128_vm2, %v1882_v16, 0 }
 0xdc1   :  { %v1880_v4 = vpop.permute.xlu1 %1879 }
 0xdc5   :  { %v2017_v29 = vpop.permute.xlu1 %2016 }
 0xdc6   :  { %v2022_v30 = vsel %vm128_vm2, %v2017_v29, 0 }
 0xdc9   :  { %v2015_v33 = vpop.permute.xlu1 %2014 }
 0xdcd   :  { %v2285_v15 = vpop.permute.xlu1 %2284 }
 0xdce   :  { %v2290_v34 = vsel %vm128_vm2, %v2285_v15, 0 }
 0xdd1   :  { %v2420_v37 = vpop.permute.xlu1 %2419 }
 0xdd2   :  { %v2425_v39 = vsel %vm128_vm2, %v2420_v37, 0 }
 0xdd5   :  { %v2555_v10 = vpop.permute.xlu1 %2554 }
 0xdd6   :  { %v2560_v14 = vsel %vm128_vm2, %v2555_v10, 0 }
 0xe7a   :  { %v1660_v22 = vpop.f32.mrf.mxu1 }
 0xe7b   :  { %v1667_v18 = vsel %vm181_vm4, -3.5355338e+09, %v1660_v22 }
 0xe7c   :  { %v3370_v49 = vpop.f32.mrf.mxu1  ;;  %v1669_v40 = vsel %vm184_vm5, %v1667_v18, -inf }
 0xe7d   :  { %1670 = vmax.xlane.f32.xlu0 %v1669_v40 }
 0xe7e   :  { %v1663_v52 = vpop.f32.mrf.mxu1 }
 0xe7f   :  { %v1668_v45 = vsel %vm181_vm4, -3.5355338e+09, %v1663_v52 }
 0xe80   :  { %v3371_v46 = vpop.f32.mrf.mxu1  ;;  %v1672_v43 = vsel %vm188_vm6, %v1668_v45, -inf }
 0xe81   :  { %1673 = vmax.xlane.f32.xlu0 %v1672_v43 }
 0xf06   :  { %v1671_v54 = vpop.xlane.xlu0 %1670 }
 0xf07   :  { %v1675_v26 = vsub.f32 %v1667_v18, %v1671_v54 }
 0xf09   :  { %v1677_v56 = vmul.f32 1.442695, %v1675_v26 }
 0xf0a   :  { %v1674_v57 = vpop.xlane.xlu0 %1673 }
 0xf0b   :  { %3623 = vpow2.f32 %v1677_v56  ;;  %v1676_v58 = vsub.f32 %v1668_v45, %v1674_v57 }
 0xf0d   :  { %v1679_v55 = vmul.f32 1.442695, %v1676_v58 }
 0xf0f   :  { %3625 = vpow2.f32 %v1679_v55 }
 0xf18   :  { %v3624_v25 = vpop.eup %3623 }
 0xf19   :  { %v1681_v60 = vsel %vm184_vm5, %v3624_v25, 0.0 }
 0xf1a   :  { %1682 = vadd.xlane.f32.xlu0 %v1681_v60 }
 0xf1c   :  { %v3626_v47 = vpop.eup %3625 }
 0xf1d   :  { %v1684_v51 = vsel %vm188_vm6, %v3626_v47, 0.0 }
 0xf1e   :  { %1685 = vadd.xlane.f32.xlu0 %v1684_v51 }
 0xf34   :  { %1746 = vrot.lane.b32.xlu0 %v4230_v59, %s3703_s25 }
 0xf38   :  { %2157 = vrot.lane.b32.xlu0 %v4245_v21, %s3696_s17 }
 0xf3c   :  { %2282 = vrot.lane.b32.xlu0 %v2152_v61, %s3700_s22 }
 0xf40   :  { %2417 = vrot.lane.b32.xlu0 %v2152_v61, %s3701_s23 }
 0xf44   :  { %2552 = vrot.lane.b32.xlu0 %v2152_v61, %s3702_s24 }
 0xfa3   :  { %v1683_v50 = vpop.xlane.xlu0 %1682 }
 0xfa4   :  { %3627 = vrcp.f32 %v1683_v50 }
 0xfa7   :  { %v1686_v6 = vpop.xlane.xlu0 %1685 }
 0xfa8   :  { %3629 = vrcp.f32 %v1686_v6 }
 0xfab   :  { %v1747_v12 = vpop.permute.xlu0 %1746 }
 0xfac   :  { %v1752_v63 = vsel %vm128_vm2, %v1747_v12, 0 }
 0xfaf   :  { %v2158_v31 = vpop.permute.xlu0 %2157 }
 0xfb0   :  { %v2163_v35 = vsel %vm128_vm2, %v2158_v31, 0 }
 0xfb1   :  { %v3628_v24 = vpop.eup %3627 }
 0xfb2   :  { %v1688_v1 = vmul.f32 %v3628_v24, %v3624_v25 }
 0xfb3   :  { %v2283_v38 = vpop.permute.xlu0 %2282 }
 0xfb5   :  { %v3630_v7 = vpop.eup %3629 }
 0xfb6   :  { %v1690_v11 = vmul.f32 %v3630_v7, %v3626_v47 }
 0xfb7   :  { %v2418_v41 = vpop.permute.xlu0 %2417 }
 0xfb8   :  { %v1691_v13 = vpack.c.bf16 %v1690_v11, %v1688_v1 }
 0xfba   :  { %3375 = vmatmul.mubr.msk.bf16.vlgmr.msra.gmra.mxu1 %vm184_vm5, %v1691_v13 }
 0xfbb   :  { %3379 = vmatpush3.bf16.xpose.msra.mxu1 %v1752_v63  ;;  %3380 = vmatprep.mubr.msk.bf16.mxu1 %vm3695_vm1, %v3694_v8  ;;  %v2553_v42 = vpop.permute.xlu0 %2552 }
 0xfbc   :  { %3390 = vmatprep.subr.bf16.mxu1 %v3694_v8 }
 0xfc2   :  { %3381 = vmatmul.mubr.msk.bf16.vlgmr.msra.gmra.mxu1 %vm128_vm2, %v1745_v9 }
 0xfc3   :  { %3391 = vmatpush3.bf16.xpose.msra.mxu1 %v1887_v5  ;;  %3392 = vmatprep.mubr.msk.bf16.mxu1 %vm3695_vm1, %v3694_v8 }
 0xfc4   :  { %3402 = vmatprep.subr.bf16.mxu1 %v3694_v8 }
 0xfca   :  { %3393 = vmatmul.mubr.msk.bf16.vlgmr.msra.gmra.mxu1 %vm128_vm2, %v1880_v4 }
 0xfcb   :  { %3403 = vmatpush3.bf16.xpose.msra.mxu1 %v2022_v30  ;;  %3404 = vmatprep.mubr.msk.bf16.mxu1 %vm3695_vm1, %v3694_v8 }
 0xfcc   :  { %3414 = vmatprep.subr.bf16.mxu1 %v3694_v8 }
 0xfd2   :  { %3405 = vmatmul.mubr.msk.bf16.vlgmr.msra.gmra.mxu1 %vm128_vm2, %v2015_v33 }
 0xfd3   :  { %3415 = vmatpush3.bf16.xpose.msra.mxu1 %v2163_v35  ;;  %3416 = vmatprep.mubr.msk.bf16.mxu1 %vm3695_vm1, %v3694_v8 }
 0xfd4   :  { %3426 = vmatprep.subr.bf16.mxu1 %v3694_v8 }
 0xfda   :  { %3417 = vmatmul.mubr.msk.bf16.vlgmr.msra.gmra.mxu1 %vm128_vm2, %v2152_v61 }
 0xfdb   :  { %3427 = vmatpush3.bf16.xpose.msra.mxu1 %v2290_v34  ;;  %3428 = vmatprep.mubr.msk.bf16.mxu1 %vm3695_vm1, %v3694_v8 }
 0xfdc   :  { %3438 = vmatprep.subr.bf16.mxu1 %v3694_v8 }
 0xfe2   :  { %3429 = vmatmul.mubr.msk.bf16.vlgmr.msra.gmra.mxu1 %vm128_vm2, %v2283_v38 }
 0xfe3   :  { %3439 = vmatpush3.bf16.xpose.msra.mxu1 %v2425_v39  ;;  %3440 = vmatprep.mubr.msk.bf16.mxu1 %vm3695_vm1, %v3694_v8 }
 0xfe4   :  { %3450 = vmatprep.subr.bf16.mxu1 %v3694_v8 }
 0xfea   :  { %3441 = vmatmul.mubr.msk.bf16.vlgmr.msra.gmra.mxu1 %vm128_vm2, %v2418_v41 }
 0xfeb   :  { %3451 = vmatpush3.bf16.xpose.msra.mxu1 %v2560_v14  ;;  %3452 = vmatprep.mubr.msk.bf16.mxu1 %vm3695_vm1, %v3694_v8 }
 0xff2   :  { %3453 = vmatmul.mubr.msk.bf16.vlgmr.msra.gmra.mxu1 %vm128_vm2, %v2553_v42 }
0x107a   :  { %v1734_v17 = vpop.f32.mrf.mxu1 }
0x107b   :  { %1741 = vst.msk [vmem:[#allocation2] sm:$0xff] %vm128_vm2, %v1734_v17 }
0x107c   :  { %v3376_v44 = vpop.f32.mrf.mxu1 }
0x107e   :  { %v1737_v27 = vpop.f32.mrf.mxu1 }
0x107f   :  { %1742 = vst.msk [vmem:[#allocation2 + $0x8] sm:$0xf] %vm260_vm9, %v1737_v27 }
0x1080   :  { %v3377_v32 = vpop.f32.mrf.mxu1 }
0x1082   :  { %v1788_v48 = vpop.f32.mrf.mxu1 }
0x1083   :  { %v4315_v36 = vsel %vm181_vm4, -3.5355338e+09, %v1788_v48 }
0x1084   :  { %v3382_v22 = vpop.f32.mrf.mxu1  ;;  %v1797_v18 = vsel %vm184_vm5, %v4315_v36, -inf }
0x1085   :  { %1798 = vmax.xlane.f32.xlu1 %v1797_v18 }
0x1086   :  { %v1791_v49 = vpop.f32.mrf.mxu1 }
0x1087   :  { %v4321_v40 = vsel %vm181_vm4, -3.5355338e+09, %v1791_v49 }
0x1088   :  { %v3383_v52 = vpop.f32.mrf.mxu1  ;;  %v1800_v45 = vsel %vm188_vm6, %v4321_v40, -inf }
0x1089   :  { %1801 = vmax.xlane.f32.xlu0 %v1800_v45 }
0x108a   :  { %v1923_v46 = vpop.f32.mrf.mxu1 }
0x108b   :  { %v4327_v43 = vsel %vm181_vm4, -3.5355338e+09, %v1923_v46 }
0x108c   :  { %v3394_v54 = vpop.f32.mrf.mxu1  ;;  %v1932_v26 = vsel %vm184_vm5, %v4327_v43, -inf }
0x108d   :  { %1933 = vmax.xlane.f32.xlu0 %v1932_v26 }
0x108e   :  { %v1926_v56 = vpop.f32.mrf.mxu1 }
0x108f   :  { %v4333_v57 = vsel %vm181_vm4, -3.5355338e+09, %v1926_v56 }
0x1090   :  { %v1935_v58 = vsel %vm188_vm6, %v4333_v57, -inf  ;;  %v3395_v55 = vpop.f32.mrf.mxu1 }
0x1091   :  { %1936 = vmax.xlane.f32.xlu1 %v1935_v58 }
0x1092   :  { %v2058_v25 = vpop.f32.mrf.mxu1 }
0x1093   :  { %v4339_v60 = vsel %vm181_vm4, -3.5355338e+09, %v2058_v25 }
0x1094   :  { %v3406_v47 = vpop.f32.mrf.mxu1  ;;  %v2067_v51 = vsel %vm184_vm5, %v4339_v60, -inf }
0x1095   :  { %2068 = vmax.xlane.f32.xlu0 %v2067_v51 }
0x1096   :  { %v2061_v62 = vpop.f32.mrf.mxu1 }
0x1097   :  { %v4345_v0 = vsel %vm181_vm4, -3.5355338e+09, %v2061_v62 }
0x1098   :  { %v2070_v2 = vsel %vm188_vm6, %v4345_v0, -inf  ;;  %v3407_v3 = vpop.f32.mrf.mxu1 }
0x1099   :  { %2071 = vmax.xlane.f32.xlu1 %v2070_v2 }
0x109a   :  { %v2199_v61 = vpop.f32.mrf.mxu1 }
0x109b   :  { %v4351_v50 = vsel %vm737_vm11, -3.5355338e+09, %v2199_v61 }
0x109c   :  { %v3418_v6 = vpop.f32.mrf.mxu1  ;;  %v2208_v24 = vsel %vm184_vm5, %v4351_v50, -inf }
0x109d   :  { %2209 = vmax.xlane.f32.xlu0 %v2208_v24 }
0x109e   :  { %v2202_v7 = vpop.f32.mrf.mxu1 }
0x109f   :  { %v4357_v28 = vsel %vm737_vm11, -3.5355338e+09, %v2202_v7 }
0x10a0   :  { %v2211_v9 = vsel %vm188_vm6, %v4357_v28, -inf  ;;  %v3419_v1 = vpop.f32.mrf.mxu1 }
0x10a1   :  { %2212 = vmax.xlane.f32.xlu1 %v2211_v9 }
0x10a2   :  { %v2326_v11 = vpop.f32.mrf.mxu1 }
0x10a3   :  { %v4363_v12 = vsel %vm737_vm11, -3.5355338e+09, %v2326_v11 }
0x10a4   :  { %v3430_v13 = vpop.f32.mrf.mxu1  ;;  %v2335_v63 = vsel %vm184_vm5, %v4363_v12, -inf }
0x10a5   :  { %2336 = vmax.xlane.f32.xlu0 %v2335_v63 }
0x10a6   :  { %v2329_v16 = vpop.f32.mrf.mxu1 }
0x10a7   :  { %v4369_v4 = vsel %vm737_vm11, -3.5355338e+09, %v2329_v16 }
0x10a8   :  { %v2338_v5 = vsel %vm188_vm6, %v4369_v4, -inf  ;;  %v3431_v29 = vpop.f32.mrf.mxu1 }
0x10a9   :  { %2339 = vmax.xlane.f32.xlu1 %v2338_v5 }
0x10aa   :  { %v2461_v30 = vpop.f32.mrf.mxu1 }
0x10ab   :  { %v4375_v31 = vsel %vm737_vm11, -3.5355338e+09, %v2461_v30 }
0x10ac   :  { %v3442_v33 = vpop.f32.mrf.mxu1  ;;  %v2470_v35 = vsel %vm184_vm5, %v4375_v31, -inf }
0x10ad   :  { %2471 = vmax.xlane.f32.xlu0 %v2470_v35 }
0x10ae   :  { %v2464_v15 = vpop.f32.mrf.mxu1 }
0x10af   :  { %v4381_v34 = vsel %vm737_vm11, -3.5355338e+09, %v2464_v15 }
0x10b0   :  { %v2473_v37 = vsel %vm188_vm6, %v4381_v34, -inf  ;;  %v3443_v38 = vpop.f32.mrf.mxu1 }
0x10b1   :  { %2474 = vmax.xlane.f32.xlu1 %v2473_v37 }
0x10b2   :  { %v2596_v39 = vpop.f32.mrf.mxu1 }
0x10b3   :  { %v4397_v44 = vsel %vm737_vm11, -3.5355338e+09, %v2596_v39 }
0x10b4   :  { %v3454_v10 = vpop.f32.mrf.mxu1  ;;  %v2605_v27 = vsel %vm184_vm5, %v4397_v44, -inf }
0x10b6   :  { %v2599_v41 = vpop.f32.mrf.mxu1 }
0x10b7   :  { %v4387_v14 = vsel %vm737_vm11, -3.5355338e+09, %v2599_v41 }
0x10b8   :  { %v2608_v42 = vsel %vm188_vm6, %v4387_v14, -inf  ;;  %v3455_v17 = vpop.f32.mrf.mxu1 }
0x10b9   :  { %2609 = vmax.xlane.f32.xlu1 %v2608_v42 }
0x10c3   :  { %1820 = vrot.lane.b32.xlu0 %v4230_v59, %s3705_s1 }
0x10ca   :  { %1955 = vrot.lane.b32.xlu1 %v4230_v59, %s3706_s29 }
0x10e2   :  { %2606 = vmax.xlane.f32.xlu0 %v2605_v27 }
0x110e   :  { %v1799_v32 = vpop.xlane.xlu1 %1798 }
0x110f   :  { %v1803_v48 = vsub.f32 %v4315_v36, %v1799_v32 }
0x1111   :  { %v1805_v22 = vmul.f32 1.442695, %v1803_v48 }
0x1112   :  { %v1802_v18 = vpop.xlane.xlu0 %1801 }
0x1113   :  { %3631 = vpow2.f32 %v1805_v22  ;;  %v1804_v49 = vsub.f32 %v4321_v40, %v1802_v18 }
0x1115   :  { %v1807_v52 = vmul.f32 1.442695, %v1804_v49 }
0x1116   :  { %v1934_v45 = vpop.xlane.xlu0 %1933 }
0x1117   :  { %3633 = vpow2.f32 %v1807_v52  ;;  %v1938_v46 = vsub.f32 %v4327_v43, %v1934_v45 }
0x1119   :  { %v1940_v53 = vmul.f32 1.442695, %v1938_v46 }
0x111a   :  { %v1937_v54 = vpop.xlane.xlu1 %1936 }
0x111b   :  { %3635 = vpow2.f32 %v1940_v53  ;;  %v1939_v26 = vsub.f32 %v4333_v57, %v1937_v54 }
0x111d   :  { %v1942_v56 = vmul.f32 1.442695, %v1939_v26 }
0x111e   :  { %v2069_v58 = vpop.xlane.xlu0 %2068 }
0x111f   :  { %3637 = vpow2.f32 %v1942_v56  ;;  %v2073_v36 = vsub.f32 %v4339_v60, %v2069_v58 }
0x1120   :  { %v4406_v55 = vpop.eup %3631 }
0x1121   :  { %v2075_v25 = vmul.f32 1.442695, %v2073_v36  ;;  %v1809_v40 = vsel %vm184_vm5, %v4406_v55, 0.0 }
0x1122   :  { %v2072_v47 = vpop.xlane.xlu1 %2071  ;;  %1810 = vadd.xlane.f32.xlu0 %v1809_v40 }
0x1123   :  { %3639 = vpow2.f32 %v2075_v25  ;;  %v2074_v43 = vsub.f32 %v4345_v0, %v2072_v47 }
0x1124   :  { %v4411_v51 = vpop.eup %3633 }
0x1125   :  { %v2077_v62 = vmul.f32 1.442695, %v2074_v43  ;;  %v1812_v57 = vsel %vm188_vm6, %v4411_v51, 0.0 }
0x1126   :  { %1813 = vadd.xlane.f32.xlu1 %v1812_v57  ;;  %v2210_v3 = vpop.xlane.xlu0 %2209 }
0x1127   :  { %3641 = vpow2.f32 %v2077_v62  ;;  %v2214_v32 = vsub.f32 %v4351_v50, %v2210_v3 }
0x1128   :  { %v4415_v60 = vpop.eup %3635 }
0x1129   :  { %v1944_v2 = vsel %vm184_vm5, %v4415_v60, 0.0  ;;  %v2216_v48 = vmul.f32 1.442695, %v2214_v32 }
0x112a   :  { %v2213_v61 = vpop.xlane.xlu1 %2212  ;;  %1945 = vadd.xlane.f32.xlu0 %v1944_v2 }
0x112b   :  { %v2215_v6 = vsub.f32 %v4357_v28, %v2213_v61 }
0x112c   :  { %v4420_v24 = vpop.eup %3637 }
0x112d   :  { %v2218_v0 = vmul.f32 1.442695, %v2215_v6  ;;  %v1947_v7 = vsel %vm188_vm6, %v4420_v24, 0.0 }
0x112e   :  { %v2337_v9 = vpop.xlane.xlu0 %2336  ;;  %1948 = vadd.xlane.f32.xlu1 %v1947_v7 }
0x112f   :  { %3643 = vpow2.f32 %v2218_v0  ;;  %v2341_v1 = vsub.f32 %v4363_v12, %v2337_v9 }
0x1130   :  { %v4425_v11 = vpop.eup %3639 }
0x1131   :  { %v2343_v13 = vmul.f32 1.442695, %v2341_v1  ;;  %v2079_v63 = vsel %vm184_vm5, %v4425_v11, 0.0 }
0x1132   :  { %v2340_v16 = vpop.xlane.xlu1 %2339  ;;  %2080 = vadd.xlane.f32.xlu0 %v2079_v63 }
0x1133   :  { %3645 = vpow2.f32 %v2343_v13  ;;  %v2342_v28 = vsub.f32 %v4369_v4, %v2340_v16 }
0x1134   :  { %v4430_v5 = vpop.eup %3641 }
0x1135   :  { %v2345_v29 = vmul.f32 1.442695, %v2342_v28  ;;  %v2082_v30 = vsel %vm188_vm6, %v4430_v5, 0.0 }
0x1136   :  { %v2472_v33 = vpop.xlane.xlu0 %2471  ;;  %2083 = vadd.xlane.f32.xlu1 %v2082_v30 }
0x1137   :  { %3647 = vpow2.f32 %v2345_v29  ;;  %v2476_v22 = vsub.f32 %v4375_v31, %v2472_v33 }
0x1139   :  { %v2478_v18 = vmul.f32 1.442695, %v2476_v22 }
0x113a   :  { %v1821_v12 = vpop.permute.xlu0 %1820  ;;  %v2475_v35 = vpop.xlane.xlu1 %2474 }
0x113b   :  { %v1826_v15 = vsel %vm214_vm8, %v1821_v12, 0  ;;  %v2477_v37 = vsub.f32 %v4381_v34, %v2475_v35 }
0x113c   :  { %v4436_v38 = vpop.eup %3643  ;;  %3385 = vmatpush3.bf16.msra.mxu0 %v1826_v15 }
0x113d   :  { %v2480_v39 = vmul.f32 1.442695, %v2477_v37  ;;  %v2223_v4 = vsel %vm188_vm6, %v4436_v38, 0.0  ;;  %3396 = vmatprep.subr.bf16.mxu0 %v3694_v8 }
0x113e   :  { %2224 = vadd.xlane.f32.xlu1 %v2223_v4 }
0x113f   :  { %3649 = vpow2.f32 %v2480_v39 }
0x1140   :  { %v4441_v10 = vpop.eup %3645  ;;  %3651 = vpow2.f32 %v2216_v48 }
0x1141   :  { %v2347_v41 = vsel %vm184_vm5, %v4441_v10, 0.0  ;;  %3653 = vpow2.f32 %v2478_v18 }
0x1142   :  { %2348 = vadd.xlane.f32.xlu1 %v2347_v41  ;;  %v2610_v45 = vpop.xlane.xlu1 %2609 }
0x1143   :  { %v2612_v46 = vsub.f32 %v4387_v14, %v2610_v45 }
0x1144   :  { %v4445_v42 = vpop.eup %3647 }
0x1145   :  { %v2350_v34 = vsel %vm188_vm6, %v4445_v42, 0.0  ;;  %v2615_v54 = vmul.f32 1.442695, %v2612_v46 }
0x1146   :  { %2351 = vadd.xlane.f32.xlu1 %v2350_v34 }
0x1148   :  { %2090 = vrot.lane.b32.xlu0 %v4230_v59, %s3707_s30 }
0x114c   :  { %v4451_v17 = vpop.eup %3649 }
0x114d   :  { %v2485_v27 = vsel %vm188_vm6, %v4451_v17, 0.0  ;;  %v4457_v49 = vpop.eup %3651 }
0x114e   :  { %2486 = vadd.xlane.f32.xlu1 %v2485_v27  ;;  %v2220_v52 = vsel %vm184_vm5, %v4457_v49, 0.0  ;;  %v4461_v59 = vpop.eup %3653 }
0x114f   :  { %v2482_v50 = vsel %vm184_vm5, %v4461_v59, 0.0 }
0x1167   :  { %2221 = vadd.xlane.f32.xlu0 %v2220_v52 }
0x116b   :  { %2483 = vadd.xlane.f32.xlu0 %v2482_v50  ;;  %v2607_v53 = vpop.xlane.xlu0 %2606 }
0x116c   :  { %v2611_v31 = vsub.f32 %v4397_v44, %v2607_v53  ;;  %v1956_v44 = vpop.permute.xlu1 %1955 }
0x116d   :  { %v1961_v0 = vsel %vm214_vm8, %v1956_v44, 0 }
0x116e   :  { %v2613_v26 = vmul.f32 1.442695, %v2611_v31 }
0x1170   :  { %3655 = vpow2.f32 %v2613_v26 }
0x1171   :  { %3657 = vpow2.f32 %v2615_v54 }
0x117d   :  { %v4467_v56 = vpop.eup %3655 }
0x117e   :  { %v2617_v58 = vsel %vm184_vm5, %v4467_v56, 0.0  ;;  %v4471_v36 = vpop.eup %3657 }
0x117f   :  { %2618 = vadd.xlane.f32.xlu1 %v2617_v58  ;;  %v2620_v14 = vsel %vm188_vm6, %v4471_v36, 0.0 }
0x1181   :  { %2358 = vrot.lane.b32.xlu0 %v4245_v21, %s3705_s1 }
0x1183   :  { %2621 = vadd.xlane.f32.xlu1 %v2620_v14 }
0x1185   :  { %2493 = vrot.lane.b32.xlu0 %v4245_v21, %s3706_s29 }
0x1189   :  { %2628 = vrot.lane.b32.xlu0 %v4245_v21, %s3707_s30 }
0x1194   :  { %2231 = vrot.lane.b32.xlu1 %v4245_v21, %s3698_s20 }
0x11ab   :  { %v1811_v25 = vpop.xlane.xlu0 %1810 }
0x11ac   :  { %3659 = vrcp.f32 %v1811_v25 }
0x11af   :  { %v1814_v40 = vpop.xlane.xlu1 %1813 }
0x11b0   :  { %3661 = vrcp.f32 %v1814_v40 }
0x11b3   :  { %v1946_v47 = vpop.xlane.xlu0 %1945 }
0x11b4   :  { %3663 = vrcp.f32 %v1946_v47 }
0x11b7   :  { %v1949_v43 = vpop.xlane.xlu1 %1948 }
0x11b8   :  { %3665 = vrcp.f32 %v1949_v43 }
0x11b9   :  { %v3660_v62 = vpop.eup %3659 }
0x11ba   :  { %v1816_v3 = vmul.f32 %v3660_v62, %v4406_v55 }
0x11bb   :  { %v2081_v57 = vpop.xlane.xlu0 %2080 }
0x11bc   :  { %3667 = vrcp.f32 %v2081_v57 }
0x11bd   :  { %v3662_v2 = vpop.eup %3661 }
0x11be   :  { %v1818_v61 = vmul.f32 %v3662_v2, %v4411_v51 }
0x11bf   :  { %v2084_v6 = vpop.xlane.xlu1 %2083  ;;  %v2091_v51 = vpop.permute.xlu0 %2090 }
0x11c0   :  { %3669 = vrcp.f32 %v2084_v6  ;;  %v1819_v21 = vpack.c.bf16 %v1818_v61, %v1816_v3  ;;  %v2096_v63 = vsel %vm214_vm8, %v2091_v51, 0 }
0x11c1   :  { %v3664_v7 = vpop.eup %3663 }
0x11c2   :  { %3387 = vmatmul.mubr.msk.bf16.vlgmr.msra.gmra.mxu0 %vm184_vm5, %v1819_v21  ;;  %v1951_v1 = vmul.f32 %v3664_v7, %v4415_v60 }
0x11c3   :  { %3397 = vmatpush3.bf16.msra.mxu0 %v1961_v0  ;;  %3398 = vmatprep.mubr.msk.bf16.mxu0 %vm3695_vm1, %v3694_v8 }
0x11c4   :  { %3408 = vmatprep.subr.bf16.mxu0 %v3694_v8 }
0x11c5   :  { %v3666_v9 = vpop.eup %3665 }
0x11c6   :  { %v1953_v55 = vmul.f32 %v3666_v9, %v4420_v24 }
0x11c7   :  { %v2225_v24 = vpop.xlane.xlu1 %2224 }
0x11c8   :  { %v1954_v13 = vpack.c.bf16 %v1953_v55, %v1951_v1 }
0x11c9   :  { %v3668_v16 = vpop.eup %3667 }
0x11ca   :  { %3399 = vmatmul.mubr.msk.bf16.vlgmr.msra.gmra.mxu0 %vm184_vm5, %v1954_v13  ;;  %v2086_v29 = vmul.f32 %v3668_v16, %v4425_v11 }
0x11cb   :  { %3409 = vmatpush3.bf16.msra.mxu0 %v2096_v63  ;;  %3410 = vmatprep.mubr.msk.bf16.mxu0 %vm3695_vm1, %v3694_v8  ;;  %v2349_v33 = vpop.xlane.xlu1 %2348 }
0x11cc   :  { %3420 = vmatprep.subr.bf16.mxu0 %v3694_v8 }
0x11cd   :  { %v3670_v28 = vpop.eup %3669 }
0x11ce   :  { %v2088_v60 = vmul.f32 %v3670_v28, %v4430_v5 }
0x11cf   :  { %v2352_v35 = vpop.xlane.xlu1 %2351 }
0x11d0   :  { %v2089_v30 = vpack.c.bf16 %v2088_v60, %v2086_v29 }
0x11d2   :  { %3411 = vmatmul.mubr.msk.bf16.vlgmr.msra.gmra.mxu0 %vm184_vm5, %v2089_v30 }
0x11d3   :  { %3422 = vmatprep.mubr.msk.bf16.mxu0 %vm3695_vm1, %v3694_v8 }
0x11d7   :  { %v2487_v15 = vpop.xlane.xlu1 %2486 }
0x11f0   :  { %v2222_v12 = vpop.xlane.xlu0 %2221 }
0x11f1   :  { %3671 = vrcp.f32 %v2222_v12 }
0x11f2   :  { %3673 = vrcp.f32 %v2225_v24 }
0x11f3   :  { %3675 = vrcp.f32 %v2352_v35 }
0x11f4   :  { %3677 = vrcp.f32 %v2349_v33  ;;  %v2484_v11 = vpop.xlane.xlu0 %2483 }
0x11f5   :  { %3679 = vrcp.f32 %v2484_v11 }
0x11f6   :  { %3681 = vrcp.f32 %v2487_v15 }
0x11f8   :  { %v2359_v48 = vpop.permute.xlu0 %2358 }
0x11f9   :  { %v2364_v52 = vsel %vm214_vm8, %v2359_v48, 0 }
0x11fc   :  { %v2494_v46 = vpop.permute.xlu0 %2493 }
0x11fd   :  { %v2499_v31 = vsel %vm214_vm8, %v2494_v46, 0 }
0x11fe   :  { %v3672_v39 = vpop.eup %3671 }
0x11ff   :  { %v3674_v5 = vpop.eup %3673  ;;  %v2227_v41 = vmul.f32 %v3672_v39, %v4457_v49 }
0x1200   :  { %v2229_v32 = vmul.f32 %v3674_v5, %v4436_v38  ;;  %v3676_v18 = vpop.eup %3675  ;;  %v2629_v58 = vpop.permute.xlu0 %2628 }
0x1201   :  { %v3678_v45 = vpop.eup %3677  ;;  %v2356_v38 = vmul.f32 %v3676_v18, %v4445_v42  ;;  %v2634_v44 = vsel %vm214_vm8, %v2629_v58, 0 }
0x1202   :  { %v2230_v22 = vpack.c.bf16 %v2229_v32, %v2227_v41  ;;  %v2354_v49 = vmul.f32 %v3678_v45, %v4441_v10  ;;  %v3680_v53 = vpop.eup %3679 }
0x1203   :  { %v3682_v54 = vpop.eup %3681  ;;  %v2489_v26 = vmul.f32 %v3680_v53, %v4461_v59 }
0x1204   :  { %v2357_v50 = vpack.c.bf16 %v2356_v38, %v2354_v49  ;;  %v2491_v42 = vmul.f32 %v3682_v54, %v4451_v17 }
0x1206   :  { %v2492_v10 = vpack.c.bf16 %v2491_v42, %v2489_v26 }
0x1208   :  { %v2619_v37 = vpop.xlane.xlu1 %2618 }
0x120c   :  { %v2622_v4 = vpop.xlane.xlu1 %2621 }
0x120d   :  { %3683 = vrcp.f32 %v2622_v4 }
0x120e   :  { %3685 = vrcp.f32 %v2619_v37 }
0x1210   :  { %v2232_v34 = vpop.permute.xlu1 %2231 }
0x1211   :  { %v2237_v27 = vsel %vm214_vm8, %v2232_v34, 0 }
0x1212   :  { %3421 = vmatpush3.bf16.msra.mxu0 %v2237_v27 }
0x1213   :  { %3432 = vmatprep.subr.bf16.mxu0 %v3694_v8 }
0x1215   :  { %3423 = vmatmul.mubr.msk.bf16.vlgmr.msra.gmra.mxu0 %vm184_vm5, %v2230_v22 }
0x1216   :  { %3433 = vmatpush3.bf16.msra.mxu0 %v2364_v52  ;;  %3434 = vmatprep.mubr.msk.bf16.mxu0 %vm3695_vm1, %v3694_v8 }
0x1217   :  { %3444 = vmatprep.subr.bf16.mxu0 %v3694_v8 }
0x121a   :  { %v3684_v14 = vpop.eup %3683 }
0x121b   :  { %v3686_v25 = vpop.eup %3685  ;;  %v2626_v40 = vmul.f32 %v3684_v14, %v4471_v36 }
0x121c   :  { %v2624_v47 = vmul.f32 %v3686_v25, %v4467_v56 }
0x121d   :  { %3435 = vmatmul.mubr.msk.bf16.vlgmr.msra.gmra.mxu0 %vm184_vm5, %v2357_v50 }
0x121e   :  { %3445 = vmatpush3.bf16.msra.mxu0 %v2499_v31  ;;  %3446 = vmatprep.mubr.msk.bf16.mxu0 %vm3695_vm1, %v3694_v8  ;;  %v2627_v43 = vpack.c.bf16 %v2626_v40, %v2624_v47 }
0x121f   :  { %3456 = vmatprep.subr.bf16.mxu0 %v3694_v8 }
0x1225   :  { %3447 = vmatmul.mubr.msk.bf16.vlgmr.msra.gmra.mxu0 %vm184_vm5, %v2492_v10 }
0x1226   :  { %3457 = vmatpush3.bf16.msra.mxu0 %v2634_v44  ;;  %3458 = vmatprep.mubr.msk.bf16.mxu0 %vm3695_vm1, %v3694_v8 }
0x122d   :  { %3459 = vmatmul.mubr.msk.bf16.vlgmr.msra.gmra.mxu0 %vm184_vm5, %v2627_v43 }
0x1282   :  { %v1862_v17 = vpop.f32.mrf.mxu0 }
0x1283   :  { %1871 = vrot.lane.b32.xlu0 %v1862_v17, %s3708_s9 }
0x1284   :  { %v3388_v59 = vpop.f32.mrf.mxu0 }
0x1286   :  { %v1865_v62 = vpop.f32.mrf.mxu0 }
0x1287   :  { %1873 = vrot.lane.b32.xlu1 %v1865_v62, %s3708_s9 }
0x1288   :  { %v3389_v57 = vpop.f32.mrf.mxu0 }
0x128a   :  { %v1997_v2 = vpop.f32.mrf.mxu0 }
0x128b   :  { %2006 = vrot.lane.b32.xlu1 %v1997_v2, %s3709_s10 }
0x128c   :  { %v3400_v3 = vpop.f32.mrf.mxu0 }
0x128e   :  { %v2000_v8 = vpop.f32.mrf.mxu0 }
0x128f   :  { %2008 = vrot.lane.b32.xlu0 %v2000_v8, %s3709_s10  ;;  %v3545_v8 = vld [vmem:[%s4619_s4 + $0x18] sm:$0xff]  }
0x1290   :  { %v3401_v36 = vpop.f32.mrf.mxu0  ;;  %3462 = vmatprep.subr.bf16.mxu1 %v3545_v8 }
0x1291   :  { %3463 = vmatpush3.bf16.msra.mxu1 %v3545_v8 }
0x1292   :  { %v2132_v56 = vpop.f32.mrf.mxu0 }
0x1293   :  { %2141 = vrot.lane.b32.xlu0 %v2132_v56, %s3710_s11 }
0x1294   :  { %v3412_v61 = vpop.f32.mrf.mxu0 }
0x1296   :  { %v2135_v6 = vpop.f32.mrf.mxu0 }
0x1297   :  { %2143 = vrot.lane.b32.xlu1 %v2135_v6, %s3710_s11 }
0x1298   :  { %v3413_v21 = vpop.f32.mrf.mxu0 }
0x1299   :  { %v3546_v21 = vld [vmem:[%s4619_s4 + $0x10] sm:$0xff]  }
0x129a   :  { %3464 = vmatprep.subr.bf16.mxu1 %v3546_v21 }
0x129b   :  { %3465 = vmatpush3.bf16.msra.mxu1 %v3546_v21 }
0x12d5   :  { %v2273_v0 = vpop.f32.mrf.mxu0 }
0x12d6   :  { %2280 = vst.msk [vmem:[#allocation2 + $0xc] sm:$0xff] %vm128_vm2, %v2273_v0 }
0x12d7   :  { %v3424_v7 = vpop.f32.mrf.mxu0 }
0x12d9   :  { %v2276_v9 = vpop.f32.mrf.mxu0 }
0x12da   :  { %2281 = vst.msk [vmem:[#allocation2 + $0x14] sm:$0xf] %vm260_vm9, %v2276_v9  ;;  %v3547_v9 = vld [vmem:[%s4620_s6 + $0x78] sm:$0xff]  }
0x12db   :  { %v3425_v1 = vpop.f32.mrf.mxu0  ;;  %3470 = vmatprep.subr.bf16.mxu0 %v3547_v9 }
0x12dc   :  { %v3548_v1 = vld [vmem:[%s4620_s6 + $0x70] sm:$0xff]   ;;  %3471 = vmatpush3.bf16.msra.mxu0 %v3547_v9 }
0x12dd   :  { %v2400_v55 = vpop.f32.mrf.mxu0  ;;  %3472 = vmatprep.subr.bf16.mxu0 %v3548_v1 }
0x12de   :  { %2409 = vrot.lane.b32.xlu0 %v2400_v55, %s3708_s9 }
0x12df   :  { %v3436_v51 = vpop.f32.mrf.mxu0 }
0x12e0   :  { %v3549_v51 = vld [vmem:[%s4620_s6 + $0x68] sm:$0xff]   ;;  %3473 = vmatpush3.bf16.msra.mxu0 %v3548_v1 }
0x12e1   :  { %v2403_v13 = vpop.f32.mrf.mxu0  ;;  %3474 = vmatprep.subr.bf16.mxu0 %v3549_v51 }
0x12e2   :  { %2411 = vrot.lane.b32.xlu0 %v2403_v13, %s3708_s9  ;;  %v3550_v13 = vld [vmem:[%s4620_s6 + $0x60] sm:$0xff]  }
0x12e3   :  { %v3437_v63 = vpop.f32.mrf.mxu0 }
0x12e4   :  { %3475 = vmatpush3.bf16.msra.mxu0 %v3549_v51  ;;  %v3551_v63 = vld [vmem:[%s4620_s6 + $0x58] sm:$0xff]  }
0x12e5   :  { %v2535_v16 = vpop.f32.mrf.mxu0  ;;  %3476 = vmatprep.subr.bf16.mxu0 %v3550_v13 }
0x12e6   :  { %2544 = vrot.lane.b32.xlu1 %v2535_v16, %s3709_s10 }
0x12e7   :  { %v3448_v28 = vpop.f32.mrf.mxu0 }
0x12e8   :  { %3477 = vmatpush3.bf16.msra.mxu0 %v3550_v13 }
0x12e9   :  { %v2538_v29 = vpop.f32.mrf.mxu0  ;;  %3478 = vmatprep.subr.bf16.mxu0 %v3551_v63 }
0x12ea   :  { %2546 = vrot.lane.b32.xlu0 %v2538_v29, %s3709_s10 }
0x12eb   :  { %v3449_v60 = vpop.f32.mrf.mxu0 }
0x12ec   :  { %3479 = vmatpush3.bf16.msra.mxu0 %v3551_v63 }
0x12ed   :  { %v2670_v30 = vpop.f32.mrf.mxu0 }
0x12ee   :  { %2679 = vrot.lane.b32.xlu1 %v2670_v30, %s3710_s11 }
0x12ef   :  { %v3460_v24 = vpop.f32.mrf.mxu0 }
0x12f1   :  { %v2673_v33 = vpop.f32.mrf.mxu0 }
0x12f2   :  { %2681 = vrot.lane.b32.xlu1 %v2673_v33, %s3710_s11 }
0x12f3   :  { %v3461_v12 = vpop.f32.mrf.mxu0 }
0x12f5   :  { %v1872_v35 = vpop.permute.xlu0 %1871 }
0x12f6   :  { %1877 = vst.msk [vmem:[#allocation2] sm:$0xff] %vm396_vm12, %v1872_v35  ;;  %v3552_v35 = vld [vmem:[%s4620_s6 + $0x50] sm:$0xff]  }
0x12f7   :  { %3480 = vmatprep.subr.bf16.mxu0 %v3552_v35 }
0x12f8   :  { %3481 = vmatpush3.bf16.msra.mxu0 %v3552_v35 }
0x12f9   :  { %v1874_v15 = vpop.permute.xlu1 %1873 }
0x12fa   :  { %1878 = vst.msk [vmem:[#allocation2 + $0x8] sm:$0xf] %vm398_vm13, %v1874_v15  ;;  %v3553_v15 = vld [vmem:[%s4620_s6 + $0x48] sm:$0xff]  }
0x12fb   :  { %3482 = vmatprep.subr.bf16.mxu0 %v3553_v15 }
0x12fc   :  { %3483 = vmatpush3.bf16.msra.mxu0 %v3553_v15 }
0x12fd   :  { %v2007_v37 = vpop.permute.xlu1 %2006 }
0x12fe   :  { %2012 = vst.msk [vmem:[#allocation2] sm:$0xff] %vm533_vm14, %v2007_v37  ;;  %v3554_v37 = vld [vmem:[%s4620_s6 + $0x40] sm:$0xff]  }
0x12ff   :  { %3484 = vmatprep.subr.bf16.mxu0 %v3554_v37 }
0x1300   :  { %3485 = vmatpush3.bf16.msra.mxu0 %v3554_v37 }
0x1301   :  { %v2009_v39 = vpop.permute.xlu0 %2008 }
0x1302   :  { %2013 = vst.msk [vmem:[#allocation2 + $0x8] sm:$0xf] %vm535_vm15, %v2009_v39 }
0x1305   :  { %v2142_v11 = vpop.permute.xlu0 %2141 }
0x1306   :  { %2147 = vst.msk [vmem:[#allocation2] sm:$0xff] %vm670_vm3, %v2142_v11  ;;  %v3106_v11 = vld [vmem:[%s4621_s5 + $0x1] ss:$0 sm:$0xff] }
0x1309   :  { %v2144_v4 = vpop.permute.xlu1 %2143 }
0x130a   :  { %2148 = vst.msk [vmem:[#allocation2 + $0x8] sm:$0xf] %vm672_vm10, %v2144_v4 }
0x130d   :  { %v2687_v22 = vld [vmem:[#allocation2] sm:$0xff] }
0x130e   :  { %v2690_v52 = vadd.f32 %v2687_v22, %v4213_v19 }
0x1310   :  { %v2693_v50 = vsel %vm63_vm0, %v2690_v52, 0.0 }
0x1350   :  { %v2410_v5 = vpop.permute.xlu0 %2409 }
0x1351   :  { %2415 = vst.msk [vmem:[#allocation2 + $0xc] sm:$0xff] %vm396_vm12, %v2410_v5 }
0x1354   :  { %v2412_v41 = vpop.permute.xlu0 %2411 }
0x1355   :  { %2416 = vst.msk [vmem:[#allocation2 + $0x14] sm:$0xf] %vm398_vm13, %v2412_v41 }
0x1358   :  { %v2545_v34 = vpop.permute.xlu1 %2544 }
0x1359   :  { %2550 = vst.msk [vmem:[#allocation2 + $0xc] sm:$0xff] %vm533_vm14, %v2545_v34 }
0x135c   :  { %v2547_v27 = vpop.permute.xlu0 %2546 }
0x135d   :  { %2551 = vst.msk [vmem:[#allocation2 + $0x14] sm:$0xf] %vm535_vm15, %v2547_v27 }
0x1360   :  { %v2680_v32 = vpop.permute.xlu1 %2679 }
0x1361   :  { %2685 = vst.msk [vmem:[#allocation2 + $0xc] sm:$0xff] %vm670_vm3, %v2680_v32 }
0x1364   :  { %v2682_v48 = vpop.permute.xlu1 %2681 }
0x1365   :  { %2686 = vst.msk [vmem:[#allocation2 + $0x14] sm:$0xf] %vm672_vm10, %v2682_v48 }
0x1368   :  { %v2688_v18 = vld [vmem:[#allocation2 + $0x8] sm:$0xff] }
0x1369   :  { %v2691_v45 = vadd.f32 %v2688_v18, %v4215_v20 }
0x136b   :  { %v2694_v38 = vsel %vm63_vm0, %v2691_v45, 0.0 }
0x136c   :  { %v2689_v49 = vld [vmem:[#allocation2 + $0x10] sm:$0xff]  ;;  %v2695_v53 = vadd.f32 %v2694_v38, %v2693_v50 }
0x136d   :  { %v2692_v46 = vadd.f32 %v2689_v49, %v4217_v23  ;;  %v3111_v49 = vld [vmem:[%s4622_s7 + $0x1] ss:$0 sm:$0xff] }
0x136f   :  { %v2696_v31 = vsel %vm63_vm0, %v2692_v46, 0.0 }
0x1370   :  { %v2697_v54 = vadd.f32 %v2696_v31, %v2695_v53 }
0x1372   :  { %2698 = vadd.xlane.f32.xlu0 %v2697_v54 }
0x13fb   :  { %v2699_v26 = vpop.xlane.xlu0 %2698 }
0x13fc   :  { %v2700_v42 = vrot.slane %v2699_v26, 4 }
0x13fe   :  { %v2701_v58 = vadd.f32 %v2700_v42, %v2699_v26 }
0x1400   :  { %v2702_v10 = vrot.slane %v2701_v58, 2 }
0x1402   :  { %v2703_v14 = vadd.f32 %v2702_v10, %v2701_v58 }
0x1404   :  { %v2704_v19 = vrot.slane %v2703_v14, 1 }
0x1406   :  { %v2705_v44 = vadd.f32 %v2704_v19, %v2703_v14 }
0x1408   :  { %3502 = vpush %v2705_v44 }
0x1439   :  { %s3503_s3 = spop %3502 }
0x143a   :  { %s2709_s17 = smul.f32 0.0013020834, %s3503_s3 }
0x143c   :  { %v2710_v20 = vstv %s2709_s17 }
0x143d   :  { %v2711_v25 = vsub.f32 %v2690_v52, %v2710_v20  ;;  %v2712_v23 = vsub.f32 %v2691_v45, %v2710_v20  ;;  %v2713_v40 = vsub.f32 %v2692_v46, %v2710_v20 }
0x143f   :  { %v2714_v47 = vmul.f32 %v2711_v25, %v2711_v25  ;;  %v2715_v43 = vmul.f32 %v2712_v23, %v2712_v23  ;;  %v2716_v17 = vmul.f32 %v2713_v40, %v2713_v40 }
0x1441   :  { %v2717_v59 = vsel %vm63_vm0, %v2714_v47, 0.0  ;;  %v2718_v62 = vsel %vm63_vm0, %v2715_v43, 0.0  ;;  %v2720_v2 = vsel %vm63_vm0, %v2716_v17, 0.0 }
0x1442   :  { %v2719_v57 = vadd.f32 %v2718_v62, %v2717_v59 }
0x1444   :  { %v2721_v3 = vadd.f32 %v2720_v2, %v2719_v57 }
0x1446   :  { %2722 = vadd.xlane.f32.xlu1 %v2721_v3 }
0x14cf   :  { %v2723_v36 = vpop.xlane.xlu1 %2722 }
0x14d0   :  { %v2724_v56 = vrot.slane %v2723_v36, 4 }
0x14d2   :  { %v2725_v61 = vadd.f32 %v2724_v56, %v2723_v36 }
0x14d4   :  { %v2726_v6 = vrot.slane %v2725_v61, 2 }
0x14d6   :  { %v2727_v0 = vadd.f32 %v2726_v6, %v2725_v61 }
0x14d8   :  { %v2728_v7 = vrot.slane %v2727_v0, 1 }
0x14da   :  { %v2729_v55 = vadd.f32 %v2728_v7, %v2727_v0 }
0x14dc   :  { %3504 = vpush %v2729_v55 }
0x150d   :  { %s3505_s27 = spop %3504 }
0x150e   :  { %s2733_s0 = smul.f32 0.0013020834, %s3505_s27 }
0x1510   :  { %s2734_s28 = sadd.f32 1e-05, %s2733_s0 }
0x1512   :  { %v2735_v16 = vstv %s2734_s28 }
0x1513   :  { %3687 = vrsqrt.f32 %v2735_v16 }
0x1520   :  { %v3688_v28 = vpop.eup %3687 }
0x1521   :  { %3506 = vpush %v3688_v28 }
0x1552   :  { %s3507_s12 = spop %3506 }
0x1553   :  { %v2738_v29 = vstv %s3507_s12 }
0x1554   :  { %v2739_v60 = vmul.f32 %v2738_v29, %v2711_v25  ;;  %v2740_v30 = vmul.f32 %v2738_v29, %v2712_v23  ;;  %v2741_v24 = vmul.f32 %v2738_v29, %v2713_v40 }
0x1556   :  { %v2768_v33 = vpack.c.bf16 %v2740_v30, %v2739_v60  ;;  %v2769_v12 = vpack.c.bf16 %v2741_v24, %v2741_v24 }
0x1558   :  { %3466 = vmatprep.mubr.msk.bf16.mxu1 %vm63_vm0, %v2768_v33 }
0x1559   :  { %3467 = vmatmul.mubr.msk.bf16.vlgmr.msra.gmra.mxu1 %vm63_vm0, %v2769_v12 }
0x1619   :  { %v3468_v39 = vpop.f32.mrf.mxu1 }
0x161a   :  { %v2837_v5 = vadd.f32 %v3468_v39, %v3106_v11 }
0x161b   :  { %v2828_v4 = vpop.f32.mrf.mxu1 }
0x161c   :  { %v2829_v34 = vadd.f32 %v3106_v11, %v2828_v4  ;;  %v2844_v48 = vmax.f32 %v2837_v5, 0.0 }
0x161d   :  { %v3469_v41 = vpop.f32.mrf.mxu1 }
0x161e   :  { %v2842_v22 = vmax.f32 %v2829_v34, 0.0  ;;  %v2846_v45 = vpack.c.bf16 %v2844_v48, %v2844_v48 }
0x161f   :  { %v2831_v27 = vpop.f32.mrf.mxu1 }
0x1620   :  { %v2832_v32 = vadd.f32 %v3106_v11, %v2831_v27 }
0x1622   :  { %v2843_v18 = vmax.f32 %v2832_v32, 0.0 }
0x1624   :  { %v2845_v52 = vpack.c.bf16 %v2843_v18, %v2842_v22 }
0x1626   :  { %3486 = vmatprep.mubr.bf16.mxu0 %v2845_v52 }
0x1627   :  { %3487 = vmatmul.mubr.bf16.vlgmr.msra.gmra.mxu0 %v2846_v45 }
0x16e7   :  { %v3488_v38 = vpop.f32.mrf.mxu0 }
0x16e8   :  { %v2944_v31 = vadd.f32 %v3488_v38, %v3111_v49 }
0x16e9   :  { %v2935_v46 = vpop.f32.mrf.mxu0 }
0x16ea   :  { %v2936_v50 = vadd.f32 %v3111_v49, %v2935_v46  ;;  %v2951_v58 = vadd.f32 %v2944_v31, %v2741_v24 }
0x16eb   :  { %v3489_v53 = vpop.f32.mrf.mxu0 }
0x16ec   :  { %v2949_v26 = vadd.f32 %v2936_v50, %v2739_v60  ;;  %v2955_v20 = vsel %vm63_vm0, %v2951_v58, 0.0 }
0x16ed   :  { %v2938_v54 = vpop.f32.mrf.mxu0 }
0x16ee   :  { %v2939_v42 = vadd.f32 %v3111_v49, %v2938_v54  ;;  %v2952_v14 = vsel %vm63_vm0, %v2949_v26, 0.0 }
0x16f0   :  { %v2950_v10 = vadd.f32 %v2939_v42, %v2740_v30 }
0x16f2   :  { %v2953_v19 = vsel %vm63_vm0, %v2950_v10, 0.0 }
0x16f3   :  { %v2954_v44 = vadd.f32 %v2953_v19, %v2952_v14 }
0x16f5   :  { %v2956_v25 = vadd.f32 %v2955_v20, %v2954_v44 }
0x16f7   :  { %2957 = vadd.xlane.f32.xlu0 %v2956_v25 }
0x1780   :  { %v2958_v23 = vpop.xlane.xlu0 %2957 }
0x1781   :  { %v2959_v40 = vrot.slane %v2958_v23, 4 }
0x1783   :  { %v2960_v47 = vadd.f32 %v2959_v40, %v2958_v23 }
0x1785   :  { %v2961_v43 = vrot.slane %v2960_v47, 2 }
0x1787   :  { %v2962_v17 = vadd.f32 %v2961_v43, %v2960_v47 }
0x1789   :  { %v2963_v59 = vrot.slane %v2962_v17, 1 }
0x178b   :  { %v2964_v62 = vadd.f32 %v2963_v59, %v2962_v17 }
0x178d   :  { %3508 = vpush %v2964_v62 }
0x17be   :  { %s3509_s5 = spop %3508 }
0x17bf   :  { %s2968_s7 = smul.f32 0.0013020834, %s3509_s5 }
0x17c1   :  { %v2969_v57 = vstv %s2968_s7 }
0x17c2   :  { %v2970_v2 = vsub.f32 %v2949_v26, %v2969_v57  ;;  %v2971_v3 = vsub.f32 %v2950_v10, %v2969_v57  ;;  %v2972_v8 = vsub.f32 %v2951_v58, %v2969_v57 }
0x17c4   :  { %v2973_v36 = vmul.f32 %v2970_v2, %v2970_v2  ;;  %v2974_v56 = vmul.f32 %v2971_v3, %v2971_v3  ;;  %v2975_v61 = vmul.f32 %v2972_v8, %v2972_v8 }
0x17c6   :  { %v2976_v6 = vsel %vm63_vm0, %v2973_v36, 0.0  ;;  %v2977_v21 = vsel %vm63_vm0, %v2974_v56, 0.0  ;;  %v2979_v7 = vsel %vm63_vm0, %v2975_v61, 0.0  ;;  %vm3014_vm0 = vcmask 257024  }
0x17c7   :  { %v2978_v0 = vadd.f32 %v2977_v21, %v2976_v6 }
0x17c9   :  { %v2980_v9 = vadd.f32 %v2979_v7, %v2978_v0 }
0x17cb   :  { %2981 = vadd.xlane.f32.xlu0 %v2980_v9 }
0x1854   :  { %v2982_v1 = vpop.xlane.xlu0 %2981 }
0x1855   :  { %v2983_v55 = vrot.slane %v2982_v1, 4 }
0x1857   :  { %v2984_v51 = vadd.f32 %v2983_v55, %v2982_v1 }
0x1859   :  { %v2985_v13 = vrot.slane %v2984_v51, 2 }
0x185b   :  { %v2986_v63 = vadd.f32 %v2985_v13, %v2984_v51 }
0x185d   :  { %v2987_v16 = vrot.slane %v2986_v63, 1 }
0x185f   :  { %v2988_v28 = vadd.f32 %v2987_v16, %v2986_v63 }
0x1861   :  { %3510 = vpush %v2988_v28 }
0x1892   :  { %s3511_s20 = spop %3510 }
0x1893   :  { %s2992_s21 = smul.f32 0.0013020834, %s3511_s20 }
0x1895   :  { %s2993_s22 = sadd.f32 1e-05, %s2992_s21 }
0x1897   :  { %v2994_v29 = vstv %s2993_s22 }
0x1898   :  { %3689 = vrsqrt.f32 %v2994_v29 }
0x18a5   :  { %v3690_v60 = vpop.eup %3689 }
0x18a6   :  { %3512 = vpush %v3690_v60 }
0x18d7   :  { %s3513_s23 = spop %3512 }
0x18d8   :  { %v2997_v30 = vstv %s3513_s23 }
0x18d9   :  { %v2998_v24 = vmul.f32 %v2997_v30, %v2970_v2  ;;  %v2999_v33 = vmul.f32 %v2997_v30, %v2971_v3  ;;  %v3000_v12 = vmul.f32 %v2997_v30, %v2972_v8 }
0x18db   :  { %v3123_v35 = vpack.c.bf16 %v2998_v24, %v2998_v24  ;;  %v3124_v15 = vpack.c.bf16 %v2999_v33, %v2999_v33  ;;  %v3125_v37 = vpack.c.bf16 %v3000_v12, %v3000_v12 }
0x18dd   :  { %3015 = vst.msk [vmem:[%s4623_s8] sm:$0xf] %vm3014_vm0, %v3123_v35  ;;  %3016 = vst.msk [vmem:[%s4623_s8 + $0x4] sm:$0xf] %vm3014_vm0, %v3124_v15 }
0x18de   :  { %3017 = vst.msk [vmem:[%s4623_s8 + $0x8] sm:$0xf] %vm3014_vm0, %v3125_v37 }

// kernel: transformer_forward.3
= control target key start
LH: loop header
LB: loop body
LE: loop exit
PB: predicated region body
PF: predicated region fallthrough
CT: control target
= control target key end

     0   :  { %v5957_v0 = vmov 0.0   ;;  %vm5958_vm0 = vmmov 0   ;;  %vm82_vm1 = vcmask 261120   ;;  %s5960_s23 = smov 120   ;;  %s5961_s24 = smov 88   ;;  %vm134_vm2 = vcmask 64512   ;;  %s7104_s2 = inlined_call_operand.vmem [shape: bf16[2,32,96], index: 2, kind: input, shape index: {}]   ;;  %s7105_s0 = inlined_call_operand.vmem [shape: f32[16,32], index: 0, kind: input, shape index: {}]   ;;  %s7106_s3 = inlined_call_operand.vmem [shape: f32[2,1,96], index: 3, kind: input, shape index: {}]   ;;  %s7107_s6 = inlined_call_operand.vmem [shape: bf16[2,32,64], index: 6, kind: input, shape index: {}]   ;;  %s7108_s1 = inlined_call_operand.vmem [shape: bf16[24,32], index: 1, kind: input, shape index: {}]   ;;  %s7109_s4 = inlined_call_operand.vmem [shape: bf16[2,32,32], index: 4, kind: input, shape index: {}]   ;;  %s7110_s7 = inlined_call_operand.vmem [shape: f32[2,1,64], index: 7, kind: input, shape index: {}]   ;;  %s7111_s5 = inlined_call_operand.vmem [shape: f32[2,1,32], index: 5, kind: input, shape index: {}]   ;;  %s7112_s8 = inlined_call_operand.vmem [shape: bf16[2,32,128], index: 8, kind: input, shape index: {}]   ;;  %s7113_s10 = inlined_call_operand.vmem [shape: bf16[2,128,32], index: 10, kind: input, shape index: {}]   ;;  %s7114_s9 = inlined_call_operand.vmem [shape: f32[2,1,128], index: 9, kind: input, shape index: {}]   ;;  %s7115_s11 = inlined_call_operand.vmem [shape: f32[2,1,32], index: 11, kind: input, shape index: {}]   ;;  %s7116_s12 = inlined_call_operand.vmem [shape: bf16[32,128], index: 12, kind: input, shape index: {}]   ;;  %s7117_s13 = inlined_call_operand.vmem [shape: f32[1,128], index: 13, kind: input, shape index: {}]   ;;  %s7118_s14 = inlined_call_operand.vmem [shape: f32[16,128], index: 14, kind: output, shape index: {}]  }
   0x1   :  { %5231 = vmatprep.subr.bf16.mxu1 %v5957_v0  ;;  %v5779_v1 = vld [vmem:[%s7104_s2 + $0x8] sm:$0xff]   ;;  %5235 = vmatprep.mubr.msk.bf16.mxu1 %vm5958_vm0, %v5957_v0  ;;  %v5780_v2 = vld [vmem:[%s7104_s2] sm:$0xff]   ;;  %s5962_s25 = smov 80   ;;  %s5963_s26 = smov 112   ;;  %v48_v41 = vlaneseq  ;;  %vm199_vm4 = vcmask 1043456   ;;  %vm360_vm5 = vcmask 130112  }
   0x2   :  { %5245 = vmatprep.subr.bf16.mxu0 %v5957_v0  ;;  %5247 = vmatprep.mubr.msk.bf16.mxu0 %vm5958_vm0, %v5957_v0  ;;  %v6063_v3 = vld [vmem:[%s7105_s0] sm:$0xff]  ;;  %v6068_v4 = vld [vmem:[%s7105_s0 + $0x8] sm:$0xff]  ;;  %s5959_s0 = smov 96   ;;  %s5964_s27 = smov 72   ;;  %vm477_vm6 = vcmask 195712   ;;  %vm594_vm7 = vcmask 261312  }
   0x3   :  { %5232 = vmatpush3.bf16.msra.mxu1 %v5779_v1  ;;  %v58_v5 = vpack.c.bf16 %v6068_v4, %v6063_v3  ;;  %v4897_v6 = vld [vmem:[%s7106_s3] ss:$0 sm:$0xff]  ;;  %s5965_s28 = smov 104   ;;  %v49_v42 = vshrl.u32 %v48_v41, 7  ;;  %v51_v43 = vand.u32 127, %v48_v41  ;;  %s7123_s29 = smov 56  }
   0x4   :  { %5233 = vmatprep.subr.bf16.mxu1 %v5957_v0  ;;  %s7125_s30 = smov 64   ;;  %s7121_s15 = smov 48   ;;  %vm1718_vm8 = vcmask 1041408   ;;  %vm1306_vm9 = vcmask 97280   ;;  %vm1325_vm10 = vcmask 1045504  }
   0x5   :  { %vm6147_vm3 = vcmp.gt.s32.totalorder %v51_v43, %v49_v42  ;;  %s7119_s16 = smov 40   ;;  %s7131_s17 = smov 8  }
   0x6   :  { %s7129_s18 = smov 16   ;;  %s7127_s19 = smov 24  }
   0x7   :  { %5234 = vmatpush3.bf16.msra.mxu1 %v5780_v2 }
   0x8   :  { %5239 = vmatprep.subr.bf16.mxu1 %v5957_v0 }
   0xa   :  { %5236 = vmatmul.mubr.msk.bf16.vlgmr.msra.gmra.mxu1 %vm82_vm1, %v58_v5 }
   0xb   :  { %5241 = vmatprep.mubr.msk.bf16.mxu1 %vm5958_vm0, %v5957_v0 }
  0xca   :  { %v120_v7 = vpop.f32.mrf.mxu1 }
  0xcb   :  { %v121_v9 = vadd.f32 %v4897_v6, %v120_v7 }
  0xcc   :  { %v5237_v8 = vpop.f32.mrf.mxu1 }
  0xcd   :  { %v127_v13 = vmul.f32 0.35355338, %v121_v9 }
  0xce   :  { %v123_v10 = vpop.f32.mrf.mxu1 }
  0xcf   :  { %v124_v11 = vadd.f32 %v4897_v6, %v123_v10 }
  0xd0   :  { %v5238_v12 = vpop.f32.mrf.mxu1 }
  0xd1   :  { %v128_v14 = vmul.f32 0.35355338, %v124_v11  ;;  %v6080_v15 = vpack.c.bf16 %v124_v11, %v121_v9 }
  0xd3   :  { %v129_v16 = vpack.c.bf16 %v128_v14, %v127_v13  ;;  %132 = vrot.lane.b32.xlu0 %v6080_v15, %s5959_s0  ;;  %v6094_v17 = vrot.slane %v6080_v15, 4 }
  0xd5   :  { %245 = vrot.lane.b32.xlu1 %v129_v16, %s5960_s23  ;;  %v596_v18 = vrot.slane %v129_v16, 4 }
  0xd7   :  { %247 = vrot.lane.b32.xlu0 %v6080_v15, %s5961_s24 }
  0xd9   :  { %364 = vrot.lane.b32.xlu1 %v6080_v15, %s5962_s25 }
  0xdb   :  { %362 = vrot.lane.b32.xlu0 %v129_v16, %s5963_s26 }
  0xdd   :  { %481 = vrot.lane.b32.xlu1 %v6080_v15, %s5964_s27 }
  0xdf   :  { %479 = vrot.lane.b32.xlu0 %v129_v16, %s5965_s28 }
  0xe1   :  { %598 = vrot.lane.b32.xlu1 %v6094_v17, %s5959_s0 }
  0xe3   :  { %710 = vrot.lane.b32.xlu0 %v6094_v17, %s5961_s24 }
  0xe5   :  { %708 = vrot.lane.b32.xlu1 %v596_v18, %s5960_s23 }
  0xe7   :  { %826 = vrot.lane.b32.xlu0 %v6094_v17, %s5962_s25 }
  0xe9   :  { %824 = vrot.lane.b32.xlu1 %v596_v18, %s5963_s26 }
  0xeb   :  { %942 = vrot.lane.b32.xlu0 %v6094_v17, %s5964_s27 }
  0xed   :  { %940 = vrot.lane.b32.xlu1 %v596_v18, %s5965_s28 }
 0x145   :  { %v133_v19 = vpop.permute.xlu0 %132 }
 0x146   :  { %v139_v20 = vsel %vm134_vm2, %v133_v19, 0 }
 0x147   :  { %5240 = vmatpush3.bf16.xpose.msra.mxu1 %v139_v20  ;;  %v246_v22 = vpop.permute.xlu1 %245 }
 0x148   :  { %5251 = vmatprep.subr.bf16.mxu1 %v5957_v0 }
 0x149   :  { %v248_v21 = vpop.permute.xlu0 %247 }
 0x14a   :  { %v253_v23 = vsel %vm134_vm2, %v248_v21, 0 }
 0x14b   :  { %v365_v24 = vpop.permute.xlu1 %364 }
 0x14c   :  { %v370_v25 = vsel %vm134_vm2, %v365_v24, 0 }
 0x14d   :  { %v363_v27 = vpop.permute.xlu0 %362 }
 0x14e   :  { %5242 = vmatmul.mubr.msk.bf16.vlgmr.msra.gmra.mxu1 %vm134_vm2, %v129_v16 }
 0x14f   :  { %5252 = vmatpush3.bf16.xpose.msra.mxu1 %v253_v23  ;;  %5253 = vmatprep.mubr.msk.bf16.mxu1 %vm5958_vm0, %v5957_v0  ;;  %v482_v26 = vpop.permute.xlu1 %481 }
 0x150   :  { %5263 = vmatprep.subr.bf16.mxu1 %v5957_v0  ;;  %v487_v28 = vsel %vm134_vm2, %v482_v26, 0 }
 0x151   :  { %v480_v30 = vpop.permute.xlu0 %479 }
 0x153   :  { %v599_v29 = vpop.permute.xlu1 %598 }
 0x154   :  { %v604_v31 = vsel %vm134_vm2, %v599_v29, 0 }
 0x155   :  { %v711_v32 = vpop.permute.xlu0 %710 }
 0x156   :  { %5254 = vmatmul.mubr.msk.bf16.vlgmr.msra.gmra.mxu1 %vm134_vm2, %v246_v22  ;;  %v716_v33 = vsel %vm134_vm2, %v711_v32, 0 }
 0x157   :  { %5264 = vmatpush3.bf16.xpose.msra.mxu1 %v370_v25  ;;  %5265 = vmatprep.mubr.msk.bf16.mxu1 %vm5958_vm0, %v5957_v0  ;;  %v709_v35 = vpop.permute.xlu1 %708 }
 0x158   :  { %5275 = vmatprep.subr.bf16.mxu1 %v5957_v0 }
 0x159   :  { %v827_v34 = vpop.permute.xlu0 %826 }
 0x15a   :  { %v832_v36 = vsel %vm134_vm2, %v827_v34, 0 }
 0x15b   :  { %v825_v38 = vpop.permute.xlu1 %824 }
 0x15d   :  { %v943_v37 = vpop.permute.xlu0 %942 }
 0x15e   :  { %5266 = vmatmul.mubr.msk.bf16.vlgmr.msra.gmra.mxu1 %vm134_vm2, %v363_v27  ;;  %v948_v39 = vsel %vm134_vm2, %v943_v37, 0 }
 0x15f   :  { %5276 = vmatpush3.bf16.xpose.msra.mxu1 %v487_v28  ;;  %5277 = vmatprep.mubr.msk.bf16.mxu1 %vm5958_vm0, %v5957_v0  ;;  %v941_v40 = vpop.permute.xlu1 %940 }
 0x160   :  { %5287 = vmatprep.subr.bf16.mxu1 %v5957_v0 }
 0x166   :  { %5278 = vmatmul.mubr.msk.bf16.vlgmr.msra.gmra.mxu1 %vm134_vm2, %v480_v30 }
 0x167   :  { %5288 = vmatpush3.bf16.xpose.msra.mxu1 %v604_v31  ;;  %5289 = vmatprep.mubr.msk.bf16.mxu1 %vm5958_vm0, %v5957_v0 }
 0x168   :  { %5299 = vmatprep.subr.bf16.mxu1 %v5957_v0 }
 0x16e   :  { %5290 = vmatmul.mubr.msk.bf16.vlgmr.msra.gmra.mxu1 %vm134_vm2, %v596_v18 }
 0x16f   :  { %5300 = vmatpush3.bf16.xpose.msra.mxu1 %v716_v33  ;;  %5301 = vmatprep.mubr.msk.bf16.mxu1 %vm5958_vm0, %v5957_v0 }
 0x170   :  { %5311 = vmatprep.subr.bf16.mxu1 %v5957_v0 }
 0x176   :  { %5302 = vmatmul.mubr.msk.bf16.vlgmr.msra.gmra.mxu1 %vm134_vm2, %v709_v35 }
 0x177   :  { %5312 = vmatpush3.bf16.xpose.msra.mxu1 %v832_v36  ;;  %5313 = vmatprep.mubr.msk.bf16.mxu1 %vm5958_vm0, %v5957_v0 }
 0x178   :  { %5323 = vmatprep.subr.bf16.mxu1 %v5957_v0 }
 0x17e   :  { %5314 = vmatmul.mubr.msk.bf16.vlgmr.msra.gmra.mxu1 %vm134_vm2, %v825_v38 }
 0x17f   :  { %5324 = vmatpush3.bf16.xpose.msra.mxu1 %v948_v39  ;;  %5325 = vmatprep.mubr.msk.bf16.mxu1 %vm5958_vm0, %v5957_v0 }
 0x180   :  { %5335 = vmatprep.subr.bf16.mxu1 %v5957_v0 }
 0x186   :  { %5326 = vmatmul.mubr.msk.bf16.vlgmr.msra.gmra.mxu1 %vm134_vm2, %v941_v40 }
 0x187   :  { %5339 = vmatprep.mubr.msk.bf16.mxu1 %vm5958_vm0, %v5957_v0 }
 0x20e   :  { %v175_v45 = vpop.f32.mrf.mxu1 }
 0x20f   :  { %v181_v46 = vsel %vm6147_vm3, -3.5355338e+09, %v175_v45 }
 0x210   :  { %v5243_v47 = vpop.f32.mrf.mxu1  ;;  %v182_v48 = vsel %vm134_vm2, %v181_v46, -inf }
 0x211   :  { %183 = vmax.xlane.f32.xlu0 %v182_v48 }
 0x212   :  { %v178_v49 = vpop.f32.mrf.mxu1 }
 0x214   :  { %v5244_v50 = vpop.f32.mrf.mxu1 }
 0x216   :  { %v289_v51 = vpop.f32.mrf.mxu1 }
 0x217   :  { %v295_v52 = vsel %vm6147_vm3, -3.5355338e+09, %v289_v51 }
 0x218   :  { %v5255_v53 = vpop.f32.mrf.mxu1  ;;  %v296_v54 = vsel %vm134_vm2, %v295_v52, -inf }
 0x219   :  { %297 = vmax.xlane.f32.xlu1 %v296_v54 }
 0x21a   :  { %v292_v55 = vpop.f32.mrf.mxu1 }
 0x21c   :  { %v5256_v56 = vpop.f32.mrf.mxu1 }
 0x21e   :  { %v406_v57 = vpop.f32.mrf.mxu1 }
 0x21f   :  { %v412_v58 = vsel %vm6147_vm3, -3.5355338e+09, %v406_v57 }
 0x220   :  { %v5267_v59 = vpop.f32.mrf.mxu1  ;;  %v413_v60 = vsel %vm134_vm2, %v412_v58, -inf }
 0x221   :  { %414 = vmax.xlane.f32.xlu0 %v413_v60 }
 0x222   :  { %v409_v61 = vpop.f32.mrf.mxu1 }
 0x224   :  { %v5268_v62 = vpop.f32.mrf.mxu1 }
 0x226   :  { %v523_v63 = vpop.f32.mrf.mxu1 }
 0x227   :  { %v6162_v1 = vsel %vm6147_vm3, -3.5355338e+09, %v523_v63 }
 0x228   :  { %v5279_v2 = vpop.f32.mrf.mxu1  ;;  %v530_v5 = vsel %vm134_vm2, %v6162_v1, -inf }
 0x229   :  { %531 = vmax.xlane.f32.xlu0 %v530_v5 }
 0x22a   :  { %v526_v6 = vpop.f32.mrf.mxu1 }
 0x22c   :  { %v5280_v7 = vpop.f32.mrf.mxu1 }
 0x22e   :  { %v640_v8 = vpop.f32.mrf.mxu1 }
 0x22f   :  { %v6168_v9 = vsel %vm6147_vm3, -3.5355338e+09, %v640_v8 }
 0x230   :  { %v5291_v10 = vpop.f32.mrf.mxu1  ;;  %v647_v11 = vsel %vm134_vm2, %v6168_v9, -inf }
 0x231   :  { %648 = vmax.xlane.f32.xlu1 %v647_v11 }
 0x232   :  { %v643_v12 = vpop.f32.mrf.mxu1 }
 0x234   :  { %v5292_v13 = vpop.f32.mrf.mxu1 }
 0x236   :  { %v752_v14 = vpop.f32.mrf.mxu1 }
 0x237   :  { %v6174_v16 = vsel %vm6147_vm3, -3.5355338e+09, %v752_v14 }
 0x238   :  { %v5303_v18 = vpop.f32.mrf.mxu1  ;;  %v759_v19 = vsel %vm134_vm2, %v6174_v16, -inf }
 0x239   :  { %760 = vmax.xlane.f32.xlu0 %v759_v19 }
 0x23a   :  { %v755_v20 = vpop.f32.mrf.mxu1 }
 0x23c   :  { %v5304_v21 = vpop.f32.mrf.mxu1 }
 0x23e   :  { %v868_v22 = vpop.f32.mrf.mxu1 }
 0x23f   :  { %v874_v23 = vsel %vm6147_vm3, -3.5355338e+09, %v868_v22 }
 0x240   :  { %v5315_v24 = vpop.f32.mrf.mxu1  ;;  %v875_v25 = vsel %vm134_vm2, %v874_v23, -inf }
 0x241   :  { %876 = vmax.xlane.f32.xlu1 %v875_v25 }
 0x242   :  { %v871_v26 = vpop.f32.mrf.mxu1 }
 0x244   :  { %v5316_v27 = vpop.f32.mrf.mxu1 }
 0x246   :  { %v984_v28 = vpop.f32.mrf.mxu1 }
 0x247   :  { %v6187_v32 = vsel %vm6147_vm3, -3.5355338e+09, %v984_v28 }
 0x248   :  { %v5327_v29 = vpop.f32.mrf.mxu1  ;;  %v991_v33 = vsel %vm134_vm2, %v6187_v32, -inf }
 0x24a   :  { %v987_v30 = vpop.f32.mrf.mxu1 }
 0x24c   :  { %v5328_v31 = vpop.f32.mrf.mxu1 }
 0x24f   :  { %308 = vrot.lane.b32.xlu0 %v6080_v15, %s7123_s29 }
 0x252   :  { %194 = vrot.lane.b32.xlu1 %v6080_v15, %s7125_s30 }
 0x26e   :  { %992 = vmax.xlane.f32.xlu0 %v991_v33 }
 0x29a   :  { %v184_v34 = vpop.xlane.xlu0 %183 }
 0x29b   :  { %v185_v35 = vsub.f32 %v181_v46, %v184_v34 }
 0x29d   :  { %v186_v36 = vmul.f32 1.442695, %v185_v35 }
 0x29f   :  { %5815 = vpow2.f32 %v186_v36 }
 0x2a2   :  { %v298_v37 = vpop.xlane.xlu1 %297 }
 0x2a3   :  { %v299_v38 = vsub.f32 %v295_v52, %v298_v37 }
 0x2a5   :  { %v300_v39 = vmul.f32 1.442695, %v299_v38 }
 0x2a7   :  { %5817 = vpow2.f32 %v300_v39 }
 0x2aa   :  { %v415_v40 = vpop.xlane.xlu0 %414 }
 0x2ab   :  { %v416_v41 = vsub.f32 %v412_v58, %v415_v40 }
 0x2ac   :  { %v6191_v42 = vpop.eup %5815 }
 0x2ad   :  { %v417_v43 = vmul.f32 1.442695, %v416_v41  ;;  %v188_v45 = vsel %vm134_vm2, %v6191_v42, 0.0 }
 0x2ae   :  { %189 = vadd.xlane.f32.xlu1 %v188_v45 }
 0x2af   :  { %5819 = vpow2.f32 %v417_v43 }
 0x2b2   :  { %v532_v53 = vpop.xlane.xlu0 %531 }
 0x2b3   :  { %v533_v55 = vsub.f32 %v6162_v1, %v532_v53 }
 0x2b4   :  { %v6195_v47 = vpop.eup %5817 }
 0x2b5   :  { %v302_v46 = vsel %vm134_vm2, %v6195_v47, 0.0  ;;  %v534_v56 = vmul.f32 1.442695, %v533_v55 }
 0x2b6   :  { %303 = vadd.xlane.f32.xlu0 %v302_v46 }
 0x2b7   :  { %5821 = vpow2.f32 %v534_v56 }
 0x2ba   :  { %v649_v50 = vpop.xlane.xlu1 %648 }
 0x2bb   :  { %v650_v57 = vsub.f32 %v6168_v9, %v649_v50 }
 0x2bc   :  { %v6199_v48 = vpop.eup %5819 }
 0x2bd   :  { %v419_v49 = vsel %vm134_vm2, %v6199_v48, 0.0  ;;  %v651_v60 = vmul.f32 1.442695, %v650_v57 }
 0x2be   :  { %420 = vadd.xlane.f32.xlu1 %v419_v49 }
 0x2bf   :  { %5823 = vpow2.f32 %v651_v60 }
 0x2c2   :  { %v761_v58 = vpop.xlane.xlu0 %760 }
 0x2c3   :  { %v762_v59 = vsub.f32 %v6174_v16, %v761_v58 }
 0x2c5   :  { %v763_v62 = vmul.f32 1.442695, %v762_v59 }
 0x2c6   :  { %v309_v10 = vpop.permute.xlu0 %308 }
 0x2c7   :  { %5825 = vpow2.f32 %v763_v62  ;;  %v314_v24 = vsel %vm199_vm4, %v309_v10, 0 }
 0x2ca   :  { %v877_v51 = vpop.xlane.xlu1 %876 }
 0x2cb   :  { %v878_v61 = vsub.f32 %v874_v23, %v877_v51 }
 0x2cc   :  { %425 = vrot.lane.b32.xlu0 %v6080_v15, %s7121_s15 }
 0x2cd   :  { %v879_v63 = vmul.f32 1.442695, %v878_v61 }
 0x2ce   :  { %v195_v52 = vpop.permute.xlu1 %194 }
 0x2cf   :  { %542 = vrot.lane.b32.xlu1 %v6080_v15, %s7119_s16  ;;  %v201_v54 = vsel %vm199_vm4, %v195_v52, 0  ;;  %5827 = vpow2.f32 %v879_v63  ;;  %v5822_v15 = vpop.eup %5821 }
 0x2d0   :  { %5246 = vmatpush3.bf16.msra.mxu0 %v201_v54  ;;  %v536_v2 = vsel %vm134_vm2, %v5822_v15, 0.0  ;;  %v6213_v5 = vpop.eup %5823 }
 0x2d1   :  { %5257 = vmatprep.subr.bf16.mxu0 %v5957_v0  ;;  %v653_v6 = vsel %vm134_vm2, %v6213_v5, 0.0 }
 0x2d4   :  { %v6215_v1 = vpop.eup %5825 }
 0x2d5   :  { %v765_v8 = vsel %vm134_vm2, %v6215_v1, 0.0 }
 0x2dc   :  { %v6219_v7 = vpop.eup %5827 }
 0x2dd   :  { %v881_v9 = vsel %vm134_vm2, %v6219_v7, 0.0 }
 0x2eb   :  { %537 = vadd.xlane.f32.xlu0 %v536_v2 }
 0x2ef   :  { %654 = vadd.xlane.f32.xlu0 %v653_v6 }
 0x2f3   :  { %766 = vadd.xlane.f32.xlu1 %v765_v8  ;;  %882 = vadd.xlane.f32.xlu0 %v881_v9 }
 0x2f7   :  { %v993_v11 = vpop.xlane.xlu0 %992 }
 0x2f8   :  { %v994_v12 = vsub.f32 %v6187_v32, %v993_v11 }
 0x2fa   :  { %v995_v13 = vmul.f32 1.442695, %v994_v12 }
 0x2fc   :  { %5829 = vpow2.f32 %v995_v13 }
 0x304   :  { %771 = vrot.lane.b32.xlu1 %v6094_v17, %s7123_s29 }
 0x308   :  { %887 = vrot.lane.b32.xlu1 %v6094_v17, %s7121_s15 }
 0x309   :  { %v6230_v14 = vpop.eup %5829 }
 0x30a   :  { %v997_v16 = vsel %vm134_vm2, %v6230_v14, 0.0 }
 0x30b   :  { %998 = vadd.xlane.f32.xlu0 %v997_v16 }
 0x30c   :  { %1003 = vrot.lane.b32.xlu1 %v6094_v17, %s7119_s16 }
 0x321   :  { %659 = vrot.lane.b32.xlu0 %v6094_v17, %s7125_s30  ;;  %s7135_s30 = smov 16  }
 0x337   :  { %v190_v18 = vpop.xlane.xlu1 %189 }
 0x338   :  { %5831 = vrcp.f32 %v190_v18 }
 0x33f   :  { %v304_v19 = vpop.xlane.xlu0 %303 }
 0x340   :  { %5833 = vrcp.f32 %v304_v19 }
 0x343   :  { %v426_v26 = vpop.permute.xlu0 %425 }
 0x344   :  { %v431_v28 = vsel %vm199_vm4, %v426_v26, 0 }
 0x345   :  { %v5832_v20 = vpop.eup %5831 }
 0x346   :  { %v192_v21 = vmul.f32 %v5832_v20, %v6191_v42 }
 0x347   :  { %v421_v22 = vpop.xlane.xlu1 %420 }
 0x348   :  { %5835 = vrcp.f32 %v421_v22  ;;  %v193_v23 = vpack.c.bf16 %v192_v21, %v192_v21 }
 0x34a   :  { %5248 = vmatmul.mubr.msk.bf16.vlgmr.msra.gmra.mxu0 %vm134_vm2, %v193_v23 }
 0x34b   :  { %5258 = vmatpush3.bf16.msra.mxu0 %v314_v24  ;;  %5259 = vmatprep.mubr.msk.bf16.mxu0 %vm5958_vm0, %v5957_v0  ;;  %v543_v31 = vpop.permute.xlu1 %542 }
 0x34c   :  { %5269 = vmatprep.subr.bf16.mxu0 %v5957_v0  ;;  %v548_v33 = vsel %vm199_vm4, %v543_v31, 0 }
 0x34d   :  { %v5834_v17 = vpop.eup %5833 }
 0x34e   :  { %v306_v25 = vmul.f32 %v5834_v17, %v6195_v47 }
 0x350   :  { %v307_v27 = vpack.c.bf16 %v306_v25, %v306_v25 }
 0x352   :  { %5260 = vmatmul.mubr.msk.bf16.vlgmr.msra.gmra.mxu0 %vm134_vm2, %v307_v27 }
 0x353   :  { %5270 = vmatpush3.bf16.msra.mxu0 %v431_v28  ;;  %5271 = vmatprep.mubr.msk.bf16.mxu0 %vm5958_vm0, %v5957_v0 }
 0x354   :  { %5281 = vmatprep.subr.bf16.mxu0 %v5957_v0 }
 0x355   :  { %v5836_v29 = vpop.eup %5835 }
 0x356   :  { %v423_v30 = vmul.f32 %v5836_v29, %v6199_v48 }
 0x358   :  { %v424_v32 = vpack.c.bf16 %v423_v30, %v423_v30 }
 0x35a   :  { %5272 = vmatmul.mubr.msk.bf16.vlgmr.msra.gmra.mxu0 %vm134_vm2, %v424_v32 }
 0x35b   :  { %5282 = vmatpush3.bf16.msra.mxu0 %v548_v33  ;;  %5283 = vmatprep.mubr.msk.bf16.mxu0 %vm5958_vm0, %v5957_v0 }
 0x35c   :  { %5293 = vmatprep.subr.bf16.mxu0 %v5957_v0 }
 0x374   :  { %v538_v34 = vpop.xlane.xlu0 %537 }
 0x375   :  { %5837 = vrcp.f32 %v538_v34 }
 0x378   :  { %v655_v37 = vpop.xlane.xlu0 %654 }
 0x379   :  { %5839 = vrcp.f32 %v655_v37 }
 0x37c   :  { %v767_v39 = vpop.xlane.xlu1 %766  ;;  %v883_v40 = vpop.xlane.xlu0 %882 }
 0x37d   :  { %5841 = vrcp.f32 %v767_v39 }
 0x37e   :  { %5843 = vrcp.f32 %v883_v40 }
 0x380   :  { %v772_v46 = vpop.permute.xlu1 %771 }
 0x381   :  { %v777_v50 = vsel %vm199_vm4, %v772_v46, 0 }
 0x382   :  { %v5838_v35 = vpop.eup %5837 }
 0x383   :  { %v540_v36 = vmul.f32 %v5838_v35, %v5822_v15 }
 0x384   :  { %v888_v52 = vpop.permute.xlu1 %887 }
 0x385   :  { %v541_v38 = vpack.c.bf16 %v540_v36, %v540_v36  ;;  %v893_v55 = vsel %vm199_vm4, %v888_v52, 0 }
 0x386   :  { %v5840_v41 = vpop.eup %5839 }
 0x387   :  { %5284 = vmatmul.mubr.msk.bf16.vlgmr.msra.gmra.mxu0 %vm134_vm2, %v541_v38  ;;  %v657_v43 = vmul.f32 %v5840_v41, %v6213_v5 }
 0x388   :  { %5295 = vmatprep.mubr.msk.bf16.mxu0 %vm5958_vm0, %v5957_v0  ;;  %v1004_v57 = vpop.permute.xlu1 %1003 }
 0x389   :  { %v658_v48 = vpack.c.bf16 %v657_v43, %v657_v43  ;;  %v1009_v60 = vsel %vm199_vm4, %v1004_v57, 0 }
 0x38a   :  { %v5842_v49 = vpop.eup %5841 }
 0x38b   :  { %v769_v51 = vmul.f32 %v5842_v49, %v6215_v1  ;;  %v5844_v54 = vpop.eup %5843 }
 0x38c   :  { %v885_v56 = vmul.f32 %v5844_v54, %v6219_v7 }
 0x38d   :  { %v770_v53 = vpack.c.bf16 %v769_v51, %v769_v51 }
 0x38e   :  { %v886_v58 = vpack.c.bf16 %v885_v56, %v885_v56 }
 0x394   :  { %v999_v42 = vpop.xlane.xlu0 %998 }
 0x395   :  { %5845 = vrcp.f32 %v999_v42 }
 0x398   :  { %v660_v45 = vpop.permute.xlu0 %659 }
 0x399   :  { %v665_v47 = vsel %vm199_vm4, %v660_v45, 0 }
 0x39a   :  { %5294 = vmatpush3.bf16.msra.mxu0 %v665_v47 }
 0x39b   :  { %5305 = vmatprep.subr.bf16.mxu0 %v5957_v0 }
 0x39d   :  { %5296 = vmatmul.mubr.msk.bf16.vlgmr.msra.gmra.mxu0 %vm134_vm2, %v658_v48 }
 0x39e   :  { %5306 = vmatpush3.bf16.msra.mxu0 %v777_v50  ;;  %5307 = vmatprep.mubr.msk.bf16.mxu0 %vm5958_vm0, %v5957_v0 }
 0x39f   :  { %5317 = vmatprep.subr.bf16.mxu0 %v5957_v0 }
 0x3a2   :  { %v5846_v59 = vpop.eup %5845 }
 0x3a3   :  { %v1001_v61 = vmul.f32 %v5846_v59, %v6230_v14 }
 0x3a5   :  { %5308 = vmatmul.mubr.msk.bf16.vlgmr.msra.gmra.mxu0 %vm134_vm2, %v770_v53  ;;  %v1002_v62 = vpack.c.bf16 %v1001_v61, %v1001_v61  ;;  %v5781_v61 = vld [vmem:[%s7107_s6 + $0x8] sm:$0xff]  }
 0x3a6   :  { %5318 = vmatpush3.bf16.msra.mxu0 %v893_v55  ;;  %5319 = vmatprep.mubr.msk.bf16.mxu0 %vm5958_vm0, %v5957_v0 }
 0x3a7   :  { %5329 = vmatprep.subr.bf16.mxu0 %v5957_v0 }
 0x3ad   :  { %5320 = vmatmul.mubr.msk.bf16.vlgmr.msra.gmra.mxu0 %vm134_vm2, %v886_v58 }
 0x3ae   :  { %5330 = vmatpush3.bf16.msra.mxu0 %v1009_v60  ;;  %5331 = vmatprep.mubr.msk.bf16.mxu0 %vm5958_vm0, %v5957_v0 }
 0x3af   :  { %5343 = vmatprep.subr.bf16.mxu0 %v5781_v61 }
 0x3b5   :  { %5332 = vmatmul.mubr.msk.bf16.vlgmr.msra.gmra.mxu0 %vm134_vm2, %v1002_v62  ;;  %v5782_v62 = vld [vmem:[%s7107_s6] sm:$0xff]  }
 0x3b6   :  { %5344 = vmatpush3.bf16.msra.mxu0 %v5781_v61 }
 0x3b7   :  { %5345 = vmatprep.subr.bf16.mxu0 %v5782_v62 }
 0x3ba   :  { %5346 = vmatpush3.bf16.msra.mxu0 %v5782_v62 }
 0x3bb   :  { %5357 = vmatprep.subr.bf16.mxu0 %v5957_v0 }
 0x40a   :  { %v237_v63 = vpop.f32.mrf.mxu0 }
 0x40b   :  { %243 = vst.msk [vmem:[#allocation2] sm:$0xff] %vm134_vm2, %v237_v63  ;;  %v5783_v63 = vld [vmem:[%s7108_s1] sm:$0xff]  }
 0x40c   :  { %v5249_v15 = vpop.f32.mrf.mxu0  ;;  %5347 = vmatprep.mubr.msk.bf16.mxu0 %vm82_vm1, %v5783_v63 }
 0x40d   :  { %v5784_v15 = vld [vmem:[%s7108_s1 + $0x8] ss:$0 sps:$4 sm:$0xff]  }
 0x40e   :  { %v240_v2 = vpop.f32.mrf.mxu0  ;;  %5348 = vmatmul.mubr.msk.bf16.vlgmr.msra.gmra.mxu0 %vm82_vm1, %v5784_v15 }
 0x40f   :  { %v5785_v2 = vld [vmem:[%s7109_s4 + $0x8] sm:$0xff]   ;;  %5359 = vmatprep.mubr.msk.bf16.mxu0 %vm5958_vm0, %v5957_v0 }
 0x410   :  { %v5250_v5 = vpop.f32.mrf.mxu0  ;;  %5336 = vmatpush3.bf16.msra.mxu1 %v5785_v2 }
 0x411   :  { %5337 = vmatprep.subr.bf16.mxu1 %v5957_v0 }
 0x412   :  { %v350_v1 = vpop.f32.mrf.mxu0 }
 0x413   :  { %357 = vrot.lane.b32.xlu1 %v350_v1, %s7131_s17 }
 0x414   :  { %v5261_v6 = vpop.f32.mrf.mxu0 }
 0x416   :  { %v353_v7 = vpop.f32.mrf.mxu0 }
 0x418   :  { %v5262_v8 = vpop.f32.mrf.mxu0 }
 0x419   :  { %v5786_v8 = vld [vmem:[%s7109_s4] sm:$0xff]  }
 0x41a   :  { %v467_v9 = vpop.f32.mrf.mxu0  ;;  %5338 = vmatpush3.bf16.msra.mxu1 %v5786_v8 }
 0x41b   :  { %474 = vrot.lane.b32.xlu0 %v467_v9, %s7129_s18  ;;  %5351 = vmatprep.subr.bf16.mxu1 %v5957_v0 }
 0x41c   :  { %v5273_v10 = vpop.f32.mrf.mxu0 }
 0x41e   :  { %v470_v11 = vpop.f32.mrf.mxu0 }
 0x420   :  { %v5274_v12 = vpop.f32.mrf.mxu0 }
 0x447   :  { %v584_v13 = vpop.f32.mrf.mxu0 }
 0x448   :  { %591 = vrot.lane.b32.xlu0 %v584_v13, %s7127_s19 }
 0x449   :  { %v5285_v14 = vpop.f32.mrf.mxu0 }
 0x44b   :  { %v587_v16 = vpop.f32.mrf.mxu0 }
 0x44d   :  { %v5286_v18 = vpop.f32.mrf.mxu0 }
 0x45d   :  { %v701_v19 = vpop.f32.mrf.mxu0 }
 0x45e   :  { %707 = vst.msk [vmem:[#allocation2 + $0x8] sm:$0xff] %vm134_vm2, %v701_v19 }
 0x45f   :  { %v5297_v20 = vpop.f32.mrf.mxu0 }
 0x461   :  { %v704_v21 = vpop.f32.mrf.mxu0 }
 0x462   :  { %v4921_v21 = vld [vmem:[%s7110_s7] ss:$0 sm:$0xff] }
 0x463   :  { %v5298_v22 = vpop.f32.mrf.mxu0 }
 0x465   :  { %v813_v23 = vpop.f32.mrf.mxu0 }
 0x466   :  { %820 = vrot.lane.b32.xlu1 %v813_v23, %s7131_s17 }
 0x467   :  { %v5309_v24 = vpop.f32.mrf.mxu0 }
 0x469   :  { %v816_v17 = vpop.f32.mrf.mxu0 }
 0x46b   :  { %v5310_v25 = vpop.f32.mrf.mxu0 }
 0x46d   :  { %v929_v26 = vpop.f32.mrf.mxu0 }
 0x46e   :  { %936 = vrot.lane.b32.xlu1 %v929_v26, %s7129_s18 }
 0x46f   :  { %v5321_v27 = vpop.f32.mrf.mxu0 }
 0x471   :  { %v932_v28 = vpop.f32.mrf.mxu0 }
 0x473   :  { %v5322_v29 = vpop.f32.mrf.mxu0 }
 0x475   :  { %v1045_v30 = vpop.f32.mrf.mxu0 }
 0x476   :  { %1052 = vrot.lane.b32.xlu1 %v1045_v30, %s7127_s19 }
 0x477   :  { %v5333_v31 = vpop.f32.mrf.mxu0 }
 0x479   :  { %v1048_v32 = vpop.f32.mrf.mxu0 }
 0x47b   :  { %v5334_v33 = vpop.f32.mrf.mxu0 }
 0x47c   :  { %v4917_v33 = vld [vmem:[%s7111_s5] ss:$0 sm:$0xff] }
 0x485   :  { %v358_v34 = vpop.permute.xlu1 %357 }
 0x486   :  { %361 = vst.msk [vmem:[#allocation2] sm:$0xff] %vm360_vm5, %v358_v34 }
 0x48d   :  { %v475_v35 = vpop.permute.xlu0 %474 }
 0x48e   :  { %478 = vst.msk [vmem:[#allocation2] sm:$0xff] %vm477_vm6, %v475_v35 }
 0x4ba   :  { %v592_v36 = vpop.permute.xlu0 %591 }
 0x4bb   :  { %595 = vst.msk [vmem:[#allocation2] sm:$0xff] %vm594_vm7, %v592_v36 }
 0x4c2   :  { %v1056_v40 = vld [vmem:[#allocation2] sm:$0xff] }
 0x4c3   :  { %v1058_v41 = vadd.f32 %v1056_v40, %v6063_v3 }
 0x4c5   :  { %v1060_v45 = vsel %vm82_vm1, %v1058_v41, 0.0 }
 0x4ce   :  { %v5349_v20 = vpop.f32.mrf.mxu0 }
 0x4cf   :  { %v1253_v26 = vadd.f32 %v5349_v20, %v4921_v21 }
 0x4d0   :  { %v1244_v22 = vpop.f32.mrf.mxu0 }
 0x4d1   :  { %v1245_v24 = vadd.f32 %v4921_v21, %v1244_v22  ;;  %v1259_v29 = vpack.c.bf16 %v1253_v26, %v1253_v26 }
 0x4d2   :  { %v5350_v23 = vpop.f32.mrf.mxu0 }
 0x4d3   :  { %v1720_v30 = vrot.slane %v1259_v29, 6 }
 0x4d4   :  { %v1247_v17 = vpop.f32.mrf.mxu0 }
 0x4d5   :  { %v1248_v25 = vadd.f32 %v4921_v21, %v1247_v17 }
 0x4d7   :  { %v6337_v27 = vpack.c.bf16 %v1248_v25, %v1245_v24 }
 0x4d8   :  { %v821_v37 = vpop.permute.xlu1 %820 }
 0x4d9   :  { %823 = vst.msk [vmem:[#allocation2 + $0x8] sm:$0xff] %vm360_vm5, %v821_v37  ;;  %v1264_v28 = vsel %vm134_vm2, %v6337_v27, 0  ;;  %v1719_v31 = vrot.slane %v6337_v27, 6 }
 0x4db   :  { %v6350_v32 = vsel %vm1718_vm8, %v1719_v31, %v1720_v30 }
 0x4e0   :  { %v937_v38 = vpop.permute.xlu1 %936 }
 0x4e1   :  { %939 = vst.msk [vmem:[#allocation2 + $0x8] sm:$0xff] %vm477_vm6, %v937_v38 }
 0x4e8   :  { %v1053_v39 = vpop.permute.xlu1 %1052 }
 0x4e9   :  { %1055 = vst.msk [vmem:[#allocation2 + $0x8] sm:$0xff] %vm594_vm7, %v1053_v39 }
 0x4f0   :  { %v1057_v42 = vld [vmem:[#allocation2 + $0x8] sm:$0xff] }
 0x4f1   :  { %v1059_v43 = vadd.f32 %v1057_v42, %v6068_v4 }
 0x4f3   :  { %v1061_v47 = vsel %vm82_vm1, %v1059_v43, 0.0 }
 0x4f4   :  { %v1062_v46 = vadd.f32 %v1061_v47, %v1060_v45 }
 0x4f6   :  { %1063 = vadd.xlane.f32.xlu0 %v1062_v46 }
 0x50c   :  { %1373 = vrot.lane.b32.xlu0 %v6337_v27, %s5960_s23 }
 0x510   :  { %1488 = vrot.lane.b32.xlu0 %v6337_v27, %s5963_s26 }
 0x514   :  { %1603 = vrot.lane.b32.xlu0 %v6337_v27, %s5965_s28 }
 0x518   :  { %1831 = vrot.lane.b32.xlu0 %v6350_v32, %s5960_s23 }
 0x51c   :  { %1946 = vrot.lane.b32.xlu0 %v6350_v32, %s5963_s26 }
 0x520   :  { %2061 = vrot.lane.b32.xlu0 %v6350_v32, %s5965_s28 }
 0x57f   :  { %v1064_v48 = vpop.xlane.xlu0 %1063 }
 0x580   :  { %v1065_v49 = vrot.slane %v1064_v48, 4 }
 0x582   :  { %v1066_v50 = vadd.f32 %v1065_v49, %v1064_v48 }
 0x583   :  { %v1374_v42 = vpop.permute.xlu0 %1373 }
 0x584   :  { %v1067_v51 = vrot.slane %v1066_v50, 2  ;;  %v1379_v45 = vsel %vm134_vm2, %v1374_v42, 0 }
 0x586   :  { %v1068_v52 = vadd.f32 %v1067_v51, %v1066_v50 }
 0x587   :  { %v1489_v46 = vpop.permute.xlu0 %1488 }
 0x588   :  { %v1069_v53 = vrot.slane %v1068_v52, 1  ;;  %v1494_v49 = vsel %vm134_vm2, %v1489_v46, 0 }
 0x58a   :  { %v1070_v54 = vadd.f32 %v1069_v53, %v1068_v52 }
 0x58b   :  { %v1604_v50 = vpop.permute.xlu0 %1603 }
 0x58c   :  { %5727 = vpush %v1070_v54  ;;  %v1609_v52 = vsel %vm134_vm2, %v1604_v50, 0  ;;  %v1726_v54 = vsel %vm134_vm2, %v6350_v32, 0 }
 0x5bd   :  { %s5728_s20 = spop %5727 }
 0x5be   :  { %s1074_s21 = smul.f32 0.001953125, %s5728_s20 }
 0x5c0   :  { %v1075_v3 = vstv %s1074_s21 }
 0x5c1   :  { %v1076_v55 = vsub.f32 %v1058_v41, %v1075_v3  ;;  %v1077_v56 = vsub.f32 %v1059_v43, %v1075_v3  ;;  %v1832_v3 = vpop.permute.xlu0 %1831 }
 0x5c3   :  { %v1078_v4 = vmul.f32 %v1076_v55, %v1076_v55  ;;  %v1079_v57 = vmul.f32 %v1077_v56, %v1077_v56 }
 0x5c5   :  { %v1080_v58 = vsel %vm82_vm1, %v1078_v4, 0.0  ;;  %v1081_v59 = vsel %vm82_vm1, %v1079_v57, 0.0 }
 0x5c6   :  { %v1082_v60 = vadd.f32 %v1081_v59, %v1080_v58 }
 0x5c8   :  { %1083 = vadd.xlane.f32.xlu1 %v1082_v60 }
 0x651   :  { %v1084_v5 = vpop.xlane.xlu1 %1083 }
 0x652   :  { %v1085_v1 = vrot.slane %v1084_v5, 4 }
 0x654   :  { %v1086_v6 = vadd.f32 %v1085_v1, %v1084_v5 }
 0x656   :  { %v1087_v7 = vrot.slane %v1086_v6, 2 }
 0x658   :  { %v1088_v9 = vadd.f32 %v1087_v7, %v1086_v6 }
 0x65a   :  { %v1089_v10 = vrot.slane %v1088_v9, 1 }
 0x65c   :  { %v1090_v11 = vadd.f32 %v1089_v10, %v1088_v9 }
 0x65e   :  { %5729 = vpush %v1090_v11 }
 0x68f   :  { %s5730_s15 = spop %5729 }
 0x690   :  { %s1094_s18 = smul.f32 0.001953125, %s5730_s15  ;;  %s7136_s15 = smov 24  }
 0x692   :  { %s1095_s19 = sadd.f32 1e-05, %s1094_s18 }
 0x694   :  { %v1096_v12 = vstv %s1095_s19 }
 0x695   :  { %5847 = vrsqrt.f32 %v1096_v12 }
 0x6a2   :  { %v5848_v13 = vpop.eup %5847 }
 0x6a3   :  { %5731 = vpush %v5848_v13 }
 0x6d4   :  { %s5732_s22 = spop %5731 }
 0x6d5   :  { %v1099_v14 = vstv %s5732_s22 }
 0x6d6   :  { %v6325_v16 = vmul.f32 %v1099_v14, %v1076_v55  ;;  %v6327_v18 = vmul.f32 %v1099_v14, %v1077_v56  ;;  %v1837_v55 = vsel %vm134_vm2, %v1832_v3, 0  ;;  %v1947_v56 = vpop.permute.xlu0 %1946 }
 0x6d7   :  { %v1952_v57 = vsel %vm134_vm2, %v1947_v56, 0 }
 0x6d8   :  { %v1102_v19 = vpack.c.bf16 %v6327_v18, %v6325_v16 }
 0x6da   :  { %5340 = vmatmul.mubr.msk.bf16.vlgmr.msra.gmra.mxu1 %vm82_vm1, %v1102_v19  ;;  %v2062_v58 = vpop.permute.xlu0 %2061 }
 0x6db   :  { %5353 = vmatprep.mubr.msk.bf16.mxu1 %vm5958_vm0, %v5957_v0  ;;  %5352 = vmatpush3.bf16.xpose.msra.mxu1 %v1264_v28  ;;  %v2067_v60 = vsel %vm134_vm2, %v2062_v58, 0 }
 0x6dc   :  { %5363 = vmatprep.subr.bf16.mxu1 %v5957_v0 }
 0x79a   :  { %v1163_v34 = vpop.f32.mrf.mxu1 }
 0x79b   :  { %v1164_v36 = vadd.f32 %v4917_v33, %v1163_v34 }
 0x79c   :  { %v5341_v35 = vpop.f32.mrf.mxu1 }
 0x79d   :  { %v1170_v40 = vmul.f32 0.35355338, %v1164_v36 }
 0x79e   :  { %v1166_v37 = vpop.f32.mrf.mxu1 }
 0x79f   :  { %v1167_v38 = vadd.f32 %v4917_v33, %v1166_v37 }
 0x7a0   :  { %v5342_v39 = vpop.f32.mrf.mxu1 }
 0x7a1   :  { %v1171_v41 = vmul.f32 0.35355338, %v1167_v38 }
 0x7a3   :  { %v1172_v43 = vpack.c.bf16 %v1171_v41, %v1170_v40 }
 0x7a5   :  { %1371 = vrot.lane.b32.xlu1 %v1172_v43, %s5960_s23  ;;  %5354 = vmatmul.mubr.msk.bf16.vlgmr.msra.gmra.mxu1 %vm134_vm2, %v1172_v43  ;;  %v1716_v47 = vrot.slane %v1172_v43, 4 }
 0x7a6   :  { %5364 = vmatpush3.bf16.xpose.msra.mxu1 %v1379_v45  ;;  %5365 = vmatprep.mubr.msk.bf16.mxu1 %vm5958_vm0, %v5957_v0 }
 0x7a7   :  { %5375 = vmatprep.subr.bf16.mxu1 %v5957_v0 }
 0x7a9   :  { %1486 = vrot.lane.b32.xlu1 %v1172_v43, %s5963_s26 }
 0x7ad   :  { %1601 = vrot.lane.b32.xlu1 %v1172_v43, %s5965_s28 }
 0x7b1   :  { %1829 = vrot.lane.b32.xlu1 %v1716_v47, %s5960_s23 }
 0x7b5   :  { %1944 = vrot.lane.b32.xlu1 %v1716_v47, %s5963_s26 }
 0x7b9   :  { %2059 = vrot.lane.b32.xlu1 %v1716_v47, %s5965_s28 }
 0x817   :  { %v1372_v48 = vpop.permute.xlu1 %1371 }
 0x818   :  { %5366 = vmatmul.mubr.msk.bf16.vlgmr.msra.gmra.mxu1 %vm134_vm2, %v1372_v48 }
 0x819   :  { %5376 = vmatpush3.bf16.xpose.msra.mxu1 %v1494_v49  ;;  %5377 = vmatprep.mubr.msk.bf16.mxu1 %vm5958_vm0, %v5957_v0 }
 0x81a   :  { %5387 = vmatprep.subr.bf16.mxu1 %v5957_v0 }
 0x81b   :  { %v1487_v51 = vpop.permute.xlu1 %1486 }
 0x81f   :  { %v1602_v53 = vpop.permute.xlu1 %1601 }
 0x820   :  { %5378 = vmatmul.mubr.msk.bf16.vlgmr.msra.gmra.mxu1 %vm134_vm2, %v1487_v51 }
 0x821   :  { %5388 = vmatpush3.bf16.xpose.msra.mxu1 %v1609_v52  ;;  %5389 = vmatprep.mubr.msk.bf16.mxu1 %vm5958_vm0, %v5957_v0 }
 0x822   :  { %5399 = vmatprep.subr.bf16.mxu1 %v5957_v0 }
 0x823   :  { %v1830_v4 = vpop.permute.xlu1 %1829 }
 0x827   :  { %v1945_v59 = vpop.permute.xlu1 %1944 }
 0x828   :  { %5390 = vmatmul.mubr.msk.bf16.vlgmr.msra.gmra.mxu1 %vm134_vm2, %v1602_v53 }
 0x829   :  { %5400 = vmatpush3.bf16.xpose.msra.mxu1 %v1726_v54  ;;  %5401 = vmatprep.mubr.msk.bf16.mxu1 %vm5958_vm0, %v5957_v0 }
 0x82a   :  { %5411 = vmatprep.subr.bf16.mxu1 %v5957_v0 }
 0x82b   :  { %v2060_v61 = vpop.permute.xlu1 %2059 }
 0x830   :  { %5402 = vmatmul.mubr.msk.bf16.vlgmr.msra.gmra.mxu1 %vm134_vm2, %v1716_v47 }
 0x831   :  { %5412 = vmatpush3.bf16.xpose.msra.mxu1 %v1837_v55  ;;  %5413 = vmatprep.mubr.msk.bf16.mxu1 %vm5958_vm0, %v5957_v0 }
 0x832   :  { %5423 = vmatprep.subr.bf16.mxu1 %v5957_v0 }
 0x838   :  { %5414 = vmatmul.mubr.msk.bf16.vlgmr.msra.gmra.mxu1 %vm134_vm2, %v1830_v4 }
 0x839   :  { %5424 = vmatpush3.bf16.xpose.msra.mxu1 %v1952_v57  ;;  %5425 = vmatprep.mubr.msk.bf16.mxu1 %vm5958_vm0, %v5957_v0 }
 0x83a   :  { %5435 = vmatprep.subr.bf16.mxu1 %v5957_v0 }
 0x840   :  { %5426 = vmatmul.mubr.msk.bf16.vlgmr.msra.gmra.mxu1 %vm134_vm2, %v1945_v59 }
 0x841   :  { %5436 = vmatpush3.bf16.xpose.msra.mxu1 %v2067_v60  ;;  %5437 = vmatprep.mubr.msk.bf16.mxu1 %vm5958_vm0, %v5957_v0 }
 0x842   :  { %5447 = vmatprep.subr.bf16.mxu1 %v5957_v0 }
 0x848   :  { %5438 = vmatmul.mubr.msk.bf16.vlgmr.msra.gmra.mxu1 %vm134_vm2, %v2060_v61 }
 0x849   :  { %5451 = vmatprep.mubr.msk.bf16.mxu1 %vm5958_vm0, %v5957_v0 }
 0x865   :  { %v1300_v62 = vpop.f32.mrf.mxu1 }
 0x866   :  { %v1307_v63 = vsel %vm1306_vm9, %v1300_v62, -inf }
 0x867   :  { %1308 = vmax.xlane.f32.xlu0 %v1307_v63  ;;  %v5355_v15 = vpop.f32.mrf.mxu1 }
 0x869   :  { %v1303_v2 = vpop.f32.mrf.mxu1 }
 0x86b   :  { %v5356_v5 = vpop.f32.mrf.mxu1 }
 0x8d8   :  { %v1415_v1 = vpop.f32.mrf.mxu1 }
 0x8d9   :  { %v1421_v6 = vsel %vm1306_vm9, %v1415_v1, -inf }
 0x8da   :  { %1422 = vmax.xlane.f32.xlu1 %v1421_v6  ;;  %v5367_v7 = vpop.f32.mrf.mxu1 }
 0x8dc   :  { %v1418_v8 = vpop.f32.mrf.mxu1 }
 0x8de   :  { %v5368_v9 = vpop.f32.mrf.mxu1 }
 0x8e0   :  { %v1530_v10 = vpop.f32.mrf.mxu1 }
 0x8e1   :  { %v1536_v11 = vsel %vm1306_vm9, %v1530_v10, -inf }
 0x8e2   :  { %1537 = vmax.xlane.f32.xlu0 %v1536_v11  ;;  %v5379_v12 = vpop.f32.mrf.mxu1 }
 0x8e4   :  { %v1533_v13 = vpop.f32.mrf.mxu1 }
 0x8e6   :  { %v5380_v14 = vpop.f32.mrf.mxu1 }
 0x8e8   :  { %v6409_v19 = vpop.f32.mrf.mxu1 }
 0x8e9   :  { %v1651_v20 = vsel %vm1306_vm9, %v6409_v19, -inf }
 0x8ea   :  { %1652 = vmax.xlane.f32.xlu0 %v1651_v20  ;;  %v5391_v21 = vpop.f32.mrf.mxu1 }
 0x8ec   :  { %v1648_v22 = vpop.f32.mrf.mxu1 }
 0x8ee   :  { %v5392_v23 = vpop.f32.mrf.mxu1 }
 0x8f0   :  { %v6413_v24 = vpop.f32.mrf.mxu1  ;;  %v1309_v45 = vpop.xlane.xlu0 %1308 }
 0x8f1   :  { %v1768_v17 = vsel %vm1306_vm9, %v6413_v24, -inf  ;;  %v1310_v47 = vsub.f32 %v1300_v62, %v1309_v45 }
 0x8f2   :  { %1769 = vmax.xlane.f32.xlu1 %v1768_v17  ;;  %v5403_v25 = vpop.f32.mrf.mxu1 }
 0x8f3   :  { %v1311_v46 = vmul.f32 1.442695, %v1310_v47 }
 0x8f4   :  { %v1765_v26 = vpop.f32.mrf.mxu1 }
 0x8f5   :  { %5849 = vpow2.f32 %v1311_v46 }
 0x8f6   :  { %v5404_v28 = vpop.f32.mrf.mxu1 }
 0x8f8   :  { %v1873_v29 = vpop.f32.mrf.mxu1 }
 0x8f9   :  { %v1879_v30 = vsel %vm1306_vm9, %v1873_v29, -inf }
 0x8fa   :  { %1880 = vmax.xlane.f32.xlu0 %v1879_v30  ;;  %v5415_v31 = vpop.f32.mrf.mxu1 }
 0x8fc   :  { %v1876_v33 = vpop.f32.mrf.mxu1 }
 0x8fe   :  { %v5416_v34 = vpop.f32.mrf.mxu1 }
 0x900   :  { %v1988_v35 = vpop.f32.mrf.mxu1 }
 0x901   :  { %v1994_v36 = vsel %vm1306_vm9, %v1988_v35, -inf }
 0x902   :  { %1995 = vmax.xlane.f32.xlu1 %v1994_v36  ;;  %v5427_v37 = vpop.f32.mrf.mxu1  ;;  %v6427_v49 = vpop.eup %5849 }
 0x903   :  { %v1313_v50 = vsel %vm1306_vm9, %v6427_v49, 0.0 }
 0x904   :  { %v1991_v38 = vpop.f32.mrf.mxu1 }
 0x906   :  { %v5428_v39 = vpop.f32.mrf.mxu1 }
 0x908   :  { %v6419_v40 = vpop.f32.mrf.mxu1 }
 0x909   :  { %v2109_v48 = vsel %vm1306_vm9, %v6419_v40, -inf }
 0x90a   :  { %v5439_v41 = vpop.f32.mrf.mxu1 }
 0x90c   :  { %v2106_v42 = vpop.f32.mrf.mxu1 }
 0x90e   :  { %v5440_v43 = vpop.f32.mrf.mxu1 }
 0x910   :  { %1433 = vrot.lane.b32.xlu0 %v6337_v27, %s5961_s24 }
 0x913   :  { %1320 = vrot.lane.b32.xlu1 %v6337_v27, %s5959_s0 }
 0x92f   :  { %2110 = vmax.xlane.f32.xlu0 %v2109_v48 }
 0x937   :  { %1314 = vadd.xlane.f32.xlu1 %v1313_v50 }
 0x963   :  { %v1423_v51 = vpop.xlane.xlu1 %1422 }
 0x964   :  { %v1424_v52 = vsub.f32 %v1415_v1, %v1423_v51 }
 0x966   :  { %v1425_v53 = vmul.f32 1.442695, %v1424_v52 }
 0x968   :  { %5851 = vpow2.f32 %v1425_v53 }
 0x96b   :  { %v1538_v54 = vpop.xlane.xlu0 %1537 }
 0x96c   :  { %v1539_v3 = vsub.f32 %v1530_v10, %v1538_v54 }
 0x96e   :  { %v1540_v55 = vmul.f32 1.442695, %v1539_v3 }
 0x970   :  { %5853 = vpow2.f32 %v1540_v55 }
 0x973   :  { %v1653_v62 = vpop.xlane.xlu0 %1652 }
 0x974   :  { %v1654_v15 = vsub.f32 %v6409_v19, %v1653_v62 }
 0x975   :  { %v6431_v56 = vpop.eup %5851 }
 0x976   :  { %v1427_v4 = vsel %vm1306_vm9, %v6431_v56, 0.0  ;;  %v1655_v2 = vmul.f32 1.442695, %v1654_v15 }
 0x977   :  { %1428 = vadd.xlane.f32.xlu0 %v1427_v4 }
 0x978   :  { %5855 = vpow2.f32 %v1655_v2 }
 0x97b   :  { %v1770_v59 = vpop.xlane.xlu1 %1769 }
 0x97c   :  { %v1771_v5 = vsub.f32 %v6413_v24, %v1770_v59 }
 0x97d   :  { %v6435_v57 = vpop.eup %5853 }
 0x97e   :  { %v1542_v58 = vsel %vm1306_vm9, %v6435_v57, 0.0  ;;  %v1772_v7 = vmul.f32 1.442695, %v1771_v5 }
 0x97f   :  { %1543 = vadd.xlane.f32.xlu1 %v1542_v58 }
 0x980   :  { %5857 = vpow2.f32 %v1772_v7 }
 0x983   :  { %v1881_v1 = vpop.xlane.xlu0 %1880 }
 0x984   :  { %v1882_v6 = vsub.f32 %v1873_v29, %v1881_v1 }
 0x985   :  { %v5856_v11 = vpop.eup %5855 }
 0x986   :  { %v1883_v9 = vmul.f32 1.442695, %v1882_v6 }
 0x987   :  { %v1434_v22 = vpop.permute.xlu0 %1433 }
 0x988   :  { %5859 = vpow2.f32 %v1883_v9  ;;  %v1439_v33 = vsel %vm1325_vm10, %v1434_v22, 0 }
 0x98b   :  { %v1996_v60 = vpop.xlane.xlu1 %1995 }
 0x98c   :  { %v1997_v8 = vsub.f32 %v1988_v35, %v1996_v60 }
 0x98d   :  { %1548 = vrot.lane.b32.xlu0 %v6337_v27, %s5962_s25  ;;  %v6448_v12 = vpop.eup %5857 }
 0x98e   :  { %v1998_v10 = vmul.f32 1.442695, %v1997_v8  ;;  %v1774_v14 = vsel %vm1306_vm9, %v6448_v12, 0.0 }
 0x98f   :  { %v1321_v61 = vpop.permute.xlu1 %1320 }
 0x990   :  { %v1327_v63 = vsel %vm1325_vm10, %v1321_v61, 0  ;;  %1663 = vrot.lane.b32.xlu1 %v6337_v27, %s5964_s27  ;;  %5861 = vpow2.f32 %v1998_v10  ;;  %v1657_v27 = vsel %vm1306_vm9, %v5856_v11, 0.0 }
 0x991   :  { %5358 = vmatpush3.bf16.msra.mxu0 %v1327_v63 }
 0x992   :  { %5369 = vmatprep.subr.bf16.mxu0 %v5957_v0 }
 0x995   :  { %v6450_v13 = vpop.eup %5859 }
 0x996   :  { %v1885_v20 = vsel %vm1306_vm9, %v6450_v13, 0.0 }
 0x99d   :  { %v6454_v19 = vpop.eup %5861 }
 0x99e   :  { %v2000_v21 = vsel %vm1306_vm9, %v6454_v19, 0.0 }
 0x9ac   :  { %1658 = vadd.xlane.f32.xlu0 %v1657_v27 }
 0x9b0   :  { %1775 = vadd.xlane.f32.xlu0 %v1774_v14 }
 0x9b4   :  { %1886 = vadd.xlane.f32.xlu1 %v1885_v20  ;;  %2001 = vadd.xlane.f32.xlu0 %v2000_v21 }
 0x9b8   :  { %v2111_v23 = vpop.xlane.xlu0 %2110 }
 0x9b9   :  { %v2112_v24 = vsub.f32 %v6419_v40, %v2111_v23 }
 0x9bb   :  { %v2113_v17 = vmul.f32 1.442695, %v2112_v24 }
 0x9bd   :  { %5863 = vpow2.f32 %v2113_v17 }
 0x9c0   :  { %v1315_v25 = vpop.xlane.xlu1 %1314 }
 0x9c1   :  { %5865 = vrcp.f32 %v1315_v25 }
 0x9c5   :  { %1891 = vrot.lane.b32.xlu1 %v6350_v32, %s5961_s24 }
 0x9c9   :  { %2006 = vrot.lane.b32.xlu1 %v6350_v32, %s5962_s25 }
 0x9ca   :  { %v6465_v26 = vpop.eup %5863 }
 0x9cb   :  { %v2115_v28 = vsel %vm1306_vm9, %v6465_v26, 0.0 }
 0x9cc   :  { %2116 = vadd.xlane.f32.xlu0 %v2115_v28 }
 0x9cd   :  { %2121 = vrot.lane.b32.xlu1 %v6350_v32, %s5964_s27 }
 0x9ce   :  { %v5866_v29 = vpop.eup %5865 }
 0x9cf   :  { %v1317_v30 = vmul.f32 %v5866_v29, %v6427_v49 }
 0x9d1   :  { %v1318_v31 = vpack.c.bf16 %v1317_v30, %v1317_v30 }
 0x9d3   :  { %5360 = vmatmul.mubr.msk.bf16.vlgmr.msra.gmra.mxu0 %vm1306_vm9, %v1318_v31 }
 0x9d4   :  { %5370 = vmatpush3.bf16.msra.mxu0 %v1439_v33  ;;  %5371 = vmatprep.mubr.msk.bf16.mxu0 %vm5958_vm0, %v5957_v0 }
 0x9d5   :  { %5381 = vmatprep.subr.bf16.mxu0 %v5957_v0 }
 0x9e2   :  { %1780 = vrot.lane.b32.xlu0 %v6350_v32, %s5959_s0 }
 0xa00   :  { %v1429_v34 = vpop.xlane.xlu0 %1428 }
 0xa01   :  { %5867 = vrcp.f32 %v1429_v34 }
 0xa04   :  { %v1549_v38 = vpop.permute.xlu0 %1548 }
 0xa05   :  { %v1554_v40 = vsel %vm1325_vm10, %v1549_v38, 0 }
 0xa08   :  { %v1544_v35 = vpop.xlane.xlu1 %1543 }
 0xa09   :  { %5869 = vrcp.f32 %v1544_v35 }
 0xa0c   :  { %v1664_v42 = vpop.permute.xlu1 %1663 }
 0xa0d   :  { %v1669_v45 = vsel %vm1325_vm10, %v1664_v42, 0 }
 0xa0e   :  { %v5868_v36 = vpop.eup %5867 }
 0xa0f   :  { %v1431_v37 = vmul.f32 %v5868_v36, %v6431_v56 }
 0xa11   :  { %v1432_v39 = vpack.c.bf16 %v1431_v37, %v1431_v37 }
 0xa13   :  { %5372 = vmatmul.mubr.msk.bf16.vlgmr.msra.gmra.mxu0 %vm1306_vm9, %v1432_v39 }
 0xa14   :  { %5382 = vmatpush3.bf16.msra.mxu0 %v1554_v40  ;;  %5383 = vmatprep.mubr.msk.bf16.mxu0 %vm5958_vm0, %v5957_v0 }
 0xa15   :  { %5393 = vmatprep.subr.bf16.mxu0 %v5957_v0 }
 0xa16   :  { %v5870_v32 = vpop.eup %5869 }
 0xa17   :  { %v1546_v41 = vmul.f32 %v5870_v32, %v6435_v57 }
 0xa19   :  { %v1547_v43 = vpack.c.bf16 %v1546_v41, %v1546_v41 }
 0xa1b   :  { %5384 = vmatmul.mubr.msk.bf16.vlgmr.msra.gmra.mxu0 %vm1306_vm9, %v1547_v43 }
 0xa1c   :  { %5394 = vmatpush3.bf16.msra.mxu0 %v1669_v45  ;;  %5395 = vmatprep.mubr.msk.bf16.mxu0 %vm5958_vm0, %v5957_v0 }
 0xa1d   :  { %5405 = vmatprep.subr.bf16.mxu0 %v5957_v0 }
 0xa35   :  { %v1659_v47 = vpop.xlane.xlu0 %1658 }
 0xa36   :  { %5871 = vrcp.f32 %v1659_v47 }
 0xa39   :  { %v1776_v49 = vpop.xlane.xlu0 %1775 }
 0xa3a   :  { %5873 = vrcp.f32 %v1776_v49 }
 0xa3d   :  { %v1887_v51 = vpop.xlane.xlu1 %1886  ;;  %v2002_v52 = vpop.xlane.xlu0 %2001 }
 0xa3e   :  { %5875 = vrcp.f32 %v1887_v51 }
 0xa3f   :  { %5877 = vrcp.f32 %v2002_v52 }
 0xa41   :  { %v1892_v4 = vpop.permute.xlu1 %1891 }
 0xa42   :  { %v1897_v59 = vsel %vm1325_vm10, %v1892_v4, 0 }
 0xa43   :  { %v5872_v46 = vpop.eup %5871 }
 0xa44   :  { %v1661_v48 = vmul.f32 %v5872_v46, %v5856_v11 }
 0xa45   :  { %v2007_v61 = vpop.permute.xlu1 %2006 }
 0xa46   :  { %v1662_v50 = vpack.c.bf16 %v1661_v48, %v1661_v48  ;;  %v2012_v15 = vsel %vm1325_vm10, %v2007_v61, 0 }
 0xa47   :  { %v5874_v53 = vpop.eup %5873 }
 0xa48   :  { %5396 = vmatmul.mubr.msk.bf16.vlgmr.msra.gmra.mxu0 %vm1306_vm9, %v1662_v50  ;;  %v1778_v3 = vmul.f32 %v5874_v53, %v6448_v12 }
 0xa49   :  { %5407 = vmatprep.mubr.msk.bf16.mxu0 %vm5958_vm0, %v5957_v0  ;;  %v2122_v5 = vpop.permute.xlu1 %2121 }
 0xa4a   :  { %v1779_v57 = vpack.c.bf16 %v1778_v3, %v1778_v3  ;;  %v2127_v7 = vsel %vm1325_vm10, %v2122_v5, 0 }
 0xa4b   :  { %v5876_v58 = vpop.eup %5875 }
 0xa4c   :  { %v1889_v60 = vmul.f32 %v5876_v58, %v6450_v13  ;;  %v5878_v63 = vpop.eup %5877 }
 0xa4d   :  { %v2004_v2 = vmul.f32 %v5878_v63, %v6454_v19 }
 0xa4e   :  { %v1890_v62 = vpack.c.bf16 %v1889_v60, %v1889_v60 }
 0xa4f   :  { %v2005_v1 = vpack.c.bf16 %v2004_v2, %v2004_v2 }
 0xa55   :  { %v2117_v54 = vpop.xlane.xlu0 %2116 }
 0xa56   :  { %5879 = vrcp.f32 %v2117_v54 }
 0xa59   :  { %v1781_v55 = vpop.permute.xlu0 %1780 }
 0xa5a   :  { %v1786_v56 = vsel %vm1325_vm10, %v1781_v55, 0 }
 0xa5b   :  { %5406 = vmatpush3.bf16.msra.mxu0 %v1786_v56 }
 0xa5c   :  { %5417 = vmatprep.subr.bf16.mxu0 %v5957_v0 }
 0xa5e   :  { %5408 = vmatmul.mubr.msk.bf16.vlgmr.msra.gmra.mxu0 %vm1306_vm9, %v1779_v57 }
 0xa5f   :  { %5418 = vmatpush3.bf16.msra.mxu0 %v1897_v59  ;;  %5419 = vmatprep.mubr.msk.bf16.mxu0 %vm5958_vm0, %v5957_v0 }
 0xa60   :  { %5429 = vmatprep.subr.bf16.mxu0 %v5957_v0 }
 0xa63   :  { %v5880_v6 = vpop.eup %5879 }
 0xa64   :  { %v2119_v8 = vmul.f32 %v5880_v6, %v6465_v26 }
 0xa66   :  { %5420 = vmatmul.mubr.msk.bf16.vlgmr.msra.gmra.mxu0 %vm1306_vm9, %v1890_v62  ;;  %v2120_v9 = vpack.c.bf16 %v2119_v8, %v2119_v8  ;;  %v5787_v8 = vld [vmem:[%s7112_s8 + $0x8] sm:$0xff]  }
 0xa67   :  { %5430 = vmatpush3.bf16.msra.mxu0 %v2012_v15  ;;  %5431 = vmatprep.mubr.msk.bf16.mxu0 %vm5958_vm0, %v5957_v0 }
 0xa68   :  { %5441 = vmatprep.subr.bf16.mxu0 %v5957_v0  ;;  %5448 = vmatpush3.bf16.msra.mxu1 %v5787_v8 }
 0xa69   :  { %5449 = vmatprep.subr.bf16.mxu1 %v5957_v0 }
 0xa6e   :  { %5432 = vmatmul.mubr.msk.bf16.vlgmr.msra.gmra.mxu0 %vm1306_vm9, %v2005_v1 }
 0xa6f   :  { %5442 = vmatpush3.bf16.msra.mxu0 %v2127_v7  ;;  %5443 = vmatprep.mubr.msk.bf16.mxu0 %vm5958_vm0, %v5957_v0 }
 0xa70   :  { %5455 = vmatprep.subr.bf16.mxu0 %v5957_v0 }
 0xa76   :  { %5444 = vmatmul.mubr.msk.bf16.vlgmr.msra.gmra.mxu0 %vm1306_vm9, %v2120_v9 }
 0xa77   :  { %5471 = vmatprep.mubr.msk.bf16.mxu0 %vm5958_vm0, %v5957_v0 }
 0xa93   :  { %v1363_v10 = vpop.f32.mrf.mxu0 }
 0xa94   :  { %1369 = vst.msk [vmem:[#allocation2] sm:$0xff] %vm134_vm2, %v1363_v10 }
 0xa95   :  { %v5361_v11 = vpop.f32.mrf.mxu0 }
 0xa97   :  { %v1366_v27 = vpop.f32.mrf.mxu0 }
 0xa99   :  { %v5362_v12 = vpop.f32.mrf.mxu0 }
 0xa9a   :  { %v5788_v12 = vld [vmem:[%s7112_s8] sm:$0xff]  }
 0xa9b   :  { %5450 = vmatpush3.bf16.msra.mxu1 %v5788_v12 }
 0xa9c   :  { %5475 = vmatprep.subr.bf16.mxu1 %v5957_v0 }
 0xad3   :  { %v1475_v13 = vpop.f32.mrf.mxu0 }
 0xad4   :  { %1482 = vrot.lane.b32.xlu1 %v1475_v13, %s7131_s17 }
 0xad5   :  { %v5373_v14 = vpop.f32.mrf.mxu0 }
 0xad7   :  { %v1478_v19 = vpop.f32.mrf.mxu0 }
 0xad8   :  { %v5789_v19 = vld [vmem:[%s7113_s10 + $0x38] sm:$0xff]  }
 0xad9   :  { %v5374_v20 = vpop.f32.mrf.mxu0  ;;  %5456 = vmatpush3.bf16.msra.mxu0 %v5789_v19 }
 0xada   :  { %5457 = vmatprep.subr.bf16.mxu0 %v5957_v0 }
 0xadb   :  { %v1590_v21 = vpop.f32.mrf.mxu0 }
 0xadc   :  { %1597 = vrot.lane.b32.xlu0 %v1590_v21, %s7135_s30  ;;  %v5790_v21 = vld [vmem:[%s7113_s10 + $0x30] sm:$0xff]  }
 0xadd   :  { %v5385_v22 = vpop.f32.mrf.mxu0  ;;  %5458 = vmatpush3.bf16.msra.mxu0 %v5790_v21 }
 0xade   :  { %v5791_v22 = vld [vmem:[%s7113_s10 + $0x28] sm:$0xff]   ;;  %5459 = vmatprep.subr.bf16.mxu0 %v5957_v0 }
 0xadf   :  { %v1593_v23 = vpop.f32.mrf.mxu0 }
 0xae0   :  { %v5792_v23 = vld [vmem:[%s7113_s10 + $0x20] sm:$0xff]  }
 0xae1   :  { %v5386_v24 = vpop.f32.mrf.mxu0  ;;  %5460 = vmatpush3.bf16.msra.mxu0 %v5791_v22 }
 0xae2   :  { %5461 = vmatprep.subr.bf16.mxu0 %v5957_v0  ;;  %v5793_v24 = vld [vmem:[%s7113_s10 + $0x18] sm:$0xff]  }
 0xae5   :  { %5462 = vmatpush3.bf16.msra.mxu0 %v5792_v23 }
 0xae6   :  { %5463 = vmatprep.subr.bf16.mxu0 %v5957_v0 }
 0xae9   :  { %5464 = vmatpush3.bf16.msra.mxu0 %v5793_v24 }
 0xaea   :  { %5465 = vmatprep.subr.bf16.mxu0 %v5957_v0 }
 0xb08   :  { %v1705_v17 = vpop.f32.mrf.mxu0 }
 0xb09   :  { %1712 = vrot.lane.b32.xlu0 %v1705_v17, %s7136_s15 }
 0xb0a   :  { %v5397_v25 = vpop.f32.mrf.mxu0 }
 0xb0c   :  { %v1708_v26 = vpop.f32.mrf.mxu0 }
 0xb0e   :  { %v5398_v28 = vpop.f32.mrf.mxu0 }
 0xb1e   :  { %v1822_v29 = vpop.f32.mrf.mxu0 }
 0xb1f   :  { %1828 = vst.msk [vmem:[#allocation2 + $0x8] sm:$0xff] %vm134_vm2, %v1822_v29 }
 0xb20   :  { %v5409_v30 = vpop.f32.mrf.mxu0 }
 0xb22   :  { %v1825_v31 = vpop.f32.mrf.mxu0 }
 0xb23   :  { %v5794_v31 = vld [vmem:[%s7113_s10 + $0x10] sm:$0xff]  }
 0xb24   :  { %v5410_v33 = vpop.f32.mrf.mxu0  ;;  %5466 = vmatpush3.bf16.msra.mxu0 %v5794_v31 }
 0xb25   :  { %5467 = vmatprep.subr.bf16.mxu0 %v5957_v0  ;;  %v5795_v33 = vld [vmem:[%s7113_s10 + $0x8] sm:$0xff]  }
 0xb26   :  { %v1933_v34 = vpop.f32.mrf.mxu0 }
 0xb27   :  { %1940 = vrot.lane.b32.xlu1 %v1933_v34, %s7131_s17  ;;  %v5796_v34 = vld [vmem:[%s7113_s10] sm:$0xff]  }
 0xb28   :  { %v5421_v35 = vpop.f32.mrf.mxu0  ;;  %5468 = vmatpush3.bf16.msra.mxu0 %v5795_v33 }
 0xb29   :  { %5469 = vmatprep.subr.bf16.mxu0 %v5957_v0  ;;  %v4944_v35 = vld [vmem:[%s7114_s9] ss:$0 sm:$0xff] }
 0xb2a   :  { %v1936_v36 = vpop.f32.mrf.mxu0 }
 0xb2c   :  { %v5422_v37 = vpop.f32.mrf.mxu0  ;;  %5470 = vmatpush3.bf16.msra.mxu0 %v5796_v34 }
 0xb2d   :  { %5501 = vmatprep.subr.bf16.mxu0 %v5957_v0 }
 0xb2e   :  { %v2048_v38 = vpop.f32.mrf.mxu0 }
 0xb2f   :  { %2055 = vrot.lane.b32.xlu1 %v2048_v38, %s7135_s30 }
 0xb30   :  { %v5433_v39 = vpop.f32.mrf.mxu0 }
 0xb32   :  { %v2051_v40 = vpop.f32.mrf.mxu0 }
 0xb34   :  { %v5434_v32 = vpop.f32.mrf.mxu0 }
 0xb36   :  { %v2163_v41 = vpop.f32.mrf.mxu0 }
 0xb37   :  { %2170 = vrot.lane.b32.xlu1 %v2163_v41, %s7136_s15 }
 0xb38   :  { %v5445_v42 = vpop.f32.mrf.mxu0 }
 0xb3a   :  { %v2166_v43 = vpop.f32.mrf.mxu0 }
 0xb3c   :  { %v5446_v45 = vpop.f32.mrf.mxu0 }
 0xb3d   :  { %v4948_v45 = vld [vmem:[%s7115_s11] ss:$0 sm:$0xff] }
 0xb46   :  { %v1483_v47 = vpop.permute.xlu1 %1482 }
 0xb47   :  { %1485 = vst.msk [vmem:[#allocation2] sm:$0xff] %vm360_vm5, %v1483_v47 }
 0xb4e   :  { %v1598_v46 = vpop.permute.xlu0 %1597 }
 0xb4f   :  { %1600 = vst.msk [vmem:[#allocation2] sm:$0xff] %vm477_vm6, %v1598_v46 }
 0xb7b   :  { %v1713_v48 = vpop.permute.xlu0 %1712 }
 0xb7c   :  { %1715 = vst.msk [vmem:[#allocation2] sm:$0xff] %vm594_vm7, %v1713_v48 }
 0xb83   :  { %v2174_v52 = vld [vmem:[#allocation2] sm:$0xff] }
 0xb84   :  { %v2176_v53 = vadd.f32 %v2174_v52, %v6325_v16 }
 0xb86   :  { %v2178_v55 = vsel %vm82_vm1, %v2176_v53, 0.0 }
 0xb99   :  { %v1941_v49 = vpop.permute.xlu1 %1940 }
 0xb9a   :  { %1943 = vst.msk [vmem:[#allocation2 + $0x8] sm:$0xff] %vm360_vm5, %v1941_v49 }
 0xba1   :  { %v2056_v50 = vpop.permute.xlu1 %2055 }
 0xba2   :  { %2058 = vst.msk [vmem:[#allocation2 + $0x8] sm:$0xff] %vm477_vm6, %v2056_v50 }
 0xba9   :  { %v2171_v51 = vpop.permute.xlu1 %2170 }
 0xbaa   :  { %2173 = vst.msk [vmem:[#allocation2 + $0x8] sm:$0xff] %vm594_vm7, %v2171_v51 }
 0xbb1   :  { %v2175_v54 = vld [vmem:[#allocation2 + $0x8] sm:$0xff] }
 0xbb2   :  { %v2177_v3 = vadd.f32 %v2175_v54, %v6327_v18 }
 0xbb4   :  { %v2179_v56 = vsel %vm82_vm1, %v2177_v3, 0.0 }
 0xbb5   :  { %v2180_v4 = vadd.f32 %v2179_v56, %v2178_v55 }
 0xbb7   :  { %2181 = vadd.xlane.f32.xlu0 %v2180_v4 }
 0xc40   :  { %v2182_v57 = vpop.xlane.xlu0 %2181 }
 0xc41   :  { %v2183_v58 = vrot.slane %v2182_v57, 4 }
 0xc43   :  { %v2184_v59 = vadd.f32 %v2183_v58, %v2182_v57 }
 0xc45   :  { %v2185_v60 = vrot.slane %v2184_v59, 2 }
 0xc47   :  { %v2186_v61 = vadd.f32 %v2185_v60, %v2184_v59 }
 0xc49   :  { %v2187_v62 = vrot.slane %v2186_v61, 1 }
 0xc4b   :  { %v2188_v63 = vadd.f32 %v2187_v62, %v2186_v61 }
 0xc4d   :  { %5733 = vpush %v2188_v63 }
 0xc7e   :  { %s5734_s18 = spop %5733 }
 0xc7f   :  { %s2192_s19 = smul.f32 0.001953125, %s5734_s18 }
 0xc81   :  { %v2193_v16 = vstv %s2192_s19 }
 0xc82   :  { %v2194_v15 = vsub.f32 %v2176_v53, %v2193_v16  ;;  %v2195_v2 = vsub.f32 %v2177_v3, %v2193_v16 }
 0xc84   :  { %v2196_v18 = vmul.f32 %v2194_v15, %v2194_v15  ;;  %v2197_v5 = vmul.f32 %v2195_v2, %v2195_v2 }
 0xc86   :  { %v2198_v1 = vsel %vm82_vm1, %v2196_v18, 0.0  ;;  %v2199_v6 = vsel %vm82_vm1, %v2197_v5, 0.0 }
 0xc87   :  { %v2200_v7 = vadd.f32 %v2199_v6, %v2198_v1  ;;  %v5797_v6 = vld [vmem:[%s7104_s2 + $0x18] sm:$0xff]  }
 0xc89   :  { %2201 = vadd.xlane.f32.xlu1 %v2200_v7 }
 0xd12   :  { %v2202_v9 = vpop.xlane.xlu1 %2201 }
 0xd13   :  { %v2203_v10 = vrot.slane %v2202_v9, 4 }
 0xd15   :  { %v2204_v11 = vadd.f32 %v2203_v10, %v2202_v9 }
 0xd17   :  { %v2205_v27 = vrot.slane %v2204_v11, 2 }
 0xd19   :  { %v2206_v13 = vadd.f32 %v2205_v27, %v2204_v11  ;;  %v5798_v11 = vld [vmem:[%s7104_s2 + $0x10] sm:$0xff]  }
 0xd1b   :  { %v2207_v14 = vrot.slane %v2206_v13, 1 }
 0xd1d   :  { %v2208_v20 = vadd.f32 %v2207_v14, %v2206_v13 }
 0xd1f   :  { %5735 = vpush %v2208_v20 }
 0xd50   :  { %s5736_s19 = spop %5735 }
 0xd51   :  { %s2212_s22 = smul.f32 0.001953125, %s5736_s19 }
 0xd53   :  { %s2213_s20 = sadd.f32 1e-05, %s2212_s22  ;;  %s7138_s22 = smov 56  }
 0xd55   :  { %v2214_v17 = vstv %s2213_s20  ;;  %s7139_s20 = smov 48  }
 0xd56   :  { %5881 = vrsqrt.f32 %v2214_v17  ;;  %v4962_v17 = vld [vmem:[%s7106_s3 + $0x1] ss:$0 sm:$0xff]  ;;  %s7137_s3 = smov 64  }
 0xd63   :  { %v5882_v25 = vpop.eup %5881 }
 0xd64   :  { %5737 = vpush %v5882_v25 }
 0xd95   :  { %s5738_s17 = spop %5737 }
 0xd96   :  { %v2217_v26 = vstv %s5738_s17  ;;  %s7140_s17 = smov 40  }
 0xd97   :  { %v2218_v28 = vmul.f32 %v2217_v26, %v2194_v15  ;;  %v2219_v29 = vmul.f32 %v2217_v26, %v2195_v2 }
 0xd99   :  { %v2242_v30 = vpack.c.bf16 %v2219_v29, %v2218_v28 }
 0xd9b   :  { %5452 = vmatmul.mubr.msk.bf16.vlgmr.msra.gmra.mxu1 %vm82_vm1, %v2242_v30 }
 0xd9c   :  { %5479 = vmatprep.mubr.msk.bf16.mxu1 %vm5958_vm0, %v5957_v0  ;;  %5476 = vmatpush3.bf16.msra.mxu1 %v5797_v6 }
 0xd9d   :  { %5477 = vmatprep.subr.bf16.mxu1 %v5957_v0 }
 0xda0   :  { %5478 = vmatpush3.bf16.msra.mxu1 %v5798_v11 }
 0xda1   :  { %5483 = vmatprep.subr.bf16.mxu1 %v5957_v0 }
 0xe5b   :  { %v2298_v36 = vpop.f32.mrf.mxu1 }
 0xe5c   :  { %v2299_v38 = vadd.f32 %v4944_v35, %v2298_v36 }
 0xe5d   :  { %v5453_v37 = vpop.f32.mrf.mxu1 }
 0xe5e   :  { %v2305_v41 = vmax.f32 %v2299_v38, 0.0 }
 0xe5f   :  { %v2301_v39 = vpop.f32.mrf.mxu1 }
 0xe60   :  { %v2302_v40 = vadd.f32 %v4944_v35, %v2301_v39 }
 0xe61   :  { %v5454_v32 = vpop.f32.mrf.mxu1 }
 0xe62   :  { %v2306_v42 = vmax.f32 %v2302_v40, 0.0 }
 0xe64   :  { %v2307_v43 = vpack.c.bf16 %v2306_v42, %v2305_v41 }
 0xe66   :  { %5472 = vmatmul.mubr.bf16.vlgmr.msra.gmra.mxu0 %v2307_v43 }
 0xe67   :  { %5503 = vmatprep.mubr.msk.bf16.mxu0 %vm5958_vm0, %v5957_v0 }
 0xf26   :  { %v2396_v47 = vpop.f32.mrf.mxu0 }
 0xf27   :  { %v2397_v46 = vadd.f32 %v4948_v45, %v2396_v47 }
 0xf28   :  { %v5473_v48 = vpop.f32.mrf.mxu0 }
 0xf29   :  { %v2403_v50 = vadd.f32 %v2397_v46, %v2218_v28 }
 0xf2a   :  { %v2399_v49 = vpop.f32.mrf.mxu0 }
 0xf2b   :  { %v2400_v51 = vadd.f32 %v4948_v45, %v2399_v49  ;;  %v2405_v54 = vsel %vm82_vm1, %v2403_v50, 0.0 }
 0xf2c   :  { %v5474_v52 = vpop.f32.mrf.mxu0 }
 0xf2d   :  { %v2404_v53 = vadd.f32 %v2400_v51, %v2219_v29 }
 0xf2f   :  { %v2406_v3 = vsel %vm82_vm1, %v2404_v53, 0.0 }
 0xf30   :  { %v2407_v55 = vadd.f32 %v2406_v3, %v2405_v54 }
 0xf32   :  { %2408 = vadd.xlane.f32.xlu0 %v2407_v55 }
 0xfbb   :  { %v2409_v56 = vpop.xlane.xlu0 %2408 }
 0xfbc   :  { %v2410_v4 = vrot.slane %v2409_v56, 4 }
 0xfbe   :  { %v2411_v57 = vadd.f32 %v2410_v4, %v2409_v56 }
 0xfc0   :  { %v2412_v58 = vrot.slane %v2411_v57, 2 }
 0xfc2   :  { %v2413_v59 = vadd.f32 %v2412_v58, %v2411_v57 }
 0xfc4   :  { %v2414_v60 = vrot.slane %v2413_v59, 1 }
 0xfc6   :  { %v2415_v61 = vadd.f32 %v2414_v60, %v2413_v59 }
 0xfc8   :  { %5739 = vpush %v2415_v61 }
 0xff9   :  { %s5740_s29 = spop %5739 }
 0xffa   :  { %s2419_s18 = smul.f32 0.001953125, %s5740_s29 }
 0xffc   :  { %v2420_v62 = vstv %s2419_s18 }
 0xffd   :  { %v2421_v63 = vsub.f32 %v2403_v50, %v2420_v62  ;;  %v2422_v16 = vsub.f32 %v2404_v53, %v2420_v62 }
 0xfff   :  { %v2423_v15 = vmul.f32 %v2421_v63, %v2421_v63  ;;  %v2424_v2 = vmul.f32 %v2422_v16, %v2422_v16 }
0x1001   :  { %v2425_v18 = vsel %vm82_vm1, %v2423_v15, 0.0  ;;  %v2426_v5 = vsel %vm82_vm1, %v2424_v2, 0.0 }
0x1002   :  { %v2427_v1 = vadd.f32 %v2426_v5, %v2425_v18 }
0x1004   :  { %2428 = vadd.xlane.f32.xlu0 %v2427_v1 }
0x108d   :  { %v2429_v7 = vpop.xlane.xlu0 %2428 }
0x108e   :  { %v2430_v8 = vrot.slane %v2429_v7, 4 }
0x1090   :  { %v2431_v9 = vadd.f32 %v2430_v8, %v2429_v7 }
0x1092   :  { %v2432_v10 = vrot.slane %v2431_v9, 2 }
0x1094   :  { %v2433_v27 = vadd.f32 %v2432_v10, %v2431_v9 }
0x1096   :  { %v2434_v12 = vrot.slane %v2433_v27, 1 }
0x1098   :  { %v2435_v13 = vadd.f32 %v2434_v12, %v2433_v27 }
0x109a   :  { %5741 = vpush %v2435_v13 }
0x10cb   :  { %s5742_s21 = spop %5741 }
0x10cc   :  { %s2439_s16 = smul.f32 0.001953125, %s5742_s21 }
0x10ce   :  { %s2440_s29 = sadd.f32 1e-05, %s2439_s16 }
0x10d0   :  { %v2441_v14 = vstv %s2440_s29  ;;  %s7141_s29 = smov 8  }
0x10d1   :  { %5883 = vrsqrt.f32 %v2441_v14 }
0x10de   :  { %v5884_v19 = vpop.eup %5883 }
0x10df   :  { %5743 = vpush %v5884_v19 }
0x1110   :  { %s5744_s18 = spop %5743 }
0x1111   :  { %v2444_v20 = vstv %s5744_s18 }
0x1112   :  { %v6601_v21 = vmul.f32 %v2444_v20, %v2421_v63  ;;  %v6603_v22 = vmul.f32 %v2444_v20, %v2422_v16 }
0x1114   :  { %v2447_v23 = vpack.c.bf16 %v6603_v22, %v6601_v21 }
0x1116   :  { %5480 = vmatmul.mubr.msk.bf16.vlgmr.msra.gmra.mxu1 %vm82_vm1, %v2447_v23 }
0x1117   :  { %5485 = vmatprep.mubr.msk.bf16.mxu1 %vm5958_vm0, %v5957_v0 }
0x11d6   :  { %v2510_v24 = vpop.f32.mrf.mxu1 }
0x11d7   :  { %v2511_v28 = vadd.f32 %v4962_v17, %v2510_v24 }
0x11d8   :  { %v5481_v25 = vpop.f32.mrf.mxu1 }
0x11d9   :  { %v2517_v34 = vmul.f32 0.35355338, %v2511_v28 }
0x11da   :  { %v2513_v26 = vpop.f32.mrf.mxu1 }
0x11db   :  { %v2514_v29 = vadd.f32 %v4962_v17, %v2513_v26 }
0x11dc   :  { %v5482_v30 = vpop.f32.mrf.mxu1 }
0x11dd   :  { %v6613_v31 = vpack.c.bf16 %v2514_v29, %v2511_v28  ;;  %v2518_v33 = vmul.f32 0.35355338, %v2514_v29 }
0x11df   :  { %2522 = vrot.lane.b32.xlu1 %v6613_v31, %s5959_s0  ;;  %v2519_v35 = vpack.c.bf16 %v2518_v33, %v2517_v34  ;;  %v6625_v36 = vrot.slane %v6613_v31, 4 }
0x11e1   :  { %v2981_v50 = vrot.slane %v2519_v35, 4 }
0x11e3   :  { %2635 = vrot.lane.b32.xlu1 %v6613_v31, %s5961_s24 }
0x11e7   :  { %2633 = vrot.lane.b32.xlu1 %v2519_v35, %s5960_s23 }
0x11eb   :  { %2751 = vrot.lane.b32.xlu1 %v6613_v31, %s5962_s25 }
0x11ef   :  { %2749 = vrot.lane.b32.xlu1 %v2519_v35, %s5963_s26 }
0x11f3   :  { %2865 = vrot.lane.b32.xlu1 %v2519_v35, %s5965_s28 }
0x11f7   :  { %3095 = vrot.lane.b32.xlu1 %v6625_v36, %s5961_s24 }
0x11fb   :  { %3211 = vrot.lane.b32.xlu1 %v6625_v36, %s5962_s25 }
0x11ff   :  { %3327 = vrot.lane.b32.xlu1 %v6625_v36, %s5964_s27 }
0x1251   :  { %v2523_v37 = vpop.permute.xlu1 %2522 }
0x1252   :  { %v2528_v38 = vsel %vm134_vm2, %v2523_v37, 0 }
0x1253   :  { %5484 = vmatpush3.bf16.xpose.msra.mxu1 %v2528_v38 }
0x1254   :  { %5489 = vmatprep.subr.bf16.mxu1 %v5957_v0 }
0x1255   :  { %v2636_v54 = vpop.permute.xlu1 %2635 }
0x1256   :  { %v2641_v57 = vsel %vm134_vm2, %v2636_v54, 0 }
0x1259   :  { %v2634_v4 = vpop.permute.xlu1 %2633 }
0x125a   :  { %5486 = vmatmul.mubr.msk.bf16.vlgmr.msra.gmra.mxu1 %vm134_vm2, %v2519_v35 }
0x125b   :  { %5491 = vmatprep.mubr.msk.bf16.mxu1 %vm5958_vm0, %v5957_v0 }
0x125d   :  { %v2752_v58 = vpop.permute.xlu1 %2751 }
0x125e   :  { %v2757_v59 = vsel %vm134_vm2, %v2752_v58, 0 }
0x1261   :  { %v2750_v61 = vpop.permute.xlu1 %2749 }
0x1265   :  { %v2866_v16 = vpop.permute.xlu1 %2865 }
0x1269   :  { %v3096_v2 = vpop.permute.xlu1 %3095 }
0x126a   :  { %v3101_v18 = vsel %vm134_vm2, %v3096_v2, 0 }
0x126d   :  { %v3212_v5 = vpop.permute.xlu1 %3211 }
0x126e   :  { %v3217_v6 = vsel %vm134_vm2, %v3212_v5, 0 }
0x1271   :  { %v3328_v7 = vpop.permute.xlu1 %3327 }
0x1272   :  { %v3333_v9 = vsel %vm134_vm2, %v3328_v7, 0 }
0x131a   :  { %v2564_v39 = vpop.f32.mrf.mxu1 }
0x131b   :  { %v2570_v40 = vsel %vm6147_vm3, -3.5355338e+09, %v2564_v39 }
0x131c   :  { %v5487_v32 = vpop.f32.mrf.mxu1  ;;  %v2571_v41 = vsel %vm134_vm2, %v2570_v40, -inf }
0x131d   :  { %2572 = vmax.xlane.f32.xlu0 %v2571_v41 }
0x131e   :  { %v2567_v42 = vpop.f32.mrf.mxu1 }
0x1320   :  { %v5488_v43 = vpop.f32.mrf.mxu1 }
0x13a6   :  { %v2573_v45 = vpop.xlane.xlu0 %2572 }
0x13a7   :  { %v2574_v47 = vsub.f32 %v2570_v40, %v2573_v45 }
0x13a9   :  { %v2575_v46 = vmul.f32 1.442695, %v2574_v47 }
0x13ab   :  { %5885 = vpow2.f32 %v2575_v46 }
0x13b8   :  { %v5886_v48 = vpop.eup %5885 }
0x13b9   :  { %v2577_v49 = vsel %vm134_vm2, %v5886_v48, 0.0 }
0x13ba   :  { %2578 = vadd.xlane.f32.xlu0 %v2577_v49 }
0x13d0   :  { %2583 = vrot.lane.b32.xlu0 %v6613_v31, %s7137_s3 }
0x13d4   :  { %2867 = vrot.lane.b32.xlu0 %v6613_v31, %s5964_s27 }
0x13d8   :  { %2983 = vrot.lane.b32.xlu0 %v6625_v36, %s5959_s0 }
0x13dc   :  { %3093 = vrot.lane.b32.xlu0 %v2981_v50, %s5960_s23 }
0x13e0   :  { %3209 = vrot.lane.b32.xlu0 %v2981_v50, %s5963_s26 }
0x13e4   :  { %3325 = vrot.lane.b32.xlu0 %v2981_v50, %s5965_s28 }
0x1443   :  { %v2579_v51 = vpop.xlane.xlu0 %2578 }
0x1444   :  { %5887 = vrcp.f32 %v2579_v51 }
0x1447   :  { %v2584_v52 = vpop.permute.xlu0 %2583 }
0x1448   :  { %v2589_v53 = vsel %vm199_vm4, %v2584_v52, 0 }
0x1449   :  { %5490 = vmatpush3.bf16.msra.mxu1 %v2589_v53 }
0x144a   :  { %5495 = vmatprep.subr.bf16.mxu1 %v5957_v0 }
0x144b   :  { %v2868_v60 = vpop.permute.xlu0 %2867 }
0x144c   :  { %v2873_v62 = vsel %vm134_vm2, %v2868_v60, 0 }
0x144f   :  { %v2984_v63 = vpop.permute.xlu0 %2983 }
0x1450   :  { %v2989_v15 = vsel %vm134_vm2, %v2984_v63, 0 }
0x1451   :  { %v5888_v3 = vpop.eup %5887 }
0x1452   :  { %v2581_v55 = vmul.f32 %v5888_v3, %v5886_v48 }
0x1453   :  { %v3094_v1 = vpop.permute.xlu0 %3093 }
0x1454   :  { %v2582_v56 = vpack.c.bf16 %v2581_v55, %v2581_v55 }
0x1456   :  { %5492 = vmatmul.mubr.msk.bf16.vlgmr.msra.gmra.mxu1 %vm134_vm2, %v2582_v56 }
0x1457   :  { %5496 = vmatpush3.bf16.xpose.msra.mxu1 %v2641_v57  ;;  %5497 = vmatprep.mubr.msk.bf16.mxu1 %vm5958_vm0, %v5957_v0  ;;  %v3210_v8 = vpop.permute.xlu0 %3209 }
0x1458   :  { %5507 = vmatprep.subr.bf16.mxu1 %v5957_v0 }
0x145b   :  { %v3326_v10 = vpop.permute.xlu0 %3325 }
0x145e   :  { %5498 = vmatmul.mubr.msk.bf16.vlgmr.msra.gmra.mxu1 %vm134_vm2, %v2634_v4 }
0x145f   :  { %5508 = vmatpush3.bf16.xpose.msra.mxu1 %v2757_v59  ;;  %5509 = vmatprep.mubr.msk.bf16.mxu1 %vm5958_vm0, %v5957_v0 }
0x1460   :  { %5519 = vmatprep.subr.bf16.mxu1 %v5957_v0 }
0x1466   :  { %5510 = vmatmul.mubr.msk.bf16.vlgmr.msra.gmra.mxu1 %vm134_vm2, %v2750_v61 }
0x1467   :  { %5520 = vmatpush3.bf16.xpose.msra.mxu1 %v2873_v62  ;;  %5521 = vmatprep.mubr.msk.bf16.mxu1 %vm5958_vm0, %v5957_v0 }
0x1468   :  { %5531 = vmatprep.subr.bf16.mxu1 %v5957_v0 }
0x146e   :  { %5522 = vmatmul.mubr.msk.bf16.vlgmr.msra.gmra.mxu1 %vm134_vm2, %v2866_v16 }
0x146f   :  { %5532 = vmatpush3.bf16.xpose.msra.mxu1 %v2989_v15  ;;  %5533 = vmatprep.mubr.msk.bf16.mxu1 %vm5958_vm0, %v5957_v0 }
0x1470   :  { %5543 = vmatprep.subr.bf16.mxu1 %v5957_v0 }
0x1476   :  { %5534 = vmatmul.mubr.msk.bf16.vlgmr.msra.gmra.mxu1 %vm134_vm2, %v2981_v50 }
0x1477   :  { %5544 = vmatpush3.bf16.xpose.msra.mxu1 %v3101_v18  ;;  %5545 = vmatprep.mubr.msk.bf16.mxu1 %vm5958_vm0, %v5957_v0 }
0x1478   :  { %5555 = vmatprep.subr.bf16.mxu1 %v5957_v0 }
0x147e   :  { %5546 = vmatmul.mubr.msk.bf16.vlgmr.msra.gmra.mxu1 %vm134_vm2, %v3094_v1 }
0x147f   :  { %5556 = vmatpush3.bf16.xpose.msra.mxu1 %v3217_v6  ;;  %5557 = vmatprep.mubr.msk.bf16.mxu1 %vm5958_vm0, %v5957_v0 }
0x1480   :  { %5567 = vmatprep.subr.bf16.mxu1 %v5957_v0 }
0x1486   :  { %5558 = vmatmul.mubr.msk.bf16.vlgmr.msra.gmra.mxu1 %vm134_vm2, %v3210_v8 }
0x1487   :  { %5568 = vmatpush3.bf16.xpose.msra.mxu1 %v3333_v9  ;;  %5569 = vmatprep.mubr.msk.bf16.mxu1 %vm5958_vm0, %v5957_v0 }
0x1488   :  { %5579 = vmatprep.subr.bf16.mxu1 %v5957_v0 }
0x148e   :  { %5570 = vmatmul.mubr.msk.bf16.vlgmr.msra.gmra.mxu1 %vm134_vm2, %v3326_v10 }
0x148f   :  { %5583 = vmatprep.mubr.msk.bf16.mxu1 %vm5958_vm0, %v5957_v0 }
0x1516   :  { %v2625_v11 = vpop.f32.mrf.mxu1 }
0x1517   :  { %2631 = vst.msk [vmem:[#allocation2] sm:$0xff] %vm134_vm2, %v2625_v11 }
0x1518   :  { %v5493_v27 = vpop.f32.mrf.mxu1 }
0x151a   :  { %v2628_v12 = vpop.f32.mrf.mxu1 }
0x151c   :  { %v5494_v13 = vpop.f32.mrf.mxu1 }
0x151e   :  { %v2677_v14 = vpop.f32.mrf.mxu1 }
0x151f   :  { %v2683_v19 = vsel %vm6147_vm3, -3.5355338e+09, %v2677_v14 }
0x1520   :  { %v2684_v20 = vsel %vm134_vm2, %v2683_v19, -inf  ;;  %v5499_v23 = vpop.f32.mrf.mxu1 }
0x1521   :  { %2685 = vmax.xlane.f32.xlu1 %v2684_v20 }
0x1522   :  { %v2680_v24 = vpop.f32.mrf.mxu1 }
0x1524   :  { %v5500_v17 = vpop.f32.mrf.mxu1 }
0x1526   :  { %v2793_v25 = vpop.f32.mrf.mxu1 }
0x1527   :  { %v2799_v26 = vsel %vm6147_vm3, -3.5355338e+09, %v2793_v25 }
0x1528   :  { %v2800_v28 = vsel %vm134_vm2, %v2799_v26, -inf  ;;  %v5511_v29 = vpop.f32.mrf.mxu1 }
0x1529   :  { %2801 = vmax.xlane.f32.xlu0 %v2800_v28 }
0x152a   :  { %v2796_v30 = vpop.f32.mrf.mxu1 }
0x152c   :  { %v5512_v33 = vpop.f32.mrf.mxu1 }
0x152e   :  { %v2909_v34 = vpop.f32.mrf.mxu1 }
0x152f   :  { %v2915_v35 = vsel %vm6147_vm3, -3.5355338e+09, %v2909_v34 }
0x1530   :  { %v2916_v37 = vsel %vm134_vm2, %v2915_v35, -inf  ;;  %v5523_v38 = vpop.f32.mrf.mxu1 }
0x1531   :  { %2917 = vmax.xlane.f32.xlu0 %v2916_v37 }
0x1532   :  { %v2912_v39 = vpop.f32.mrf.mxu1 }
0x1534   :  { %v5524_v40 = vpop.f32.mrf.mxu1 }
0x1536   :  { %v3025_v32 = vpop.f32.mrf.mxu1 }
0x1537   :  { %v3031_v41 = vsel %vm6147_vm3, -3.5355338e+09, %v3025_v32 }
0x1538   :  { %v3032_v42 = vsel %vm134_vm2, %v3031_v41, -inf  ;;  %v5535_v43 = vpop.f32.mrf.mxu1 }
0x1539   :  { %3033 = vmax.xlane.f32.xlu1 %v3032_v42 }
0x153a   :  { %v3028_v45 = vpop.f32.mrf.mxu1 }
0x153c   :  { %v5536_v47 = vpop.f32.mrf.mxu1 }
0x153e   :  { %v3137_v46 = vpop.f32.mrf.mxu1 }
0x153f   :  { %v3143_v48 = vsel %vm6147_vm3, -3.5355338e+09, %v3137_v46 }
0x1540   :  { %v3144_v49 = vsel %vm134_vm2, %v3143_v48, -inf  ;;  %v5547_v50 = vpop.f32.mrf.mxu1 }
0x1541   :  { %3145 = vmax.xlane.f32.xlu0 %v3144_v49 }
0x1542   :  { %v3140_v51 = vpop.f32.mrf.mxu1 }
0x1544   :  { %v5548_v52 = vpop.f32.mrf.mxu1 }
0x1546   :  { %v3253_v53 = vpop.f32.mrf.mxu1 }
0x1547   :  { %v3259_v54 = vsel %vm6147_vm3, -3.5355338e+09, %v3253_v53 }
0x1548   :  { %v3260_v3 = vsel %vm134_vm2, %v3259_v54, -inf  ;;  %v5559_v55 = vpop.f32.mrf.mxu1 }
0x1549   :  { %3261 = vmax.xlane.f32.xlu1 %v3260_v3 }
0x154a   :  { %v3256_v56 = vpop.f32.mrf.mxu1 }
0x154c   :  { %v5560_v4 = vpop.f32.mrf.mxu1 }
0x154e   :  { %v3369_v57 = vpop.f32.mrf.mxu1 }
0x154f   :  { %v3375_v58 = vsel %vm6147_vm3, -3.5355338e+09, %v3369_v57 }
0x1550   :  { %v3376_v59 = vsel %vm134_vm2, %v3375_v58, -inf  ;;  %v5571_v60 = vpop.f32.mrf.mxu1 }
0x1551   :  { %3377 = vmax.xlane.f32.xlu0 %v3376_v59 }
0x1552   :  { %v3372_v61 = vpop.f32.mrf.mxu1 }
0x1554   :  { %v5572_v62 = vpop.f32.mrf.mxu1 }
0x155a   :  { %2696 = vrot.lane.b32.xlu1 %v6613_v31, %s7138_s22 }
0x1567   :  { %2812 = vrot.lane.b32.xlu0 %v6613_v31, %s7139_s20 }
0x15aa   :  { %v2686_v63 = vpop.xlane.xlu1 %2685 }
0x15ab   :  { %v2687_v16 = vsub.f32 %v2683_v19, %v2686_v63 }
0x15ad   :  { %v2688_v15 = vmul.f32 1.442695, %v2687_v16 }
0x15af   :  { %5889 = vpow2.f32 %v2688_v15 }
0x15b2   :  { %v2802_v2 = vpop.xlane.xlu0 %2801 }
0x15b3   :  { %v2803_v18 = vsub.f32 %v2799_v26, %v2802_v2 }
0x15b5   :  { %v2804_v44 = vmul.f32 1.442695, %v2803_v18 }
0x15b7   :  { %5891 = vpow2.f32 %v2804_v44 }
0x15ba   :  { %v2918_v5 = vpop.xlane.xlu0 %2917 }
0x15bb   :  { %v2919_v1 = vsub.f32 %v2915_v35, %v2918_v5 }
0x15bc   :  { %v5890_v6 = vpop.eup %5889 }
0x15bd   :  { %v2920_v7 = vmul.f32 1.442695, %v2919_v1  ;;  %v2690_v8 = vsel %vm134_vm2, %v5890_v6, 0.0 }
0x15be   :  { %2691 = vadd.xlane.f32.xlu1 %v2690_v8 }
0x15bf   :  { %5893 = vpow2.f32 %v2920_v7 }
0x15c2   :  { %v3034_v12 = vpop.xlane.xlu1 %3033 }
0x15c3   :  { %v3035_v20 = vsub.f32 %v3031_v41, %v3034_v12 }
0x15c4   :  { %v5892_v9 = vpop.eup %5891 }
0x15c5   :  { %v2806_v10 = vsel %vm134_vm2, %v5892_v9, 0.0  ;;  %v3036_v24 = vmul.f32 1.442695, %v3035_v20 }
0x15c6   :  { %2807 = vadd.xlane.f32.xlu0 %v2806_v10 }
0x15c7   :  { %5895 = vpow2.f32 %v3036_v24 }
0x15ca   :  { %v3146_v23 = vpop.xlane.xlu0 %3145 }
0x15cb   :  { %v3147_v17 = vsub.f32 %v3143_v48, %v3146_v23 }
0x15cc   :  { %v6719_v11 = vpop.eup %5893 }
0x15cd   :  { %v2922_v27 = vsel %vm134_vm2, %v6719_v11, 0.0  ;;  %v3148_v28 = vmul.f32 1.442695, %v3147_v17 }
0x15ce   :  { %2923 = vadd.xlane.f32.xlu1 %v2922_v27 }
0x15cf   :  { %5897 = vpow2.f32 %v3148_v28 }
0x15d2   :  { %v3262_v13 = vpop.xlane.xlu1 %3261 }
0x15d3   :  { %v3263_v26 = vsub.f32 %v3259_v54, %v3262_v13  ;;  %v5955_v13 = vld [vmem:[%s7108_s1] sm:$0xff]  }
0x15d4   :  { %v5896_v34 = vpop.eup %5895 }
0x15d5   :  { %v3264_v30 = vmul.f32 1.442695, %v3263_v26 }
0x15d6   :  { %v2697_v14 = vpop.permute.xlu1 %2696 }
0x15d7   :  { %v2702_v19 = vsel %vm199_vm4, %v2697_v14, 0  ;;  %5899 = vpow2.f32 %v3264_v30 }
0x15d8   :  { %5502 = vmatpush3.bf16.msra.mxu0 %v2702_v19 }
0x15d9   :  { %5513 = vmatprep.subr.bf16.mxu0 %v5957_v0 }
0x15da   :  { %v3378_v25 = vpop.xlane.xlu0 %3377 }
0x15db   :  { %v3379_v29 = vsub.f32 %v3375_v58, %v3378_v25 }
0x15dc   :  { %2928 = vrot.lane.b32.xlu0 %v6613_v31, %s7140_s17  ;;  %v3038_v31 = vsel %vm134_vm2, %v5896_v34, 0.0  ;;  %v6730_v35 = vpop.eup %5897 }
0x15dd   :  { %v3380_v33 = vmul.f32 1.442695, %v3379_v29  ;;  %v3150_v38 = vsel %vm134_vm2, %v6730_v35, 0.0 }
0x15de   :  { %v2813_v42 = vpop.permute.xlu0 %2812 }
0x15df   :  { %3044 = vrot.lane.b32.xlu1 %v6625_v36, %s7137_s3  ;;  %5901 = vpow2.f32 %v3380_v33  ;;  %v2818_v49 = vsel %vm199_vm4, %v2813_v42, 0 }
0x15e4   :  { %v6732_v37 = vpop.eup %5899 }
0x15e5   :  { %v3266_v40 = vsel %vm134_vm2, %v6732_v37, 0.0 }
0x15ec   :  { %v6736_v39 = vpop.eup %5901 }
0x15ed   :  { %v3382_v32 = vsel %vm134_vm2, %v6736_v39, 0.0 }
0x15fb   :  { %3039 = vadd.xlane.f32.xlu0 %v3038_v31 }
0x15ff   :  { %3151 = vadd.xlane.f32.xlu0 %v3150_v38 }
0x1603   :  { %3267 = vadd.xlane.f32.xlu1 %v3266_v40  ;;  %3383 = vadd.xlane.f32.xlu0 %v3382_v32 }
0x1614   :  { %3272 = vrot.lane.b32.xlu1 %v6625_v36, %s7139_s20 }
0x1618   :  { %3388 = vrot.lane.b32.xlu1 %v6625_v36, %s7140_s17 }
0x1619   :  { %3156 = vrot.lane.b32.xlu0 %v6625_v36, %s7138_s22 }
0x1647   :  { %v2692_v41 = vpop.xlane.xlu1 %2691 }
0x1648   :  { %5903 = vrcp.f32 %v2692_v41 }
0x164f   :  { %v2808_v43 = vpop.xlane.xlu0 %2807 }
0x1650   :  { %5905 = vrcp.f32 %v2808_v43 }
0x1653   :  { %v2929_v51 = vpop.permute.xlu0 %2928 }
0x1654   :  { %v2934_v53 = vsel %vm199_vm4, %v2929_v51, 0 }
0x1655   :  { %v5904_v45 = vpop.eup %5903 }
0x1656   :  { %v2694_v47 = vmul.f32 %v5904_v45, %v5890_v6 }
0x1657   :  { %v2924_v46 = vpop.xlane.xlu1 %2923 }
0x1658   :  { %5907 = vrcp.f32 %v2924_v46  ;;  %v2695_v48 = vpack.c.bf16 %v2694_v47, %v2694_v47 }
0x165a   :  { %5504 = vmatmul.mubr.msk.bf16.vlgmr.msra.gmra.mxu0 %vm134_vm2, %v2695_v48 }
0x165b   :  { %5514 = vmatpush3.bf16.msra.mxu0 %v2818_v49  ;;  %5515 = vmatprep.mubr.msk.bf16.mxu0 %vm5958_vm0, %v5957_v0  ;;  %v3045_v55 = vpop.permute.xlu1 %3044 }
0x165c   :  { %5525 = vmatprep.subr.bf16.mxu0 %v5957_v0  ;;  %v3050_v4 = vsel %vm199_vm4, %v3045_v55, 0 }
0x165d   :  { %v5906_v36 = vpop.eup %5905 }
0x165e   :  { %v2810_v50 = vmul.f32 %v5906_v36, %v5892_v9 }
0x1660   :  { %v2811_v52 = vpack.c.bf16 %v2810_v50, %v2810_v50 }
0x1662   :  { %5516 = vmatmul.mubr.msk.bf16.vlgmr.msra.gmra.mxu0 %vm134_vm2, %v2811_v52 }
0x1663   :  { %5526 = vmatpush3.bf16.msra.mxu0 %v2934_v53  ;;  %5527 = vmatprep.mubr.msk.bf16.mxu0 %vm5958_vm0, %v5957_v0 }
0x1664   :  { %5537 = vmatprep.subr.bf16.mxu0 %v5957_v0 }
0x1665   :  { %v5908_v54 = vpop.eup %5907 }
0x1666   :  { %v2926_v3 = vmul.f32 %v5908_v54, %v6719_v11 }
0x1668   :  { %v2927_v56 = vpack.c.bf16 %v2926_v3, %v2926_v3 }
0x166a   :  { %5528 = vmatmul.mubr.msk.bf16.vlgmr.msra.gmra.mxu0 %vm134_vm2, %v2927_v56 }
0x166b   :  { %5538 = vmatpush3.bf16.msra.mxu0 %v3050_v4  ;;  %5539 = vmatprep.mubr.msk.bf16.mxu0 %vm5958_vm0, %v5957_v0 }
0x166c   :  { %5549 = vmatprep.subr.bf16.mxu0 %v5957_v0 }
0x1684   :  { %v3040_v57 = vpop.xlane.xlu0 %3039 }
0x1685   :  { %5909 = vrcp.f32 %v3040_v57 }
0x1688   :  { %v3152_v58 = vpop.xlane.xlu0 %3151 }
0x1689   :  { %5911 = vrcp.f32 %v3152_v58 }
0x168c   :  { %v3268_v59 = vpop.xlane.xlu1 %3267  ;;  %v3384_v60 = vpop.xlane.xlu0 %3383 }
0x168d   :  { %5913 = vrcp.f32 %v3268_v59 }
0x168e   :  { %5915 = vrcp.f32 %v3384_v60 }
0x1690   :  { %v3157_v63 = vpop.permute.xlu0 %3156  ;;  %v3273_v44 = vpop.permute.xlu1 %3272 }
0x1691   :  { %v3162_v2 = vsel %vm199_vm4, %v3157_v63, 0  ;;  %v3278_v6 = vsel %vm199_vm4, %v3273_v44, 0 }
0x1692   :  { %v5910_v61 = vpop.eup %5909 }
0x1693   :  { %v3042_v62 = vmul.f32 %v5910_v61, %v5896_v34 }
0x1694   :  { %v3389_v8 = vpop.permute.xlu1 %3388 }
0x1695   :  { %v3043_v16 = vpack.c.bf16 %v3042_v62, %v3042_v62  ;;  %v3394_v11 = vsel %vm199_vm4, %v3389_v8, 0  ;;  %v5799_v8 = vld [vmem:[%s7107_s6 + $0x18] sm:$0xff]  }
0x1696   :  { %v5912_v15 = vpop.eup %5911 }
0x1697   :  { %5540 = vmatmul.mubr.msk.bf16.vlgmr.msra.gmra.mxu0 %vm134_vm2, %v3043_v16  ;;  %v3154_v18 = vmul.f32 %v5912_v15, %v6730_v35 }
0x1698   :  { %5550 = vmatpush3.bf16.msra.mxu0 %v3162_v2  ;;  %5551 = vmatprep.mubr.msk.bf16.mxu0 %vm5958_vm0, %v5957_v0 }
0x1699   :  { %5561 = vmatprep.subr.bf16.mxu0 %v5957_v0  ;;  %v3155_v5 = vpack.c.bf16 %v3154_v18, %v3154_v18 }
0x169a   :  { %v5914_v1 = vpop.eup %5913 }
0x169b   :  { %v3270_v7 = vmul.f32 %v5914_v1, %v6732_v37  ;;  %v5916_v10 = vpop.eup %5915 }
0x169c   :  { %v3386_v27 = vmul.f32 %v5916_v10, %v6736_v39  ;;  %v5801_v10 = vld [vmem:[%s7109_s4 + $0x18] sm:$0xff]  }
0x169d   :  { %v3271_v9 = vpack.c.bf16 %v3270_v7, %v3270_v7  ;;  %5580 = vmatpush3.bf16.msra.mxu1 %v5801_v10 }
0x169e   :  { %v3387_v12 = vpack.c.bf16 %v3386_v27, %v3386_v27  ;;  %5581 = vmatprep.subr.bf16.mxu1 %v5957_v0 }
0x169f   :  { %5552 = vmatmul.mubr.msk.bf16.vlgmr.msra.gmra.mxu0 %vm134_vm2, %v3155_v5 }
0x16a0   :  { %5562 = vmatpush3.bf16.msra.mxu0 %v3278_v6  ;;  %5563 = vmatprep.mubr.msk.bf16.mxu0 %vm5958_vm0, %v5957_v0 }
0x16a1   :  { %5573 = vmatprep.subr.bf16.mxu0 %v5957_v0 }
0x16a7   :  { %5564 = vmatmul.mubr.msk.bf16.vlgmr.msra.gmra.mxu0 %vm134_vm2, %v3271_v9  ;;  %v5800_v9 = vld [vmem:[%s7107_s6 + $0x10] sm:$0xff]  }
0x16a8   :  { %5574 = vmatpush3.bf16.msra.mxu0 %v3394_v11  ;;  %5575 = vmatprep.mubr.msk.bf16.mxu0 %vm5958_vm0, %v5957_v0  ;;  %v5956_v11 = vld [vmem:[%s7108_s1 + $0x8] ss:$0 sps:$4 sm:$0xff]  }
0x16a9   :  { %5587 = vmatprep.subr.bf16.mxu0 %v5799_v8 }
0x16af   :  { %5576 = vmatmul.mubr.msk.bf16.vlgmr.msra.gmra.mxu0 %vm134_vm2, %v3387_v12 }
0x16b0   :  { %5591 = vmatprep.mubr.msk.bf16.mxu0 %vm82_vm1, %v5955_v13  ;;  %5588 = vmatpush3.bf16.msra.mxu0 %v5799_v8 }
0x16b1   :  { %5589 = vmatprep.subr.bf16.mxu0 %v5800_v9 }
0x16b4   :  { %5590 = vmatpush3.bf16.msra.mxu0 %v5800_v9 }
0x16b5   :  { %5601 = vmatprep.subr.bf16.mxu0 %v5957_v0 }
0x16b7   :  { %5592 = vmatmul.mubr.msk.bf16.vlgmr.msra.gmra.mxu0 %vm82_vm1, %v5956_v11 }
0x16b8   :  { %5603 = vmatprep.mubr.msk.bf16.mxu0 %vm5958_vm0, %v5957_v0 }
0x171a   :  { %v2738_v14 = vpop.f32.mrf.mxu0 }
0x171b   :  { %2745 = vrot.lane.b32.xlu1 %v2738_v14, %s7141_s29 }
0x171c   :  { %v5505_v19 = vpop.f32.mrf.mxu0 }
0x171d   :  { %v5802_v19 = vld [vmem:[%s7109_s4 + $0x10] sm:$0xff]  }
0x171e   :  { %v2741_v20 = vpop.f32.mrf.mxu0  ;;  %5582 = vmatpush3.bf16.msra.mxu1 %v5802_v19 }
0x171f   :  { %5595 = vmatprep.subr.bf16.mxu1 %v5957_v0 }
0x1720   :  { %v5506_v23 = vpop.f32.mrf.mxu0 }
0x1722   :  { %v2854_v24 = vpop.f32.mrf.mxu0 }
0x1723   :  { %2861 = vrot.lane.b32.xlu0 %v2854_v24, %s7135_s30 }
0x1724   :  { %v5517_v17 = vpop.f32.mrf.mxu0 }
0x1726   :  { %v2857_v25 = vpop.f32.mrf.mxu0 }
0x1728   :  { %v5518_v26 = vpop.f32.mrf.mxu0 }
0x172a   :  { %v2970_v28 = vpop.f32.mrf.mxu0 }
0x172b   :  { %2977 = vrot.lane.b32.xlu0 %v2970_v28, %s7136_s15 }
0x172c   :  { %v5529_v29 = vpop.f32.mrf.mxu0 }
0x172e   :  { %v2973_v30 = vpop.f32.mrf.mxu0 }
0x1730   :  { %v5530_v33 = vpop.f32.mrf.mxu0 }
0x1757   :  { %v3086_v34 = vpop.f32.mrf.mxu0 }
0x1758   :  { %3092 = vst.msk [vmem:[#allocation2 + $0x8] sm:$0xff] %vm134_vm2, %v3086_v34  ;;  %v4996_v34 = vld [vmem:[%s7110_s7 + $0x1] ss:$0 sm:$0xff] }
0x1759   :  { %v5541_v31 = vpop.f32.mrf.mxu0 }
0x175b   :  { %v3089_v35 = vpop.f32.mrf.mxu0 }
0x175d   :  { %v5542_v37 = vpop.f32.mrf.mxu0 }
0x175f   :  { %v3198_v38 = vpop.f32.mrf.mxu0 }
0x1760   :  { %3205 = vrot.lane.b32.xlu1 %v3198_v38, %s7141_s29 }
0x1761   :  { %v5553_v39 = vpop.f32.mrf.mxu0 }
0x1763   :  { %v3201_v40 = vpop.f32.mrf.mxu0 }
0x1765   :  { %v5554_v32 = vpop.f32.mrf.mxu0 }
0x1767   :  { %v3314_v41 = vpop.f32.mrf.mxu0 }
0x1768   :  { %3321 = vrot.lane.b32.xlu1 %v3314_v41, %s7135_s30 }
0x1769   :  { %v5565_v42 = vpop.f32.mrf.mxu0 }
0x176b   :  { %v3317_v43 = vpop.f32.mrf.mxu0 }
0x176d   :  { %v5566_v45 = vpop.f32.mrf.mxu0 }
0x176f   :  { %v3430_v47 = vpop.f32.mrf.mxu0 }
0x1770   :  { %3437 = vrot.lane.b32.xlu1 %v3430_v47, %s7136_s15 }
0x1771   :  { %v5577_v46 = vpop.f32.mrf.mxu0 }
0x1772   :  { %v4987_v46 = vld [vmem:[%s7111_s5 + $0x1] ss:$0 sm:$0xff] }
0x1773   :  { %v3433_v48 = vpop.f32.mrf.mxu0 }
0x1775   :  { %v5578_v49 = vpop.f32.mrf.mxu0 }
0x1777   :  { %v5593_v33 = vpop.f32.mrf.mxu0 }
0x1778   :  { %v3628_v40 = vadd.f32 %v5593_v33, %v4996_v34 }
0x1779   :  { %v3619_v31 = vpop.f32.mrf.mxu0 }
0x177a   :  { %v3620_v37 = vadd.f32 %v4996_v34, %v3619_v31  ;;  %v3634_v42 = vpack.c.bf16 %v3628_v40, %v3628_v40 }
0x177b   :  { %v5594_v35 = vpop.f32.mrf.mxu0 }
0x177c   :  { %v4092_v43 = vrot.slane %v3634_v42, 6 }
0x177d   :  { %v3622_v38 = vpop.f32.mrf.mxu0 }
0x177e   :  { %v3623_v39 = vadd.f32 %v4996_v34, %v3622_v38 }
0x1780   :  { %v6838_v32 = vpack.c.bf16 %v3623_v39, %v3620_v37 }
0x1782   :  { %v3639_v41 = vsel %vm134_vm2, %v6838_v32, 0  ;;  %v4091_v45 = vrot.slane %v6838_v32, 6 }
0x1784   :  { %v6851_v47 = vsel %vm1718_vm8, %v4091_v45, %v4092_v43 }
0x178d   :  { %v2746_v36 = vpop.permute.xlu1 %2745 }
0x178e   :  { %2748 = vst.msk [vmem:[#allocation2] sm:$0xff] %vm360_vm5, %v2746_v36 }
0x1795   :  { %v2862_v50 = vpop.permute.xlu0 %2861 }
0x1796   :  { %2864 = vst.msk [vmem:[#allocation2] sm:$0xff] %vm477_vm6, %v2862_v50 }
0x179d   :  { %v2978_v51 = vpop.permute.xlu0 %2977 }
0x179e   :  { %2980 = vst.msk [vmem:[#allocation2] sm:$0xff] %vm594_vm7, %v2978_v51 }
0x17a5   :  { %v3441_v3 = vld [vmem:[#allocation2] sm:$0xff] }
0x17a6   :  { %v3443_v55 = vadd.f32 %v3441_v3, %v6601_v21 }
0x17a8   :  { %v3445_v57 = vsel %vm82_vm1, %v3443_v55, 0.0 }
0x17d2   :  { %v3206_v52 = vpop.permute.xlu1 %3205 }
0x17d3   :  { %3208 = vst.msk [vmem:[#allocation2 + $0x8] sm:$0xff] %vm360_vm5, %v3206_v52 }
0x17da   :  { %v3322_v53 = vpop.permute.xlu1 %3321 }
0x17db   :  { %3324 = vst.msk [vmem:[#allocation2 + $0x8] sm:$0xff] %vm477_vm6, %v3322_v53 }
0x17e2   :  { %v3438_v54 = vpop.permute.xlu1 %3437 }
0x17e3   :  { %3440 = vst.msk [vmem:[#allocation2 + $0x8] sm:$0xff] %vm594_vm7, %v3438_v54 }
0x17ea   :  { %v3442_v56 = vld [vmem:[#allocation2 + $0x8] sm:$0xff] }
0x17eb   :  { %v3444_v4 = vadd.f32 %v3442_v56, %v6603_v22 }
0x17ed   :  { %v3446_v58 = vsel %vm82_vm1, %v3444_v4, 0.0 }
0x17ee   :  { %v3447_v59 = vadd.f32 %v3446_v58, %v3445_v57 }
0x17f0   :  { %3448 = vadd.xlane.f32.xlu0 %v3447_v59 }
0x1806   :  { %3746 = vrot.lane.b32.xlu0 %v6838_v32, %s5960_s23 }
0x180a   :  { %3861 = vrot.lane.b32.xlu0 %v6838_v32, %s5963_s26 }
0x180e   :  { %3976 = vrot.lane.b32.xlu0 %v6838_v32, %s5965_s28 }
0x1812   :  { %4203 = vrot.lane.b32.xlu0 %v6851_v47, %s5960_s23 }
0x1816   :  { %4318 = vrot.lane.b32.xlu0 %v6851_v47, %s5963_s26 }
0x181a   :  { %4433 = vrot.lane.b32.xlu0 %v6851_v47, %s5965_s28 }
0x1879   :  { %v3449_v60 = vpop.xlane.xlu0 %3448 }
0x187a   :  { %v3450_v61 = vrot.slane %v3449_v60, 4 }
0x187c   :  { %v3451_v62 = vadd.f32 %v3450_v61, %v3449_v60 }
0x187d   :  { %v3747_v3 = vpop.permute.xlu0 %3746 }
0x187e   :  { %v3452_v63 = vrot.slane %v3451_v62, 2  ;;  %v3752_v56 = vsel %vm134_vm2, %v3747_v3, 0 }
0x1880   :  { %v3453_v16 = vadd.f32 %v3452_v63, %v3451_v62 }
0x1881   :  { %v3862_v57 = vpop.permute.xlu0 %3861 }
0x1882   :  { %v3454_v15 = vrot.slane %v3453_v16, 1  ;;  %v3867_v59 = vsel %vm134_vm2, %v3862_v57, 0 }
0x1884   :  { %v3455_v2 = vadd.f32 %v3454_v15, %v3453_v16  ;;  %v4098_v16 = vsel %vm134_vm2, %v6851_v47, 0 }
0x1885   :  { %v3977_v60 = vpop.permute.xlu0 %3976 }
0x1886   :  { %5745 = vpush %v3455_v2  ;;  %v3982_v62 = vsel %vm134_vm2, %v3977_v60, 0 }
0x1889   :  { %v4204_v15 = vpop.permute.xlu0 %4203 }
0x188a   :  { %v4209_v2 = vsel %vm134_vm2, %v4204_v15, 0 }
0x18b7   :  { %s5746_s18 = spop %5745 }
0x18b8   :  { %s3459_s2 = smul.f32 0.001953125, %s5746_s18 }
0x18ba   :  { %v3460_v21 = vstv %s3459_s2 }
0x18bb   :  { %v3461_v18 = vsub.f32 %v3443_v55, %v3460_v21  ;;  %v3462_v44 = vsub.f32 %v3444_v4, %v3460_v21  ;;  %v4319_v21 = vpop.permute.xlu0 %4318 }
0x18bd   :  { %v3463_v22 = vmul.f32 %v3461_v18, %v3461_v18  ;;  %v3464_v5 = vmul.f32 %v3462_v44, %v3462_v44 }
0x18bf   :  { %v3465_v1 = vsel %vm82_vm1, %v3463_v22, 0.0  ;;  %v3466_v6 = vsel %vm82_vm1, %v3464_v5, 0.0  ;;  %v4434_v22 = vpop.permute.xlu0 %4433 }
0x18c0   :  { %v3467_v7 = vadd.f32 %v3466_v6, %v3465_v1  ;;  %v4439_v1 = vsel %vm134_vm2, %v4434_v22, 0 }
0x18c2   :  { %3468 = vadd.xlane.f32.xlu1 %v3467_v7 }
0x194b   :  { %v3469_v27 = vpop.xlane.xlu1 %3468 }
0x194c   :  { %v3470_v12 = vrot.slane %v3469_v27, 4 }
0x194e   :  { %v3471_v13 = vadd.f32 %v3470_v12, %v3469_v27 }
0x1950   :  { %v3472_v14 = vrot.slane %v3471_v13, 2 }
0x1952   :  { %v3473_v20 = vadd.f32 %v3472_v14, %v3471_v13 }
0x1954   :  { %v3474_v23 = vrot.slane %v3473_v20, 1 }
0x1956   :  { %v3475_v24 = vadd.f32 %v3474_v23, %v3473_v20 }
0x1958   :  { %5747 = vpush %v3475_v24 }
0x1989   :  { %s5748_s1 = spop %5747 }
0x198a   :  { %s3479_s19 = smul.f32 0.001953125, %s5748_s1 }
0x198c   :  { %s3480_s3 = sadd.f32 1e-05, %s3479_s19 }
0x198e   :  { %v3481_v17 = vstv %s3480_s3 }
0x198f   :  { %5917 = vrsqrt.f32 %v3481_v17 }
0x199c   :  { %v5918_v25 = vpop.eup %5917 }
0x199d   :  { %5749 = vpush %v5918_v25 }
0x19ce   :  { %s5750_s22 = spop %5749 }
0x19cf   :  { %v3484_v26 = vstv %s5750_s22 }
0x19d0   :  { %v6826_v28 = vmul.f32 %v3484_v26, %v3461_v18  ;;  %v6828_v29 = vmul.f32 %v3484_v26, %v3462_v44  ;;  %v4324_v44 = vsel %vm134_vm2, %v4319_v21, 0 }
0x19d2   :  { %v3487_v30 = vpack.c.bf16 %v6828_v29, %v6826_v28 }
0x19d4   :  { %5584 = vmatmul.mubr.msk.bf16.vlgmr.msra.gmra.mxu1 %vm82_vm1, %v3487_v30 }
0x19d5   :  { %5597 = vmatprep.mubr.msk.bf16.mxu1 %vm5958_vm0, %v5957_v0  ;;  %5596 = vmatpush3.bf16.xpose.msra.mxu1 %v3639_v41 }
0x19d6   :  { %5607 = vmatprep.subr.bf16.mxu1 %v5957_v0 }
0x1a94   :  { %v3550_v48 = vpop.f32.mrf.mxu1 }
0x1a95   :  { %v3551_v36 = vadd.f32 %v4987_v46, %v3550_v48 }
0x1a96   :  { %v5585_v49 = vpop.f32.mrf.mxu1 }
0x1a97   :  { %v3557_v53 = vmul.f32 0.35355338, %v3551_v36 }
0x1a98   :  { %v3553_v50 = vpop.f32.mrf.mxu1 }
0x1a99   :  { %v3554_v51 = vadd.f32 %v4987_v46, %v3553_v50 }
0x1a9a   :  { %v5586_v52 = vpop.f32.mrf.mxu1 }
0x1a9b   :  { %v3558_v54 = vmul.f32 0.35355338, %v3554_v51 }
0x1a9d   :  { %v3559_v55 = vpack.c.bf16 %v3558_v54, %v3557_v53 }
0x1a9f   :  { %3744 = vrot.lane.b32.xlu1 %v3559_v55, %s5960_s23  ;;  %5598 = vmatmul.mubr.msk.bf16.vlgmr.msra.gmra.mxu1 %vm134_vm2, %v3559_v55  ;;  %v4089_v4 = vrot.slane %v3559_v55, 4 }
0x1aa0   :  { %5608 = vmatpush3.bf16.xpose.msra.mxu1 %v3752_v56  ;;  %5609 = vmatprep.mubr.msk.bf16.mxu1 %vm5958_vm0, %v5957_v0 }
0x1aa1   :  { %5619 = vmatprep.subr.bf16.mxu1 %v5957_v0 }
0x1aa3   :  { %3859 = vrot.lane.b32.xlu1 %v3559_v55, %s5963_s26 }
0x1aa7   :  { %3974 = vrot.lane.b32.xlu1 %v3559_v55, %s5965_s28 }
0x1aab   :  { %4201 = vrot.lane.b32.xlu1 %v4089_v4, %s5960_s23 }
0x1aaf   :  { %4316 = vrot.lane.b32.xlu1 %v4089_v4, %s5963_s26 }
0x1ab3   :  { %4431 = vrot.lane.b32.xlu1 %v4089_v4, %s5965_s28 }
0x1b11   :  { %v3745_v58 = vpop.permute.xlu1 %3744 }
0x1b12   :  { %5610 = vmatmul.mubr.msk.bf16.vlgmr.msra.gmra.mxu1 %vm134_vm2, %v3745_v58 }
0x1b13   :  { %5620 = vmatpush3.bf16.xpose.msra.mxu1 %v3867_v59  ;;  %5621 = vmatprep.mubr.msk.bf16.mxu1 %vm5958_vm0, %v5957_v0 }
0x1b14   :  { %5631 = vmatprep.subr.bf16.mxu1 %v5957_v0 }
0x1b15   :  { %v3860_v61 = vpop.permute.xlu1 %3859 }
0x1b19   :  { %v3975_v63 = vpop.permute.xlu1 %3974 }
0x1b1a   :  { %5622 = vmatmul.mubr.msk.bf16.vlgmr.msra.gmra.mxu1 %vm134_vm2, %v3860_v61 }
0x1b1b   :  { %5632 = vmatpush3.bf16.xpose.msra.mxu1 %v3982_v62  ;;  %5633 = vmatprep.mubr.msk.bf16.mxu1 %vm5958_vm0, %v5957_v0 }
0x1b1c   :  { %5643 = vmatprep.subr.bf16.mxu1 %v5957_v0 }
0x1b1d   :  { %v4202_v18 = vpop.permute.xlu1 %4201 }
0x1b21   :  { %v4317_v5 = vpop.permute.xlu1 %4316 }
0x1b22   :  { %5634 = vmatmul.mubr.msk.bf16.vlgmr.msra.gmra.mxu1 %vm134_vm2, %v3975_v63 }
0x1b23   :  { %5644 = vmatpush3.bf16.xpose.msra.mxu1 %v4098_v16  ;;  %5645 = vmatprep.mubr.msk.bf16.mxu1 %vm5958_vm0, %v5957_v0 }
0x1b24   :  { %5655 = vmatprep.subr.bf16.mxu1 %v5957_v0 }
0x1b25   :  { %v4432_v6 = vpop.permute.xlu1 %4431 }
0x1b2a   :  { %5646 = vmatmul.mubr.msk.bf16.vlgmr.msra.gmra.mxu1 %vm134_vm2, %v4089_v4 }
0x1b2b   :  { %5656 = vmatpush3.bf16.xpose.msra.mxu1 %v4209_v2  ;;  %5657 = vmatprep.mubr.msk.bf16.mxu1 %vm5958_vm0, %v5957_v0 }
0x1b2c   :  { %5667 = vmatprep.subr.bf16.mxu1 %v5957_v0 }
0x1b32   :  { %5658 = vmatmul.mubr.msk.bf16.vlgmr.msra.gmra.mxu1 %vm134_vm2, %v4202_v18 }
0x1b33   :  { %5668 = vmatpush3.bf16.xpose.msra.mxu1 %v4324_v44  ;;  %5669 = vmatprep.mubr.msk.bf16.mxu1 %vm5958_vm0, %v5957_v0 }
0x1b34   :  { %5679 = vmatprep.subr.bf16.mxu1 %v5957_v0 }
0x1b3a   :  { %5670 = vmatmul.mubr.msk.bf16.vlgmr.msra.gmra.mxu1 %vm134_vm2, %v4317_v5 }
0x1b3b   :  { %5680 = vmatpush3.bf16.xpose.msra.mxu1 %v4439_v1  ;;  %5681 = vmatprep.mubr.msk.bf16.mxu1 %vm5958_vm0, %v5957_v0 }
0x1b3c   :  { %5691 = vmatprep.subr.bf16.mxu1 %v5957_v0 }
0x1b42   :  { %5682 = vmatmul.mubr.msk.bf16.vlgmr.msra.gmra.mxu1 %vm134_vm2, %v4432_v6 }
0x1b43   :  { %5695 = vmatprep.mubr.msk.bf16.mxu1 %vm5958_vm0, %v5957_v0 }
0x1b5f   :  { %v3675_v7 = vpop.f32.mrf.mxu1 }
0x1b60   :  { %v3681_v8 = vsel %vm1306_vm9, %v3675_v7, -inf }
0x1b61   :  { %3682 = vmax.xlane.f32.xlu0 %v3681_v8  ;;  %v5599_v9 = vpop.f32.mrf.mxu1 }
0x1b63   :  { %v3678_v10 = vpop.f32.mrf.mxu1 }
0x1b65   :  { %v5600_v11 = vpop.f32.mrf.mxu1 }
0x1bd2   :  { %v3788_v27 = vpop.f32.mrf.mxu1 }
0x1bd3   :  { %v3794_v12 = vsel %vm1306_vm9, %v3788_v27, -inf }
0x1bd4   :  { %3795 = vmax.xlane.f32.xlu1 %v3794_v12  ;;  %v5611_v13 = vpop.f32.mrf.mxu1 }
0x1bd6   :  { %v3791_v14 = vpop.f32.mrf.mxu1 }
0x1bd8   :  { %v5612_v19 = vpop.f32.mrf.mxu1 }
0x1bda   :  { %v3903_v20 = vpop.f32.mrf.mxu1 }
0x1bdb   :  { %v3909_v23 = vsel %vm1306_vm9, %v3903_v20, -inf }
0x1bdc   :  { %3910 = vmax.xlane.f32.xlu0 %v3909_v23  ;;  %v5623_v24 = vpop.f32.mrf.mxu1 }
0x1bde   :  { %v3906_v17 = vpop.f32.mrf.mxu1 }
0x1be0   :  { %v5624_v25 = vpop.f32.mrf.mxu1 }
0x1be2   :  { %v6910_v26 = vpop.f32.mrf.mxu1 }
0x1be3   :  { %v4024_v30 = vsel %vm1306_vm9, %v6910_v26, -inf }
0x1be4   :  { %4025 = vmax.xlane.f32.xlu0 %v4024_v30  ;;  %v5635_v33 = vpop.f32.mrf.mxu1 }
0x1be6   :  { %v4021_v34 = vpop.f32.mrf.mxu1 }
0x1be8   :  { %v5636_v31 = vpop.f32.mrf.mxu1 }
0x1bea   :  { %v4134_v35 = vpop.f32.mrf.mxu1  ;;  %v3683_v55 = vpop.xlane.xlu0 %3682 }
0x1beb   :  { %v4140_v37 = vsel %vm1306_vm9, %v4134_v35, -inf  ;;  %v3684_v56 = vsub.f32 %v3675_v7, %v3683_v55 }
0x1bec   :  { %4141 = vmax.xlane.f32.xlu1 %v4140_v37  ;;  %v5647_v38 = vpop.f32.mrf.mxu1 }
0x1bed   :  { %v3685_v4 = vmul.f32 1.442695, %v3684_v56 }
0x1bee   :  { %v4137_v39 = vpop.f32.mrf.mxu1 }
0x1bef   :  { %5919 = vpow2.f32 %v3685_v4 }
0x1bf0   :  { %v5648_v40 = vpop.f32.mrf.mxu1 }
0x1bf2   :  { %v4245_v41 = vpop.f32.mrf.mxu1 }
0x1bf3   :  { %v4251_v42 = vsel %vm1306_vm9, %v4245_v41, -inf }
0x1bf4   :  { %4252 = vmax.xlane.f32.xlu0 %v4251_v42  ;;  %v5659_v43 = vpop.f32.mrf.mxu1 }
0x1bf6   :  { %v4248_v45 = vpop.f32.mrf.mxu1 }
0x1bf8   :  { %v5660_v46 = vpop.f32.mrf.mxu1 }
0x1bfa   :  { %v4360_v48 = vpop.f32.mrf.mxu1 }
0x1bfb   :  { %v4366_v49 = vsel %vm1306_vm9, %v4360_v48, -inf }
0x1bfc   :  { %4367 = vmax.xlane.f32.xlu1 %v4366_v49  ;;  %v5671_v36 = vpop.f32.mrf.mxu1  ;;  %v6925_v58 = vpop.eup %5919 }
0x1bfd   :  { %v3687_v59 = vsel %vm1306_vm9, %v6925_v58, 0.0 }
0x1bfe   :  { %v4363_v50 = vpop.f32.mrf.mxu1 }
0x1c00   :  { %v5672_v51 = vpop.f32.mrf.mxu1 }
0x1c02   :  { %v6917_v52 = vpop.f32.mrf.mxu1 }
0x1c03   :  { %v4481_v57 = vsel %vm1306_vm9, %v6917_v52, -inf }
0x1c04   :  { %v5683_v53 = vpop.f32.mrf.mxu1 }
0x1c06   :  { %v4478_v54 = vpop.f32.mrf.mxu1 }
0x1c08   :  { %v5684_v3 = vpop.f32.mrf.mxu1 }
0x1c0a   :  { %3806 = vrot.lane.b32.xlu0 %v6838_v32, %s5961_s24 }
0x1c0d   :  { %3694 = vrot.lane.b32.xlu1 %v6838_v32, %s5959_s0 }
0x1c29   :  { %4482 = vmax.xlane.f32.xlu0 %v4481_v57 }
0x1c31   :  { %3688 = vadd.xlane.f32.xlu1 %v3687_v59 }
0x1c5d   :  { %v3796_v60 = vpop.xlane.xlu1 %3795 }
0x1c5e   :  { %v3797_v61 = vsub.f32 %v3788_v27, %v3796_v60 }
0x1c60   :  { %v3798_v62 = vmul.f32 1.442695, %v3797_v61 }
0x1c62   :  { %5921 = vpow2.f32 %v3798_v62 }
0x1c65   :  { %v3911_v63 = vpop.xlane.xlu0 %3910 }
0x1c66   :  { %v3912_v16 = vsub.f32 %v3903_v20, %v3911_v63 }
0x1c68   :  { %v3913_v15 = vmul.f32 1.442695, %v3912_v16 }
0x1c6a   :  { %5923 = vpow2.f32 %v3913_v15 }
0x1c6d   :  { %v4026_v6 = vpop.xlane.xlu0 %4025 }
0x1c6e   :  { %v4027_v8 = vsub.f32 %v6910_v26, %v4026_v6 }
0x1c6f   :  { %v6929_v2 = vpop.eup %5921 }
0x1c70   :  { %v3800_v21 = vsel %vm1306_vm9, %v6929_v2, 0.0  ;;  %v4028_v9 = vmul.f32 1.442695, %v4027_v8 }
0x1c71   :  { %3801 = vadd.xlane.f32.xlu0 %v3800_v21 }
0x1c72   :  { %5925 = vpow2.f32 %v4028_v9 }
0x1c75   :  { %v4142_v22 = vpop.xlane.xlu1 %4141 }
0x1c76   :  { %v4143_v10 = vsub.f32 %v4134_v35, %v4142_v22 }
0x1c77   :  { %v6933_v18 = vpop.eup %5923 }
0x1c78   :  { %v3915_v44 = vsel %vm1306_vm9, %v6933_v18, 0.0  ;;  %v4144_v12 = vmul.f32 1.442695, %v4143_v10 }
0x1c79   :  { %3916 = vadd.xlane.f32.xlu1 %v3915_v44 }
0x1c7a   :  { %5927 = vpow2.f32 %v4144_v12 }
0x1c7d   :  { %v4253_v11 = vpop.xlane.xlu0 %4252 }
0x1c7e   :  { %v4254_v27 = vsub.f32 %v4245_v41, %v4253_v11 }
0x1c7f   :  { %v5926_v20 = vpop.eup %5925 }
0x1c80   :  { %v4255_v14 = vmul.f32 1.442695, %v4254_v27 }
0x1c81   :  { %v3807_v33 = vpop.permute.xlu0 %3806 }
0x1c82   :  { %5929 = vpow2.f32 %v4255_v14  ;;  %v3812_v43 = vsel %vm1325_vm10, %v3807_v33, 0 }
0x1c85   :  { %v4368_v5 = vpop.xlane.xlu1 %4367 }
0x1c86   :  { %v4369_v13 = vsub.f32 %v4360_v48, %v4368_v5 }
0x1c87   :  { %3921 = vrot.lane.b32.xlu0 %v6838_v32, %s5962_s25  ;;  %v6945_v23 = vpop.eup %5927 }
0x1c88   :  { %v4370_v19 = vmul.f32 1.442695, %v4369_v13  ;;  %v4146_v17 = vsel %vm1306_vm9, %v6945_v23, 0.0 }
0x1c89   :  { %v3695_v1 = vpop.permute.xlu1 %3694 }
0x1c8a   :  { %v3700_v7 = vsel %vm1325_vm10, %v3695_v1, 0  ;;  %4036 = vrot.lane.b32.xlu1 %v6838_v32, %s5964_s27  ;;  %5931 = vpow2.f32 %v4370_v19  ;;  %v4030_v32 = vsel %vm1306_vm9, %v5926_v20, 0.0 }
0x1c8b   :  { %5602 = vmatpush3.bf16.msra.mxu0 %v3700_v7 }
0x1c8c   :  { %5613 = vmatprep.subr.bf16.mxu0 %v5957_v0 }
0x1c8f   :  { %v6947_v24 = vpop.eup %5929 }
0x1c90   :  { %v4257_v26 = vsel %vm1306_vm9, %v6947_v24, 0.0 }
0x1c97   :  { %v6951_v25 = vpop.eup %5931 }
0x1c98   :  { %v4372_v30 = vsel %vm1306_vm9, %v6951_v25, 0.0 }
0x1ca6   :  { %4031 = vadd.xlane.f32.xlu0 %v4030_v32 }
0x1caa   :  { %4147 = vadd.xlane.f32.xlu0 %v4146_v17 }
0x1cae   :  { %4258 = vadd.xlane.f32.xlu1 %v4257_v26  ;;  %4373 = vadd.xlane.f32.xlu0 %v4372_v30 }
0x1cb2   :  { %v4483_v34 = vpop.xlane.xlu0 %4482 }
0x1cb3   :  { %v4484_v31 = vsub.f32 %v6917_v52, %v4483_v34 }
0x1cb5   :  { %v4485_v35 = vmul.f32 1.442695, %v4484_v31 }
0x1cb7   :  { %5933 = vpow2.f32 %v4485_v35 }
0x1cba   :  { %v3689_v37 = vpop.xlane.xlu1 %3688 }
0x1cbb   :  { %5935 = vrcp.f32 %v3689_v37 }
0x1cbf   :  { %4263 = vrot.lane.b32.xlu1 %v6851_v47, %s5961_s24 }
0x1cc3   :  { %4378 = vrot.lane.b32.xlu1 %v6851_v47, %s5962_s25 }
0x1cc4   :  { %v6962_v38 = vpop.eup %5933 }
0x1cc5   :  { %v4487_v39 = vsel %vm1306_vm9, %v6962_v38, 0.0 }
0x1cc6   :  { %4488 = vadd.xlane.f32.xlu0 %v4487_v39 }
0x1cc7   :  { %4493 = vrot.lane.b32.xlu1 %v6851_v47, %s5964_s27 }
0x1cc8   :  { %v5936_v40 = vpop.eup %5935 }
0x1cc9   :  { %v3691_v41 = vmul.f32 %v5936_v40, %v6925_v58 }
0x1ccb   :  { %v3692_v42 = vpack.c.bf16 %v3691_v41, %v3691_v41 }
0x1ccd   :  { %5604 = vmatmul.mubr.msk.bf16.vlgmr.msra.gmra.mxu0 %vm1306_vm9, %v3692_v42 }
0x1cce   :  { %5614 = vmatpush3.bf16.msra.mxu0 %v3812_v43  ;;  %5615 = vmatprep.mubr.msk.bf16.mxu0 %vm5958_vm0, %v5957_v0 }
0x1ccf   :  { %5625 = vmatprep.subr.bf16.mxu0 %v5957_v0 }
0x1cdc   :  { %4152 = vrot.lane.b32.xlu0 %v6851_v47, %s5959_s0 }
0x1cfa   :  { %v3802_v45 = vpop.xlane.xlu0 %3801 }
0x1cfb   :  { %5937 = vrcp.f32 %v3802_v45 }
0x1cfe   :  { %v3922_v36 = vpop.permute.xlu0 %3921 }
0x1cff   :  { %v3927_v51 = vsel %vm1325_vm10, %v3922_v36, 0 }
0x1d02   :  { %v3917_v46 = vpop.xlane.xlu1 %3916 }
0x1d03   :  { %5939 = vrcp.f32 %v3917_v46 }
0x1d06   :  { %v4037_v53 = vpop.permute.xlu1 %4036 }
0x1d07   :  { %v4042_v3 = vsel %vm1325_vm10, %v4037_v53, 0 }
0x1d08   :  { %v5938_v48 = vpop.eup %5937 }
0x1d09   :  { %v3804_v49 = vmul.f32 %v5938_v48, %v6929_v2 }
0x1d0b   :  { %v3805_v50 = vpack.c.bf16 %v3804_v49, %v3804_v49 }
0x1d0d   :  { %5616 = vmatmul.mubr.msk.bf16.vlgmr.msra.gmra.mxu0 %vm1306_vm9, %v3805_v50 }
0x1d0e   :  { %5626 = vmatpush3.bf16.msra.mxu0 %v3927_v51  ;;  %5627 = vmatprep.mubr.msk.bf16.mxu0 %vm5958_vm0, %v5957_v0 }
0x1d0f   :  { %5637 = vmatprep.subr.bf16.mxu0 %v5957_v0 }
0x1d10   :  { %v5940_v47 = vpop.eup %5939 }
0x1d11   :  { %v3919_v52 = vmul.f32 %v5940_v47, %v6933_v18 }
0x1d13   :  { %v3920_v54 = vpack.c.bf16 %v3919_v52, %v3919_v52 }
0x1d15   :  { %5628 = vmatmul.mubr.msk.bf16.vlgmr.msra.gmra.mxu0 %vm1306_vm9, %v3920_v54 }
0x1d16   :  { %5638 = vmatpush3.bf16.msra.mxu0 %v4042_v3  ;;  %5639 = vmatprep.mubr.msk.bf16.mxu0 %vm5958_vm0, %v5957_v0 }
0x1d17   :  { %5649 = vmatprep.subr.bf16.mxu0 %v5957_v0 }
0x1d2f   :  { %v4032_v55 = vpop.xlane.xlu0 %4031 }
0x1d30   :  { %5941 = vrcp.f32 %v4032_v55 }
0x1d33   :  { %v4148_v57 = vpop.xlane.xlu0 %4147 }
0x1d34   :  { %5943 = vrcp.f32 %v4148_v57 }
0x1d37   :  { %v4259_v59 = vpop.xlane.xlu1 %4258  ;;  %v4374_v60 = vpop.xlane.xlu0 %4373 }
0x1d38   :  { %5945 = vrcp.f32 %v4259_v59 }
0x1d39   :  { %5947 = vrcp.f32 %v4374_v60 }
0x1d3b   :  { %v4264_v2 = vpop.permute.xlu1 %4263 }
0x1d3c   :  { %v4269_v44 = vsel %vm1325_vm10, %v4264_v2, 0 }
0x1d3d   :  { %v5942_v56 = vpop.eup %5941 }
0x1d3e   :  { %v4034_v4 = vmul.f32 %v5942_v56, %v5926_v20 }
0x1d3f   :  { %v4379_v5 = vpop.permute.xlu1 %4378 }
0x1d40   :  { %v4035_v58 = vpack.c.bf16 %v4034_v4, %v4034_v4  ;;  %v4384_v7 = vsel %vm1325_vm10, %v4379_v5, 0 }
0x1d41   :  { %v5944_v61 = vpop.eup %5943 }
0x1d42   :  { %5640 = vmatmul.mubr.msk.bf16.vlgmr.msra.gmra.mxu0 %vm1306_vm9, %v4035_v58  ;;  %v4150_v63 = vmul.f32 %v5944_v61, %v6945_v23 }
0x1d43   :  { %5651 = vmatprep.mubr.msk.bf16.mxu0 %vm5958_vm0, %v5957_v0  ;;  %v4494_v9 = vpop.permute.xlu1 %4493 }
0x1d44   :  { %v4151_v21 = vpack.c.bf16 %v4150_v63, %v4150_v63  ;;  %v4499_v27 = vsel %vm1325_vm10, %v4494_v9, 0 }
0x1d45   :  { %v5946_v18 = vpop.eup %5945 }
0x1d46   :  { %v4261_v22 = vmul.f32 %v5946_v18, %v6947_v24  ;;  %v5948_v6 = vpop.eup %5947 }
0x1d47   :  { %v4376_v8 = vmul.f32 %v5948_v6, %v6951_v25 }
0x1d48   :  { %v4262_v1 = vpack.c.bf16 %v4261_v22, %v4261_v22 }
0x1d49   :  { %v4377_v10 = vpack.c.bf16 %v4376_v8, %v4376_v8 }
0x1d4f   :  { %v4489_v62 = vpop.xlane.xlu0 %4488 }
0x1d50   :  { %5949 = vrcp.f32 %v4489_v62 }
0x1d53   :  { %v4153_v16 = vpop.permute.xlu0 %4152 }
0x1d54   :  { %v4158_v15 = vsel %vm1325_vm10, %v4153_v16, 0 }
0x1d55   :  { %5650 = vmatpush3.bf16.msra.mxu0 %v4158_v15 }
0x1d56   :  { %5661 = vmatprep.subr.bf16.mxu0 %v5957_v0 }
0x1d58   :  { %5652 = vmatmul.mubr.msk.bf16.vlgmr.msra.gmra.mxu0 %vm1306_vm9, %v4151_v21 }
0x1d59   :  { %5662 = vmatpush3.bf16.msra.mxu0 %v4269_v44  ;;  %5663 = vmatprep.mubr.msk.bf16.mxu0 %vm5958_vm0, %v5957_v0 }
0x1d5a   :  { %5673 = vmatprep.subr.bf16.mxu0 %v5957_v0 }
0x1d5d   :  { %v5950_v11 = vpop.eup %5949 }
0x1d5e   :  { %v4491_v12 = vmul.f32 %v5950_v11, %v6962_v38 }
0x1d60   :  { %5664 = vmatmul.mubr.msk.bf16.vlgmr.msra.gmra.mxu0 %vm1306_vm9, %v4262_v1  ;;  %v4492_v13 = vpack.c.bf16 %v4491_v12, %v4491_v12 }
0x1d61   :  { %5674 = vmatpush3.bf16.msra.mxu0 %v4384_v7  ;;  %5675 = vmatprep.mubr.msk.bf16.mxu0 %vm5958_vm0, %v5957_v0 }
0x1d62   :  { %5685 = vmatprep.subr.bf16.mxu0 %v5957_v0 }
0x1d68   :  { %5676 = vmatmul.mubr.msk.bf16.vlgmr.msra.gmra.mxu0 %vm1306_vm9, %v4377_v10 }
0x1d69   :  { %5686 = vmatpush3.bf16.msra.mxu0 %v4499_v27  ;;  %5687 = vmatprep.mubr.msk.bf16.mxu0 %vm5958_vm0, %v5957_v0  ;;  %v5803_v27 = vld [vmem:[%s7112_s8 + $0x18] sm:$0xff]  }
0x1d6a   :  { %5699 = vmatprep.subr.bf16.mxu0 %v5957_v0  ;;  %5692 = vmatpush3.bf16.msra.mxu1 %v5803_v27 }
0x1d6b   :  { %5693 = vmatprep.subr.bf16.mxu1 %v5957_v0 }
0x1d70   :  { %5688 = vmatmul.mubr.msk.bf16.vlgmr.msra.gmra.mxu0 %vm1306_vm9, %v4492_v13 }
0x1d71   :  { %5715 = vmatprep.mubr.msk.bf16.mxu0 %vm5958_vm0, %v5957_v0 }
0x1d8d   :  { %v3736_v14 = vpop.f32.mrf.mxu0 }
0x1d8e   :  { %3742 = vst.msk [vmem:[#allocation2] sm:$0xff] %vm134_vm2, %v3736_v14 }
0x1d8f   :  { %v5605_v19 = vpop.f32.mrf.mxu0 }
0x1d91   :  { %v3739_v20 = vpop.f32.mrf.mxu0 }
0x1d92   :  { %v5804_v20 = vld [vmem:[%s7112_s8 + $0x10] sm:$0xff]  }
0x1d93   :  { %v5606_v32 = vpop.f32.mrf.mxu0  ;;  %5694 = vmatpush3.bf16.msra.mxu1 %v5804_v20 }
0x1d94   :  { %5719 = vmatprep.subr.bf16.mxu1 %v5957_v0 }
0x1dcd   :  { %v3848_v23 = vpop.f32.mrf.mxu0 }
0x1dce   :  { %3855 = vrot.lane.b32.xlu1 %v3848_v23, %s7141_s29 }
0x1dcf   :  { %v5617_v24 = vpop.f32.mrf.mxu0 }
0x1dd0   :  { %v5805_v24 = vld [vmem:[%s7113_s10 + $0x78] sm:$0xff]  }
0x1dd1   :  { %v3851_v17 = vpop.f32.mrf.mxu0  ;;  %5700 = vmatpush3.bf16.msra.mxu0 %v5805_v24 }
0x1dd2   :  { %5701 = vmatprep.subr.bf16.mxu0 %v5957_v0 }
0x1dd3   :  { %v5618_v25 = vpop.f32.mrf.mxu0 }
0x1dd4   :  { %v5806_v25 = vld [vmem:[%s7113_s10 + $0x70] sm:$0xff]  }
0x1dd5   :  { %v3963_v26 = vpop.f32.mrf.mxu0  ;;  %5702 = vmatpush3.bf16.msra.mxu0 %v5806_v25 }
0x1dd6   :  { %3970 = vrot.lane.b32.xlu0 %v3963_v26, %s7135_s30  ;;  %v5807_v26 = vld [vmem:[%s7113_s10 + $0x68] sm:$0xff]   ;;  %5703 = vmatprep.subr.bf16.mxu0 %v5957_v0 }
0x1dd7   :  { %v5629_v30 = vpop.f32.mrf.mxu0 }
0x1dd8   :  { %v5808_v30 = vld [vmem:[%s7113_s10 + $0x60] sm:$0xff]  }
0x1dd9   :  { %v3966_v33 = vpop.f32.mrf.mxu0  ;;  %5704 = vmatpush3.bf16.msra.mxu0 %v5807_v26  ;;  %v5052_v26 = vld [vmem:[%s7117_s13] ss:$0 sm:$0xff] }
0x1dda   :  { %5705 = vmatprep.subr.bf16.mxu0 %v5957_v0  ;;  %v5809_v33 = vld [vmem:[%s7113_s10 + $0x58] sm:$0xff]  }
0x1ddb   :  { %v5630_v34 = vpop.f32.mrf.mxu0 }
0x1ddd   :  { %5706 = vmatpush3.bf16.msra.mxu0 %v5808_v30 }
0x1dde   :  { %5707 = vmatprep.subr.bf16.mxu0 %v5957_v0 }
0x1de1   :  { %5708 = vmatpush3.bf16.msra.mxu0 %v5809_v33 }
0x1de2   :  { %5709 = vmatprep.subr.bf16.mxu0 %v5957_v0 }
0x1e02   :  { %v4078_v31 = vpop.f32.mrf.mxu0 }
0x1e03   :  { %4085 = vrot.lane.b32.xlu0 %v4078_v31, %s7136_s15 }
0x1e04   :  { %v5641_v35 = vpop.f32.mrf.mxu0 }
0x1e06   :  { %v4081_v37 = vpop.f32.mrf.mxu0 }
0x1e08   :  { %v5642_v38 = vpop.f32.mrf.mxu0 }
0x1e18   :  { %v4194_v39 = vpop.f32.mrf.mxu0 }
0x1e19   :  { %4200 = vst.msk [vmem:[#allocation2 + $0x8] sm:$0xff] %vm134_vm2, %v4194_v39 }
0x1e1a   :  { %v5653_v40 = vpop.f32.mrf.mxu0 }
0x1e1b   :  { %v5810_v40 = vld [vmem:[%s7113_s10 + $0x50] sm:$0xff]  }
0x1e1c   :  { %v4197_v41 = vpop.f32.mrf.mxu0  ;;  %5710 = vmatpush3.bf16.msra.mxu0 %v5810_v40 }
0x1e1d   :  { %5711 = vmatprep.subr.bf16.mxu0 %v5957_v0  ;;  %v5811_v41 = vld [vmem:[%s7113_s10 + $0x48] sm:$0xff]  }
0x1e1e   :  { %v5654_v42 = vpop.f32.mrf.mxu0 }
0x1e1f   :  { %v5812_v42 = vld [vmem:[%s7113_s10 + $0x40] sm:$0xff]  }
0x1e20   :  { %v4305_v43 = vpop.f32.mrf.mxu0  ;;  %5712 = vmatpush3.bf16.msra.mxu0 %v5811_v41 }
0x1e21   :  { %4312 = vrot.lane.b32.xlu1 %v4305_v43, %s7141_s29  ;;  %5713 = vmatprep.subr.bf16.mxu0 %v5957_v0  ;;  %v5039_v43 = vld [vmem:[%s7114_s9 + $0x1] ss:$0 sm:$0xff] }
0x1e22   :  { %v5665_v45 = vpop.f32.mrf.mxu0 }
0x1e24   :  { %v4308_v46 = vpop.f32.mrf.mxu0  ;;  %5714 = vmatpush3.bf16.msra.mxu0 %v5812_v42 }
0x1e26   :  { %v5666_v48 = vpop.f32.mrf.mxu0 }
0x1e28   :  { %v4420_v49 = vpop.f32.mrf.mxu0 }
0x1e29   :  { %4427 = vrot.lane.b32.xlu1 %v4420_v49, %s7135_s30 }
0x1e2a   :  { %v5677_v36 = vpop.f32.mrf.mxu0 }
0x1e2c   :  { %v4423_v50 = vpop.f32.mrf.mxu0 }
0x1e2e   :  { %v5678_v51 = vpop.f32.mrf.mxu0 }
0x1e30   :  { %v4535_v47 = vpop.f32.mrf.mxu0 }
0x1e31   :  { %4542 = vrot.lane.b32.xlu1 %v4535_v47, %s7136_s15 }
0x1e32   :  { %v5689_v52 = vpop.f32.mrf.mxu0 }
0x1e34   :  { %v4538_v53 = vpop.f32.mrf.mxu0 }
0x1e35   :  { %v5043_v53 = vld [vmem:[%s7115_s11 + $0x1] ss:$0 sm:$0xff] }
0x1e36   :  { %v5690_v54 = vpop.f32.mrf.mxu0 }
0x1e40   :  { %v3856_v3 = vpop.permute.xlu1 %3855 }
0x1e41   :  { %3858 = vst.msk [vmem:[#allocation2] sm:$0xff] %vm360_vm5, %v3856_v3 }
0x1e48   :  { %v3971_v55 = vpop.permute.xlu0 %3970 }
0x1e49   :  { %3973 = vst.msk [vmem:[#allocation2] sm:$0xff] %vm477_vm6, %v3971_v55 }
0x1e75   :  { %v4086_v56 = vpop.permute.xlu0 %4085 }
0x1e76   :  { %4088 = vst.msk [vmem:[#allocation2] sm:$0xff] %vm594_vm7, %v4086_v56 }
0x1e7d   :  { %v4546_v59 = vld [vmem:[#allocation2] sm:$0xff] }
0x1e7e   :  { %v4548_v60 = vadd.f32 %v4546_v59, %v6826_v28 }
0x1e80   :  { %v4550_v63 = vsel %vm82_vm1, %v4548_v60, 0.0 }
0x1e93   :  { %v4313_v4 = vpop.permute.xlu1 %4312 }
0x1e94   :  { %4315 = vst.msk [vmem:[#allocation2 + $0x8] sm:$0xff] %vm360_vm5, %v4313_v4 }
0x1e9b   :  { %v4428_v57 = vpop.permute.xlu1 %4427 }
0x1e9c   :  { %4430 = vst.msk [vmem:[#allocation2 + $0x8] sm:$0xff] %vm477_vm6, %v4428_v57 }
0x1ea3   :  { %v4543_v58 = vpop.permute.xlu1 %4542 }
0x1ea4   :  { %4545 = vst.msk [vmem:[#allocation2 + $0x8] sm:$0xff] %vm594_vm7, %v4543_v58 }
0x1eab   :  { %v4547_v61 = vld [vmem:[#allocation2 + $0x8] sm:$0xff] }
0x1eac   :  { %v4549_v62 = vadd.f32 %v4547_v61, %v6828_v29 }
0x1eae   :  { %v4551_v16 = vsel %vm82_vm1, %v4549_v62, 0.0 }
0x1eaf   :  { %v4552_v15 = vadd.f32 %v4551_v16, %v4550_v63 }
0x1eb1   :  { %4553 = vadd.xlane.f32.xlu0 %v4552_v15 }
0x1f3a   :  { %v4554_v2 = vpop.xlane.xlu0 %4553 }
0x1f3b   :  { %v4555_v21 = vrot.slane %v4554_v2, 4 }
0x1f3d   :  { %v4556_v18 = vadd.f32 %v4555_v21, %v4554_v2 }
0x1f3f   :  { %v4557_v44 = vrot.slane %v4556_v18, 2 }
0x1f41   :  { %v4558_v22 = vadd.f32 %v4557_v44, %v4556_v18 }
0x1f43   :  { %v4559_v5 = vrot.slane %v4558_v22, 1 }
0x1f45   :  { %v4560_v1 = vadd.f32 %v4559_v5, %v4558_v22 }
0x1f47   :  { %5751 = vpush %v4560_v1 }
0x1f78   :  { %s5752_s5 = spop %5751 }
0x1f79   :  { %s4564_s0 = smul.f32 0.001953125, %s5752_s5 }
0x1f7b   :  { %v4565_v28 = vstv %s4564_s0 }
0x1f7c   :  { %v4566_v6 = vsub.f32 %v4548_v60, %v4565_v28  ;;  %v4567_v7 = vsub.f32 %v4549_v62, %v4565_v28 }
0x1f7e   :  { %v4568_v29 = vmul.f32 %v4566_v6, %v4566_v6  ;;  %v4569_v8 = vmul.f32 %v4567_v7, %v4567_v7 }
0x1f80   :  { %v4570_v9 = vsel %vm82_vm1, %v4568_v29, 0.0  ;;  %v4571_v10 = vsel %vm82_vm1, %v4569_v8, 0.0 }
0x1f81   :  { %v4572_v11 = vadd.f32 %v4571_v10, %v4570_v9  ;;  %v5813_v9 = vld [vmem:[%s7116_s12 + $0x8] sm:$0xff]  }
0x1f83   :  { %4573 = vadd.xlane.f32.xlu1 %v4572_v11 }
0x200c   :  { %v4574_v12 = vpop.xlane.xlu1 %4573 }
0x200d   :  { %v4575_v13 = vrot.slane %v4574_v12, 4 }
0x200f   :  { %v4576_v14 = vadd.f32 %v4575_v13, %v4574_v12  ;;  %v5814_v13 = vld [vmem:[%s7116_s12] sm:$0xff]  }
0x2011   :  { %v4577_v19 = vrot.slane %v4576_v14, 2 }
0x2013   :  { %v4578_v32 = vadd.f32 %v4577_v19, %v4576_v14 }
0x2015   :  { %v4579_v23 = vrot.slane %v4578_v32, 1 }
0x2017   :  { %v4580_v17 = vadd.f32 %v4579_v23, %v4578_v32 }
0x2019   :  { %5753 = vpush %v4580_v17 }
0x204a   :  { %s5754_s2 = spop %5753 }
0x204b   :  { %s4584_s1 = smul.f32 0.001953125, %s5754_s2 }
0x204d   :  { %s4585_s19 = sadd.f32 1e-05, %s4584_s1 }
0x204f   :  { %v4586_v34 = vstv %s4585_s19 }
0x2050   :  { %5951 = vrsqrt.f32 %v4586_v34 }
0x205d   :  { %v5952_v31 = vpop.eup %5951 }
0x205e   :  { %5755 = vpush %v5952_v31 }
0x208f   :  { %s5756_s3 = spop %5755 }
0x2090   :  { %v4589_v35 = vstv %s5756_s3 }
0x2091   :  { %v4590_v37 = vmul.f32 %v4589_v35, %v4566_v6  ;;  %v4591_v38 = vmul.f32 %v4589_v35, %v4567_v7 }
0x2093   :  { %v4618_v39 = vpack.c.bf16 %v4591_v38, %v4590_v37 }
0x2095   :  { %5696 = vmatmul.mubr.msk.bf16.vlgmr.msra.gmra.mxu1 %vm82_vm1, %v4618_v39 }
0x2096   :  { %5723 = vmatprep.mubr.msk.bf16.mxu1 %vm5958_vm0, %v5957_v0  ;;  %5720 = vmatpush3.bf16.msra.mxu1 %v5813_v9 }
0x2097   :  { %5721 = vmatprep.subr.bf16.mxu1 %v5957_v0 }
0x209a   :  { %5722 = vmatpush3.bf16.msra.mxu1 %v5814_v13 }
0x2155   :  { %v4674_v45 = vpop.f32.mrf.mxu1 }
0x2156   :  { %v4675_v48 = vadd.f32 %v5039_v43, %v4674_v45 }
0x2157   :  { %v5697_v46 = vpop.f32.mrf.mxu1 }
0x2158   :  { %v4681_v51 = vmax.f32 %v4675_v48, 0.0 }
0x2159   :  { %v4677_v49 = vpop.f32.mrf.mxu1 }
0x215a   :  { %v4678_v36 = vadd.f32 %v5039_v43, %v4677_v49 }
0x215b   :  { %v5698_v50 = vpop.f32.mrf.mxu1 }
0x215c   :  { %v4682_v47 = vmax.f32 %v4678_v36, 0.0 }
0x215e   :  { %v4683_v52 = vpack.c.bf16 %v4682_v47, %v4681_v51 }
0x2160   :  { %5716 = vmatmul.mubr.bf16.vlgmr.msra.gmra.mxu0 %v4683_v52 }
0x2220   :  { %v4772_v54 = vpop.f32.mrf.mxu0 }
0x2221   :  { %v4773_v3 = vadd.f32 %v5043_v53, %v4772_v54 }
0x2222   :  { %v5717_v55 = vpop.f32.mrf.mxu0 }
0x2223   :  { %v4779_v4 = vadd.f32 %v4773_v3, %v4590_v37 }
0x2224   :  { %v4775_v56 = vpop.f32.mrf.mxu0 }
0x2225   :  { %v4776_v57 = vadd.f32 %v5043_v53, %v4775_v56  ;;  %v4781_v60 = vsel %vm82_vm1, %v4779_v4, 0.0 }
0x2226   :  { %v5718_v58 = vpop.f32.mrf.mxu0 }
0x2227   :  { %v4780_v59 = vadd.f32 %v4776_v57, %v4591_v38 }
0x2229   :  { %v4782_v61 = vsel %vm82_vm1, %v4780_v59, 0.0 }
0x222a   :  { %v4783_v62 = vadd.f32 %v4782_v61, %v4781_v60 }
0x222c   :  { %4784 = vadd.xlane.f32.xlu0 %v4783_v62 }
0x22b5   :  { %v4785_v63 = vpop.xlane.xlu0 %4784 }
0x22b6   :  { %v4786_v16 = vrot.slane %v4785_v63, 4 }
0x22b8   :  { %v4787_v15 = vadd.f32 %v4786_v16, %v4785_v63 }
0x22ba   :  { %v4788_v2 = vrot.slane %v4787_v15, 2 }
0x22bc   :  { %v4789_v21 = vadd.f32 %v4788_v2, %v4787_v15 }
0x22be   :  { %v4790_v18 = vrot.slane %v4789_v21, 1 }
0x22c0   :  { %v4791_v44 = vadd.f32 %v4790_v18, %v4789_v21 }
0x22c2   :  { %5757 = vpush %v4791_v44 }
0x22f3   :  { %s5758_s9 = spop %5757 }
0x22f4   :  { %s4795_s10 = smul.f32 0.001953125, %s5758_s9 }
0x22f6   :  { %v4796_v22 = vstv %s4795_s10 }
0x22f7   :  { %v4797_v5 = vsub.f32 %v4779_v4, %v4796_v22  ;;  %v4798_v1 = vsub.f32 %v4780_v59, %v4796_v22 }
0x22f9   :  { %v4799_v28 = vmul.f32 %v4797_v5, %v4797_v5  ;;  %v4800_v6 = vmul.f32 %v4798_v1, %v4798_v1 }
0x22fb   :  { %v4801_v7 = vsel %vm82_vm1, %v4799_v28, 0.0  ;;  %v4802_v29 = vsel %vm82_vm1, %v4800_v6, 0.0 }
0x22fc   :  { %v4803_v8 = vadd.f32 %v4802_v29, %v4801_v7 }
0x22fe   :  { %4804 = vadd.xlane.f32.xlu0 %v4803_v8 }
0x2387   :  { %v4805_v10 = vpop.xlane.xlu0 %4804 }
0x2388   :  { %v4806_v11 = vrot.slane %v4805_v10, 4 }
0x238a   :  { %v4807_v27 = vadd.f32 %v4806_v11, %v4805_v10 }
0x238c   :  { %v4808_v12 = vrot.slane %v4807_v27, 2 }
0x238e   :  { %v4809_v14 = vadd.f32 %v4808_v12, %v4807_v27 }
0x2390   :  { %v4810_v19 = vrot.slane %v4809_v14, 1 }
0x2392   :  { %v4811_v20 = vadd.f32 %v4810_v19, %v4809_v14 }
0x2394   :  { %5759 = vpush %v4811_v20 }
0x23c5   :  { %s5760_s30 = spop %5759 }
0x23c6   :  { %s4815_s15 = smul.f32 0.001953125, %s5760_s30 }
0x23c8   :  { %s4816_s8 = sadd.f32 1e-05, %s4815_s15 }
0x23ca   :  { %v4817_v32 = vstv %s4816_s8 }
0x23cb   :  { %5953 = vrsqrt.f32 %v4817_v32 }
0x23d8   :  { %v5954_v23 = vpop.eup %5953 }
0x23d9   :  { %5761 = vpush %v5954_v23 }
0x240a   :  { %s5762_s29 = spop %5761 }
0x240b   :  { %v4820_v0 = vstv %s5762_s29 }
0x240c   :  { %v4821_v24 = vmul.f32 %v4820_v0, %v4797_v5  ;;  %v4822_v17 = vmul.f32 %v4820_v0, %v4798_v1 }
0x240e   :  { %v4823_v25 = vpack.c.bf16 %v4822_v17, %v4821_v24 }
0x2410   :  { %5724 = vmatmul.mubr.msk.bf16.vlgmr.msra.gmra.mxu1 %vm82_vm1, %v4823_v25 }
0x24d0   :  { %v4884_v30 = vpop.f32.mrf.mxu1 }
0x24d1   :  { %v4885_v33 = vadd.f32 %v5052_v26, %v4884_v30 }
0x24d2   :  { %v5725_v34 = vpop.f32.mrf.mxu1 }
0x24d3   :  { %4891 = vst [vmem:[%s7118_s14] sm:$0xff] %v4885_v33 }
0x24d4   :  { %v4887_v31 = vpop.f32.mrf.mxu1 }
0x24d5   :  { %v4888_v35 = vadd.f32 %v5052_v26, %v4887_v31 }
0x24d6   :  { %v5726_v37 = vpop.f32.mrf.mxu1 }
0x24d7   :  { %4892 = vst [vmem:[%s7118_s14 + $0x8] sm:$0xff] %v4888_v35 }

</bundles_post_ra>
